<compile_context>
chip_gen: v6e
topology: v6e:2x2x1
jax: 0.10.0
libtpu: 0.0.40
codegen_flags: <defaults>
</compile_context>

<pallas_src>
import functools
import math

import jax
import jax.numpy as jnp
from jax import lax
from jax.experimental import pallas as pl
from jax.experimental.pallas import tpu as pltpu


def _mhsa_kernel(x_ref, wqkv_ref, bqkv_ref, wo_ref, bo_ref, o_ref,
                 *, num_heads, head_dim, embed):
    # x_ref: (1, S, E) VMEM tile for the current batch element.
    x = x_ref[0]                                             # (S, E)
    S = x.shape[0]

    # Fused Q/K/V projection: W_qkv is (E, 3E), bias (1, 3E).
    # The 1/sqrt(head_dim) scale is already folded into the Q columns/bias.
    qkv = jnp.dot(x, wqkv_ref[...],
                  preferred_element_type=jnp.float32) + bqkv_ref[...]   # (S, 3E)
    q = qkv[:, 0 * embed:1 * embed]                          # (S, E), pre-scaled
    k = qkv[:, 1 * embed:2 * embed]
    v = qkv[:, 2 * embed:3 * embed]

    # Output accumulator; combine_heads is folded into the head loop.
    acc = jnp.zeros((S, embed), jnp.float32)

    for h in range(num_heads):                               # static unroll over heads
        lo = h * head_dim
        hi = lo + head_dim
        qh = q[:, lo:hi]                                     # (S, hd)
        kh = k[:, lo:hi]
        vh = v[:, lo:hi]

        # Q @ K^T without materializing an explicit transpose.
        s = lax.dot_general(qh, kh, (((1,), (1,)), ((), ())),
                            preferred_element_type=jnp.float32)          # (S, S)
        s = s - jnp.max(s, axis=-1, keepdims=True)
        p = jnp.exp(s)                                       # unnormalized probs
        denom = jnp.sum(p, axis=-1, keepdims=True)           # (S, 1)

        # PV matmul in bf16 (f32 accumulate); normalize afterwards on the
        # small (S, hd) tensor using the EUP approximate reciprocal.
        pv = jnp.dot(p.astype(jnp.bfloat16), vh.astype(jnp.bfloat16),
                     preferred_element_type=jnp.float32)                 # (S, hd)
        attn_h = pv * pl.reciprocal(denom, approx=True)

        # concat_h(attn_h) @ Wo_t  ==  sum_h attn_h @ Wo_t[lo:hi, :]
        acc = acc + jnp.dot(attn_h, wo_ref[lo:hi, :],
                            preferred_element_type=jnp.float32)          # (S, E)

    o_ref[0] = (acc + bo_ref[...]).astype(o_ref.dtype)


def multi_head_self_attention(x_nchw, params, num_heads):
    """x_nchw: (B, C, H, W) float32; C == embed_size."""
    B, C, H, W = x_nchw.shape
    E = C
    S = H * W
    head_dim = E // num_heads
    scale = 1.0 / math.sqrt(head_dim)

    # Raw row-major reshape, exactly like torch's x.reshape(B, H*W, -1).
    x_seq = jnp.reshape(x_nchw, (B, S, E))

    # PyTorch Linear: y = x @ W.T + b, with W of shape (out, in).
    # Pre-transpose to (in, out); fold the attention scale into Q's weight
    # and bias; fuse Q/K/V into one (E, 3E) weight and (1, 3E) bias.
    wq_t = params["wq"].T * scale
    wk_t = params["wk"].T
    wv_t = params["wv"].T
    w_qkv = jnp.concatenate([wq_t, wk_t, wv_t], axis=1)      # (E, 3E)
    b_qkv = jnp.concatenate(
        [params["bq"] * scale, params["bk"], params["bv"]]).reshape(1, 3 * E)
    wo_t = params["wo"].T                                    # (E, E)
    bo = params["bo"].reshape(1, E)

    kernel = functools.partial(_mhsa_kernel, num_heads=num_heads,
                               head_dim=head_dim, embed=E)

    out_seq = pl.pallas_call(
        kernel,
        out_shape=jax.ShapeDtypeStruct((B, S, E), jnp.float32),
        grid_spec=pltpu.PrefetchScalarGridSpec(
            num_scalar_prefetch=0,
            grid=(B,),
            in_specs=[
                pl.BlockSpec((1, S, E), lambda b: (b, 0, 0)),   # x
                pl.BlockSpec((E, 3 * E), lambda b: (0, 0)),     # fused W_qkv
                pl.BlockSpec((1, 3 * E), lambda b: (0, 0)),     # fused b_qkv
                pl.BlockSpec((E, E), lambda b: (0, 0)),         # W_o
                pl.BlockSpec((1, E), lambda b: (0, 0)),         # b_o
            ],
            out_specs=pl.BlockSpec((1, S, E), lambda b: (b, 0, 0)),
        ),
        compiler_params=pltpu.CompilerParams(
            dimension_semantics=("parallel",)),
    )(x_seq, w_qkv, b_qkv, wo_t, bo)

    # (B, S, E) -> (B, H, W, E) -> (B, E, H, W)  (matches the final permute).
    return jnp.transpose(out_seq.reshape(B, H, W, E), (0, 3, 1, 2))


def _xavier_uniform(key, out_f, in_f):
    limit = math.sqrt(6.0 / (in_f + out_f))
    return jax.random.uniform(key, (out_f, in_f), jnp.float32, -limit, limit)


def _reference(x_nchw, params, num_heads):
    """Pure-JAX f32 reference mirroring the PyTorch forward."""
    B, C, H, W = x_nchw.shape
    E = C
    hd = E // num_heads
    x = x_nchw.reshape(B, H * W, E)
    q = x @ params["wq"].T + params["bq"]
    k = x @ params["wk"].T + params["bk"]
    v = x @ params["wv"].T + params["bv"]

    def split(t):
        return t.reshape(B, -1, num_heads, hd).transpose(0, 2, 1, 3)

    q, k, v = split(q), split(k), split(v)
    s = jnp.einsum("bhqd,bhkd->bhqk", q, k) / math.sqrt(hd)
    p = jax.nn.softmax(s, axis=-1)
    a = jnp.einsum("bhqk,bhkd->bhqd", p, v)
    a = a.transpose(0, 2, 1, 3).reshape(B, -1, E)
    o = a @ params["wo"].T + params["bo"]
    return o.reshape(B, H, W, E).transpose(0, 3, 1, 2)


if __name__ == "__main__":
    # Small shapes consistent with the module: embed_size == channels.
    B, C, H, W = 2, 32, 16, 16
    num_heads = 4
    E = C

    root = jax.random.PRNGKey(0)
    kx, kq, kk, kv, ko = jax.random.split(root, 5)

    x = jax.random.normal(kx, (B, C, H, W), jnp.float32)

    params = {
        "wq": _xavier_uniform(kq, E, E),
        "wk": _xavier_uniform(kk, E, E),
        "wv": _xavier_uniform(kv, E, E),
        "wo": _xavier_uniform(ko, E, E),
        "bq": jnp.zeros((E,), jnp.float32),
        "bk": jnp.zeros((E,), jnp.float32),
        "bv": jnp.zeros((E,), jnp.float32),
        "bo": jnp.zeros((E,), jnp.float32),
    }

    out = multi_head_self_attention(x, params, num_heads)
    out = jax.block_until_ready(out)

    ref = _reference(x, params, num_heads)
    assert out.shape == (B, E, H, W)
    # Tolerance slightly looser than pure f32 because the PV matmul runs in
    # bf16 (f32 accumulate) and the softmax denom uses the approx reciprocal.
    assert jnp.allclose(out, ref, atol=2e-2, rtol=2e-2), (
        float(jnp.max(jnp.abs(out - ref))))

    print("KERNEL_OK")
</pallas_src>

<mosaic_0001>
module attributes {stable_mosaic.version = 11 : i64} {
  func.func @_mhsa_kernel(%arg0: i32, %arg1: memref<1x256x32xf32, #tpu.memory_space<vmem>>, %arg2: memref<32x96xf32, #tpu.memory_space<vmem>>, %arg3: memref<1x96xf32, #tpu.memory_space<vmem>>, %arg4: memref<32x32xf32, #tpu.memory_space<vmem>>, %arg5: memref<1x32xf32, #tpu.memory_space<vmem>>, %arg6: memref<1x256x32xf32, #tpu.memory_space<vmem>>) attributes {dimension_semantics = [#tpu.dimension_semantics<parallel>], iteration_bounds = array<i64: 2>, scalar_prefetch = 0 : i64, scratch_operands = 0 : i64, tpu.core_type = #tpu.core_type<tc>, window_params = [{transform_indices = @transform_0, window_bounds = array<i64: 1, 256, 32>}, {pipeline_mode = #tpu.pipeline_mode<synchronous>, transform_indices = @transform_1, window_bounds = array<i64: 32, 96>}, {pipeline_mode = #tpu.pipeline_mode<synchronous>, transform_indices = @transform_2, window_bounds = array<i64: 1, 96>}, {pipeline_mode = #tpu.pipeline_mode<synchronous>, transform_indices = @transform_3, window_bounds = array<i64: 32, 32>}, {pipeline_mode = #tpu.pipeline_mode<synchronous>, transform_indices = @transform_4, window_bounds = array<i64: 1, 32>}, {transform_indices = @transform_5, window_bounds = array<i64: 1, 256, 32>}]} {
    %c0 = arith.constant 0 : index
    %c0_0 = arith.constant 0 : index
    %c0_1 = arith.constant 0 : index
    %0 = vector.load %arg1[%c0, %c0_0, %c0_1] : memref<1x256x32xf32, #tpu.memory_space<vmem>>, vector<1x256x32xf32>
    %1 = vector.shape_cast %0 : vector<1x256x32xf32> to vector<256x32xf32>
    %c0_2 = arith.constant 0 : index
    %c0_3 = arith.constant 0 : index
    %2 = vector.load %arg2[%c0_2, %c0_3] : memref<32x96xf32, #tpu.memory_space<vmem>>, vector<32x96xf32>
    %cst = arith.constant dense<0.000000e+00> : vector<256x96xf32>
    %3 = tpu.matmul %1, %2, %cst {dimension_numbers = #tpu.dot_dimension_numbers<[1], [0], [0], [1], [0, 0, 1, 1], [], []>} : vector<256x32xf32>, vector<32x96xf32>, vector<256x96xf32> -> vector<256x96xf32>
    %c0_4 = arith.constant 0 : index
    %c0_5 = arith.constant 0 : index
    %4 = vector.load %arg3[%c0_4, %c0_5] : memref<1x96xf32, #tpu.memory_space<vmem>>, vector<1x96xf32>
    %5 = vector.broadcast %4 : vector<1x96xf32> to vector<256x96xf32>
    %6 = arith.addf %3, %5 : vector<256x96xf32>
    %7 = vector.extract_strided_slice %6 {offsets = [0, 0], sizes = [256, 32], strides = [1, 1]} : vector<256x96xf32> to vector<256x32xf32>
    %8 = vector.extract_strided_slice %6 {offsets = [0, 32], sizes = [256, 32], strides = [1, 1]} : vector<256x96xf32> to vector<256x32xf32>
    %9 = vector.extract_strided_slice %6 {offsets = [0, 64], sizes = [256, 32], strides = [1, 1]} : vector<256x96xf32> to vector<256x32xf32>
    %cst_6 = arith.constant 0.000000e+00 : f32
    %10 = vector.broadcast %cst_6 : f32 to vector<256x32xf32>
    %11 = vector.extract_strided_slice %7 {offsets = [0, 0], sizes = [256, 8], strides = [1, 1]} : vector<256x32xf32> to vector<256x8xf32>
    %12 = vector.extract_strided_slice %8 {offsets = [0, 0], sizes = [256, 8], strides = [1, 1]} : vector<256x32xf32> to vector<256x8xf32>
    %13 = vector.extract_strided_slice %9 {offsets = [0, 0], sizes = [256, 8], strides = [1, 1]} : vector<256x32xf32> to vector<256x8xf32>
    %cst_7 = arith.constant dense<0.000000e+00> : vector<256x256xf32>
    %14 = tpu.matmul %11, %12, %cst_7 {dimension_numbers = #tpu.dot_dimension_numbers<[1], [1], [0], [0], [0, 0, 1, 0], [], []>} : vector<256x8xf32>, vector<256x8xf32>, vector<256x256xf32> -> vector<256x256xf32>
    %cst_8 = arith.constant dense<0xFF800000> : vector<256xf32>
    %15 = vector.multi_reduction <maximumf>, %14, %cst_8 [1] : vector<256x256xf32> to vector<256xf32>
    %16 = vector.shape_cast %15 : vector<256xf32> to vector<256x1xf32>
    %17 = vector.broadcast %16 : vector<256x1xf32> to vector<256x256xf32>
    %18 = arith.subf %14, %17 : vector<256x256xf32>
    %19 = math.exp %18 : vector<256x256xf32>
    %cst_9 = arith.constant dense<0.000000e+00> : vector<256xf32>
    %20 = vector.multi_reduction <add>, %19, %cst_9 [1] : vector<256x256xf32> to vector<256xf32>
    %21 = vector.shape_cast %20 : vector<256xf32> to vector<256x1xf32>
    %22 = arith.truncf %19 : vector<256x256xf32> to vector<256x256xbf16>
    %23 = arith.truncf %13 : vector<256x8xf32> to vector<256x8xbf16>
    %cst_10 = arith.constant dense<0.000000e+00> : vector<256x8xf32>
    %24 = tpu.matmul %22, %23, %cst_10 {dimension_numbers = #tpu.dot_dimension_numbers<[1], [0], [0], [1], [0, 0, 1, 1], [], []>} : vector<256x256xbf16>, vector<256x8xbf16>, vector<256x8xf32> -> vector<256x8xf32>
    %25 = tpu.reciprocal %21 {approx = true} : vector<256x1xf32> -> vector<256x1xf32>
    %26 = vector.broadcast %25 : vector<256x1xf32> to vector<256x8xf32>
    %27 = arith.mulf %24, %26 : vector<256x8xf32>
    %c0_11 = arith.constant 0 : index
    %c0_12 = arith.constant 0 : index
    %28 = vector.load %arg4[%c0_11, %c0_12] : memref<32x32xf32, #tpu.memory_space<vmem>>, vector<8x32xf32>
    %cst_13 = arith.constant dense<0.000000e+00> : vector<256x32xf32>
    %29 = tpu.matmul %27, %28, %cst_13 {dimension_numbers = #tpu.dot_dimension_numbers<[1], [0], [0], [1], [0, 0, 1, 1], [], []>} : vector<256x8xf32>, vector<8x32xf32>, vector<256x32xf32> -> vector<256x32xf32>
    %30 = arith.addf %10, %29 : vector<256x32xf32>
    %31 = vector.extract_strided_slice %7 {offsets = [0, 8], sizes = [256, 8], strides = [1, 1]} : vector<256x32xf32> to vector<256x8xf32>
    %32 = vector.extract_strided_slice %8 {offsets = [0, 8], sizes = [256, 8], strides = [1, 1]} : vector<256x32xf32> to vector<256x8xf32>
    %33 = vector.extract_strided_slice %9 {offsets = [0, 8], sizes = [256, 8], strides = [1, 1]} : vector<256x32xf32> to vector<256x8xf32>
    %cst_14 = arith.constant dense<0.000000e+00> : vector<256x256xf32>
    %34 = tpu.matmul %31, %32, %cst_14 {dimension_numbers = #tpu.dot_dimension_numbers<[1], [1], [0], [0], [0, 0, 1, 0], [], []>} : vector<256x8xf32>, vector<256x8xf32>, vector<256x256xf32> -> vector<256x256xf32>
    %cst_15 = arith.constant dense<0xFF800000> : vector<256xf32>
    %35 = vector.multi_reduction <maximumf>, %34, %cst_15 [1] : vector<256x256xf32> to vector<256xf32>
    %36 = vector.shape_cast %35 : vector<256xf32> to vector<256x1xf32>
    %37 = vector.broadcast %36 : vector<256x1xf32> to vector<256x256xf32>
    %38 = arith.subf %34, %37 : vector<256x256xf32>
    %39 = math.exp %38 : vector<256x256xf32>
    %cst_16 = arith.constant dense<0.000000e+00> : vector<256xf32>
    %40 = vector.multi_reduction <add>, %39, %cst_16 [1] : vector<256x256xf32> to vector<256xf32>
    %41 = vector.shape_cast %40 : vector<256xf32> to vector<256x1xf32>
    %42 = arith.truncf %39 : vector<256x256xf32> to vector<256x256xbf16>
    %43 = arith.truncf %33 : vector<256x8xf32> to vector<256x8xbf16>
    %cst_17 = arith.constant dense<0.000000e+00> : vector<256x8xf32>
    %44 = tpu.matmul %42, %43, %cst_17 {dimension_numbers = #tpu.dot_dimension_numbers<[1], [0], [0], [1], [0, 0, 1, 1], [], []>} : vector<256x256xbf16>, vector<256x8xbf16>, vector<256x8xf32> -> vector<256x8xf32>
    %45 = tpu.reciprocal %41 {approx = true} : vector<256x1xf32> -> vector<256x1xf32>
    %46 = vector.broadcast %45 : vector<256x1xf32> to vector<256x8xf32>
    %47 = arith.mulf %44, %46 : vector<256x8xf32>
    %c8 = arith.constant 8 : index
    %c0_18 = arith.constant 0 : index
    %48 = vector.load %arg4[%c8, %c0_18] : memref<32x32xf32, #tpu.memory_space<vmem>>, vector<8x32xf32>
    %cst_19 = arith.constant dense<0.000000e+00> : vector<256x32xf32>
    %49 = tpu.matmul %47, %48, %cst_19 {dimension_numbers = #tpu.dot_dimension_numbers<[1], [0], [0], [1], [0, 0, 1, 1], [], []>} : vector<256x8xf32>, vector<8x32xf32>, vector<256x32xf32> -> vector<256x32xf32>
    %50 = arith.addf %30, %49 : vector<256x32xf32>
    %51 = vector.extract_strided_slice %7 {offsets = [0, 16], sizes = [256, 8], strides = [1, 1]} : vector<256x32xf32> to vector<256x8xf32>
    %52 = vector.extract_strided_slice %8 {offsets = [0, 16], sizes = [256, 8], strides = [1, 1]} : vector<256x32xf32> to vector<256x8xf32>
    %53 = vector.extract_strided_slice %9 {offsets = [0, 16], sizes = [256, 8], strides = [1, 1]} : vector<256x32xf32> to vector<256x8xf32>
    %cst_20 = arith.constant dense<0.000000e+00> : vector<256x256xf32>
    %54 = tpu.matmul %51, %52, %cst_20 {dimension_numbers = #tpu.dot_dimension_numbers<[1], [1], [0], [0], [0, 0, 1, 0], [], []>} : vector<256x8xf32>, vector<256x8xf32>, vector<256x256xf32> -> vector<256x256xf32>
    %cst_21 = arith.constant dense<0xFF800000> : vector<256xf32>
    %55 = vector.multi_reduction <maximumf>, %54, %cst_21 [1] : vector<256x256xf32> to vector<256xf32>
    %56 = vector.shape_cast %55 : vector<256xf32> to vector<256x1xf32>
    %57 = vector.broadcast %56 : vector<256x1xf32> to vector<256x256xf32>
    %58 = arith.subf %54, %57 : vector<256x256xf32>
    %59 = math.exp %58 : vector<256x256xf32>
    %cst_22 = arith.constant dense<0.000000e+00> : vector<256xf32>
    %60 = vector.multi_reduction <add>, %59, %cst_22 [1] : vector<256x256xf32> to vector<256xf32>
    %61 = vector.shape_cast %60 : vector<256xf32> to vector<256x1xf32>
    %62 = arith.truncf %59 : vector<256x256xf32> to vector<256x256xbf16>
    %63 = arith.truncf %53 : vector<256x8xf32> to vector<256x8xbf16>
    %cst_23 = arith.constant dense<0.000000e+00> : vector<256x8xf32>
    %64 = tpu.matmul %62, %63, %cst_23 {dimension_numbers = #tpu.dot_dimension_numbers<[1], [0], [0], [1], [0, 0, 1, 1], [], []>} : vector<256x256xbf16>, vector<256x8xbf16>, vector<256x8xf32> -> vector<256x8xf32>
    %65 = tpu.reciprocal %61 {approx = true} : vector<256x1xf32> -> vector<256x1xf32>
    %66 = vector.broadcast %65 : vector<256x1xf32> to vector<256x8xf32>
    %67 = arith.mulf %64, %66 : vector<256x8xf32>
    %c16 = arith.constant 16 : index
    %c0_24 = arith.constant 0 : index
    %68 = vector.load %arg4[%c16, %c0_24] : memref<32x32xf32, #tpu.memory_space<vmem>>, vector<8x32xf32>
    %cst_25 = arith.constant dense<0.000000e+00> : vector<256x32xf32>
    %69 = tpu.matmul %67, %68, %cst_25 {dimension_numbers = #tpu.dot_dimension_numbers<[1], [0], [0], [1], [0, 0, 1, 1], [], []>} : vector<256x8xf32>, vector<8x32xf32>, vector<256x32xf32> -> vector<256x32xf32>
    %70 = arith.addf %50, %69 : vector<256x32xf32>
    %71 = vector.extract_strided_slice %7 {offsets = [0, 24], sizes = [256, 8], strides = [1, 1]} : vector<256x32xf32> to vector<256x8xf32>
    %72 = vector.extract_strided_slice %8 {offsets = [0, 24], sizes = [256, 8], strides = [1, 1]} : vector<256x32xf32> to vector<256x8xf32>
    %73 = vector.extract_strided_slice %9 {offsets = [0, 24], sizes = [256, 8], strides = [1, 1]} : vector<256x32xf32> to vector<256x8xf32>
    %cst_26 = arith.constant dense<0.000000e+00> : vector<256x256xf32>
    %74 = tpu.matmul %71, %72, %cst_26 {dimension_numbers = #tpu.dot_dimension_numbers<[1], [1], [0], [0], [0, 0, 1, 0], [], []>} : vector<256x8xf32>, vector<256x8xf32>, vector<256x256xf32> -> vector<256x256xf32>
    %cst_27 = arith.constant dense<0xFF800000> : vector<256xf32>
    %75 = vector.multi_reduction <maximumf>, %74, %cst_27 [1] : vector<256x256xf32> to vector<256xf32>
    %76 = vector.shape_cast %75 : vector<256xf32> to vector<256x1xf32>
    %77 = vector.broadcast %76 : vector<256x1xf32> to vector<256x256xf32>
    %78 = arith.subf %74, %77 : vector<256x256xf32>
    %79 = math.exp %78 : vector<256x256xf32>
    %cst_28 = arith.constant dense<0.000000e+00> : vector<256xf32>
    %80 = vector.multi_reduction <add>, %79, %cst_28 [1] : vector<256x256xf32> to vector<256xf32>
    %81 = vector.shape_cast %80 : vector<256xf32> to vector<256x1xf32>
    %82 = arith.truncf %79 : vector<256x256xf32> to vector<256x256xbf16>
    %83 = arith.truncf %73 : vector<256x8xf32> to vector<256x8xbf16>
    %cst_29 = arith.constant dense<0.000000e+00> : vector<256x8xf32>
    %84 = tpu.matmul %82, %83, %cst_29 {dimension_numbers = #tpu.dot_dimension_numbers<[1], [0], [0], [1], [0, 0, 1, 1], [], []>} : vector<256x256xbf16>, vector<256x8xbf16>, vector<256x8xf32> -> vector<256x8xf32>
    %85 = tpu.reciprocal %81 {approx = true} : vector<256x1xf32> -> vector<256x1xf32>
    %86 = vector.broadcast %85 : vector<256x1xf32> to vector<256x8xf32>
    %87 = arith.mulf %84, %86 : vector<256x8xf32>
    %c24 = arith.constant 24 : index
    %c0_30 = arith.constant 0 : index
    %88 = vector.load %arg4[%c24, %c0_30] : memref<32x32xf32, #tpu.memory_space<vmem>>, vector<8x32xf32>
    %cst_31 = arith.constant dense<0.000000e+00> : vector<256x32xf32>
    %89 = tpu.matmul %87, %88, %cst_31 {dimension_numbers = #tpu.dot_dimension_numbers<[1], [0], [0], [1], [0, 0, 1, 1], [], []>} : vector<256x8xf32>, vector<8x32xf32>, vector<256x32xf32> -> vector<256x32xf32>
    %90 = arith.addf %70, %89 : vector<256x32xf32>
    %c0_32 = arith.constant 0 : index
    %c0_33 = arith.constant 0 : index
    %91 = vector.load %arg5[%c0_32, %c0_33] : memref<1x32xf32, #tpu.memory_space<vmem>>, vector<1x32xf32>
    %92 = vector.broadcast %91 : vector<1x32xf32> to vector<256x32xf32>
    %93 = arith.addf %90, %92 : vector<256x32xf32>
    %c0_34 = arith.constant 0 : index
    %c0_35 = arith.constant 0 : index
    %c0_36 = arith.constant 0 : index
    %94 = vector.load %arg6[%c0_34, %c0_35, %c0_36] : memref<1x256x32xf32, #tpu.memory_space<vmem>>, vector<1x256x32xf32>
    %95 = vector.shape_cast %94 : vector<1x256x32xf32> to vector<256x32xf32>
    %96 = vector.shape_cast %93 : vector<256x32xf32> to vector<1x256x32xf32>
    tpu.vector_store %arg6[%c0_34, %c0_35, %c0_36], %96 {strides = array<i32>} : memref<1x256x32xf32, #tpu.memory_space<vmem>>, vector<1x256x32xf32>,
    return
  }
  func.func @transform_0(%arg0: i32) -> (i32, i32, i32) {
    %c0_i32 = arith.constant 0 : i32
    %c0_i32_0 = arith.constant 0 : i32
    %c0_i32_1 = arith.constant 0 : i32
    return %arg0, %c0_i32, %c0_i32_0 : i32, i32, i32
  }
  func.func @transform_1(%arg0: i32) -> (i32, i32) {
    %c0_i32 = arith.constant 0 : i32
    %c0_i32_0 = arith.constant 0 : i32
    %c0_i32_1 = arith.constant 0 : i32
    return %c0_i32, %c0_i32_0 : i32, i32
  }
  func.func @transform_2(%arg0: i32) -> (i32, i32) {
    %c0_i32 = arith.constant 0 : i32
    %c0_i32_0 = arith.constant 0 : i32
    %c0_i32_1 = arith.constant 0 : i32
    return %c0_i32, %c0_i32_0 : i32, i32
  }
  func.func @transform_3(%arg0: i32) -> (i32, i32) {
    %c0_i32 = arith.constant 0 : i32
    %c0_i32_0 = arith.constant 0 : i32
    %c0_i32_1 = arith.constant 0 : i32
    return %c0_i32, %c0_i32_0 : i32, i32
  }
  func.func @transform_4(%arg0: i32) -> (i32, i32) {
    %c0_i32 = arith.constant 0 : i32
    %c0_i32_0 = arith.constant 0 : i32
    %c0_i32_1 = arith.constant 0 : i32
    return %c0_i32, %c0_i32_0 : i32, i32
  }
  func.func @transform_5(%arg0: i32) -> (i32, i32, i32) {
    %c0_i32 = arith.constant 0 : i32
    %c0_i32_0 = arith.constant 0 : i32
    %c0_i32_1 = arith.constant 0 : i32
    return %arg0, %c0_i32, %c0_i32_0 : i32, i32, i32
  }
}

</mosaic_0001>

<bundles_post_ra>
// kernel: tpu_custom_call.1
= control target key start
LH: loop header
LB: loop body
LE: loop exit
PB: predicated region body
PF: predicated region fallthrough
CT: control target
= control target key end

     0   :  { %s9403_s18 = smov 0   ;;  %s13551_s0 = inlined_call_operand.vmem [shape: f32[2,256,32], index: 0, kind: input, shape index: {}]   ;;  %s13552_s1 = inlined_call_operand.vmem [shape: f32[32,96], index: 1, kind: input, shape index: {}]   ;;  %s13553_s2 = inlined_call_operand.vmem [shape: f32[1,96], index: 2, kind: input, shape index: {}]   ;;  %s13554_s3 = inlined_call_operand.vmem [shape: f32[32,32], index: 3, kind: input, shape index: {}]   ;;  %s13555_s4 = inlined_call_operand.vmem [shape: f32[1,32], index: 4, kind: input, shape index: {}]   ;;  %s13556_s5 = inlined_call_operand.vmem [shape: f32[2,256,32], index: 5, kind: output, shape index: {}]  }
   0x1 LB: > { %s6878_s19 = sadd.s32 4294967295, %s9360_s18   ;;  %p6882_p0 = scmp.ge.s32.totalorder %s9360_s18, 1  ;;  %s9360_s18 = sphi %s9403_s18, %s15_s18  }
   0x2   : > { %p187_p1 = scmp.lt.s32.totalorder %s9360_s18, 3 }
   0x4   : > { %p188_p2 = pnand %p6882_p0, %p187_p1 }
   0x6   : > { %191 = sbr.rel (%p188_p2) target bundleno = 3485 (0xd9d), region = 40 }
   0xb   : > { %v261_v0 = vld [vmem:[%s13552_s1 + $0x18] sm:$0xff]  ;;  %v260_v1 = vld [vmem:[%s13552_s1 + $0x10] sm:$0xff]  ;;  %p215_p3 = scmp.lt.s32.totalorder %s6878_s19, 1  ;;  %v259_v2 = vld [vmem:[%s13552_s1 + $0x8] sm:$0xff]  ;;  %vm269_vm0 = vcmask 261120   ;;  %vm687_vm1 = vcmask 64512  }
   0xc   : > { %8309 = vmatprep.subr.mxu0 %v261_v0  ;;  %v258_v3 = vld [vmem:[%s13552_s1] sm:$0xff]  ;;  %s9362_s9 = smov 96   ;;  %s9363_s10 = smov 120  }
   0xd   : > { %8310 = vmatpush3.msra.mxu0 %v261_v0  ;;  %s14523_s19 = smov (!%p215_p3, %s6878_s19), 1  ;;  %v9500_v36 = vld [vmem:[%s13553_s2] ss:$0 sm:$0xff]  ;;  %s9364_s11 = smov 88  }
   0xe   : > { %8311 = vmatprep.subr.mxu0 %v260_v1  ;;  %s7307_s28 = sshll.u32 %s14523_s19, 8  ;;  %s9365_s12 = smov 64  }
   0xf   : > { %8312 = vmatpush3.msra.mxu0 %v260_v1  ;;  %s9431_s6 = scalar_lea.vmem %s13551_s0, %s7307_s28  ;;  %s9366_s13 = smov 56  }
  0x10   : > { %8313 = vmatprep.subr.mxu0 %v259_v2  ;;  %v226_v4 = vld [vmem:[%s9431_s6] sm:$0xff]  ;;  %v227_v5 = vld [vmem:[%s9431_s6 + $0x8] sm:$0xff]  ;;  %v228_v6 = vld [vmem:[%s9431_s6 + $0x10] sm:$0xff]  ;;  %s9367_s14 = smov 80   ;;  %s9368_s17 = smov 112  }
  0x11   : > { %8314 = vmatpush3.msra.mxu0 %v259_v2  ;;  %8317 = vmatprep.mubr.msk.f32.mxu0 %vm269_vm0, %v226_v4  ;;  %v229_v7 = vld [vmem:[%s9431_s6 + $0x18] sm:$0xff]  ;;  %v230_v8 = vld [vmem:[%s9431_s6 + $0x20] sm:$0xff]  ;;  %v231_v9 = vld [vmem:[%s9431_s6 + $0x28] sm:$0xff]  ;;  %s9369_s22 = smov 48   ;;  %s9370_s23 = smov 72  }
  0x12   : > { %8315 = vmatprep.subr.mxu0 %v258_v3  ;;  %v232_v10 = vld [vmem:[%s9431_s6 + $0x30] sm:$0xff]  ;;  %v233_v11 = vld [vmem:[%s9431_s6 + $0x38] sm:$0xff]  ;;  %v234_v12 = vld [vmem:[%s9431_s6 + $0x40] sm:$0xff]  ;;  %s9371_s24 = smov 104   ;;  %s9372_s27 = smov 40  }
  0x13   : > { %8316 = vmatpush3.msra.mxu0 %v258_v3  ;;  %v235_v13 = vld [vmem:[%s9431_s6 + $0x48] sm:$0xff]  ;;  %v236_v14 = vld [vmem:[%s9431_s6 + $0x50] sm:$0xff]  ;;  %v237_v15 = vld [vmem:[%s9431_s6 + $0x58] sm:$0xff] }
  0x14   : > { %8318 = vmatmul.mubr.msk.f32.vlgmr.msra.gmra.mxu0 %vm269_vm0, %v227_v5  ;;  %v238_v16 = vld [vmem:[%s9431_s6 + $0x60] sm:$0xff]  ;;  %v239_v17 = vld [vmem:[%s9431_s6 + $0x68] sm:$0xff]  ;;  %v240_v18 = vld [vmem:[%s9431_s6 + $0x70] sm:$0xff] }
  0x15   : > { %8320 = vmatprep.mubr.msk.f32.mxu0 %vm269_vm0, %v228_v6  ;;  %v241_v19 = vld [vmem:[%s9431_s6 + $0x78] sm:$0xff]  ;;  %v242_v20 = vld [vmem:[%s9431_s6 + $0x80] sm:$0xff]  ;;  %v243_v21 = vld [vmem:[%s9431_s6 + $0x88] sm:$0xff] }
  0x16   : > { %v244_v22 = vld [vmem:[%s9431_s6 + $0x90] sm:$0xff]  ;;  %v245_v23 = vld [vmem:[%s9431_s6 + $0x98] sm:$0xff]  ;;  %v246_v24 = vld [vmem:[%s9431_s6 + $0xa0] sm:$0xff] }
  0x17   : > { %v247_v25 = vld [vmem:[%s9431_s6 + $0xa8] sm:$0xff]  ;;  %v248_v26 = vld [vmem:[%s9431_s6 + $0xb0] sm:$0xff]  ;;  %v249_v27 = vld [vmem:[%s9431_s6 + $0xb8] sm:$0xff] }
  0x18   : > { %8321 = vmatmul.mubr.msk.f32.gmra.mxu0 %vm269_vm0, %v229_v7  ;;  %v250_v28 = vld [vmem:[%s9431_s6 + $0xc0] sm:$0xff]  ;;  %v251_v29 = vld [vmem:[%s9431_s6 + $0xc8] sm:$0xff]  ;;  %v252_v30 = vld [vmem:[%s9431_s6 + $0xd0] sm:$0xff] }
  0x19   : > { %8323 = vmatprep.mubr.msk.f32.mxu0 %vm269_vm0, %v230_v8  ;;  %v253_v31 = vld [vmem:[%s9431_s6 + $0xd8] sm:$0xff]  ;;  %v254_v32 = vld [vmem:[%s9431_s6 + $0xe0] sm:$0xff]  ;;  %v255_v33 = vld [vmem:[%s9431_s6 + $0xe8] sm:$0xff] }
  0x1a   : > { %v256_v34 = vld [vmem:[%s9431_s6 + $0xf0] sm:$0xff]  ;;  %v257_v35 = vld [vmem:[%s9431_s6 + $0xf8] sm:$0xff] }
  0x1c   : > { %8324 = vmatmul.mubr.msk.f32.gmra.mxu0 %vm269_vm0, %v231_v9 }
  0x1d   : > { %8326 = vmatprep.mubr.msk.f32.mxu0 %vm269_vm0, %v232_v10 }
  0x20   : > { %8327 = vmatmul.mubr.msk.f32.gmra.mxu0 %vm269_vm0, %v233_v11 }
  0x21   : > { %8329 = vmatprep.mubr.msk.f32.mxu0 %vm269_vm0, %v234_v12 }
  0x24   : > { %8330 = vmatmul.mubr.msk.f32.gmra.mxu0 %vm269_vm0, %v235_v13 }
  0x25   : > { %8332 = vmatprep.mubr.msk.f32.mxu0 %vm269_vm0, %v236_v14 }
  0x28   : > { %8333 = vmatmul.mubr.msk.f32.gmra.mxu0 %vm269_vm0, %v237_v15 }
  0x29   : > { %8335 = vmatprep.mubr.msk.f32.mxu0 %vm269_vm0, %v238_v16 }
  0x2c   : > { %8336 = vmatmul.mubr.msk.f32.gmra.mxu0 %vm269_vm0, %v239_v17 }
  0x2d   : > { %8338 = vmatprep.mubr.msk.f32.mxu0 %vm269_vm0, %v240_v18 }
  0x30   : > { %8339 = vmatmul.mubr.msk.f32.gmra.mxu0 %vm269_vm0, %v241_v19 }
  0x31   : > { %8341 = vmatprep.mubr.msk.f32.mxu0 %vm269_vm0, %v242_v20 }
  0x34   : > { %8342 = vmatmul.mubr.msk.f32.gmra.mxu0 %vm269_vm0, %v243_v21 }
  0x35   : > { %8344 = vmatprep.mubr.msk.f32.mxu0 %vm269_vm0, %v244_v22 }
  0x38   : > { %8345 = vmatmul.mubr.msk.f32.gmra.mxu0 %vm269_vm0, %v245_v23 }
  0x39   : > { %8347 = vmatprep.mubr.msk.f32.mxu0 %vm269_vm0, %v246_v24 }
  0x3c   : > { %8348 = vmatmul.mubr.msk.f32.gmra.mxu0 %vm269_vm0, %v247_v25 }
  0x3d   : > { %8350 = vmatprep.mubr.msk.f32.mxu0 %vm269_vm0, %v248_v26 }
  0x40   : > { %8351 = vmatmul.mubr.msk.f32.gmra.mxu0 %vm269_vm0, %v249_v27 }
  0x41   : > { %8353 = vmatprep.mubr.msk.f32.mxu0 %vm269_vm0, %v250_v28 }
  0x44   : > { %8354 = vmatmul.mubr.msk.f32.gmra.mxu0 %vm269_vm0, %v251_v29 }
  0x45   : > { %8356 = vmatprep.mubr.msk.f32.mxu0 %vm269_vm0, %v252_v30 }
  0x48   : > { %8357 = vmatmul.mubr.msk.f32.gmra.mxu0 %vm269_vm0, %v253_v31 }
  0x49   : > { %8359 = vmatprep.mubr.msk.f32.mxu0 %vm269_vm0, %v254_v32 }
  0x4c   : > { %8360 = vmatmul.mubr.msk.f32.gmra.mxu0 %vm269_vm0, %v255_v33 }
  0x4d   : > { %8362 = vmatprep.mubr.msk.f32.mxu0 %vm269_vm0, %v256_v34 }
  0x50   : > { %8363 = vmatmul.mubr.msk.f32.gmra.mxu0 %vm269_vm0, %v257_v35 }
  0xd4   : > { %v8319_v37 = vpop.f32.mrf.mxu0 }
  0xd5   : > { %v9503_v38 = vadd.f32 %v8319_v37, %v9500_v36 }
  0xd6   : > { %v432_v39 = vpop.f32.mrf.mxu0 }
  0xd7   : > { %13800 = vst [vmem:[#allocation2_spill] sm:$0xff] %v9503_v38  ;;  %v9506_v40 = vadd.f32 %v9500_v36, %v432_v39  ;;  %625 = vrot.lane.b32.xlu1 %v9503_v38, %s9362_s9 }
  0xd8   : > { %v8322_v41 = vpop.f32.mrf.mxu0 }
  0xd9   : > { %13801 = vst [vmem:[#allocation3_spill] sm:$0xff] %v9506_v40  ;;  %1795 = vrot.lane.b32.xlu0 %v9506_v40, %s9363_s10  ;;  %7377 = vmatprep.mubr.msk.f32.mxu1 %vm687_vm1, %v9506_v40  ;;  %v9545_v54 = vadd.f32 %v8322_v41, %v9500_v36 }
  0xda   : > { %v442_v42 = vpop.f32.mrf.mxu0 }
  0xdb   : > { %v9515_v43 = vadd.f32 %v9500_v36, %v442_v42  ;;  %1861 = vrot.lane.b32.xlu1 %v9503_v38, %s9364_s11  ;;  %13806 = vst [vmem:[#allocation8_spill] sm:$0xff] %v9545_v54 }
  0xdc   : > { %v8325_v44 = vpop.f32.mrf.mxu0 }
  0xdd   : > { %13802 = vst [vmem:[#allocation4_spill] sm:$0xff] %v9515_v43  ;;  %1799 = vrot.lane.b32.xlu0 %v9515_v43, %s9363_s10  ;;  %v9585_v2 = vadd.f32 %v8325_v44, %v9500_v36 }
  0xde   : > { %v452_v45 = vpop.f32.mrf.mxu0 }
  0xdf   : > { %v9522_v46 = vadd.f32 %v9500_v36, %v452_v45  ;;  %1797 = vrot.lane.b32.xlu1 %v9503_v38, %s9363_s10  ;;  %13812 = vst [vmem:[#allocation14_spill] sm:$0xff] %v9585_v2 }
  0xe0   : > { %v8328_v47 = vpop.f32.mrf.mxu0 }
  0xe1   : > { %13803 = vst [vmem:[#allocation5_spill] sm:$0xff] %v9522_v46  ;;  %1803 = vrot.lane.b32.xlu0 %v9522_v46, %s9363_s10  ;;  %v9614_v7 = vadd.f32 %v8328_v47, %v9500_v36  ;;  %v9635_v10 = vpack.c.bf16 %v9585_v2, %v9522_v46 }
  0xe2   : > { %v462_v48 = vpop.f32.mrf.mxu0 }
  0xe3   : > { %v9529_v49 = vadd.f32 %v9500_v36, %v462_v48  ;;  %623 = vrot.lane.b32.xlu1 %v9506_v40, %s9362_s9  ;;  %13815 = vst [vmem:[#allocation17_spill] sm:$0xff] %v9614_v7  ;;  %13817 = vst [vmem:[#allocation19_spill] sm:$0xff] %v9635_v10 }
  0xe4   : > { %v9533_v50 = vpop.f32.mrf.mxu0 }
  0xe5   : > { %13804 = vst [vmem:[#allocation6_spill] sm:$0xff] %v9529_v49  ;;  %1807 = vrot.lane.b32.xlu0 %v9529_v49, %s9363_s10  ;;  %v9652_v14 = vadd.f32 %v9533_v50, %v9500_v36  ;;  %v9676_v18 = vpack.c.bf16 %v9614_v7, %v9529_v49 }
  0xe6   : > { %v472_v51 = vpop.f32.mrf.mxu0 }
  0xe7   : > { %v9538_v52 = vadd.f32 %v9500_v36, %v472_v51  ;;  %1859 = vrot.lane.b32.xlu1 %v9506_v40, %s9364_s11  ;;  %13819 = vst [vmem:[#allocation21_spill] sm:$0xff] %v9652_v14  ;;  %13822 = vst [vmem:[#allocation24_spill] sm:$0xff] %v9676_v18 }
  0xe8   : > { %v9542_v53 = vpop.f32.mrf.mxu0 }
  0xe9   : > { %13805 = vst [vmem:[#allocation7_spill] sm:$0xff] %v9538_v52  ;;  %1811 = vrot.lane.b32.xlu0 %v9538_v52, %s9363_s10  ;;  %v9694_v21 = vadd.f32 %v9542_v53, %v9500_v36  ;;  %v9724_v28 = vpack.c.bf16 %v9652_v14, %v9538_v52 }
  0xea   : > { %v482_v55 = vpop.f32.mrf.mxu0 }
  0xeb   : > { %v9550_v56 = vadd.f32 %v9500_v36, %v482_v55  ;;  %629 = vrot.lane.b32.xlu1 %v9545_v54, %s9362_s9  ;;  %13824 = vst [vmem:[#allocation26_spill] sm:$0xff] %v9694_v21  ;;  %13829 = vst [vmem:[#allocation31_spill] sm:$0xff] %v9724_v28 }
  0xec   : > { %v9554_v57 = vpop.f32.mrf.mxu0 }
  0xed   : > { %13807 = vst [vmem:[#allocation9_spill] sm:$0xff] %v9550_v56  ;;  %1815 = vrot.lane.b32.xlu0 %v9550_v56, %s9363_s10  ;;  %v9752_v37 = vadd.f32 %v9554_v57, %v9500_v36  ;;  %v9790_v55 = vpack.c.bf16 %v9694_v21, %v9550_v56 }
  0xee   : > { %v492_v58 = vpop.f32.mrf.mxu0 }
  0xef   : > { %v9559_v59 = vadd.f32 %v9500_v36, %v492_v58  ;;  %1865 = vrot.lane.b32.xlu1 %v9545_v54, %s9364_s11  ;;  %13835 = vst [vmem:[#allocation37_spill] sm:$0xff] %v9752_v37  ;;  %13844 = vst [vmem:[#allocation46_spill] sm:$0xff] %v9790_v55 }
  0xf0   : > { %v8340_v60 = vpop.f32.mrf.mxu0 }
  0xf1   : > { %13808 = vst [vmem:[#allocation10_spill] sm:$0xff] %v9559_v59  ;;  %1819 = vrot.lane.b32.xlu0 %v9559_v59, %s9363_s10  ;;  %v9566_v61 = vadd.f32 %v8340_v60, %v9500_v36 }
  0xf2   : > { %v502_v62 = vpop.f32.mrf.mxu0 }
  0xf3   : > { %13809 = vst [vmem:[#allocation11_spill] sm:$0xff] %v9566_v61  ;;  %1801 = vrot.lane.b32.xlu1 %v9545_v54, %s9363_s10  ;;  %v9573_v63 = vadd.f32 %v9500_v36, %v502_v62 }
  0xf4   : > { %v8343_v0 = vpop.f32.mrf.mxu0 }
  0xf5   : > { %653 = vrot.lane.b32.xlu0 %v9566_v61, %s9362_s9  ;;  %13810 = vst [vmem:[#allocation12_spill] sm:$0xff] %v9573_v63  ;;  %v9580_v1 = vadd.f32 %v8343_v0, %v9500_v36 }
  0xf6   : > { %v512_v3 = vpop.f32.mrf.mxu0 }
  0xf7   : > { %627 = vrot.lane.b32.xlu1 %v9515_v43, %s9362_s9  ;;  %13811 = vst [vmem:[#allocation13_spill] sm:$0xff] %v9580_v1  ;;  %v9594_v4 = vadd.f32 %v9500_v36, %v512_v3 }
  0xf8   : > { %v8346_v5 = vpop.f32.mrf.mxu0 }
  0xf9   : > { %1823 = vrot.lane.b32.xlu0 %v9573_v63, %s9363_s10  ;;  %13813 = vst [vmem:[#allocation15_spill] sm:$0xff] %v9594_v4  ;;  %v9609_v6 = vadd.f32 %v8346_v5, %v9500_v36 }
  0xfa   : > { %v522_v8 = vpop.f32.mrf.mxu0 }
  0xfb   : > { %1863 = vrot.lane.b32.xlu1 %v9515_v43, %s9364_s11  ;;  %13814 = vst [vmem:[#allocation16_spill] sm:$0xff] %v9609_v6  ;;  %v9623_v9 = vadd.f32 %v9500_v36, %v522_v8 }
  0xfc   : > { %v8349_v11 = vpop.f32.mrf.mxu0 }
  0xfd   : > { %657 = vrot.lane.b32.xlu0 %v9580_v1, %s9362_s9  ;;  %13816 = vst [vmem:[#allocation18_spill] sm:$0xff] %v9623_v9  ;;  %v9642_v12 = vadd.f32 %v8349_v11, %v9500_v36 }
  0xfe   : > { %v532_v13 = vpop.f32.mrf.mxu0 }
  0xff   : > { %633 = vrot.lane.b32.xlu1 %v9585_v2, %s9362_s9  ;;  %13818 = vst [vmem:[#allocation20_spill] sm:$0xff] %v9642_v12  ;;  %v9657_v15 = vadd.f32 %v9500_v36, %v532_v13 }
 0x100   : > { %v8352_v16 = vpop.f32.mrf.mxu0 }
 0x101   : > { %1893 = vrot.lane.b32.xlu0 %v9580_v1, %s9364_s11  ;;  %13820 = vst [vmem:[#allocation22_spill] sm:$0xff] %v9657_v15  ;;  %v9672_v17 = vadd.f32 %v8352_v16, %v9500_v36  ;;  %v9690_v20 = vpack.c.bf16 %v9642_v12, %v9657_v15 }
 0x102   : > { %v542_v19 = vpop.f32.mrf.mxu0 }
 0x103   : > { %1869 = vrot.lane.b32.xlu1 %v9585_v2, %s9364_s11  ;;  %13821 = vst [vmem:[#allocation23_spill] sm:$0xff] %v9672_v17  ;;  %13823 = vst [vmem:[#allocation25_spill] sm:$0xff] %v9690_v20  ;;  %v9699_v22 = vadd.f32 %v9500_v36, %v542_v19 }
 0x104   : > { %v8355_v24 = vpop.f32.mrf.mxu0 }
 0x105   : > { %655 = vrot.lane.b32.xlu0 %v9594_v4, %s9362_s9  ;;  %13825 = vst [vmem:[#allocation27_spill] sm:$0xff] %v9699_v22  ;;  %v9720_v27 = vadd.f32 %v8355_v24, %v9500_v36  ;;  %v9748_v35 = vpack.c.bf16 %v9672_v17, %v9699_v22 }
 0x106   : > { %v552_v33 = vpop.f32.mrf.mxu0 }
 0x107   : > { %1805 = vrot.lane.b32.xlu1 %v9585_v2, %s9363_s10  ;;  %13828 = vst [vmem:[#allocation30_spill] sm:$0xff] %v9720_v27  ;;  %13834 = vst [vmem:[#allocation36_spill] sm:$0xff] %v9748_v35  ;;  %v9759_v41 = vadd.f32 %v9500_v36, %v552_v33  ;;  %v9841_v33 = vpack.c.bf16 %v9752_v37, %v9559_v59 }
 0x108   : > { %v8358_v48 = vpop.f32.mrf.mxu0 }
 0x109   : > { %1891 = vrot.lane.b32.xlu0 %v9594_v4, %s9364_s11  ;;  %13837 = vst [vmem:[#allocation39_spill] sm:$0xff] %v9759_v41  ;;  %v9786_v53 = vadd.f32 %v8358_v48, %v9500_v36  ;;  %v9814_v5 = vpack.c.bf16 %v9720_v27, %v9759_v41  ;;  %13852 = vst [vmem:[#allocation54_spill] sm:$0xff] %v9841_v33 }
 0x10a   : > { %v562_v0 = vpop.f32.mrf.mxu0 }
 0x10b   : > { %631 = vrot.lane.b32.xlu1 %v9522_v46, %s9362_s9  ;;  %13843 = vst [vmem:[#allocation45_spill] sm:$0xff] %v9786_v53  ;;  %13847 = vst [vmem:[#allocation49_spill] sm:$0xff] %v9814_v5  ;;  %v9821_v11 = vadd.f32 %v9500_v36, %v562_v0 }
 0x10c   : > { %v8361_v48 = vpop.f32.mrf.mxu0 }
 0x10d   : > { %1827 = vrot.lane.b32.xlu0 %v9594_v4, %s9363_s10  ;;  %13848 = vst [vmem:[#allocation50_spill] sm:$0xff] %v9821_v11 }
 0x10f   : > { %1867 = vrot.lane.b32.xlu1 %v9522_v46, %s9364_s11 }
 0x111   : > { %661 = vrot.lane.b32.xlu0 %v9609_v6, %s9362_s9 }
 0x113   : > { %637 = vrot.lane.b32.xlu1 %v9614_v7, %s9362_s9 }
 0x115   : > { %1897 = vrot.lane.b32.xlu0 %v9609_v6, %s9364_s11 }
 0x117   : > { %1873 = vrot.lane.b32.xlu1 %v9614_v7, %s9364_s11 }
 0x119   : > { %659 = vrot.lane.b32.xlu0 %v9623_v9, %s9362_s9 }
 0x11b   : > { %1809 = vrot.lane.b32.xlu1 %v9614_v7, %s9363_s10 }
 0x11d   : > { %1895 = vrot.lane.b32.xlu0 %v9623_v9, %s9364_s11 }
 0x11f   : > { %1525 = vrot.lane.b32.xlu1 %v9635_v10, %s9365_s12 }
 0x121   : > { %1831 = vrot.lane.b32.xlu0 %v9623_v9, %s9363_s10 }
 0x123   : > { %635 = vrot.lane.b32.xlu1 %v9529_v49, %s9362_s9 }
 0x125   : > { %665 = vrot.lane.b32.xlu0 %v9642_v12, %s9362_s9 }
 0x127   : > { %1871 = vrot.lane.b32.xlu1 %v9529_v49, %s9364_s11 }
 0x129   : > { %1901 = vrot.lane.b32.xlu0 %v9642_v12, %s9364_s11 }
 0x12b   : > { %641 = vrot.lane.b32.xlu1 %v9652_v14, %s9362_s9 }
 0x12d   : > { %663 = vrot.lane.b32.xlu0 %v9657_v15, %s9362_s9 }
 0x12f   : > { %1877 = vrot.lane.b32.xlu1 %v9652_v14, %s9364_s11 }
 0x131   : > { %1899 = vrot.lane.b32.xlu0 %v9657_v15, %s9364_s11 }
 0x133   : > { %1813 = vrot.lane.b32.xlu1 %v9652_v14, %s9363_s10 }
 0x135   : > { %1835 = vrot.lane.b32.xlu0 %v9657_v15, %s9363_s10 }
 0x137   : > { %1527 = vrot.lane.b32.xlu1 %v9676_v18, %s9365_s12 }
 0x139   : > { %669 = vrot.lane.b32.xlu0 %v9672_v17, %s9362_s9 }
 0x13b   : > { %639 = vrot.lane.b32.xlu1 %v9538_v52, %s9362_s9 }
 0x13d   : > { %1905 = vrot.lane.b32.xlu0 %v9672_v17, %s9364_s11 }
 0x13f   : > { %1875 = vrot.lane.b32.xlu1 %v9538_v52, %s9364_s11 }
 0x141   : > { %1541 = vrot.lane.b32.xlu0 %v9690_v20, %s9365_s12 }
 0x143   : > { %645 = vrot.lane.b32.xlu1 %v9694_v21, %s9362_s9 }
 0x145   : > { %667 = vrot.lane.b32.xlu0 %v9699_v22, %s9362_s9 }
 0x147   : > { %1881 = vrot.lane.b32.xlu1 %v9694_v21, %s9364_s11 }
 0x149   : > { %v9707_v23 = vpop.permute.xlu1 %625  ;;  %1903 = vrot.lane.b32.xlu0 %v9699_v22, %s9364_s11 }
 0x14b   : > { %v9711_v25 = vpop.permute.xlu0 %1795  ;;  %1817 = vrot.lane.b32.xlu1 %v9694_v21, %s9363_s10 }
 0x14c   : > { %13826 = vst [vmem:[#allocation28_spill] sm:$0xff] %v9711_v25 }
 0x14d   : > { %v9715_v26 = vpop.permute.xlu1 %1861  ;;  %1839 = vrot.lane.b32.xlu0 %v9699_v22, %s9363_s10 }
 0x14e   : > { %13827 = vst [vmem:[#allocation29_spill] sm:$0xff] %v9715_v26 }
 0x14f   : > { %v9726_v29 = vpop.permute.xlu0 %1799  ;;  %1529 = vrot.lane.b32.xlu1 %v9724_v28, %s9365_s12 }
 0x150   : > { %13830 = vst [vmem:[#allocation32_spill] sm:$0xff] %v9726_v29 }
 0x151   : > { %v9730_v30 = vpop.permute.xlu1 %1797  ;;  %673 = vrot.lane.b32.xlu0 %v9720_v27, %s9362_s9 }
 0x152   : > { %13831 = vst [vmem:[#allocation33_spill] sm:$0xff] %v9730_v30  ;;  %v9887_v30 = vpack.c.bf16 %v9566_v61, %v9573_v63 }
 0x153   : > { %v9734_v31 = vpop.permute.xlu0 %1803  ;;  %643 = vrot.lane.b32.xlu1 %v9550_v56, %s9362_s9 }
 0x154   : > { %13832 = vst [vmem:[#allocation34_spill] sm:$0xff] %v9734_v31  ;;  %v9876_v31 = vpack.c.bf16 %v9786_v53, %v9821_v11  ;;  %13861 = vst [vmem:[#allocation63_spill] sm:$0xff] %v9887_v30 }
 0x155   : > { %1909 = vrot.lane.b32.xlu0 %v9720_v27, %s9364_s11  ;;  %v9740_v32 = vpop.permute.xlu1 %623 }
 0x156   : > { %13858 = vst [vmem:[#allocation60_spill] sm:$0xff] %v9876_v31 }
 0x157   : > { %v9742_v34 = vpop.permute.xlu0 %1807  ;;  %1879 = vrot.lane.b32.xlu1 %v9550_v56, %s9364_s11 }
 0x158   : > { %13833 = vst [vmem:[#allocation35_spill] sm:$0xff] %v9742_v34 }
 0x159   : > { %1543 = vrot.lane.b32.xlu0 %v9748_v35, %s9365_s12  ;;  %v9756_v39 = vpop.permute.xlu1 %1859 }
 0x15a   : > { %13836 = vst [vmem:[#allocation38_spill] sm:$0xff] %v9756_v39 }
 0x15b   : > { %v9761_v42 = vpop.permute.xlu0 %1811  ;;  %649 = vrot.lane.b32.xlu1 %v9752_v37, %s9362_s9 }
 0x15c   : > { %13838 = vst [vmem:[#allocation40_spill] sm:$0xff] %v9761_v42 }
 0x15d   : > { %671 = vrot.lane.b32.xlu0 %v9759_v41, %s9362_s9  ;;  %v9767_v44 = vpop.permute.xlu1 %629 }
 0x15f   : > { %v9769_v45 = vpop.permute.xlu0 %1815  ;;  %1885 = vrot.lane.b32.xlu1 %v9752_v37, %s9364_s11 }
 0x160   : > { %13839 = vst [vmem:[#allocation41_spill] sm:$0xff] %v9769_v45 }
 0x161   : > { %1907 = vrot.lane.b32.xlu0 %v9759_v41, %s9364_s11  ;;  %v9775_v47 = vpop.permute.xlu1 %1865 }
 0x162   : > { %13840 = vst [vmem:[#allocation42_spill] sm:$0xff] %v9775_v47 }
 0x163   : > { %v9777_v50 = vpop.permute.xlu0 %1819  ;;  %1821 = vrot.lane.b32.xlu1 %v9752_v37, %s9363_s10 }
 0x164   : > { %13841 = vst [vmem:[#allocation43_spill] sm:$0xff] %v9777_v50  ;;  %v9852_v50 = vadd.f32 %v8361_v48, %v9500_v36 }
 0x165   : > { %1843 = vrot.lane.b32.xlu0 %v9759_v41, %s9363_s10  ;;  %v9783_v51 = vpop.permute.xlu1 %1801 }
 0x166   : > { %13842 = vst [vmem:[#allocation44_spill] sm:$0xff] %v9783_v51  ;;  %13854 = vst [vmem:[#allocation56_spill] sm:$0xff] %v9852_v50 }
 0x167   : > { %v9792_v57 = vpop.permute.xlu0 %653  ;;  %1531 = vrot.lane.b32.xlu1 %v9790_v55, %s9365_s12 }
 0x169   : > { %677 = vrot.lane.b32.xlu0 %v9786_v53, %s9362_s9  ;;  %v9798_v58 = vpop.permute.xlu1 %627 }
 0x16b   : > { %v9800_v60 = vpop.permute.xlu0 %1823  ;;  %647 = vrot.lane.b32.xlu1 %v9559_v59, %s9362_s9 }
 0x16c   : > { %13845 = vst [vmem:[#allocation47_spill] sm:$0xff] %v9800_v60 }
 0x16d   : > { %1913 = vrot.lane.b32.xlu0 %v9786_v53, %s9364_s11  ;;  %v9806_v62 = vpop.permute.xlu1 %1863 }
 0x16e   : > { %13846 = vst [vmem:[#allocation48_spill] sm:$0xff] %v9806_v62 }
 0x16f   : > { %v9808_v3 = vpop.permute.xlu0 %657  ;;  %1883 = vrot.lane.b32.xlu1 %v9559_v59, %s9364_s11  ;;  %v9985_v59 = vpack.c.bf16 %v9609_v6, %v9623_v9 }
 0x171   : > { %1545 = vrot.lane.b32.xlu0 %v9814_v5, %s9365_s12  ;;  %v9818_v8 = vpop.permute.xlu1 %633  ;;  %13877 = vst [vmem:[#allocation79_spill] sm:$0xff] %v9985_v59 }
 0x173   : > { %v9823_v13 = vpop.permute.xlu0 %1893  ;;  %1889 = vrot.lane.b32.xlu1 %v9566_v61, %s9364_s11 }
 0x174   : > { %13849 = vst [vmem:[#allocation51_spill] sm:$0xff] %v9823_v13 }
 0x175   : > { %675 = vrot.lane.b32.xlu0 %v9821_v11, %s9362_s9  ;;  %v9829_v16 = vpop.permute.xlu1 %1869 }
 0x176   : > { %13850 = vst [vmem:[#allocation52_spill] sm:$0xff] %v9829_v16  ;;  %v9993_v16 = vpack.c.bf16 %v9503_v38, %v9506_v40 }
 0x177   : > { %v9831_v19 = vpop.permute.xlu0 %655  ;;  %1825 = vrot.lane.b32.xlu1 %v9566_v61, %s9363_s10 }
 0x178   : > { %13879 = vst [vmem:[#allocation81_spill] sm:$0xff] %v9993_v16 }
 0x179   : > { %1911 = vrot.lane.b32.xlu0 %v9821_v11, %s9364_s11  ;;  %v9837_v24 = vpop.permute.xlu1 %1805 }
 0x17a   : > { %13851 = vst [vmem:[#allocation53_spill] sm:$0xff] %v9837_v24  ;;  %v572_v24 = vpop.f32.mrf.mxu0 }
 0x17b   : > { %v9843_v0 = vpop.permute.xlu0 %1891  ;;  %1533 = vrot.lane.b32.xlu1 %v9841_v33, %s9365_s12  ;;  %v9883_v29 = vadd.f32 %v9500_v36, %v572_v24 }
 0x17c   : > { %13853 = vst [vmem:[#allocation55_spill] sm:$0xff] %v9843_v0  ;;  %v8364_v22 = vpop.f32.mrf.mxu0 }
 0x17d   : > { %1847 = vrot.lane.b32.xlu0 %v9821_v11, %s9363_s10  ;;  %v9849_v60 = vpop.permute.xlu1 %631  ;;  %13860 = vst [vmem:[#allocation62_spill] sm:$0xff] %v9883_v29  ;;  %v9914_v39 = vadd.f32 %v8364_v22, %v9500_v36 }
 0x17f   : > { %v9854_v45 = vpop.permute.xlu0 %1827  ;;  %651 = vrot.lane.b32.xlu1 %v9573_v63, %s9362_s9  ;;  %13865 = vst [vmem:[#allocation67_spill] sm:$0xff] %v9914_v39 }
 0x180   : > { %13855 = vst [vmem:[#allocation57_spill] sm:$0xff] %v9854_v45 }
 0x181   : > { %681 = vrot.lane.b32.xlu0 %v9852_v50, %s9362_s9  ;;  %v9860_v42 = vpop.permute.xlu1 %1867 }
 0x182   : > { %13856 = vst [vmem:[#allocation58_spill] sm:$0xff] %v9860_v42 }
 0x183   : > { %v9862_v34 = vpop.permute.xlu0 %661  ;;  %1887 = vrot.lane.b32.xlu1 %v9573_v63, %s9364_s11 }
 0x185   : > { %1917 = vrot.lane.b32.xlu0 %v9852_v50, %s9364_s11  ;;  %v9868_v48 = vpop.permute.xlu1 %637 }
 0x187   : > { %v9870_v45 = vpop.permute.xlu0 %1897  ;;  %1829 = vrot.lane.b32.xlu1 %v9580_v1, %s9363_s10 }
 0x188   : > { %13857 = vst [vmem:[#allocation59_spill] sm:$0xff] %v9870_v45 }
 0x189   : > { %1547 = vrot.lane.b32.xlu0 %v9876_v31, %s9365_s12  ;;  %v9880_v51 = vpop.permute.xlu1 %1873 }
 0x18a   : > { %13859 = vst [vmem:[#allocation61_spill] sm:$0xff] %v9880_v51 }
 0x18b   : > { %v9889_v25 = vpop.permute.xlu0 %659  ;;  %1535 = vrot.lane.b32.xlu1 %v9887_v30, %s9365_s12 }
 0x18d   : > { %679 = vrot.lane.b32.xlu0 %v9883_v29, %s9362_s9  ;;  %v9895_v11 = vpop.permute.xlu1 %1809 }
 0x18e   : > { %13862 = vst [vmem:[#allocation64_spill] sm:$0xff] %v9895_v11 }
 0x18f   : > { %v9897_v41 = vpop.permute.xlu0 %1895  ;;  %1833 = vrot.lane.b32.xlu1 %v9609_v6, %s9363_s10 }
 0x190   : > { %13863 = vst [vmem:[#allocation65_spill] sm:$0xff] %v9897_v41 }
 0x191   : > { %1915 = vrot.lane.b32.xlu0 %v9883_v29, %s9364_s11  ;;  %v9903_v24 = vpop.permute.xlu1 %1525 }
 0x193   : > { %v9905_v15 = vpop.permute.xlu0 %1831  ;;  %1837 = vrot.lane.b32.xlu1 %v9642_v12, %s9363_s10  ;;  %v582_v12 = vpop.f32.mrf.mxu0 }
 0x194   : > { %13864 = vst [vmem:[#allocation66_spill] sm:$0xff] %v9905_v15 }
 0x195   : > { %1851 = vrot.lane.b32.xlu0 %v9883_v29, %s9363_s10  ;;  %v9911_v11 = vpop.permute.xlu1 %635 }
 0x197   : > { %v9916_v0 = vpop.permute.xlu0 %665  ;;  %1841 = vrot.lane.b32.xlu1 %v9672_v17, %s9363_s10  ;;  %v9938_v17 = vpack.c.bf16 %v9852_v50, %v9883_v29 }
 0x199   : > { %685 = vrot.lane.b32.xlu0 %v9914_v39, %s9362_s9  ;;  %v9922_v15 = vpop.permute.xlu1 %1871  ;;  %13868 = vst [vmem:[#allocation70_spill] sm:$0xff] %v9938_v17 }
 0x19a   : > { %13866 = vst [vmem:[#allocation68_spill] sm:$0xff] %v9922_v15 }
 0x19b   : > { %v9924_v26 = vpop.permute.xlu0 %1901  ;;  %1845 = vrot.lane.b32.xlu1 %v9720_v27, %s9363_s10  ;;  %v9945_v27 = vadd.f32 %v9500_v36, %v582_v12 }
 0x19c   : > { %13867 = vst [vmem:[#allocation69_spill] sm:$0xff] %v9924_v26  ;;  %v10001_v26 = vpack.c.bf16 %v9580_v1, %v9594_v4 }
 0x19d   : > { %1921 = vrot.lane.b32.xlu0 %v9914_v39, %s9364_s11  ;;  %v9930_v22 = vpop.permute.xlu1 %641  ;;  %13870 = vst [vmem:[#allocation72_spill] sm:$0xff] %v9945_v27  ;;  %v9969_v45 = vpack.c.bf16 %v9914_v39, %v9945_v27 }
 0x19e   : > { %13880 = vst [vmem:[#allocation82_spill] sm:$0xff] %v10001_v26 }
 0x19f   : > { %v9932_v13 = vpop.permute.xlu0 %663  ;;  %1849 = vrot.lane.b32.xlu1 %v9786_v53, %s9363_s10  ;;  %13874 = vst [vmem:[#allocation76_spill] sm:$0xff] %v9969_v45 }
 0x1a1   : > { %1549 = vrot.lane.b32.xlu0 %v9938_v17, %s9365_s12  ;;  %v9942_v62 = vpop.permute.xlu1 %1877 }
 0x1a2   : > { %13869 = vst [vmem:[#allocation71_spill] sm:$0xff] %v9942_v62 }
 0x1a3   : > { %v9947_v41 = vpop.permute.xlu0 %1899  ;;  %1853 = vrot.lane.b32.xlu1 %v9852_v50, %s9363_s10 }
 0x1a4   : > { %13871 = vst [vmem:[#allocation73_spill] sm:$0xff] %v9947_v41 }
 0x1a5   : > { %1919 = vrot.lane.b32.xlu0 %v9945_v27, %s9364_s11  ;;  %v9953_v53 = vpop.permute.xlu1 %1813 }
 0x1a6   : > { %13872 = vst [vmem:[#allocation74_spill] sm:$0xff] %v9953_v53  ;;  %v9977_v53 = vpack.c.bf16 %v9545_v54, %v9515_v43 }
 0x1a7   : > { %v9955_v47 = vpop.permute.xlu0 %1835  ;;  %1857 = vrot.lane.b32.xlu1 %v9914_v39, %s9363_s10 }
 0x1a8   : > { %13873 = vst [vmem:[#allocation75_spill] sm:$0xff] %v9955_v47  ;;  %13875 = vst [vmem:[#allocation77_spill] sm:$0xff] %v9977_v53 }
 0x1a9   : > { %1855 = vrot.lane.b32.xlu0 %v9945_v27, %s9363_s10  ;;  %v9961_v36 = vpop.permute.xlu1 %1527  ;;  %s13390_s10 = scalar_lea.vmem %s13556_s5, %s7307_s28 }
 0x1ab   : > { %v9963_v12 = vpop.permute.xlu0 %669  ;;  %683 = vrot.lane.b32.xlu1 %v9945_v27, %s9362_s9 }
 0x1ad   : > { %1551 = vrot.lane.b32.xlu0 %v9969_v45, %s9365_s12  ;;  %v9973_v47 = vpop.permute.xlu1 %639 }
 0x1af   : > { %v9979_v42 = vpop.permute.xlu0 %1905  ;;  %1523 = vrot.lane.b32.xlu1 %v9977_v53, %s9365_s12 }
 0x1b0   : > { %13876 = vst [vmem:[#allocation78_spill] sm:$0xff] %v9979_v42 }
 0x1b1   : > { %1539 = vrot.lane.b32.xlu0 %v9985_v59, %s9365_s12  ;;  %v9989_v41 = vpop.permute.xlu1 %1875 }
 0x1b2   : > { %13878 = vst [vmem:[#allocation80_spill] sm:$0xff] %v9989_v41 }
 0x1b3   : > { %v9995_v21 = vpop.permute.xlu0 %1541  ;;  %1521 = vrot.lane.b32.xlu1 %v9993_v16, %s9365_s12 }
 0x1b5   : > { %1537 = vrot.lane.b32.xlu0 %v10001_v26, %s9365_s12  ;;  %v10005_v6 = vpop.permute.xlu1 %645 }
 0x1b7   : > { %v10007_v9 = vpop.permute.xlu0 %667  ;;  %2754 = vrot.lane.b32.xlu1 %v9969_v45, %s9366_s13 }
 0x1b9   : > { %2738 = vrot.lane.b32.xlu0 %v9887_v30, %s9366_s13  ;;  %v10013_v15 = vpop.permute.xlu1 %1881 }
 0x1bb   : > { %v10015_v56 = vpop.permute.xlu0 %1903  ;;  %2752 = vrot.lane.b32.xlu1 %v9938_v17, %s9366_s13 }
 0x1bc   : > { %13881 = vst [vmem:[#allocation83_spill] sm:$0xff] %v10015_v56 }
 0x1bd   : > { %2750 = vrot.lane.b32.xlu0 %v9876_v31, %s9366_s13  ;;  %v10021_v1 = vpop.permute.xlu1 %1817 }
 0x1be   : > { %13882 = vst [vmem:[#allocation84_spill] sm:$0xff] %v10021_v1 }
 0x1bf   : > { %v10023_v4 = vpop.permute.xlu0 %1839  ;;  %2736 = vrot.lane.b32.xlu1 %v9841_v33, %s9366_s13 }
 0x1c0   : > { %13883 = vst [vmem:[#allocation85_spill] sm:$0xff] %v10023_v4 }
 0x1c1   : > { %2748 = vrot.lane.b32.xlu0 %v9814_v5, %s9366_s13  ;;  %v10029_v30 = vpop.permute.xlu1 %1529 }
 0x1c3   : > { %v10031_v45 = vpop.permute.xlu0 %673  ;;  %2734 = vrot.lane.b32.xlu1 %v9790_v55, %s9366_s13 }
 0x1c5   : > { %2746 = vrot.lane.b32.xlu0 %v9748_v35, %s9366_s13  ;;  %v10037_v31 = vpop.permute.xlu1 %643 }
 0x1c7   : > { %v10039_v17 = vpop.permute.xlu0 %1909  ;;  %2732 = vrot.lane.b32.xlu1 %v9724_v28, %s9366_s13 }
 0x1c8   : > { %13884 = vst [vmem:[#allocation86_spill] sm:$0xff] %v10039_v17 }
 0x1c9   : > { %2744 = vrot.lane.b32.xlu0 %v9690_v20, %s9366_s13  ;;  %v10045_v5 = vpop.permute.xlu1 %1879 }
 0x1ca   : > { %13885 = vst [vmem:[#allocation87_spill] sm:$0xff] %v10045_v5 }
 0x1cb   : > { %v10047_v33 = vpop.permute.xlu0 %1543  ;;  %2730 = vrot.lane.b32.xlu1 %v9676_v18, %s9366_s13 }
 0x1cd   : > { %2742 = vrot.lane.b32.xlu0 %v9985_v59, %s9366_s13  ;;  %v650_v35 = vpop.permute.xlu1 %649 }
 0x1cf   : > { %v10053_v55 = vpop.permute.xlu0 %671  ;;  %2728 = vrot.lane.b32.xlu1 %v9635_v10, %s9366_s13 }
 0x1d1   : > { %2740 = vrot.lane.b32.xlu0 %v10001_v26, %s9366_s13  ;;  %v10059_v20 = vpop.permute.xlu1 %1885 }
 0x1d3   : > { %v10061_v28 = vpop.permute.xlu0 %1907  ;;  %2726 = vrot.lane.b32.xlu1 %v9977_v53, %s9366_s13 }
 0x1d4   : > { %13886 = vst [vmem:[#allocation88_spill] sm:$0xff] %v10061_v28 }
 0x1d5   : > { %3734 = vrot.lane.b32.xlu0 %v9566_v61, %s9367_s14  ;;  %v10067_v59 = vpop.permute.xlu1 %1821 }
 0x1d6   : > { %13887 = vst [vmem:[#allocation89_spill] sm:$0xff] %v10067_v59 }
 0x1d7   : > { %v10069_v18 = vpop.permute.xlu0 %1843  ;;  %2724 = vrot.lane.b32.xlu1 %v9993_v16, %s9366_s13 }
 0x1d8   : > { %13888 = vst [vmem:[#allocation90_spill] sm:$0xff] %v10069_v18 }
 0x1d9   : > { %3732 = vrot.lane.b32.xlu0 %v9573_v63, %s9367_s14  ;;  %v1532_v26 = vpop.permute.xlu1 %1531 }
 0x1db   : > { %v678_v10 = vpop.permute.xlu0 %677  ;;  %3766 = vrot.lane.b32.xlu1 %v9914_v39, %s9367_s14 }
 0x1dd   : > { %3730 = vrot.lane.b32.xlu0 %v9752_v37, %s9367_s14  ;;  %v648_v53 = vpop.permute.xlu1 %647 }
 0x1df   : > { %v10079_v4 = vpop.permute.xlu0 %1913  ;;  %3764 = vrot.lane.b32.xlu1 %v9945_v27, %s9367_s14 }
 0x1e1   : > { %v10083_v18 = vpop.permute.xlu1 %1883 }
 0x1e3   : > { %v1546_v16 = vpop.permute.xlu0 %1545  ;;  %3762 = vrot.lane.b32.xlu1 %v9852_v50, %s9367_s14 }
 0x1e5   : > { %v10087_v59 = vpop.permute.xlu1 %1889 }
 0x1e7   : > { %v676_v1 = vpop.permute.xlu0 %675  ;;  %3760 = vrot.lane.b32.xlu1 %v9883_v29, %s9367_s14 }
 0x1e9   : > { %v10091_v39 = vpop.permute.xlu1 %1825 }
 0x1ea   : > { %13889 = vst [vmem:[#allocation91_spill] sm:$0xff] %v10091_v39 }
 0x1eb   : > { %v10093_v61 = vpop.permute.xlu0 %1911 }
 0x1ec   : > { %13890 = vst [vmem:[#allocation92_spill] sm:$0xff] %v10093_v61 }
 0x1ed   : > { %v1534_v63 = vpop.permute.xlu1 %1533 }
 0x1ef   : > { %v10095_v37 = vpop.permute.xlu0 %1847 }
 0x1f0   : > { %13891 = vst [vmem:[#allocation93_spill] sm:$0xff] %v10095_v37 }
 0x1f1   : > { %v652_v27 = vpop.permute.xlu1 %651 }
 0x1f3   : > { %v682_v56 = vpop.permute.xlu0 %681 }
 0x1f5   : > { %v10097_v51 = vpop.permute.xlu1 %1887 }
 0x1f7   : > { %v10099_v14 = vpop.permute.xlu0 %1917 }
 0x1f9   : > { %v10101_v50 = vpop.permute.xlu1 %1829 }
 0x1fa   : > { %13892 = vst [vmem:[#allocation94_spill] sm:$0xff] %v10101_v50 }
 0x1fb   : > { %v1548_v42 = vpop.permute.xlu0 %1547 }
 0x1fd   : > { %v1536_v41 = vpop.permute.xlu1 %1535 }
 0x1ff   : > { %v680_v52 = vpop.permute.xlu0 %679 }
 0x201   : > { %v10103_v28 = vpop.permute.xlu1 %1833 }
 0x202   : > { %13893 = vst [vmem:[#allocation95_spill] sm:$0xff] %v10103_v28 }
 0x203   : > { %v10105_v29 = vpop.permute.xlu0 %1915 }
 0x205   : > { %v10107_v39 = vpop.permute.xlu1 %1837 }
 0x206   : > { %13894 = vst [vmem:[#allocation96_spill] sm:$0xff] %v10107_v39 }
 0x207   : > { %v10109_v62 = vpop.permute.xlu0 %1851 }
 0x208   : > { %13895 = vst [vmem:[#allocation97_spill] sm:$0xff] %v10109_v62 }
 0x209   : > { %v10111_v37 = vpop.permute.xlu1 %1841 }
 0x20a   : > { %13896 = vst [vmem:[#allocation98_spill] sm:$0xff] %v10111_v37 }
 0x20b   : > { %v686_v7 = vpop.permute.xlu0 %685 }
 0x20c   : > { %7345 = vmatprep.subr.msk.mxu1 %vm687_vm1, %v686_v7 }
 0x20d   : > { %7346 = vmatpush3.xpose.msk.msra.mxu1 %vm687_vm1, %v9792_v57  ;;  %v10116_v50 = vpop.permute.xlu1 %1845  ;;  %v2997_v57 = vld [vmem:[%s13554_s3 + $0x8] sm:$0xff] }
 0x20f   : > { %v1922_v17 = vpop.permute.xlu0 %1921 }
 0x211   : > { %v10118_v5 = vpop.permute.xlu1 %1849 }
 0x213   : > { %v1550_v28 = vpop.permute.xlu0 %1549 }
 0x215   : > { %v10120_v49 = vpop.permute.xlu1 %1853 }
 0x217   : > { %v1920_v61 = vpop.permute.xlu0 %1919 }
 0x219   : > { %v10122_v39 = vpop.permute.xlu1 %1857 }
 0x21b   : > { %v10124_v62 = vpop.permute.xlu0 %1855 }
 0x21d   : > { %v684_v37 = vpop.permute.xlu1 %683 }
 0x21e   : > { %7347 = vmatprep.subr.msk.mxu1 %vm687_vm1, %v684_v37  ;;  %v13919_v37 = vld [vmem:[#allocation37_spill] sm:$0xff] }
 0x21f   : > { %v1552_v7 = vpop.permute.xlu0 %1551  ;;  %7348 = vmatpush3.xpose.msk.msra.mxu1 %vm687_vm1, %v652_v27  ;;  %v13911_v27 = vld [vmem:[#allocation68_spill] sm:$0xff] }
 0x220   : > { %7349 = vmatprep.subr.msk.mxu1 %vm687_vm1, %v682_v56  ;;  %7441 = vmatprep.subr.bf16.mxu0 %v1552_v7  ;;  %v13939_v7 = vld [vmem:[#allocation50_spill] sm:$0xff] }
 0x221   : > { %7442 = vmatpush3.bf16.msra.mxu0 %v1536_v41  ;;  %v13920_v41 = vld [vmem:[#allocation42_spill] sm:$0xff] }
 0x222   : > { %7443 = vmatprep.subr.bf16.mxu0 %v1550_v28  ;;  %v13912_v28 = vld [vmem:[#allocation69_spill] sm:$0xff] }
 0x223   : > { %7350 = vmatpush3.xpose.msk.msra.mxu1 %vm687_vm1, %v650_v35  ;;  %v1540_v56 = vpop.permute.xlu0 %1539  ;;  %v13918_v35 = vld [vmem:[#allocation59_spill] sm:$0xff] }
 0x224   : > { %7351 = vmatprep.subr.msk.mxu1 %vm687_vm1, %v680_v52  ;;  %v1524_v52 = vpop.permute.xlu1 %1523 }
 0x225   : > { %7444 = vmatpush3.bf16.msra.mxu0 %v1534_v63 }
 0x226   : > { %7445 = vmatprep.subr.bf16.mxu0 %v1548_v42  ;;  %v13921_v42 = vld [vmem:[#allocation65_spill] sm:$0xff] }
 0x227   : > { %7352 = vmatpush3.xpose.msk.msra.mxu1 %vm687_vm1, %v648_v53  ;;  %v13926_v53 = vld [vmem:[#allocation29_spill] sm:$0xff] }
 0x228   : > { %7353 = vmatprep.subr.msk.mxu1 %vm687_vm1, %v678_v10  ;;  %v1522_v63 = vpop.permute.xlu1 %1521  ;;  %v13901_v10 = vld [vmem:[#allocation17_spill] sm:$0xff] }
 0x229   : > { %7446 = vmatpush3.bf16.msra.mxu0 %v1532_v26  ;;  %v13910_v26 = vld [vmem:[#allocation9_spill] sm:$0xff] }
 0x22a   : > { %7447 = vmatprep.subr.bf16.mxu0 %v1546_v16 }
 0x22b   : > { %7354 = vmatpush3.xpose.msk.msra.mxu1 %vm687_vm1, %v10005_v6 }
 0x22c   : > { %7355 = vmatprep.subr.msk.mxu1 %vm687_vm1, %v676_v1  ;;  %v1538_v1 = vpop.permute.xlu0 %1537  ;;  %v2755_v6 = vpop.permute.xlu1 %2754 }
 0x22d   : > { %7448 = vmatpush3.bf16.msra.mxu0 %v10029_v30  ;;  %v13914_v30 = vld [vmem:[#allocation52_spill] sm:$0xff] }
 0x22e   : > { %7449 = vmatprep.subr.bf16.mxu0 %v10047_v33  ;;  %v13935_v33 = vld [vmem:[#allocation27_spill] sm:$0xff] }
 0x22f   : > { %7356 = vmatpush3.xpose.msk.msra.mxu1 %vm687_vm1, %v10037_v31  ;;  %v13915_v31 = vld [vmem:[#allocation73_spill] sm:$0xff] }
 0x230   : > { %7357 = vmatprep.subr.msk.mxu1 %vm687_vm1, %v10031_v45  ;;  %v13923_v45 = vld [vmem:[#allocation48_spill] sm:$0xff]  ;;  %v10330_v16 = vpop.permute.xlu1 %2752 }
 0x231   : > { %7450 = vmatpush3.bf16.msra.mxu0 %v9961_v36  ;;  %v13938_v36 = vld [vmem:[#allocation30_spill] sm:$0xff] }
 0x232   : > { %7451 = vmatprep.subr.bf16.mxu0 %v9995_v21  ;;  %v13907_v21 = vld [vmem:[#allocation21_spill] sm:$0xff] }
 0x233   : > { %7358 = vmatpush3.xpose.msk.msra.mxu1 %vm687_vm1, %v9930_v22  ;;  %v13937_v22 = vld [vmem:[#allocation39_spill] sm:$0xff] }
 0x234   : > { %7359 = vmatprep.subr.msk.mxu1 %vm687_vm1, %v10053_v55  ;;  %v13927_v55 = vld [vmem:[#allocation55_spill] sm:$0xff] }
 0x235   : > { %7452 = vmatpush3.bf16.msra.mxu0 %v9903_v24 }
 0x236   : > { %7453 = vmatprep.subr.bf16.mxu0 %v1540_v56  ;;  %v13940_v56 = vld [vmem:[#allocation45_spill] sm:$0xff] }
 0x237   : > { %7360 = vmatpush3.xpose.msk.msra.mxu1 %vm687_vm1, %v9973_v47  ;;  %v13924_v47 = vld [vmem:[#allocation51_spill] sm:$0xff] }
 0x238   : > { %7361 = vmatprep.subr.msk.mxu1 %vm687_vm1, %v9963_v12 }
 0x239   : > { %7454 = vmatpush3.bf16.msra.mxu0 %v1524_v52 }
 0x23a   : > { %7455 = vmatprep.subr.bf16.mxu0 %v1538_v1 }
 0x23b   : > { %7362 = vmatpush3.xpose.msk.msra.mxu1 %vm687_vm1, %v9868_v48  ;;  %v13936_v48 = vld [vmem:[#allocation23_spill] sm:$0xff] }
 0x23c   : > { %7363 = vmatprep.subr.msk.mxu1 %vm687_vm1, %v10007_v9  ;;  %v13899_v9 = vld [vmem:[#allocation87_spill] sm:$0xff] }
 0x23d   : > { %7456 = vmatpush3.bf16.msra.mxu0 %v1522_v63  ;;  %v13941_v63 = vld [vmem:[#allocation62_spill] sm:$0xff] }
 0x23e   : > { %7649 = vmatprep.subr.bf16.mxu0 %v2755_v6  ;;  %v13942_v6 = vld [vmem:[#allocation56_spill] sm:$0xff] }
 0x23f   : > { %7364 = vmatpush3.xpose.msk.msra.mxu1 %vm687_vm1, %v9911_v11  ;;  %v13932_v11 = vld [vmem:[#allocation16_spill] sm:$0xff] }
 0x240   : > { %7365 = vmatprep.subr.msk.mxu1 %vm687_vm1, %v9916_v0  ;;  %v10338_v0 = vpop.permute.xlu1 %2736 }
 0x243   : > { %7366 = vmatpush3.xpose.msk.msra.mxu1 %vm687_vm1, %v9818_v8  ;;  %v13931_v8 = vld [vmem:[#allocation18_spill] sm:$0xff] }
 0x244   : > { %7367 = vmatprep.subr.msk.mxu1 %vm687_vm1, %v9932_v13  ;;  %v13933_v13 = vld [vmem:[#allocation22_spill] sm:$0xff]  ;;  %v10346_v24 = vpop.permute.xlu1 %2734 }
 0x247   : > { %7368 = vmatpush3.xpose.msk.msra.mxu1 %vm687_vm1, %v9849_v60  ;;  %v13929_v60 = vld [vmem:[#allocation38_spill] sm:$0xff] }
 0x248   : > { %7369 = vmatprep.subr.msk.mxu1 %vm687_vm1, %v9862_v34  ;;  %v13917_v34 = vld [vmem:[#allocation58_spill] sm:$0xff]  ;;  %v10354_v12 = vpop.permute.xlu1 %2732 }
 0x24b   : > { %7370 = vmatpush3.xpose.msk.msra.mxu1 %vm687_vm1, %v9767_v44  ;;  %v13922_v44 = vld [vmem:[#allocation12_spill] sm:$0xff] }
 0x24c   : > { %7371 = vmatprep.subr.msk.mxu1 %vm687_vm1, %v9889_v25  ;;  %v13909_v25 = vld [vmem:[#allocation83_spill] sm:$0xff]  ;;  %v10362_v52 = vpop.permute.xlu1 %2730 }
 0x24f   : > { %7372 = vmatpush3.xpose.msk.msra.mxu1 %vm687_vm1, %v9798_v58  ;;  %v13928_v58 = vld [vmem:[#allocation15_spill] sm:$0xff] }
 0x250   : > { %7373 = vmatprep.subr.msk.mxu1 %vm687_vm1, %v9808_v3  ;;  %v13930_v3 = vld [vmem:[#allocation13_spill] sm:$0xff]  ;;  %v10370_v1 = vpop.permute.xlu1 %2728 }
 0x253   : > { %7374 = vmatpush3.xpose.msk.msra.mxu1 %vm687_vm1, %v9707_v23  ;;  %v13908_v23 = vld [vmem:[#allocation61_spill] sm:$0xff] }
 0x254   : > { %7375 = vmatprep.subr.msk.mxu1 %vm687_vm1, %v9831_v19  ;;  %v13934_v19 = vld [vmem:[#allocation20_spill] sm:$0xff] }
 0x257   : > { %7376 = vmatpush3.xpose.msk.msra.mxu1 %vm687_vm1, %v9740_v32  ;;  %v13916_v32 = vld [vmem:[#allocation10_spill] sm:$0xff] }
 0x258   : > { %7553 = vmatprep.subr.msk.mxu1 %vm687_vm1, %v1922_v17  ;;  %v13904_v17 = vld [vmem:[#allocation7_spill] sm:$0xff] }
 0x25a   : > { %7378 = vmatmul.mubr.msk.f32.vlgmr.msra.gmra.mxu1 %vm687_vm1, %v9506_v40 }
 0x25b   : > { %7379 = vmatprep.mubr.msk.f32.mxu1 %vm687_vm1, %v9503_v38  ;;  %7554 = vmatpush3.xpose.msk.msra.mxu1 %vm687_vm1, %v10087_v59  ;;  %v13897_v59 = vld [vmem:[#allocation92_spill] sm:$0xff] }
 0x25c   : > { %7555 = vmatprep.subr.msk.mxu1 %vm687_vm1, %v1920_v61  ;;  %v13898_v61 = vld [vmem:[#allocation6_spill] sm:$0xff] }
 0x25e   : > { %7380 = vmatmul.mubr.msk.f32.gmra.mxu1 %vm687_vm1, %v9503_v38 }
 0x25f   : > { %7381 = vmatprep.mubr.msk.f32.mxu1 %vm687_vm1, %v9515_v43  ;;  %7556 = vmatpush3.xpose.msk.msra.mxu1 %vm687_vm1, %v10097_v51  ;;  %v13925_v51 = vld [vmem:[#allocation11_spill] sm:$0xff] }
 0x260   : > { %7557 = vmatprep.subr.msk.mxu1 %vm687_vm1, %v10099_v14  ;;  %v13902_v14 = vld [vmem:[#allocation71_spill] sm:$0xff] }
 0x262   : > { %7382 = vmatmul.mubr.msk.f32.gmra.mxu1 %vm687_vm1, %v9515_v43 }
 0x263   : > { %7383 = vmatprep.mubr.msk.f32.mxu1 %vm687_vm1, %v9545_v54  ;;  %7558 = vmatpush3.xpose.msk.msra.mxu1 %vm687_vm1, %v10059_v20  ;;  %v13906_v20 = vld [vmem:[#allocation78_spill] sm:$0xff] }
 0x264   : > { %7559 = vmatprep.subr.msk.mxu1 %vm687_vm1, %v10105_v29  ;;  %v13913_v29 = vld [vmem:[#allocation26_spill] sm:$0xff] }
 0x266   : > { %7384 = vmatmul.mubr.msk.f32.gmra.mxu1 %vm687_vm1, %v9545_v54 }
 0x267   : > { %7385 = vmatprep.mubr.msk.f32.mxu1 %vm687_vm1, %v9522_v46  ;;  %7560 = vmatpush3.xpose.msk.msra.mxu1 %vm687_vm1, %v10083_v18  ;;  %v13905_v18 = vld [vmem:[#allocation80_spill] sm:$0xff] }
 0x268   : > { %7561 = vmatprep.subr.msk.mxu1 %vm687_vm1, %v10079_v4  ;;  %v13900_v4 = vld [vmem:[#allocation86_spill] sm:$0xff] }
 0x26a   : > { %7386 = vmatmul.mubr.msk.f32.gmra.mxu1 %vm687_vm1, %v9522_v46 }
 0x26b   : > { %7387 = vmatprep.mubr.msk.f32.mxu1 %vm687_vm1, %v9585_v2  ;;  %7562 = vmatpush3.xpose.msk.msra.mxu1 %vm687_vm1, %v10013_v15  ;;  %v13903_v15 = vld [vmem:[#allocation88_spill] sm:$0xff] }
 0x26c   : > { %7563 = vmatprep.subr.msk.mxu1 %vm687_vm1, %v13897_v59  ;;  %v10378_v59 = vpop.permute.xlu1 %2726 }
 0x26e   : > { %7388 = vmatmul.mubr.msk.f32.gmra.mxu1 %vm687_vm1, %v9585_v2 }
 0x26f   : > { %7389 = vmatprep.mubr.msk.f32.mxu1 %vm687_vm1, %v13898_v61  ;;  %7564 = vmatpush3.xpose.msk.msra.mxu1 %vm687_vm1, %v13899_v9  ;;  %v13943_v9 = vld [vmem:[#allocation72_spill] sm:$0xff] }
 0x270   : > { %7565 = vmatprep.subr.msk.mxu1 %vm687_vm1, %v13900_v4  ;;  %v13944_v4 = vld [vmem:[#allocation67_spill] sm:$0xff] }
 0x272   : > { %7390 = vmatmul.mubr.msk.f32.gmra.mxu1 %vm687_vm1, %v13898_v61 }
 0x273   : > { %7391 = vmatprep.mubr.msk.f32.mxu1 %vm687_vm1, %v13901_v10  ;;  %7566 = vmatpush3.xpose.msk.msra.mxu1 %vm687_vm1, %v13902_v14  ;;  %v10386_v14 = vpop.permute.xlu1 %2724 }
 0x274   : > { %7567 = vmatprep.subr.msk.mxu1 %vm687_vm1, %v13903_v15  ;;  %v13945_v15 = vld [vmem:[#allocation28_spill] sm:$0xff] }
 0x276   : > { %7392 = vmatmul.mubr.msk.f32.gmra.mxu1 %vm687_vm1, %v13901_v10 }
 0x277   : > { %7393 = vmatprep.mubr.msk.f32.mxu1 %vm687_vm1, %v13904_v17  ;;  %7568 = vmatpush3.xpose.msk.msra.mxu1 %vm687_vm1, %v13905_v18  ;;  %v3767_v18 = vpop.permute.xlu1 %3766 }
 0x278   : > { %7569 = vmatprep.subr.msk.mxu1 %vm687_vm1, %v13906_v20  ;;  %v13946_v20 = vld [vmem:[#allocation33_spill] sm:$0xff] }
 0x27a   : > { %7394 = vmatmul.mubr.msk.f32.gmra.mxu1 %vm687_vm1, %v13904_v17 }
 0x27b   : > { %7395 = vmatprep.mubr.msk.f32.mxu1 %vm687_vm1, %v13907_v21  ;;  %7570 = vmatpush3.xpose.msk.msra.mxu1 %vm687_vm1, %v13908_v23  ;;  %v13947_v23 = vld [vmem:[#allocation32_spill] sm:$0xff] }
 0x27c   : > { %7571 = vmatprep.subr.msk.mxu1 %vm687_vm1, %v13909_v25  ;;  %v13948_v25 = vld [vmem:[#allocation44_spill] sm:$0xff] }
 0x27e   : > { %7396 = vmatmul.mubr.msk.f32.gmra.mxu1 %vm687_vm1, %v13907_v21 }
 0x27f   : > { %7397 = vmatprep.mubr.msk.f32.mxu1 %vm687_vm1, %v13910_v26  ;;  %7572 = vmatpush3.xpose.msk.msra.mxu1 %vm687_vm1, %v13911_v27  ;;  %v13949_v27 = vld [vmem:[#allocation34_spill] sm:$0xff] }
 0x280   : > { %7573 = vmatprep.subr.msk.mxu1 %vm687_vm1, %v13912_v28  ;;  %v13950_v28 = vld [vmem:[#allocation53_spill] sm:$0xff] }
 0x282   : > { %7398 = vmatmul.mubr.msk.f32.gmra.mxu1 %vm687_vm1, %v13910_v26 }
 0x283   : > { %7399 = vmatprep.mubr.msk.f32.mxu1 %vm687_vm1, %v13913_v29  ;;  %7574 = vmatpush3.xpose.msk.msra.mxu1 %vm687_vm1, %v13914_v30  ;;  %v13951_v30 = vld [vmem:[#allocation35_spill] sm:$0xff] }
 0x284   : > { %7575 = vmatprep.subr.msk.mxu1 %vm687_vm1, %v13915_v31  ;;  %v13952_v31 = vld [vmem:[#allocation64_spill] sm:$0xff] }
 0x286   : > { %7400 = vmatmul.mubr.msk.f32.gmra.mxu1 %vm687_vm1, %v13913_v29 }
 0x287   : > { %7401 = vmatprep.mubr.msk.f32.mxu1 %vm687_vm1, %v13916_v32  ;;  %7576 = vmatpush3.xpose.msk.msra.mxu1 %vm687_vm1, %v13917_v34  ;;  %v13953_v34 = vld [vmem:[#allocation40_spill] sm:$0xff] }
 0x288   : > { %7577 = vmatprep.subr.msk.mxu1 %vm687_vm1, %v13918_v35  ;;  %v13954_v35 = vld [vmem:[#allocation74_spill] sm:$0xff] }
 0x28a   : > { %7402 = vmatmul.mubr.msk.f32.gmra.mxu1 %vm687_vm1, %v13916_v32 }
 0x28b   : > { %7403 = vmatprep.mubr.msk.f32.mxu1 %vm687_vm1, %v13919_v37  ;;  %7578 = vmatpush3.xpose.msk.msra.mxu1 %vm687_vm1, %v13920_v41  ;;  %v13955_v41 = vld [vmem:[#allocation41_spill] sm:$0xff] }
 0x28c   : > { %7579 = vmatprep.subr.msk.mxu1 %vm687_vm1, %v13921_v42  ;;  %v13956_v42 = vld [vmem:[#allocation84_spill] sm:$0xff] }
 0x28e   : > { %7404 = vmatmul.mubr.msk.f32.gmra.mxu1 %vm687_vm1, %v13919_v37 }
 0x28f   : > { %7405 = vmatprep.mubr.msk.f32.mxu1 %vm687_vm1, %v13922_v44  ;;  %7580 = vmatpush3.xpose.msk.msra.mxu1 %vm687_vm1, %v13923_v45  ;;  %v13957_v45 = vld [vmem:[#allocation43_spill] sm:$0xff] }
 0x290   : > { %7581 = vmatprep.subr.msk.mxu1 %vm687_vm1, %v13924_v47  ;;  %v13958_v47 = vld [vmem:[#allocation89_spill] sm:$0xff] }
 0x292   : > { %7406 = vmatmul.mubr.msk.f32.gmra.mxu1 %vm687_vm1, %v13922_v44  ;;  %v13970_v44 = vld [vmem:[#allocation93_spill] sm:$0xff] }
 0x293   : > { %7407 = vmatprep.mubr.msk.f32.mxu1 %vm687_vm1, %v13925_v51  ;;  %7582 = vmatpush3.xpose.msk.msra.mxu1 %vm687_vm1, %v13926_v53  ;;  %v13959_v53 = vld [vmem:[#allocation47_spill] sm:$0xff] }
 0x294   : > { %7583 = vmatprep.subr.msk.mxu1 %vm687_vm1, %v13927_v55  ;;  %v13960_v55 = vld [vmem:[#allocation91_spill] sm:$0xff] }
 0x296   : > { %7408 = vmatmul.mubr.msk.f32.gmra.mxu1 %vm687_vm1, %v13925_v51 }
 0x297   : > { %7409 = vmatprep.mubr.msk.f32.mxu1 %vm687_vm1, %v13928_v58  ;;  %7584 = vmatpush3.xpose.msk.msra.mxu1 %vm687_vm1, %v13929_v60 }
 0x298   : > { %8365 = vmatprep.subr.mxu1 %v2997_v57 }
 0x29a   : > { %7410 = vmatmul.mubr.msk.f32.gmra.mxu1 %vm687_vm1, %v13928_v58  ;;  %v13971_v58 = vld [vmem:[#allocation97_spill] sm:$0xff] }
 0x29b   : > { %7411 = vmatprep.mubr.msk.f32.mxu1 %vm687_vm1, %v13930_v3 }
 0x29e   : > { %7412 = vmatmul.mubr.msk.f32.gmra.mxu1 %vm687_vm1, %v13930_v3 }
 0x29f   : > { %7413 = vmatprep.mubr.msk.f32.mxu1 %vm687_vm1, %v13931_v8 }
 0x2a2   : > { %7414 = vmatmul.mubr.msk.f32.gmra.mxu1 %vm687_vm1, %v13931_v8 }
 0x2a3   : > { %7415 = vmatprep.mubr.msk.f32.mxu1 %vm687_vm1, %v13932_v11 }
 0x2a6   : > { %7416 = vmatmul.mubr.msk.f32.gmra.mxu1 %vm687_vm1, %v13932_v11 }
 0x2a7   : > { %7417 = vmatprep.mubr.msk.f32.mxu1 %vm687_vm1, %v13933_v13 }
 0x2aa   : > { %7418 = vmatmul.mubr.msk.f32.gmra.mxu1 %vm687_vm1, %v13933_v13 }
 0x2ab   : > { %7419 = vmatprep.mubr.msk.f32.mxu1 %vm687_vm1, %v13934_v19 }
 0x2ae   : > { %7420 = vmatmul.mubr.msk.f32.gmra.mxu1 %vm687_vm1, %v13934_v19 }
 0x2af   : > { %7421 = vmatprep.mubr.msk.f32.mxu1 %vm687_vm1, %v13935_v33 }
 0x2b2   : > { %7422 = vmatmul.mubr.msk.f32.gmra.mxu1 %vm687_vm1, %v13935_v33  ;;  %v10645_v33 = vpop.permute.xlu0 %2738 }
 0x2b3   : > { %7423 = vmatprep.mubr.msk.f32.mxu1 %vm687_vm1, %v13936_v48 }
 0x2b6   : > { %7424 = vmatmul.mubr.msk.f32.gmra.mxu1 %vm687_vm1, %v13936_v48  ;;  %v10655_v21 = vpop.permute.xlu0 %2750 }
 0x2b7   : > { %7425 = vmatprep.mubr.msk.f32.mxu1 %vm687_vm1, %v13937_v22 }
 0x2ba   : > { %7426 = vmatmul.mubr.msk.f32.gmra.mxu1 %vm687_vm1, %v13937_v22  ;;  %v10667_v29 = vpop.permute.xlu0 %2748 }
 0x2bb   : > { %7427 = vmatprep.mubr.msk.f32.mxu1 %vm687_vm1, %v13938_v36 }
 0x2be   : > { %7428 = vmatmul.mubr.msk.f32.gmra.mxu1 %vm687_vm1, %v13938_v36 }
 0x2bf   : > { %7429 = vmatprep.mubr.msk.f32.mxu1 %vm687_vm1, %v13939_v7 }
 0x2c2   : > { %7430 = vmatmul.mubr.msk.f32.gmra.mxu1 %vm687_vm1, %v13939_v7 }
 0x2c3   : > { %7431 = vmatprep.mubr.msk.f32.mxu1 %vm687_vm1, %v13940_v56 }
 0x2c6   : > { %7432 = vmatmul.mubr.msk.f32.gmra.mxu1 %vm687_vm1, %v13940_v56 }
 0x2c7   : > { %7433 = vmatprep.mubr.msk.f32.mxu1 %vm687_vm1, %v13941_v63 }
 0x2ca   : > { %7434 = vmatmul.mubr.msk.f32.gmra.mxu1 %vm687_vm1, %v13941_v63 }
 0x2cb   : > { %7435 = vmatprep.mubr.msk.f32.mxu1 %vm687_vm1, %v13942_v6 }
 0x2ce   : > { %7436 = vmatmul.mubr.msk.f32.gmra.mxu1 %vm687_vm1, %v13942_v6 }
 0x2cf   : > { %7437 = vmatprep.mubr.msk.f32.mxu1 %vm687_vm1, %v13943_v9 }
 0x2d2   : > { %7438 = vmatmul.mubr.msk.f32.gmra.mxu1 %vm687_vm1, %v13943_v9  ;;  %v13969_v9 = vld [vmem:[#allocation90_spill] sm:$0xff] }
 0x2d3   : > { %7439 = vmatprep.mubr.msk.f32.mxu1 %vm687_vm1, %v13944_v4 }
 0x2d6   : > { %7440 = vmatmul.mubr.msk.f32.gmra.mxu1 %vm687_vm1, %v13944_v4 }
 0x2d7   : > { %7585 = vmatprep.mubr.msk.f32.mxu1 %vm687_vm1, %v13945_v15 }
 0x2da   : > { %7586 = vmatmul.mubr.msk.f32.vlgmr.msra.gmra.mxu1 %vm687_vm1, %v13945_v15  ;;  %v13962_v15 = vld [vmem:[#allocation94_spill] sm:$0xff] }
 0x2db   : > { %8366 = vmatpush3.msra.mxu1 %v2997_v57  ;;  %7587 = vmatprep.mubr.msk.f32.mxu1 %vm687_vm1, %v13946_v20  ;;  %v13961_v57 = vld [vmem:[#allocation57_spill] sm:$0xff] }
 0x2dc   : > { %7827 = vmatprep.subr.msk.mxu1 %vm687_vm1, %v3767_v18 }
 0x2de   : > { %7588 = vmatmul.mubr.msk.f32.gmra.mxu1 %vm687_vm1, %v13946_v20 }
 0x2df   : > { %7589 = vmatprep.mubr.msk.f32.mxu1 %vm687_vm1, %v13947_v23 }
 0x2e2   : > { %7590 = vmatmul.mubr.msk.f32.gmra.mxu1 %vm687_vm1, %v13947_v23 }
 0x2e3   : > { %7591 = vmatprep.mubr.msk.f32.mxu1 %vm687_vm1, %v13948_v25 }
 0x2e6   : > { %7592 = vmatmul.mubr.msk.f32.gmra.mxu1 %vm687_vm1, %v13948_v25  ;;  %v13963_v25 = vld [vmem:[#allocation66_spill] sm:$0xff] }
 0x2e7   : > { %7593 = vmatprep.mubr.msk.f32.mxu1 %vm687_vm1, %v13949_v27 }
 0x2ea   : > { %7594 = vmatmul.mubr.msk.f32.gmra.mxu1 %vm687_vm1, %v13949_v27 }
 0x2eb   : > { %7595 = vmatprep.mubr.msk.f32.mxu1 %vm687_vm1, %v13950_v28 }
 0x2ee   : > { %7596 = vmatmul.mubr.msk.f32.gmra.mxu1 %vm687_vm1, %v13950_v28 }
 0x2ef   : > { %7597 = vmatprep.mubr.msk.f32.mxu1 %vm687_vm1, %v13951_v30 }
 0x2f2   : > { %7598 = vmatmul.mubr.msk.f32.gmra.mxu1 %vm687_vm1, %v13951_v30 }
 0x2f3   : > { %7599 = vmatprep.mubr.msk.f32.mxu1 %vm687_vm1, %v13952_v31 }
 0x2f6   : > { %7600 = vmatmul.mubr.msk.f32.gmra.mxu1 %vm687_vm1, %v13952_v31  ;;  %v13964_v31 = vld [vmem:[#allocation95_spill] sm:$0xff] }
 0x2f7   : > { %7601 = vmatprep.mubr.msk.f32.mxu1 %vm687_vm1, %v13953_v34 }
 0x2fa   : > { %7602 = vmatmul.mubr.msk.f32.gmra.mxu1 %vm687_vm1, %v13953_v34 }
 0x2fb   : > { %7603 = vmatprep.mubr.msk.f32.mxu1 %vm687_vm1, %v13954_v35 }
 0x2fe   : > { %7604 = vmatmul.mubr.msk.f32.gmra.mxu1 %vm687_vm1, %v13954_v35 }
 0x2ff   : > { %7605 = vmatprep.mubr.msk.f32.mxu1 %vm687_vm1, %v13955_v41 }
 0x302   : > { %7606 = vmatmul.mubr.msk.f32.gmra.mxu1 %vm687_vm1, %v13955_v41 }
 0x303   : > { %7607 = vmatprep.mubr.msk.f32.mxu1 %vm687_vm1, %v13956_v42 }
 0x306   : > { %7608 = vmatmul.mubr.msk.f32.gmra.mxu1 %vm687_vm1, %v13956_v42  ;;  %v13965_v42 = vld [vmem:[#allocation75_spill] sm:$0xff] }
 0x307   : > { %7609 = vmatprep.mubr.msk.f32.mxu1 %vm687_vm1, %v13957_v45 }
 0x30a   : > { %7610 = vmatmul.mubr.msk.f32.gmra.mxu1 %vm687_vm1, %v13957_v45 }
 0x30b   : > { %7611 = vmatprep.mubr.msk.f32.mxu1 %vm687_vm1, %v13958_v47 }
 0x30e   : > { %7612 = vmatmul.mubr.msk.f32.gmra.mxu1 %vm687_vm1, %v13958_v47 }
 0x30f   : > { %7613 = vmatprep.mubr.msk.f32.mxu1 %vm687_vm1, %v13959_v53 }
 0x312   : > { %7614 = vmatmul.mubr.msk.f32.gmra.mxu1 %vm687_vm1, %v13959_v53 }
 0x313   : > { %7615 = vmatprep.mubr.msk.f32.mxu1 %vm687_vm1, %v13960_v55 }
 0x316   : > { %7616 = vmatmul.mubr.msk.f32.gmra.mxu1 %vm687_vm1, %v13960_v55  ;;  %v13966_v55 = vld [vmem:[#allocation96_spill] sm:$0xff] }
 0x317   : > { %7617 = vmatprep.mubr.msk.f32.mxu1 %vm687_vm1, %v13961_v57 }
 0x31a   : > { %v10457_v60 = vpop.f32.mrf.mxu1  ;;  %7618 = vmatmul.mubr.msk.f32.gmra.mxu1 %vm687_vm1, %v13961_v57 }
 0x31b   : > { %7619 = vmatprep.mubr.msk.f32.mxu1 %vm687_vm1, %v13962_v15 }
 0x31c   : > { %v10463_v18 = vpop.f32.mrf.mxu1 }
 0x31d   : > { %v1073_v20 = vmax.f32 %v10457_v60, %v10463_v18 }
 0x31e   : > { %v10467_v23 = vpop.f32.mrf.mxu1  ;;  %7620 = vmatmul.mubr.msk.f32.gmra.mxu1 %vm687_vm1, %v13962_v15 }
 0x31f   : > { %7621 = vmatprep.mubr.msk.f32.mxu1 %vm687_vm1, %v13963_v25  ;;  %1074 = vmax.xlane.f32.xlu0 %v1073_v20 }
 0x320   : > { %v10473_v27 = vpop.f32.mrf.mxu1 }
 0x321   : > { %v1076_v28 = vmax.f32 %v10467_v23, %v10473_v27 }
 0x322   : > { %v10477_v30 = vpop.f32.mrf.mxu1  ;;  %7622 = vmatmul.mubr.msk.f32.gmra.mxu1 %vm687_vm1, %v13963_v25  ;;  %v13967_v25 = vld [vmem:[#allocation85_spill] sm:$0xff] }
 0x323   : > { %7623 = vmatprep.mubr.msk.f32.mxu1 %vm687_vm1, %v13964_v31  ;;  %1077 = vmax.xlane.f32.xlu1 %v1076_v28 }
 0x324   : > { %v10483_v34 = vpop.f32.mrf.mxu1 }
 0x325   : > { %v1079_v35 = vmax.f32 %v10477_v30, %v10483_v34 }
 0x326   : > { %v10487_v41 = vpop.f32.mrf.mxu1  ;;  %7624 = vmatmul.mubr.msk.f32.gmra.mxu1 %vm687_vm1, %v13964_v31 }
 0x327   : > { %7625 = vmatprep.mubr.msk.f32.mxu1 %vm687_vm1, %v13965_v42  ;;  %1080 = vmax.xlane.f32.xlu0 %v1079_v35 }
 0x328   : > { %v10493_v45 = vpop.f32.mrf.mxu1 }
 0x329   : > { %v1082_v47 = vmax.f32 %v10487_v41, %v10493_v45 }
 0x32a   : > { %v10497_v53 = vpop.f32.mrf.mxu1  ;;  %7626 = vmatmul.mubr.msk.f32.gmra.mxu1 %vm687_vm1, %v13965_v42  ;;  %v13968_v42 = vld [vmem:[#allocation98_spill] sm:$0xff] }
 0x32b   : > { %7627 = vmatprep.mubr.msk.f32.mxu1 %vm687_vm1, %v13966_v55  ;;  %1083 = vmax.xlane.f32.xlu1 %v1082_v47 }
 0x32c   : > { %v10503_v57 = vpop.f32.mrf.mxu1 }
 0x32d   : > { %v1085_v15 = vmax.f32 %v10497_v53, %v10503_v57 }
 0x32e   : > { %v10507_v20 = vpop.f32.mrf.mxu1  ;;  %7628 = vmatmul.mubr.msk.f32.gmra.mxu1 %vm687_vm1, %v13966_v55 }
 0x32f   : > { %7629 = vmatprep.mubr.msk.f32.mxu1 %vm687_vm1, %v13967_v25  ;;  %1086 = vmax.xlane.f32.xlu0 %v1085_v15 }
 0x330   : > { %v10513_v28 = vpop.f32.mrf.mxu1 }
 0x331   : > { %v1088_v31 = vmax.f32 %v10507_v20, %v10513_v28 }
 0x332   : > { %v10517_v35 = vpop.f32.mrf.mxu1  ;;  %7630 = vmatmul.mubr.msk.f32.gmra.mxu1 %vm687_vm1, %v13967_v25 }
 0x333   : > { %7631 = vmatprep.mubr.msk.f32.mxu1 %vm687_vm1, %v13968_v42  ;;  %1089 = vmax.xlane.f32.xlu1 %v1088_v31 }
 0x334   : > { %v10523_v47 = vpop.f32.mrf.mxu1 }
 0x335   : > { %v1091_v55 = vmax.f32 %v10517_v35, %v10523_v47 }
 0x336   : > { %v10527_v15 = vpop.f32.mrf.mxu1  ;;  %7632 = vmatmul.mubr.msk.f32.gmra.mxu1 %vm687_vm1, %v13968_v42 }
 0x337   : > { %7633 = vmatprep.mubr.msk.f32.mxu1 %vm687_vm1, %v13969_v9  ;;  %1092 = vmax.xlane.f32.xlu0 %v1091_v55 }
 0x338   : > { %v10533_v63 = vpop.f32.mrf.mxu1 }
 0x339   : > { %v1094_v25 = vmax.f32 %v10527_v15, %v10533_v63 }
 0x33a   : > { %v10537_v31 = vpop.f32.mrf.mxu1  ;;  %7634 = vmatmul.mubr.msk.f32.gmra.mxu1 %vm687_vm1, %v13969_v9 }
 0x33b   : > { %7635 = vmatprep.mubr.msk.f32.mxu1 %vm687_vm1, %v10116_v50  ;;  %1095 = vmax.xlane.f32.xlu1 %v1094_v25 }
 0x33c   : > { %v10543_v4 = vpop.f32.mrf.mxu1 }
 0x33d   : > { %v1097_v42 = vmax.f32 %v10537_v31, %v10543_v4 }
 0x33e   : > { %v10547_v55 = vpop.f32.mrf.mxu1  ;;  %7636 = vmatmul.mubr.msk.f32.gmra.mxu1 %vm687_vm1, %v10116_v50 }
 0x33f   : > { %7637 = vmatprep.mubr.msk.f32.mxu1 %vm687_vm1, %v13970_v44  ;;  %1098 = vmax.xlane.f32.xlu0 %v1097_v42 }
 0x340   : > { %v10553_v6 = vpop.f32.mrf.mxu1 }
 0x341   : > { %v1100_v9 = vmax.f32 %v10547_v55, %v10553_v6 }
 0x342   : > { %v10557_v25 = vpop.f32.mrf.mxu1  ;;  %7638 = vmatmul.mubr.msk.f32.gmra.mxu1 %vm687_vm1, %v13970_v44 }
 0x343   : > { %7639 = vmatprep.mubr.msk.f32.mxu1 %vm687_vm1, %v10118_v5  ;;  %1101 = vmax.xlane.f32.xlu1 %v1100_v9 }
 0x344   : > { %v10563_v51 = vpop.f32.mrf.mxu1 }
 0x345   : > { %v1103_v50 = vmax.f32 %v10557_v25, %v10563_v51 }
 0x346   : > { %v10567_v42 = vpop.f32.mrf.mxu1  ;;  %7640 = vmatmul.mubr.msk.f32.gmra.mxu1 %vm687_vm1, %v10118_v5 }
 0x347   : > { %7641 = vmatprep.mubr.msk.f32.mxu1 %vm687_vm1, %v13971_v58  ;;  %1104 = vmax.xlane.f32.xlu0 %v1103_v50 }
 0x348   : > { %v10573_v37 = vpop.f32.mrf.mxu1 }
 0x349   : > { %v1106_v44 = vmax.f32 %v10567_v42, %v10573_v37 }
 0x34a   : > { %v10577_v9 = vpop.f32.mrf.mxu1  ;;  %7642 = vmatmul.mubr.msk.f32.gmra.mxu1 %vm687_vm1, %v13971_v58 }
 0x34b   : > { %7643 = vmatprep.mubr.msk.f32.mxu1 %vm687_vm1, %v10120_v49  ;;  %1107 = vmax.xlane.f32.xlu0 %v1106_v44 }
 0x34c   : > { %v10583_v3 = vpop.f32.mrf.mxu1 }
 0x34d   : > { %v1109_v5 = vmax.f32 %v10577_v9, %v10583_v3 }
 0x34e   : > { %v10587_v50 = vpop.f32.mrf.mxu1  ;;  %7644 = vmatmul.mubr.msk.f32.gmra.mxu1 %vm687_vm1, %v10120_v49 }
 0x34f   : > { %7645 = vmatprep.mubr.msk.f32.mxu1 %vm687_vm1, %v10124_v62  ;;  %1110 = vmax.xlane.f32.xlu1 %v1109_v5 }
 0x350   : > { %v10593_v8 = vpop.f32.mrf.mxu1 }
 0x351   : > { %v1112_v58 = vmax.f32 %v10587_v50, %v10593_v8 }
 0x352   : > { %v10597_v44 = vpop.f32.mrf.mxu1  ;;  %7646 = vmatmul.mubr.msk.f32.gmra.mxu1 %vm687_vm1, %v10124_v62 }
 0x353   : > { %7647 = vmatprep.mubr.msk.f32.mxu1 %vm687_vm1, %v10122_v39  ;;  %1113 = vmax.xlane.f32.xlu0 %v1112_v58 }
 0x354   : > { %v10603_v11 = vpop.f32.mrf.mxu1 }
 0x355   : > { %v1115_v49 = vmax.f32 %v10597_v44, %v10603_v11 }
 0x356   : > { %v10607_v5 = vpop.f32.mrf.mxu1  ;;  %7648 = vmatmul.mubr.msk.f32.gmra.mxu1 %vm687_vm1, %v10122_v39 }
 0x357   : > { %1116 = vmax.xlane.f32.xlu1 %v1115_v49 }
 0x358   : > { %v10611_v13 = vpop.f32.mrf.mxu1 }
 0x359   : > { %v1118_v62 = vmax.f32 %v10607_v5, %v10611_v13 }
 0x35a   : > { %v10615_v19 = vpop.f32.mrf.mxu1 }
 0x35b   : > { %1119 = vmax.xlane.f32.xlu0 %v1118_v62 }
 0x35c   : > { %v10617_v58 = vpop.f32.mrf.mxu1 }
 0x35d   : > { %v1121_v10 = vmax.f32 %v10615_v19, %v10617_v58 }
 0x35e   : > { %v10621_v40 = vpop.f32.mrf.mxu1 }
 0x35f   : > { %1122 = vmax.xlane.f32.xlu1 %v1121_v10 }
 0x360   : > { %v10623_v38 = vpop.f32.mrf.mxu1 }
 0x361   : > { %13972 = vst [vmem:[#allocation92_spill] sm:$0xff] %v10623_v38  ;;  %v1124_v39 = vmax.f32 %v10621_v40, %v10623_v38 }
 0x362   : > { %v10627_v49 = vpop.f32.mrf.mxu1 }
 0x363   : > { %13973 = vst [vmem:[#allocation87_spill] sm:$0xff] %v10627_v49  ;;  %1125 = vmax.xlane.f32.xlu0 %v1124_v39 }
 0x364   : > { %v10629_v43 = vpop.f32.mrf.mxu1 }
 0x365   : > { %13974 = vst [vmem:[#allocation86_spill] sm:$0xff] %v10629_v43  ;;  %v1127_v62 = vmax.f32 %v10627_v49, %v10629_v43 }
 0x366   : > { %v10633_v54 = vpop.f32.mrf.mxu1 }
 0x367   : > { %13975 = vst [vmem:[#allocation71_spill] sm:$0xff] %v10633_v54  ;;  %1128 = vmax.xlane.f32.xlu1 %v1127_v62 }
 0x368   : > { %v10635_v46 = vpop.f32.mrf.mxu1 }
 0x369   : > { %13976 = vst [vmem:[#allocation88_spill] sm:$0xff] %v10635_v46  ;;  %v1130_v10 = vmax.f32 %v10633_v54, %v10635_v46 }
 0x36a   : > { %v10639_v2 = vpop.f32.mrf.mxu1 }
 0x36b   : > { %13977 = vst [vmem:[#allocation80_spill] sm:$0xff] %v10639_v2  ;;  %1131 = vmax.xlane.f32.xlu0 %v1130_v10 }
 0x36c   : > { %v10641_v61 = vpop.f32.mrf.mxu1 }
 0x36d   : > { %13978 = vst [vmem:[#allocation78_spill] sm:$0xff] %v10641_v61  ;;  %v1133_v39 = vmax.f32 %v10639_v2, %v10641_v61 }
 0x36e   : > { %v10647_v48 = vpop.f32.mrf.mxu1 }
 0x36f   : > { %13979 = vst [vmem:[#allocation61_spill] sm:$0xff] %v10647_v48  ;;  %1134 = vmax.xlane.f32.xlu1 %v1133_v39 }
 0x370   : > { %v10649_v17 = vpop.f32.mrf.mxu1 }
 0x371   : > { %13980 = vst [vmem:[#allocation83_spill] sm:$0xff] %v10649_v17  ;;  %v1136_v62 = vmax.f32 %v10647_v48, %v10649_v17 }
 0x372   : > { %v10653_v22 = vpop.f32.mrf.mxu1 }
 0x373   : > { %13981 = vst [vmem:[#allocation68_spill] sm:$0xff] %v10653_v22  ;;  %1137 = vmax.xlane.f32.xlu0 %v1136_v62 }
 0x374   : > { %v10657_v10 = vpop.f32.mrf.mxu1 }
 0x375   : > { %13982 = vst [vmem:[#allocation69_spill] sm:$0xff] %v10657_v10  ;;  %v1139_v36 = vmax.f32 %v10653_v22, %v10657_v10  ;;  %v10677_v10 = vpop.permute.xlu0 %2746 }
 0x376   : > { %v10661_v26 = vpop.f32.mrf.mxu1 }
 0x377   : > { %13983 = vst [vmem:[#allocation52_spill] sm:$0xff] %v10661_v26  ;;  %1140 = vmax.xlane.f32.xlu1 %v1139_v36 }
 0x378   : > { %v10663_v7 = vpop.f32.mrf.mxu1 }
 0x379   : > { %13984 = vst [vmem:[#allocation73_spill] sm:$0xff] %v10663_v7  ;;  %v1142_v39 = vmax.f32 %v10661_v26, %v10663_v7  ;;  %v10689_v61 = vpop.permute.xlu0 %2744 }
 0x37a   : > { %v10669_v56 = vpop.f32.mrf.mxu1 }
 0x37b   : > { %13985 = vst [vmem:[#allocation58_spill] sm:$0xff] %v10669_v56  ;;  %1143 = vmax.xlane.f32.xlu0 %v1142_v39 }
 0x37c   : > { %v10671_v62 = vpop.f32.mrf.mxu1 }
 0x37d   : > { %13986 = vst [vmem:[#allocation59_spill] sm:$0xff] %v10671_v62  ;;  %v1145_v17 = vmax.f32 %v10669_v56, %v10671_v62 }
 0x37e   : > { %v10675_v48 = vpop.f32.mrf.mxu1 }
 0x37f   : > { %13987 = vst [vmem:[#allocation42_spill] sm:$0xff] %v10675_v48  ;;  %1146 = vmax.xlane.f32.xlu1 %v1145_v17 }
 0x380   : > { %v10679_v36 = vpop.f32.mrf.mxu1 }
 0x381   : > { %13988 = vst [vmem:[#allocation65_spill] sm:$0xff] %v10679_v36  ;;  %v1148_v7 = vmax.f32 %v10675_v48, %v10679_v36  ;;  %v10699_v36 = vpop.permute.xlu0 %2742 }
 0x382   : > { %v10683_v26 = vpop.f32.mrf.mxu1 }
 0x383   : > { %13989 = vst [vmem:[#allocation48_spill] sm:$0xff] %v10683_v26  ;;  %1149 = vmax.xlane.f32.xlu0 %v1148_v7 }
 0x384   : > { %v10685_v22 = vpop.f32.mrf.mxu1 }
 0x385   : > { %13990 = vst [vmem:[#allocation51_spill] sm:$0xff] %v10685_v22  ;;  %v1151_v39 = vmax.f32 %v10683_v26, %v10685_v22  ;;  %v10711_v46 = vpop.permute.xlu0 %2740 }
 0x386   : > { %v10691_v62 = vpop.f32.mrf.mxu1 }
 0x387   : > { %13991 = vst [vmem:[#allocation29_spill] sm:$0xff] %v10691_v62  ;;  %1152 = vmax.xlane.f32.xlu1 %v1151_v39 }
 0x388   : > { %v10693_v17 = vpop.f32.mrf.mxu1 }
 0x389   : > { %13992 = vst [vmem:[#allocation55_spill] sm:$0xff] %v10693_v17  ;;  %v1154_v56 = vmax.f32 %v10691_v62, %v10693_v17 }
 0x38a   : > { %v10697_v2 = vpop.f32.mrf.mxu1 }
 0x38b   : > { %13993 = vst [vmem:[#allocation38_spill] sm:$0xff] %v10697_v2  ;;  %1155 = vmax.xlane.f32.xlu0 %v1154_v56 }
 0x38c   : > { %v10701_v7 = vpop.f32.mrf.mxu1 }
 0x38d   : > { %13994 = vst [vmem:[#allocation28_spill] sm:$0xff] %v10701_v7  ;;  %v1157_v22 = vmax.f32 %v10697_v2, %v10701_v7  ;;  %v10721_v7 = vpop.permute.xlu0 %3734  ;;  %v10729_v2 = vpop.permute.xlu1 %3764 }
 0x38e   : > { %v10705_v26 = vpop.f32.mrf.mxu1  ;;  %14000 = vst [vmem:[#allocation35_spill] sm:$0xff] %v10721_v7  ;;  %14003 = vst [vmem:[#allocation74_spill] sm:$0xff] %v10729_v2 }
 0x38f   : > { %13995 = vst [vmem:[#allocation33_spill] sm:$0xff] %v10705_v26  ;;  %1158 = vmax.xlane.f32.xlu1 %v1157_v22 }
 0x390   : > { %v10707_v48 = vpop.f32.mrf.mxu1 }
 0x391   : > { %13996 = vst [vmem:[#allocation32_spill] sm:$0xff] %v10707_v48  ;;  %v1160_v39 = vmax.f32 %v10705_v26, %v10707_v48  ;;  %v10741_v43 = vpop.permute.xlu1 %3762 }
 0x392   : > { %v10713_v17 = vpop.f32.mrf.mxu1  ;;  %14008 = vst [vmem:[#allocation47_spill] sm:$0xff] %v10741_v43 }
 0x393   : > { %13997 = vst [vmem:[#allocation44_spill] sm:$0xff] %v10713_v17  ;;  %1161 = vmax.xlane.f32.xlu0 %v1160_v39 }
 0x394   : > { %v10715_v56 = vpop.f32.mrf.mxu1 }
 0x395   : > { %13998 = vst [vmem:[#allocation34_spill] sm:$0xff] %v10715_v56  ;;  %v1163_v62 = vmax.f32 %v10713_v17, %v10715_v56  ;;  %v10735_v17 = vpop.permute.xlu0 %3732 }
 0x396   : > { %v10719_v54 = vpop.f32.mrf.mxu1  ;;  %14005 = vst [vmem:[#allocation84_spill] sm:$0xff] %v10735_v17 }
 0x397   : > { %13999 = vst [vmem:[#allocation53_spill] sm:$0xff] %v10719_v54  ;;  %1164 = vmax.xlane.f32.xlu1 %v1163_v62 }
 0x398   : > { %v10723_v22 = vpop.f32.mrf.mxu1 }
 0x399   : > { %14001 = vst [vmem:[#allocation64_spill] sm:$0xff] %v10723_v22  ;;  %v1166_v48 = vmax.f32 %v10719_v54, %v10723_v22 }
 0x39a   : > { %v10727_v26 = vpop.f32.mrf.mxu1 }
 0x39b   : > { %14002 = vst [vmem:[#allocation40_spill] sm:$0xff] %v10727_v26  ;;  %1167 = vmax.xlane.f32.xlu0 %v1166_v48  ;;  %v10747_v48 = vpop.permute.xlu0 %3730 }
 0x39c   : > { %v10731_v39 = vpop.f32.mrf.mxu1  ;;  %14010 = vst [vmem:[#allocation57_spill] sm:$0xff] %v10747_v48 }
 0x39d   : > { %14004 = vst [vmem:[#allocation41_spill] sm:$0xff] %v10731_v39  ;;  %v2308_v56 = vmax.f32 %v10727_v26, %v10731_v39 }
 0x39e   : > { %v10737_v62 = vpop.f32.mrf.mxu1 }
 0x39f   : > { %14006 = vst [vmem:[#allocation43_spill] sm:$0xff] %v10737_v62  ;;  %2309 = vmax.xlane.f32.xlu1 %v2308_v56  ;;  %v10755_v56 = vpop.permute.xlu1 %3760 }
 0x3a0   : > { %v10739_v7 = vpop.f32.mrf.mxu1  ;;  %14012 = vst [vmem:[#allocation66_spill] sm:$0xff] %v10755_v56 }
 0x3a1   : > { %14007 = vst [vmem:[#allocation89_spill] sm:$0xff] %v10739_v7  ;;  %v2311_v22 = vmax.f32 %v10737_v62, %v10739_v7 }
 0x3a2   : > { %v10745_v54 = vpop.f32.mrf.mxu1 }
 0x3a3   : > { %14009 = vst [vmem:[#allocation91_spill] sm:$0xff] %v10745_v54  ;;  %2312 = vmax.xlane.f32.xlu0 %v2311_v22 }
 0x3a4   : > { %v10749_v2 = vpop.f32.mrf.mxu1 }
 0x3a5   : > { %14011 = vst [vmem:[#allocation94_spill] sm:$0xff] %v10749_v2  ;;  %v2314_v17 = vmax.f32 %v10745_v54, %v10749_v2 }
 0x3a6   : > { %v10753_v39 = vpop.f32.mrf.mxu1 }
 0x3a7   : > { %2315 = vmax.xlane.f32.xlu0 %v2314_v17 }
 0x3a8   : > { %v1075_v26 = vpop.xlane.xlu0 %1074  ;;  %v10757_v43 = vpop.f32.mrf.mxu1 }
 0x3a9   : > { %14013 = vst [vmem:[#allocation95_spill] sm:$0xff] %v10757_v43  ;;  %v1169_v7 = vsub.f32 %v10457_v60, %v1075_v26  ;;  %v1170_v62 = vsub.f32 %v10463_v18, %v1075_v26  ;;  %v2317_v22 = vmax.f32 %v10753_v39, %v10757_v43 }
 0x3aa   : > { %v10763_v48 = vpop.f32.mrf.mxu1 }
 0x3ab   : > { %v1233_v49 = vmul.f32 1.442695, %v1169_v7  ;;  %v1235_v38 = vmul.f32 1.442695, %v1170_v62  ;;  %2318 = vmax.xlane.f32.xlu1 %v2317_v22 }
 0x3ac   : > { %v1078_v2 = vpop.xlane.xlu1 %1077  ;;  %v10765_v54 = vpop.f32.mrf.mxu1 }
 0x3ad   : > { %8586 = vpow2.f32 %v1233_v49  ;;  %v1171_v17 = vsub.f32 %v10467_v23, %v1078_v2  ;;  %v1172_v56 = vsub.f32 %v10473_v27, %v1078_v2  ;;  %v2320_v60 = vmax.f32 %v10763_v48, %v10765_v54 }
 0x3ae   : > { %8588 = vpow2.f32 %v1235_v38  ;;  %v10771_v26 = vpop.f32.mrf.mxu1 }
 0x3af   : > { %v1237_v18 = vmul.f32 1.442695, %v1171_v17  ;;  %v1239_v43 = vmul.f32 1.442695, %v1172_v56  ;;  %2321 = vmax.xlane.f32.xlu0 %v2320_v60 }
 0x3b0   : > { %v1081_v7 = vpop.xlane.xlu0 %1080  ;;  %v10773_v62 = vpop.f32.mrf.mxu1 }
 0x3b1   : > { %14014 = vst [vmem:[#allocation75_spill] sm:$0xff] %v10773_v62  ;;  %8590 = vpow2.f32 %v1237_v18  ;;  %v1173_v22 = vsub.f32 %v10477_v30, %v1081_v7  ;;  %v1174_v49 = vsub.f32 %v10483_v34, %v1081_v7  ;;  %v2323_v2 = vmax.f32 %v10771_v26, %v10773_v62 }
 0x3b2   : > { %8592 = vpow2.f32 %v1239_v43  ;;  %v10779_v23 = vpop.f32.mrf.mxu1 }
 0x3b3   : > { %14015 = vst [vmem:[#allocation96_spill] sm:$0xff] %v10779_v23  ;;  %v1241_v38 = vmul.f32 1.442695, %v1173_v22  ;;  %v1243_v27 = vmul.f32 1.442695, %v1174_v49  ;;  %2324 = vmax.xlane.f32.xlu1 %v2323_v2 }
 0x3b4   : > { %v1084_v17 = vpop.xlane.xlu1 %1083  ;;  %v10781_v56 = vpop.f32.mrf.mxu1 }
 0x3b5   : > { %14016 = vst [vmem:[#allocation85_spill] sm:$0xff] %v10781_v56  ;;  %8594 = vpow2.f32 %v1241_v38  ;;  %v1175_v60 = vsub.f32 %v10487_v41, %v1084_v17  ;;  %v1176_v18 = vsub.f32 %v10493_v45, %v1084_v17  ;;  %v2326_v30 = vmax.f32 %v10779_v23, %v10781_v56 }
 0x3b6   : > { %8596 = vpow2.f32 %v1243_v27  ;;  %v10787_v34 = vpop.f32.mrf.mxu1 }
 0x3b7   : > { %14017 = vst [vmem:[#allocation98_spill] sm:$0xff] %v10787_v34  ;;  %v1245_v43 = vmul.f32 1.442695, %v1175_v60  ;;  %v1247_v7 = vmul.f32 1.442695, %v1176_v18  ;;  %2327 = vmax.xlane.f32.xlu0 %v2326_v30 }
 0x3b8   : > { %v1087_v22 = vpop.xlane.xlu0 %1086  ;;  %v10789_v49 = vpop.f32.mrf.mxu1 }
 0x3b9   : > { %14018 = vst [vmem:[#allocation90_spill] sm:$0xff] %v10789_v49  ;;  %8598 = vpow2.f32 %v1245_v43  ;;  %v1177_v2 = vsub.f32 %v10497_v53, %v1087_v22  ;;  %v1178_v38 = vsub.f32 %v10503_v57, %v1087_v22  ;;  %v2329_v41 = vmax.f32 %v10787_v34, %v10789_v49 }
 0x3ba   : > { %v8587_v45 = vpop.eup %8586  ;;  %8600 = vpow2.f32 %v1247_v7  ;;  %v10795_v17 = vpop.f32.mrf.mxu1 }
 0x3bb   : > { %v8589_v27 = vpop.eup %8588  ;;  %v1249_v56 = vmul.f32 1.442695, %v1177_v2  ;;  %v1251_v60 = vmul.f32 1.442695, %v1178_v38  ;;  %2330 = vmax.xlane.f32.xlu1 %v2329_v41 }
 0x3bc   : > { %v1090_v18 = vpop.xlane.xlu1 %1089  ;;  %v10797_v30 = vpop.f32.mrf.mxu1  ;;  %v10799_v23 = vadd.f32 %v8589_v27, %v8587_v45 }
 0x3bd   : > { %8602 = vpow2.f32 %v1249_v56  ;;  %v1179_v53 = vsub.f32 %v10507_v20, %v1090_v18  ;;  %v1180_v57 = vsub.f32 %v10513_v28, %v1090_v18  ;;  %v2332_v43 = vmax.f32 %v10795_v17, %v10797_v30 }
 0x3be   : > { %14019 = vst [vmem:[#allocation93_spill] sm:$0xff] %v10799_v23  ;;  %v8591_v7 = vpop.eup %8590  ;;  %8604 = vpow2.f32 %v1251_v60  ;;  %v10805_v22 = vpop.f32.mrf.mxu1 }
 0x3bf   : > { %v8593_v2 = vpop.eup %8592  ;;  %v1253_v38 = vmul.f32 1.442695, %v1179_v53  ;;  %v1255_v41 = vmul.f32 1.442695, %v1180_v57  ;;  %2333 = vmax.xlane.f32.xlu0 %v2332_v43  ;;  %v1457_v49 = vpack.c.bf16 %v8591_v7, %v8587_v45 }
 0x3c0   : > { %v1093_v34 = vpop.xlane.xlu0 %1092  ;;  %v10807_v62 = vpop.f32.mrf.mxu1  ;;  %v1458_v56 = vpack.c.bf16 %v8593_v2, %v8589_v27  ;;  %v10809_v23 = vadd.f32 %v8593_v2, %v8591_v7 }
 0x3c1   : > { %8606 = vpow2.f32 %v1253_v38  ;;  %v1181_v20 = vsub.f32 %v10517_v35, %v1093_v34  ;;  %v1182_v28 = vsub.f32 %v10523_v47, %v1093_v34  ;;  %v2335_v60 = vmax.f32 %v10805_v22, %v10807_v62 }
 0x3c2   : > { %14020 = vst [vmem:[#allocation97_spill] sm:$0xff] %v10809_v23  ;;  %v8595_v18 = vpop.eup %8594  ;;  %8608 = vpow2.f32 %v1255_v41  ;;  %1601 = vmatprep.mubr.bf16.mxu0 %v1458_v56  ;;  %v10815_v53 = vpop.f32.mrf.mxu1 }
 0x3c3   : > { %v8597_v45 = vpop.eup %8596  ;;  %v1257_v57 = vmul.f32 1.442695, %v1181_v20  ;;  %v1259_v43 = vmul.f32 1.442695, %v1182_v28  ;;  %1602 = vmatmul.mubr.bf16.vlgmr.msra.gmra.mxu0 %v1457_v49  ;;  %2336 = vmax.xlane.f32.xlu1 %v2335_v60 }
 0x3c4   : > { %7650 = vmatpush3.bf16.msra.mxu0 %v10645_v33  ;;  %v1096_v27 = vpop.xlane.xlu1 %1095  ;;  %v10818_v7 = vpop.f32.mrf.mxu1  ;;  %v10820_v35 = vadd.f32 %v8597_v45, %v8595_v18 }
 0x3c5   : > { %8610 = vpow2.f32 %v1257_v57  ;;  %7651 = vmatprep.subr.bf16.mxu0 %v10330_v16  ;;  %v1183_v47 = vsub.f32 %v10527_v15, %v1096_v27  ;;  %v1184_v34 = vsub.f32 %v10533_v63, %v1096_v27  ;;  %v2338_v2 = vmax.f32 %v10815_v53, %v10818_v7 }
 0x3c6   : > { %14021 = vst [vmem:[#allocation99_spill] sm:$0xff] %v10820_v35  ;;  %v8599_v38 = vpop.eup %8598  ;;  %8612 = vpow2.f32 %v1259_v43  ;;  %v10827_v49 = vpop.f32.mrf.mxu1 }
 0x3c7   : > { %v8601_v33 = vpop.eup %8600  ;;  %v1261_v41 = vmul.f32 1.442695, %v1183_v47  ;;  %v1263_v56 = vmul.f32 1.442695, %v1184_v34  ;;  %2339 = vmax.xlane.f32.xlu0 %v2338_v2  ;;  %v1459_v20 = vpack.c.bf16 %v8599_v38, %v8595_v18 }
 0x3c8   : > { %7652 = vmatpush3.bf16.msra.mxu0 %v10338_v0  ;;  %v1099_v28 = vpop.xlane.xlu0 %1098  ;;  %v10830_v16 = vpop.f32.mrf.mxu1  ;;  %v1460_v15 = vpack.c.bf16 %v8601_v33, %v8597_v45  ;;  %v10832_v60 = vadd.f32 %v8601_v33, %v8599_v38 }
 0x3c9   : > { %8614 = vpow2.f32 %v1261_v41  ;;  %7653 = vmatprep.subr.bf16.mxu0 %v10655_v21  ;;  %v1185_v63 = vsub.f32 %v10537_v31, %v1099_v28  ;;  %v1186_v57 = vsub.f32 %v10543_v4, %v1099_v28  ;;  %v2341_v43 = vmax.f32 %v10827_v49, %v10830_v16 }
 0x3ca   : > { %14022 = vst [vmem:[#allocation100_spill] sm:$0xff] %v10832_v60  ;;  %v8603_v27 = vpop.eup %8602  ;;  %8616 = vpow2.f32 %v1263_v56  ;;  %1609 = vmatprep.mubr.bf16.mxu0 %v1460_v15  ;;  %v10839_v0 = vpop.f32.mrf.mxu1 }
 0x3cb   : > { %v8605_v18 = vpop.eup %8604  ;;  %v1265_v47 = vmul.f32 1.442695, %v1185_v63  ;;  %v1267_v45 = vmul.f32 1.442695, %v1186_v57  ;;  %1610 = vmatmul.mubr.bf16.gmra.mxu0 %v1459_v20  ;;  %2342 = vmax.xlane.f32.xlu0 %v2341_v43 }
 0x3cc   : > { %7654 = vmatpush3.bf16.msra.mxu0 %v10346_v24  ;;  %v1102_v21 = vpop.xlane.xlu1 %1101  ;;  %v10842_v34 = vpop.f32.mrf.mxu1  ;;  %v10844_v31 = vadd.f32 %v8605_v18, %v8603_v27 }
 0x3cd   : > { %8618 = vpow2.f32 %v1265_v47  ;;  %7655 = vmatprep.subr.bf16.mxu0 %v10667_v29  ;;  %v1187_v4 = vsub.f32 %v10547_v55, %v1102_v21  ;;  %v1188_v2 = vsub.f32 %v10553_v6, %v1102_v21  ;;  %v2344_v38 = vmax.f32 %v10839_v0, %v10842_v34 }
 0x3ce   : > { %14023 = vst [vmem:[#allocation101_spill] sm:$0xff] %v10844_v31  ;;  %v8607_v33 = vpop.eup %8606  ;;  %8620 = vpow2.f32 %v1267_v45  ;;  %v10851_v41 = vpop.f32.mrf.mxu1  ;;  %v14059_v31 = vld [vmem:[#allocation59_spill] sm:$0xff] }
 0x3cf   : > { %v8609_v24 = vpop.eup %8608  ;;  %v1269_v56 = vmul.f32 1.442695, %v1187_v4  ;;  %v1271_v20 = vmul.f32 1.442695, %v1188_v2  ;;  %2345 = vmax.xlane.f32.xlu1 %v2344_v38  ;;  %v1461_v28 = vpack.c.bf16 %v8607_v33, %v8603_v27 }
 0x3d0   : > { %7656 = vmatpush3.bf16.msra.mxu0 %v10354_v12  ;;  %v1105_v15 = vpop.xlane.xlu0 %1104  ;;  %v10854_v29 = vpop.f32.mrf.mxu1  ;;  %v1462_v55 = vpack.c.bf16 %v8609_v24, %v8605_v18  ;;  %v10856_v63 = vadd.f32 %v8609_v24, %v8607_v33 }
 0x3d1   : > { %8622 = vpow2.f32 %v1269_v56  ;;  %7657 = vmatprep.subr.bf16.mxu0 %v10677_v10  ;;  %v1189_v6 = vsub.f32 %v10557_v25, %v1105_v15  ;;  %v1190_v57 = vsub.f32 %v10563_v51, %v1105_v15  ;;  %v2347_v43 = vmax.f32 %v10851_v41, %v10854_v29 }
 0x3d2   : > { %14024 = vst [vmem:[#allocation102_spill] sm:$0xff] %v10856_v63  ;;  %v8611_v47 = vpop.eup %8610  ;;  %8624 = vpow2.f32 %v1271_v20  ;;  %1617 = vmatprep.mubr.bf16.mxu0 %v1462_v55  ;;  %v10863_v12 = vpop.f32.mrf.mxu1 }
 0x3d3   : > { %v8613_v27 = vpop.eup %8612  ;;  %v1273_v45 = vmul.f32 1.442695, %v1189_v6  ;;  %v1275_v18 = vmul.f32 1.442695, %v1190_v57  ;;  %1618 = vmatmul.mubr.bf16.gmra.mxu0 %v1461_v28  ;;  %2348 = vmax.xlane.f32.xlu0 %v2347_v43 }
 0x3d4   : > { %7658 = vmatpush3.bf16.msra.mxu0 %v10362_v52  ;;  %v1108_v10 = vpop.xlane.xlu0 %1107  ;;  %v10866_v21 = vpop.f32.mrf.mxu1  ;;  %v10868_v25 = vadd.f32 %v8613_v27, %v8611_v47 }
 0x3d5   : > { %8626 = vpow2.f32 %v1273_v45  ;;  %7659 = vmatprep.subr.bf16.mxu0 %v10689_v61  ;;  %v1191_v51 = vsub.f32 %v10567_v42, %v1108_v10  ;;  %v1192_v4 = vsub.f32 %v10573_v37, %v1108_v10  ;;  %v2350_v2 = vmax.f32 %v10863_v12, %v10866_v21 }
 0x3d6   : > { %14025 = vst [vmem:[#allocation103_spill] sm:$0xff] %v10868_v25  ;;  %v8615_v38 = vpop.eup %8614  ;;  %8628 = vpow2.f32 %v1275_v18  ;;  %v10875_v33 = vpop.f32.mrf.mxu1 }
 0x3d7   : > { %v8617_v52 = vpop.eup %8616  ;;  %v1277_v24 = vmul.f32 1.442695, %v1191_v51  ;;  %v1279_v56 = vmul.f32 1.442695, %v1192_v4  ;;  %2351 = vmax.xlane.f32.xlu1 %v2350_v2  ;;  %v1463_v20 = vpack.c.bf16 %v8615_v38, %v8611_v47 }
 0x3d8   : > { %7660 = vmatpush3.bf16.msra.mxu0 %v10370_v1  ;;  %v1111_v28 = vpop.xlane.xlu1 %1110  ;;  %v10878_v61 = vpop.f32.mrf.mxu1  ;;  %v1464_v42 = vpack.c.bf16 %v8617_v52, %v8613_v27  ;;  %v10880_v15 = vadd.f32 %v8617_v52, %v8615_v38 }
 0x3d9   : > { %8630 = vpow2.f32 %v1277_v24  ;;  %7661 = vmatprep.subr.bf16.mxu0 %v10699_v36  ;;  %v1193_v37 = vsub.f32 %v10577_v9, %v1111_v28  ;;  %v1194_v55 = vsub.f32 %v10583_v3, %v1111_v28 }
 0x3da   : > { %14026 = vst [vmem:[#allocation104_spill] sm:$0xff] %v10880_v15  ;;  %v8619_v6 = vpop.eup %8618  ;;  %8632 = vpow2.f32 %v1279_v56  ;;  %1625 = vmatprep.mubr.bf16.mxu0 %v1464_v42  ;;  %v10885_v57 = vpop.f32.mrf.mxu1 }
 0x3db   : > { %v8621_v43 = vpop.eup %8620  ;;  %v1281_v1 = vmul.f32 1.442695, %v1193_v37  ;;  %v1283_v47 = vmul.f32 1.442695, %v1194_v55  ;;  %1626 = vmatmul.mubr.bf16.gmra.mxu0 %v1463_v20 }
 0x3dc   : > { %7662 = vmatpush3.bf16.msra.mxu0 %v10378_v59  ;;  %v1114_v27 = vpop.xlane.xlu0 %1113  ;;  %v10888_v45 = vpop.f32.mrf.mxu1  ;;  %v10890_v18 = vadd.f32 %v8621_v43, %v8619_v6 }
 0x3dd   : > { %8634 = vpow2.f32 %v1281_v1  ;;  %7663 = vmatprep.subr.bf16.mxu0 %v10711_v46  ;;  %v1195_v3 = vsub.f32 %v10587_v50, %v1114_v27  ;;  %v1196_v9 = vsub.f32 %v10593_v8, %v1114_v27  ;;  %v2356_v36 = vmax.f32 %v10885_v57, %v10888_v45 }
 0x3de   : > { %14027 = vst [vmem:[#allocation105_spill] sm:$0xff] %v10890_v18  ;;  %v8623_v10 = vpop.eup %8622  ;;  %8636 = vpow2.f32 %v1283_v47  ;;  %v10897_v51 = vpop.f32.mrf.mxu1 }
 0x3df   : > { %v8625_v59 = vpop.eup %8624  ;;  %v1285_v4 = vmul.f32 1.442695, %v1195_v3  ;;  %v1287_v2 = vmul.f32 1.442695, %v1196_v9  ;;  %2357 = vmax.xlane.f32.xlu1 %v2356_v36  ;;  %v1465_v38 = vpack.c.bf16 %v8623_v10, %v8619_v6 }
 0x3e0   : > { %7664 = vmatpush3.bf16.msra.mxu0 %v10386_v14  ;;  %v1117_v52 = vpop.xlane.xlu1 %1116  ;;  %v10900_v46 = vpop.f32.mrf.mxu1  ;;  %v1466_v50 = vpack.c.bf16 %v8625_v59, %v8621_v43  ;;  %v10902_v24 = vadd.f32 %v8625_v59, %v8623_v10 }
 0x3e1   : > { %8638 = vpow2.f32 %v1285_v4  ;;  %v1197_v8 = vsub.f32 %v10597_v44, %v1117_v52  ;;  %v1198_v56 = vsub.f32 %v10603_v11, %v1117_v52 }
 0x3e2   : > { %14028 = vst [vmem:[#allocation106_spill] sm:$0xff] %v10902_v24  ;;  %v8627_v20 = vpop.eup %8626  ;;  %8640 = vpow2.f32 %v1287_v2  ;;  %1633 = vmatprep.mubr.bf16.mxu0 %v1466_v50  ;;  %v10906_v28 = vpop.f32.mrf.mxu1 }
 0x3e3   : > { %v8629_v42 = vpop.eup %8628  ;;  %v1289_v37 = vmul.f32 1.442695, %v1197_v8  ;;  %v1291_v55 = vmul.f32 1.442695, %v1198_v56  ;;  %1634 = vmatmul.mubr.bf16.gmra.mxu0 %v1465_v38 }
 0x3e4   : > { %v1120_v14 = vpop.xlane.xlu0 %1119  ;;  %v10908_v6 = vpop.f32.mrf.mxu1  ;;  %v10910_v43 = vadd.f32 %v8629_v42, %v8627_v20 }
 0x3e5   : > { %8642 = vpow2.f32 %v1289_v37  ;;  %v1199_v1 = vsub.f32 %v10607_v5, %v1120_v14  ;;  %v1200_v44 = vsub.f32 %v10611_v13, %v1120_v14  ;;  %v2362_v11 = vmax.f32 %v10906_v28, %v10908_v6 }
 0x3e6   : > { %14029 = vst [vmem:[#allocation107_spill] sm:$0xff] %v10910_v43  ;;  %v8631_v47 = vpop.eup %8630  ;;  %8644 = vpow2.f32 %v1291_v55  ;;  %v10916_v27 = vpop.f32.mrf.mxu1 }
 0x3e7   : > { %v8633_v3 = vpop.eup %8632  ;;  %v1293_v9 = vmul.f32 1.442695, %v1199_v1  ;;  %v1295_v36 = vmul.f32 1.442695, %v1200_v44  ;;  %2363 = vmax.xlane.f32.xlu1 %v2362_v11  ;;  %v1467_v10 = vpack.c.bf16 %v8631_v47, %v8627_v20 }
 0x3e8   : > { %v1123_v59 = vpop.xlane.xlu1 %1122  ;;  %v10918_v4 = vpop.f32.mrf.mxu1  ;;  %v1468_v2 = vpack.c.bf16 %v8633_v3, %v8629_v42  ;;  %v10920_v38 = vadd.f32 %v8633_v3, %v8631_v47 }
 0x3e9   : > { %8646 = vpow2.f32 %v1293_v9  ;;  %v1201_v13 = vsub.f32 %v10615_v19, %v1123_v59  ;;  %v1202_v5 = vsub.f32 %v10617_v58, %v1123_v59  ;;  %3728 = vrot.lane.b32.xlu0 %v13916_v32, %s9367_s14  ;;  %v14032_v58 = vld [vmem:[#allocation92_spill] sm:$0xff]  ;;  %v2359_v32 = vmax.f32 %v10897_v51, %v10900_v46 }
 0x3ea   : > { %14030 = vst [vmem:[#allocation108_spill] sm:$0xff] %v10920_v38  ;;  %v8635_v52 = vpop.eup %8634  ;;  %8648 = vpow2.f32 %v1295_v36  ;;  %1641 = vmatprep.mubr.bf16.mxu0 %v1468_v2  ;;  %v10926_v50 = vpop.f32.mrf.mxu1 }
 0x3eb   : > { %v8637_v8 = vpop.eup %8636  ;;  %v1297_v56 = vmul.f32 1.442695, %v1201_v13  ;;  %v1299_v20 = vmul.f32 1.442695, %v1202_v5  ;;  %1642 = vmatmul.mubr.bf16.gmra.mxu0 %v1467_v10 }
 0x3ec   : > { %v1126_v42 = vpop.xlane.xlu0 %1125  ;;  %v10928_v37 = vpop.f32.mrf.mxu1  ;;  %v10930_v55 = vadd.f32 %v8637_v8, %v8635_v52 }
 0x3ed   : > { %8650 = vpow2.f32 %v1297_v56  ;;  %v1203_v19 = vsub.f32 %v10621_v40, %v1126_v42  ;;  %v1204_v14 = vsub.f32 %v14032_v58, %v1126_v42  ;;  %v2368_v1 = vmax.f32 %v10926_v50, %v10928_v37  ;;  %v14034_v40 = vld [vmem:[#allocation87_spill] sm:$0xff]  ;;  %v14035_v56 = vld [vmem:[#allocation86_spill] sm:$0xff] }
 0x3ee   : > { %14031 = vst [vmem:[#allocation109_spill] sm:$0xff] %v10930_v55  ;;  %v8639_v44 = vpop.eup %8638  ;;  %8652 = vpow2.f32 %v1299_v20  ;;  %v10936_v11 = vpop.f32.mrf.mxu1 }
 0x3ef   : > { %v8641_v47 = vpop.eup %8640  ;;  %v1301_v3 = vmul.f32 1.442695, %v1203_v19  ;;  %v1303_v9 = vmul.f32 1.442695, %v1204_v14  ;;  %2369 = vmax.xlane.f32.xlu1 %v2368_v1  ;;  %v1469_v36 = vpack.c.bf16 %v8639_v44, %v8635_v52 }
 0x3f0   : > { %v1129_v10 = vpop.xlane.xlu1 %1128  ;;  %v10938_v59 = vpop.f32.mrf.mxu1  ;;  %v1470_v2 = vpack.c.bf16 %v8641_v47, %v8637_v8  ;;  %v10940_v13 = vadd.f32 %v8641_v47, %v8639_v44  ;;  %v14037_v44 = vld [vmem:[#allocation71_spill] sm:$0xff] }
 0x3f1   : > { %8654 = vpow2.f32 %v1301_v3  ;;  %v1205_v5 = vsub.f32 %v14034_v40, %v1129_v10  ;;  %v1206_v42 = vsub.f32 %v14035_v56, %v1129_v10  ;;  %v14038_v3 = vld [vmem:[#allocation88_spill] sm:$0xff] }
 0x3f2   : > { %14033 = vst [vmem:[#allocation92_spill] sm:$0xff] %v10940_v13  ;;  %v8643_v58 = vpop.eup %8642  ;;  %8656 = vpow2.f32 %v1303_v9  ;;  %1649 = vmatprep.mubr.bf16.mxu0 %v1470_v2  ;;  %v10944_v20 = vpop.f32.mrf.mxu1 }
 0x3f3   : > { %v8645_v19 = vpop.eup %8644  ;;  %v1305_v14 = vmul.f32 1.442695, %v1205_v5  ;;  %v1307_v1 = vmul.f32 1.442695, %v1206_v42  ;;  %1650 = vmatmul.mubr.bf16.gmra.mxu0 %v1469_v36 }
 0x3f4   : > { %v1132_v52 = vpop.xlane.xlu0 %1131  ;;  %v10946_v38 = vpop.f32.mrf.mxu1  ;;  %v10948_v8 = vadd.f32 %v8645_v19, %v8643_v58 }
 0x3f5   : > { %8658 = vpow2.f32 %v1305_v14  ;;  %v1207_v47 = vsub.f32 %v14037_v44, %v1132_v52  ;;  %v1208_v40 = vsub.f32 %v14038_v3, %v1132_v52  ;;  %v2374_v9 = vmax.f32 %v10944_v20, %v10946_v38  ;;  %v14041_v52 = vld [vmem:[#allocation80_spill] sm:$0xff]  ;;  %v14042_v3 = vld [vmem:[#allocation78_spill] sm:$0xff] }
 0x3f6   : > { %14036 = vst [vmem:[#allocation87_spill] sm:$0xff] %v10948_v8  ;;  %v8647_v10 = vpop.eup %8646  ;;  %8660 = vpow2.f32 %v1307_v1  ;;  %v10954_v2 = vpop.f32.mrf.mxu1 }
 0x3f7   : > { %v8649_v5 = vpop.eup %8648  ;;  %v1309_v56 = vmul.f32 1.442695, %v1207_v47  ;;  %v1311_v36 = vmul.f32 1.442695, %v1208_v40  ;;  %2375 = vmax.xlane.f32.xlu1 %v2374_v9  ;;  %v1471_v42 = vpack.c.bf16 %v8647_v10, %v8643_v58 }
 0x3f8   : > { %v1135_v13 = vpop.xlane.xlu1 %1134  ;;  %v10956_v24 = vpop.f32.mrf.mxu1  ;;  %v1472_v14 = vpack.c.bf16 %v8649_v5, %v8645_v19  ;;  %v10958_v15 = vadd.f32 %v8649_v5, %v8647_v10  ;;  %v14046_v10 = vld [vmem:[#allocation61_spill] sm:$0xff] }
 0x3f9   : > { %14039 = vst [vmem:[#allocation86_spill] sm:$0xff] %v10956_v24  ;;  %8662 = vpow2.f32 %v1309_v56  ;;  %v1209_v44 = vsub.f32 %v14041_v52, %v1135_v13  ;;  %v1210_v63 = vsub.f32 %v14042_v3, %v1135_v13  ;;  %v14047_v56 = vld [vmem:[#allocation83_spill] sm:$0xff] }
 0x3fa   : > { %14040 = vst [vmem:[#allocation71_spill] sm:$0xff] %v10958_v15  ;;  %v8651_v60 = vpop.eup %8650  ;;  %8664 = vpow2.f32 %v1311_v36  ;;  %1657 = vmatprep.mubr.bf16.mxu0 %v1472_v14  ;;  %v10962_v1 = vpop.f32.mrf.mxu1 }
 0x3fb   : > { %14043 = vst [vmem:[#allocation88_spill] sm:$0xff] %v10962_v1  ;;  %v8653_v47 = vpop.eup %8652  ;;  %v1313_v40 = vmul.f32 1.442695, %v1209_v44  ;;  %v1315_v9 = vmul.f32 1.442695, %v1210_v63  ;;  %1658 = vmatmul.mubr.bf16.gmra.mxu0 %v1471_v42 }
 0x3fc   : > { %v1138_v58 = vpop.xlane.xlu0 %1137  ;;  %v10964_v35 = vpop.f32.mrf.mxu1  ;;  %v10966_v19 = vadd.f32 %v8653_v47, %v8651_v60 }
 0x3fd   : > { %14044 = vst [vmem:[#allocation80_spill] sm:$0xff] %v10964_v35  ;;  %8666 = vpow2.f32 %v1313_v40  ;;  %v1211_v5 = vsub.f32 %v14046_v10, %v1138_v58  ;;  %v1212_v52 = vsub.f32 %v14047_v56, %v1138_v58  ;;  %v2380_v13 = vmax.f32 %v10962_v1, %v10964_v35  ;;  %v14050_v58 = vld [vmem:[#allocation68_spill] sm:$0xff]  ;;  %v14051_v56 = vld [vmem:[#allocation69_spill] sm:$0xff] }
 0x3fe   : > { %14045 = vst [vmem:[#allocation78_spill] sm:$0xff] %v10966_v19  ;;  %v8655_v36 = vpop.eup %8654  ;;  %8668 = vpow2.f32 %v1315_v9  ;;  %v10972_v14 = vpop.f32.mrf.mxu1  ;;  %v2371_v1 = vmax.f32 %v10936_v11, %v10938_v59 }
 0x3ff   : > { %14048 = vst [vmem:[#allocation61_spill] sm:$0xff] %v10972_v14  ;;  %v8657_v44 = vpop.eup %8656  ;;  %v1317_v63 = vmul.f32 1.442695, %v1211_v5  ;;  %v1319_v42 = vmul.f32 1.442695, %v1212_v52  ;;  %2381 = vmax.xlane.f32.xlu1 %v2380_v13  ;;  %v1473_v3 = vpack.c.bf16 %v8655_v36, %v8651_v60 }
 0x400   : > { %v1141_v15 = vpop.xlane.xlu1 %1140  ;;  %v10974_v8 = vpop.f32.mrf.mxu1  ;;  %v1474_v40 = vpack.c.bf16 %v8657_v44, %v8653_v47  ;;  %v10976_v19 = vadd.f32 %v8657_v44, %v8655_v36  ;;  %v14055_v36 = vld [vmem:[#allocation52_spill] sm:$0xff] }
 0x401   : > { %8670 = vpow2.f32 %v1317_v63  ;;  %v1213_v10 = vsub.f32 %v14050_v58, %v1141_v15  ;;  %v1214_v55 = vsub.f32 %v14051_v56, %v1141_v15  ;;  %v14056_v63 = vld [vmem:[#allocation73_spill] sm:$0xff] }
 0x402   : > { %14049 = vst [vmem:[#allocation83_spill] sm:$0xff] %v10976_v19  ;;  %v8659_v43 = vpop.eup %8658  ;;  %8672 = vpow2.f32 %v1319_v42  ;;  %1665 = vmatprep.mubr.bf16.mxu0 %v1474_v40  ;;  %v10980_v9 = vpop.f32.mrf.mxu1  ;;  %v2353_v40 = vmax.f32 %v10875_v33, %v10878_v61 }
 0x403   : > { %14052 = vst [vmem:[#allocation68_spill] sm:$0xff] %v10980_v9  ;;  %v8661_v5 = vpop.eup %8660  ;;  %v1321_v52 = vmul.f32 1.442695, %v1213_v10  ;;  %v1323_v13 = vmul.f32 1.442695, %v1214_v55  ;;  %1666 = vmatmul.mubr.bf16.gmra.mxu0 %v1473_v3 }
 0x404   : > { %v1144_v60 = vpop.xlane.xlu0 %1143  ;;  %v10982_v18 = vpop.f32.mrf.mxu1  ;;  %v10984_v47 = vadd.f32 %v8661_v5, %v8659_v43 }
 0x405   : > { %14053 = vst [vmem:[#allocation69_spill] sm:$0xff] %v10982_v18  ;;  %8674 = vpow2.f32 %v1321_v52  ;;  %v1215_v44 = vsub.f32 %v14055_v36, %v1144_v60  ;;  %v1216_v58 = vsub.f32 %v14056_v63, %v1144_v60  ;;  %v2386_v15 = vmax.f32 %v10980_v9, %v10982_v18  ;;  %v14058_v63 = vld [vmem:[#allocation58_spill] sm:$0xff]  ;;  %v14065_v18 = vld [vmem:[#allocation51_spill] sm:$0xff] }
 0x406   : > { %14054 = vst [vmem:[#allocation110_spill] sm:$0xff] %v10984_v47  ;;  %v8663_v42 = vpop.eup %8662  ;;  %8676 = vpow2.f32 %v1323_v13  ;;  %v10992_v55 = vpop.f32.mrf.mxu1 }
 0x407   : > { %v8665_v3 = vpop.eup %8664  ;;  %v1325_v10 = vmul.f32 1.442695, %v1215_v44  ;;  %v1327_v56 = vmul.f32 1.442695, %v1216_v58  ;;  %2387 = vmax.xlane.f32.xlu1 %v2386_v15  ;;  %v1475_v19 = vpack.c.bf16 %v8663_v42, %v8659_v43 }
 0x408   : > { %v1147_v52 = vpop.xlane.xlu1 %1146  ;;  %v10994_v47 = vpop.f32.mrf.mxu1  ;;  %2354 = vmax.xlane.f32.xlu0 %v2353_v40  ;;  %v1476_v60 = vpack.c.bf16 %v8665_v3, %v8661_v5  ;;  %v10996_v36 = vadd.f32 %v8665_v3, %v8663_v42 }
 0x409   : > { %8678 = vpow2.f32 %v1325_v10  ;;  %v1217_v25 = vsub.f32 %v14058_v63, %v1147_v52  ;;  %v1218_v23 = vsub.f32 %v14059_v31, %v1147_v52  ;;  %v14061_v31 = vld [vmem:[#allocation42_spill] sm:$0xff]  ;;  %v14062_v10 = vld [vmem:[#allocation65_spill] sm:$0xff] }
 0x40a   : > { %14057 = vst [vmem:[#allocation52_spill] sm:$0xff] %v10996_v36  ;;  %v8667_v13 = vpop.eup %8666  ;;  %8680 = vpow2.f32 %v1327_v56  ;;  %1673 = vmatprep.mubr.bf16.mxu0 %v1476_v60  ;;  %v11002_v44 = vpop.f32.mrf.mxu1 }
 0x40b   : > { %v8669_v43 = vpop.eup %8668  ;;  %v1329_v58 = vmul.f32 1.442695, %v1217_v25  ;;  %v1331_v15 = vmul.f32 1.442695, %v1218_v23  ;;  %1674 = vmatmul.mubr.bf16.gmra.mxu0 %v1475_v19  ;;  %v2365_v25 = vmax.f32 %v10916_v27, %v10918_v4 }
 0x40c   : > { %v1150_v5 = vpop.xlane.xlu0 %1149  ;;  %v11004_v42 = vpop.f32.mrf.mxu1  ;;  %2360 = vmax.xlane.f32.xlu0 %v2359_v32  ;;  %v11006_v40 = vadd.f32 %v8669_v43, %v8667_v13 }
 0x40d   : > { %8682 = vpow2.f32 %v1329_v58  ;;  %v1219_v3 = vsub.f32 %v14061_v31, %v1150_v5  ;;  %v1220_v52 = vsub.f32 %v14062_v10, %v1150_v5  ;;  %v2392_v56 = vmax.f32 %v11002_v44, %v11004_v42  ;;  %v14064_v10 = vld [vmem:[#allocation48_spill] sm:$0xff] }
 0x40e   : > { %14060 = vst [vmem:[#allocation73_spill] sm:$0xff] %v11006_v40  ;;  %v8671_v60 = vpop.eup %8670  ;;  %8684 = vpow2.f32 %v1331_v15  ;;  %v11014_v23 = vpop.f32.mrf.mxu1 }
 0x40f   : > { %v8673_v19 = vpop.eup %8672  ;;  %v1333_v63 = vmul.f32 1.442695, %v1219_v3  ;;  %v1335_v32 = vmul.f32 1.442695, %v1220_v52  ;;  %2393 = vmax.xlane.f32.xlu1 %v2392_v56  ;;  %v1477_v36 = vpack.c.bf16 %v8671_v60, %v8667_v13 }
 0x410   : > { %v1153_v58 = vpop.xlane.xlu1 %1152  ;;  %v11016_v40 = vpop.f32.mrf.mxu1  ;;  %2366 = vmax.xlane.f32.xlu0 %v2365_v25  ;;  %v1478_v5 = vpack.c.bf16 %v8673_v19, %v8669_v43  ;;  %v11018_v31 = vadd.f32 %v8673_v19, %v8671_v60 }
 0x411   : > { %8686 = vpow2.f32 %v1333_v63  ;;  %v1221_v9 = vsub.f32 %v14064_v10, %v1153_v58  ;;  %v1222_v35 = vsub.f32 %v14065_v18, %v1153_v58  ;;  %v14069_v18 = vld [vmem:[#allocation29_spill] sm:$0xff]  ;;  %v14070_v63 = vld [vmem:[#allocation55_spill] sm:$0xff] }
 0x412   : > { %14063 = vst [vmem:[#allocation58_spill] sm:$0xff] %v11018_v31  ;;  %v8675_v15 = vpop.eup %8674  ;;  %8688 = vpow2.f32 %v1335_v32  ;;  %1681 = vmatprep.mubr.bf16.mxu0 %v1478_v5  ;;  %v11024_v3 = vpop.f32.mrf.mxu1 }
 0x413   : > { %14066 = vst [vmem:[#allocation59_spill] sm:$0xff] %v11024_v3  ;;  %v8677_v13 = vpop.eup %8676  ;;  %v1337_v52 = vmul.f32 1.442695, %v1221_v9  ;;  %v1339_v56 = vmul.f32 1.442695, %v1222_v35  ;;  %1682 = vmatmul.mubr.bf16.gmra.mxu0 %v1477_v36  ;;  %v2377_v9 = vmax.f32 %v10954_v2, %v10956_v24  ;;  %v2383_v24 = vmax.f32 %v10972_v14, %v10974_v8 }
 0x414   : > { %v1156_v43 = vpop.xlane.xlu0 %1155  ;;  %v11026_v60 = vpop.f32.mrf.mxu1  ;;  %2372 = vmax.xlane.f32.xlu0 %v2371_v1  ;;  %v11028_v25 = vadd.f32 %v8677_v13, %v8675_v15 }
 0x415   : > { %14067 = vst [vmem:[#allocation42_spill] sm:$0xff] %v11026_v60  ;;  %8690 = vpow2.f32 %v1337_v52  ;;  %v1223_v19 = vsub.f32 %v14069_v18, %v1156_v43  ;;  %v1224_v58 = vsub.f32 %v14070_v63, %v1156_v43  ;;  %v2398_v32 = vmax.f32 %v11024_v3, %v11026_v60  ;;  %v14072_v43 = vld [vmem:[#allocation38_spill] sm:$0xff]  ;;  %v14073_v63 = vld [vmem:[#allocation28_spill] sm:$0xff] }
 0x416   : > { %14068 = vst [vmem:[#allocation65_spill] sm:$0xff] %v11028_v25  ;;  %v8679_v5 = vpop.eup %8678  ;;  %8692 = vpow2.f32 %v1339_v56 }
 0x417   : > { %v8681_v35 = vpop.eup %8680  ;;  %v1341_v36 = vmul.f32 1.442695, %v1223_v19  ;;  %v1343_v10 = vmul.f32 1.442695, %v1224_v58  ;;  %2399 = vmax.xlane.f32.xlu1 %v2398_v32  ;;  %v1479_v1 = vpack.c.bf16 %v8679_v5, %v8675_v15  ;;  %v14075_v32 = vld [vmem:[#allocation33_spill] sm:$0xff] }
 0x418   : > { %v1159_v31 = vpop.xlane.xlu1 %1158  ;;  %2378 = vmax.xlane.f32.xlu0 %v2377_v9  ;;  %v1480_v52 = vpack.c.bf16 %v8681_v35, %v8677_v13  ;;  %v11036_v25 = vadd.f32 %v8681_v35, %v8679_v5  ;;  %v14076_v9 = vld [vmem:[#allocation32_spill] sm:$0xff] }
 0x419   : > { %8694 = vpow2.f32 %v1341_v36  ;;  %v1225_v18 = vsub.f32 %v14072_v43, %v1159_v31  ;;  %v1226_v60 = vsub.f32 %v14073_v63, %v1159_v31  ;;  %v2389_v36 = vmax.f32 %v10992_v55, %v10994_v47 }
 0x41a   : > { %14071 = vst [vmem:[#allocation48_spill] sm:$0xff] %v11036_v25  ;;  %v8683_v3 = vpop.eup %8682  ;;  %8696 = vpow2.f32 %v1343_v10  ;;  %1689 = vmatprep.mubr.bf16.mxu0 %v1480_v52  ;;  %v11048_v52 = vpop.f32.mrf.mxu1 }
 0x41b   : > { %v8685_v56 = vpop.eup %8684  ;;  %v1345_v19 = vmul.f32 1.442695, %v1225_v18  ;;  %v1347_v58 = vmul.f32 1.442695, %v1226_v60  ;;  %1690 = vmatmul.mubr.bf16.gmra.mxu0 %v1479_v1 }
 0x41c   : > { %v1162_v15 = vpop.xlane.xlu0 %1161  ;;  %2384 = vmax.xlane.f32.xlu0 %v2383_v24  ;;  %v11042_v13 = vadd.f32 %v8685_v56, %v8683_v3 }
 0x41d   : > { %8698 = vpow2.f32 %v1345_v19  ;;  %v1227_v5 = vsub.f32 %v14075_v32, %v1162_v15  ;;  %v1228_v35 = vsub.f32 %v14076_v9, %v1162_v15  ;;  %v14078_v19 = vld [vmem:[#allocation44_spill] sm:$0xff]  ;;  %v14079_v15 = vld [vmem:[#allocation34_spill] sm:$0xff] }
 0x41e   : > { %14074 = vst [vmem:[#allocation51_spill] sm:$0xff] %v11042_v13  ;;  %v8687_v31 = vpop.eup %8686  ;;  %8700 = vpow2.f32 %v1347_v58  ;;  %v2395_v58 = vmax.f32 %v11014_v23, %v11016_v40 }
 0x41f   : > { %v8689_v10 = vpop.eup %8688  ;;  %v1349_v43 = vmul.f32 1.442695, %v1227_v5  ;;  %v1351_v60 = vmul.f32 1.442695, %v1228_v35  ;;  %v1481_v1 = vpack.c.bf16 %v8687_v31, %v8683_v3  ;;  %v11056_v5 = vpop.f32.mrf.mxu1 }
 0x420   : > { %v1165_v18 = vpop.xlane.xlu1 %1164  ;;  %2390 = vmax.xlane.f32.xlu0 %v2389_v36  ;;  %v1482_v24 = vpack.c.bf16 %v8689_v10, %v8685_v56  ;;  %v11050_v63 = vadd.f32 %v8689_v10, %v8687_v31  ;;  %14080 = vst [vmem:[#allocation55_spill] sm:$0xff] %v11056_v5  ;;  %v14082_v36 = vld [vmem:[#allocation53_spill] sm:$0xff] }
 0x421   : > { %8702 = vpow2.f32 %v1349_v43  ;;  %v1229_v32 = vsub.f32 %v14078_v19, %v1165_v18  ;;  %v1230_v9 = vsub.f32 %v14079_v15, %v1165_v18  ;;  %v14083_v43 = vld [vmem:[#allocation64_spill] sm:$0xff] }
 0x422   : > { %14077 = vst [vmem:[#allocation29_spill] sm:$0xff] %v11050_v63  ;;  %v8691_v25 = vpop.eup %8690  ;;  %8704 = vpow2.f32 %v1351_v60  ;;  %1697 = vmatprep.mubr.bf16.mxu0 %v1482_v24  ;;  %v2401_v60 = vmax.f32 %v11048_v52, %v11056_v5 }
 0x423   : > { %v8693_v13 = vpop.eup %8692  ;;  %v1353_v3 = vmul.f32 1.442695, %v1229_v32  ;;  %v1355_v35 = vmul.f32 1.442695, %v1230_v9  ;;  %1698 = vmatmul.mubr.bf16.gmra.mxu0 %v1481_v1 }
 0x424   : > { %2396 = vmax.xlane.f32.xlu0 %v2395_v58  ;;  %v1168_v56 = vpop.xlane.xlu0 %1167  ;;  %v11058_v31 = vadd.f32 %v8693_v13, %v8691_v25 }
 0x425   : > { %8706 = vpow2.f32 %v1353_v3  ;;  %v1231_v10 = vsub.f32 %v14082_v36, %v1168_v56  ;;  %v1232_v18 = vsub.f32 %v14083_v43, %v1168_v56  ;;  %v14085_v3 = vld [vmem:[#allocation40_spill] sm:$0xff]  ;;  %v14086_v36 = vld [vmem:[#allocation41_spill] sm:$0xff] }
 0x426   : > { %14081 = vst [vmem:[#allocation38_spill] sm:$0xff] %v11058_v31  ;;  %v8695_v19 = vpop.eup %8694  ;;  %8708 = vpow2.f32 %v1355_v35 }
 0x427   : > { %v8697_v24 = vpop.eup %8696  ;;  %v1357_v15 = vmul.f32 1.442695, %v1231_v10  ;;  %v1359_v63 = vmul.f32 1.442695, %v1232_v18  ;;  %v1483_v32 = vpack.c.bf16 %v8695_v19, %v8691_v25  ;;  %v14088_v25 = vld [vmem:[#allocation43_spill] sm:$0xff] }
 0x428   : > { %v2310_v9 = vpop.xlane.xlu1 %2309  ;;  %2402 = vmax.xlane.f32.xlu0 %v2401_v60  ;;  %v1484_v1 = vpack.c.bf16 %v8697_v24, %v8693_v13  ;;  %v11064_v58 = vadd.f32 %v8697_v24, %v8695_v19  ;;  %v14089_v19 = vld [vmem:[#allocation89_spill] sm:$0xff] }
 0x429   : > { %8710 = vpow2.f32 %v1357_v15  ;;  %v2404_v31 = vsub.f32 %v14085_v3, %v2310_v9  ;;  %v2405_v14 = vsub.f32 %v14086_v36, %v2310_v9 }
 0x42a   : > { %14084 = vst [vmem:[#allocation28_spill] sm:$0xff] %v11064_v58  ;;  %v8699_v56 = vpop.eup %8698  ;;  %8712 = vpow2.f32 %v1359_v63  ;;  %1705 = vmatprep.mubr.bf16.mxu0 %v1484_v1 }
 0x42b   : > { %v8701_v43 = vpop.eup %8700  ;;  %v2468_v5 = vmul.f32 1.442695, %v2404_v31  ;;  %v2470_v35 = vmul.f32 1.442695, %v2405_v14  ;;  %1706 = vmatmul.mubr.bf16.gmra.mxu0 %v1483_v32  ;;  %v14090_v14 = vld [vmem:[#allocation91_spill] sm:$0xff]  ;;  %v14091_v32 = vld [vmem:[#allocation94_spill] sm:$0xff] }
 0x42c   : > { %v2313_v10 = vpop.xlane.xlu0 %2312  ;;  %v11068_v18 = vadd.f32 %v8701_v43, %v8699_v56 }
 0x42d   : > { %8714 = vpow2.f32 %v2468_v5  ;;  %v2406_v13 = vsub.f32 %v14088_v25, %v2313_v10  ;;  %v2407_v60 = vsub.f32 %v14089_v19, %v2313_v10 }
 0x42e   : > { %14087 = vst [vmem:[#allocation33_spill] sm:$0xff] %v11068_v18  ;;  %v8703_v24 = vpop.eup %8702  ;;  %8716 = vpow2.f32 %v2470_v35 }
 0x42f   : > { %v8705_v15 = vpop.eup %8704  ;;  %v2472_v3 = vmul.f32 1.442695, %v2406_v13  ;;  %v2474_v9 = vmul.f32 1.442695, %v2407_v60  ;;  %v1485_v36 = vpack.c.bf16 %v8703_v24, %v8699_v56 }
 0x430   : > { %v2316_v63 = vpop.xlane.xlu0 %2315  ;;  %v1486_v1 = vpack.c.bf16 %v8705_v15, %v8701_v43  ;;  %v11072_v58 = vadd.f32 %v8705_v15, %v8703_v24  ;;  %v14092_v43 = vld [vmem:[#allocation95_spill] sm:$0xff] }
 0x431   : > { %8718 = vpow2.f32 %v2472_v3  ;;  %v2408_v31 = vsub.f32 %v14090_v14, %v2316_v63  ;;  %v2409_v18 = vsub.f32 %v14091_v32, %v2316_v63 }
 0x432   : > { %v8707_v5 = vpop.eup %8706  ;;  %8720 = vpow2.f32 %v2474_v9  ;;  %1713 = vmatprep.mubr.bf16.mxu0 %v1486_v1 }
 0x433   : > { %v8709_v25 = vpop.eup %8708  ;;  %v2476_v10 = vmul.f32 1.442695, %v2408_v31  ;;  %v2478_v19 = vmul.f32 1.442695, %v2409_v18  ;;  %1714 = vmatmul.mubr.bf16.gmra.mxu0 %v1485_v36 }
 0x434   : > { %v2319_v35 = vpop.xlane.xlu1 %2318  ;;  %v11076_v13 = vadd.f32 %v8709_v25, %v8707_v5 }
 0x435   : > { %8722 = vpow2.f32 %v2476_v10  ;;  %v2410_v56 = vsub.f32 %v10753_v39, %v2319_v35  ;;  %v2411_v60 = vsub.f32 %v14092_v43, %v2319_v35 }
 0x436   : > { %v8711_v24 = vpop.eup %8710  ;;  %8724 = vpow2.f32 %v2478_v19 }
 0x437   : > { %v8713_v15 = vpop.eup %8712  ;;  %v2480_v3 = vmul.f32 1.442695, %v2410_v56  ;;  %v2482_v63 = vmul.f32 1.442695, %v2411_v60  ;;  %v1487_v14 = vpack.c.bf16 %v8711_v24, %v8707_v5 }
 0x438   : > { %v2322_v9 = vpop.xlane.xlu0 %2321  ;;  %v1488_v1 = vpack.c.bf16 %v8713_v15, %v8709_v25  ;;  %v11080_v32 = vadd.f32 %v8713_v15, %v8711_v24  ;;  %v14093_v25 = vld [vmem:[#allocation75_spill] sm:$0xff] }
 0x439   : > { %8726 = vpow2.f32 %v2480_v3  ;;  %v2412_v18 = vsub.f32 %v10763_v48, %v2322_v9  ;;  %v2413_v36 = vsub.f32 %v10765_v54, %v2322_v9 }
 0x43a   : > { %v8715_v31 = vpop.eup %8714  ;;  %8728 = vpow2.f32 %v2482_v63  ;;  %1721 = vmatprep.mubr.bf16.mxu0 %v1488_v1  ;;  %v14094_v1 = vld [vmem:[#allocation96_spill] sm:$0xff] }
 0x43b   : > { %v8717_v39 = vpop.eup %8716  ;;  %v2484_v10 = vmul.f32 1.442695, %v2412_v18  ;;  %v2486_v35 = vmul.f32 1.442695, %v2413_v36  ;;  %1722 = vmatmul.mubr.bf16.gmra.mxu0 %v1487_v14  ;;  %v14095_v18 = vld [vmem:[#allocation85_spill] sm:$0xff] }
 0x43c   : > { %v2325_v19 = vpop.xlane.xlu1 %2324  ;;  %v2596_v56 = vadd.f32 %v8717_v39, %v8715_v31 }
 0x43d   : > { %8730 = vpow2.f32 %v2484_v10  ;;  %v2414_v5 = vsub.f32 %v10771_v26, %v2325_v19  ;;  %v2415_v43 = vsub.f32 %v14093_v25, %v2325_v19 }
 0x43e   : > { %v8719_v60 = vpop.eup %8718  ;;  %8732 = vpow2.f32 %v2486_v35  ;;  %2597 = vadd.xlane.f32.xlu1 %v2596_v56 }
 0x43f   : > { %v8721_v48 = vpop.eup %8720  ;;  %v2488_v24 = vmul.f32 1.442695, %v2414_v5  ;;  %v2490_v54 = vmul.f32 1.442695, %v2415_v43  ;;  %v2692_v15 = vpack.c.bf16 %v8719_v60, %v8715_v31  ;;  %v14096_v31 = vld [vmem:[#allocation98_spill] sm:$0xff] }
 0x440   : > { %v2328_v3 = vpop.xlane.xlu0 %2327  ;;  %v2693_v63 = vpack.c.bf16 %v8721_v48, %v8717_v39  ;;  %v2599_v9 = vadd.f32 %v8721_v48, %v8719_v60  ;;  %v14097_v39 = vld [vmem:[#allocation90_spill] sm:$0xff] }
 0x441   : > { %8734 = vpow2.f32 %v2488_v24  ;;  %v2416_v14 = vsub.f32 %v14094_v1, %v2328_v3  ;;  %v2417_v36 = vsub.f32 %v14095_v18, %v2328_v3 }
 0x442   : > { %v8723_v10 = vpop.eup %8722  ;;  %8736 = vpow2.f32 %v2490_v54  ;;  %2804 = vmatprep.mubr.bf16.mxu0 %v2693_v63  ;;  %2600 = vadd.xlane.f32.xlu0 %v2599_v9 }
 0x443   : > { %v8725_v26 = vpop.eup %8724  ;;  %v2492_v19 = vmul.f32 1.442695, %v2416_v14  ;;  %v2494_v35 = vmul.f32 1.442695, %v2417_v36  ;;  %2805 = vmatmul.mubr.bf16.vlgmr.msra.gmra.mxu0 %v2692_v15 }
 0x444   : > { %v2331_v56 = vpop.xlane.xlu1 %2330  ;;  %v2602_v5 = vadd.f32 %v8725_v26, %v8723_v10 }
 0x445   : > { %8738 = vpow2.f32 %v2492_v19  ;;  %v2418_v25 = vsub.f32 %v14096_v31, %v2331_v56  ;;  %v2419_v43 = vsub.f32 %v14097_v39, %v2331_v56 }
 0x446   : > { %v8727_v60 = vpop.eup %8726  ;;  %8740 = vpow2.f32 %v2494_v35  ;;  %2603 = vadd.xlane.f32.xlu1 %v2602_v5 }
 0x447   : > { %v8729_v48 = vpop.eup %8728  ;;  %v2496_v24 = vmul.f32 1.442695, %v2418_v25  ;;  %v2498_v3 = vmul.f32 1.442695, %v2419_v43  ;;  %v2694_v54 = vpack.c.bf16 %v8727_v60, %v8723_v10 }
 0x448   : > { %v2334_v63 = vpop.xlane.xlu0 %2333  ;;  %v2605_v9 = vadd.f32 %v8729_v48, %v8727_v60  ;;  %v2695_v1 = vpack.c.bf16 %v8729_v48, %v8725_v26 }
 0x449   : > { %8742 = vpow2.f32 %v2496_v24  ;;  %v2420_v15 = vsub.f32 %v10795_v17, %v2334_v63  ;;  %v2421_v14 = vsub.f32 %v10797_v30, %v2334_v63 }
 0x44a   : > { %v8731_v18 = vpop.eup %8730  ;;  %8744 = vpow2.f32 %v2498_v3  ;;  %2606 = vadd.xlane.f32.xlu0 %v2605_v9  ;;  %2812 = vmatprep.mubr.bf16.mxu0 %v2695_v1 }
 0x44b   : > { %v8733_v36 = vpop.eup %8732  ;;  %v2500_v19 = vmul.f32 1.442695, %v2420_v15  ;;  %v2502_v35 = vmul.f32 1.442695, %v2421_v14  ;;  %2813 = vmatmul.mubr.bf16.gmra.mxu0 %v2694_v54 }
 0x44c   : > { %v2337_v56 = vpop.xlane.xlu1 %2336  ;;  %v2608_v5 = vadd.f32 %v8733_v36, %v8731_v18 }
 0x44d   : > { %8746 = vpow2.f32 %v2500_v19  ;;  %v2422_v10 = vsub.f32 %v10805_v22, %v2337_v56  ;;  %v2423_v26 = vsub.f32 %v10807_v62, %v2337_v56 }
 0x44e   : > { %v8735_v31 = vpop.eup %8734  ;;  %8748 = vpow2.f32 %v2502_v35  ;;  %2609 = vadd.xlane.f32.xlu1 %v2608_v5 }
 0x44f   : > { %v8737_v17 = vpop.eup %8736  ;;  %v2504_v30 = vmul.f32 1.442695, %v2422_v10  ;;  %v2506_v25 = vmul.f32 1.442695, %v2423_v26  ;;  %v2696_v39 = vpack.c.bf16 %v8735_v31, %v8731_v18 }
 0x450   : > { %v2340_v43 = vpop.xlane.xlu0 %2339  ;;  %v2611_v60 = vadd.f32 %v8737_v17, %v8735_v31  ;;  %v2697_v48 = vpack.c.bf16 %v8737_v17, %v8733_v36 }
 0x451   : > { %8750 = vpow2.f32 %v2504_v30  ;;  %v2424_v24 = vsub.f32 %v10815_v53, %v2340_v43  ;;  %v2425_v3 = vsub.f32 %v10818_v7, %v2340_v43 }
 0x452   : > { %v8739_v54 = vpop.eup %8738  ;;  %8752 = vpow2.f32 %v2506_v25  ;;  %2612 = vadd.xlane.f32.xlu0 %v2611_v60  ;;  %2820 = vmatprep.mubr.bf16.mxu0 %v2697_v48 }
 0x453   : > { %v8741_v62 = vpop.eup %8740  ;;  %v2508_v22 = vmul.f32 1.442695, %v2424_v24  ;;  %v2510_v63 = vmul.f32 1.442695, %v2425_v3  ;;  %2821 = vmatmul.mubr.bf16.gmra.mxu0 %v2696_v39 }
 0x454   : > { %v2343_v9 = vpop.xlane.xlu0 %2342  ;;  %v2614_v1 = vadd.f32 %v8741_v62, %v8739_v54 }
 0x455   : > { %8754 = vpow2.f32 %v2508_v22  ;;  %v2426_v15 = vsub.f32 %v10827_v49, %v2343_v9  ;;  %v2427_v14 = vsub.f32 %v10830_v16, %v2343_v9 }
 0x456   : > { %v8743_v18 = vpop.eup %8742  ;;  %8756 = vpow2.f32 %v2510_v63  ;;  %2615 = vadd.xlane.f32.xlu1 %v2614_v1 }
 0x457   : > { %v8745_v53 = vpop.eup %8744  ;;  %v2512_v7 = vmul.f32 1.442695, %v2426_v15  ;;  %v2514_v36 = vmul.f32 1.442695, %v2427_v14  ;;  %v2698_v19 = vpack.c.bf16 %v8743_v18, %v8739_v54 }
 0x458   : > { %v2346_v35 = vpop.xlane.xlu1 %2345  ;;  %v2617_v56 = vadd.f32 %v8745_v53, %v8743_v18  ;;  %v2699_v5 = vpack.c.bf16 %v8745_v53, %v8741_v62 }
 0x459   : > { %8758 = vpow2.f32 %v2512_v7  ;;  %v2428_v10 = vsub.f32 %v10839_v0, %v2346_v35  ;;  %v2429_v26 = vsub.f32 %v10842_v34, %v2346_v35 }
 0x45a   : > { %v8747_v31 = vpop.eup %8746  ;;  %8760 = vpow2.f32 %v2514_v36  ;;  %2618 = vadd.xlane.f32.xlu0 %v2617_v56  ;;  %2828 = vmatprep.mubr.bf16.mxu0 %v2699_v5 }
 0x45b   : > { %v8749_v49 = vpop.eup %8748  ;;  %v2516_v16 = vmul.f32 1.442695, %v2428_v10  ;;  %v2518_v17 = vmul.f32 1.442695, %v2429_v26  ;;  %2829 = vmatmul.mubr.bf16.gmra.mxu0 %v2698_v19 }
 0x45c   : > { %v2349_v30 = vpop.xlane.xlu0 %2348  ;;  %v2620_v25 = vadd.f32 %v8749_v49, %v8747_v31 }
 0x45d   : > { %8762 = vpow2.f32 %v2516_v16  ;;  %v2430_v39 = vsub.f32 %v10851_v41, %v2349_v30  ;;  %v2431_v43 = vsub.f32 %v10854_v29, %v2349_v30 }
 0x45e   : > { %v8751_v60 = vpop.eup %8750  ;;  %8764 = vpow2.f32 %v2518_v17  ;;  %2621 = vadd.xlane.f32.xlu1 %v2620_v25 }
 0x45f   : > { %v8753_v0 = vpop.eup %8752  ;;  %v2520_v34 = vmul.f32 1.442695, %v2430_v39  ;;  %v2522_v48 = vmul.f32 1.442695, %v2431_v43  ;;  %v2700_v24 = vpack.c.bf16 %v8751_v60, %v8747_v31 }
 0x460   : > { %v2352_v3 = vpop.xlane.xlu1 %2351  ;;  %v2623_v54 = vadd.f32 %v8753_v0, %v8751_v60  ;;  %v2701_v62 = vpack.c.bf16 %v8753_v0, %v8749_v49 }
 0x461   : > { %8766 = vpow2.f32 %v2520_v34  ;;  %v2432_v22 = vsub.f32 %v10863_v12, %v2352_v3  ;;  %v2433_v63 = vsub.f32 %v10866_v21, %v2352_v3 }
 0x462   : > { %v8755_v9 = vpop.eup %8754  ;;  %8768 = vpow2.f32 %v2522_v48  ;;  %2624 = vadd.xlane.f32.xlu0 %v2623_v54  ;;  %2836 = vmatprep.mubr.bf16.mxu0 %v2701_v62 }
 0x463   : > { %v8757_v41 = vpop.eup %8756  ;;  %v2524_v29 = vmul.f32 1.442695, %v2432_v22  ;;  %v2526_v1 = vmul.f32 1.442695, %v2433_v63  ;;  %2837 = vmatmul.mubr.bf16.gmra.mxu0 %v2700_v24 }
 0x464   : > { %v2626_v15 = vadd.f32 %v8757_v41, %v8755_v9 }
 0x465   : > { %8770 = vpow2.f32 %v2524_v29 }
 0x466   : > { %v8759_v14 = vpop.eup %8758  ;;  %8772 = vpow2.f32 %v2526_v1  ;;  %2627 = vadd.xlane.f32.xlu1 %v2626_v15 }
 0x467   : > { %v8761_v18 = vpop.eup %8760  ;;  %v2702_v53 = vpack.c.bf16 %v8759_v14, %v8755_v9 }
 0x468   : > { %v2358_v7 = vpop.xlane.xlu1 %2357  ;;  %v2703_v36 = vpack.c.bf16 %v8761_v18, %v8757_v41  ;;  %v2629_v12 = vadd.f32 %v8761_v18, %v8759_v14 }
 0x469   : > { %v2436_v21 = vsub.f32 %v10885_v57, %v2358_v7  ;;  %v2437_v19 = vsub.f32 %v10888_v45, %v2358_v7 }
 0x46a   : > { %v8763_v35 = vpop.eup %8762  ;;  %2844 = vmatprep.mubr.bf16.mxu0 %v2703_v36  ;;  %2630 = vadd.xlane.f32.xlu0 %v2629_v12 }
 0x46b   : > { %v8765_v56 = vpop.eup %8764  ;;  %v2532_v5 = vmul.f32 1.442695, %v2436_v21  ;;  %v2534_v10 = vmul.f32 1.442695, %v2437_v19  ;;  %2845 = vmatmul.mubr.bf16.gmra.mxu0 %v2702_v53  ;;  %v11142_v19 = vpop.permute.xlu0 %3728 }
 0x46c   : > { %v2632_v26 = vadd.f32 %v8765_v56, %v8763_v35 }
 0x46d   : > { %8774 = vpow2.f32 %v2532_v5 }
 0x46e   : > { %v8767_v31 = vpop.eup %8766  ;;  %8776 = vpow2.f32 %v2534_v10  ;;  %2633 = vadd.xlane.f32.xlu1 %v2632_v26 }
 0x46f   : > { %v8769_v49 = vpop.eup %8768  ;;  %v2704_v16 = vpack.c.bf16 %v8767_v31, %v8763_v35 }
 0x470   : > { %v2364_v17 = vpop.xlane.xlu1 %2363  ;;  %v2705_v30 = vpack.c.bf16 %v8769_v49, %v8765_v56  ;;  %v2635_v25 = vadd.f32 %v8769_v49, %v8767_v31 }
 0x471   : > { %v2440_v57 = vsub.f32 %v10906_v28, %v2364_v17  ;;  %v2441_v45 = vsub.f32 %v10908_v6, %v2364_v17 }
 0x472   : > { %v11108_v39 = vpop.eup %8770  ;;  %2852 = vmatprep.mubr.bf16.mxu0 %v2705_v30  ;;  %2636 = vadd.xlane.f32.xlu0 %v2635_v25 }
 0x473   : > { %v11110_v43 = vpop.eup %8772  ;;  %v2540_v60 = vmul.f32 1.442695, %v2440_v57  ;;  %v2542_v0 = vmul.f32 1.442695, %v2441_v45  ;;  %2853 = vmatmul.mubr.bf16.gmra.mxu0 %v2704_v16 }
 0x474   : > { %v2638_v34 = vadd.f32 %v11110_v43, %v11108_v39 }
 0x475   : > { %8778 = vpow2.f32 %v2540_v60 }
 0x476   : > { %8780 = vpow2.f32 %v2542_v0  ;;  %2639 = vadd.xlane.f32.xlu1 %v2638_v34 }
 0x478   : > { %v2370_v48 = vpop.xlane.xlu1 %2369 }
 0x479   : > { %v2444_v28 = vsub.f32 %v10926_v50, %v2370_v48  ;;  %v2445_v6 = vsub.f32 %v10928_v37, %v2370_v48 }
 0x47a   : > { %v11116_v24 = vpop.eup %8774 }
 0x47b   : > { %v11118_v3 = vpop.eup %8776  ;;  %v2548_v54 = vmul.f32 1.442695, %v2444_v28  ;;  %v2550_v62 = vmul.f32 1.442695, %v2445_v6 }
 0x47c   : > { %v2644_v22 = vadd.f32 %v11118_v3, %v11116_v24 }
 0x47d   : > { %8782 = vpow2.f32 %v2548_v54 }
 0x47e   : > { %8784 = vpow2.f32 %v2550_v62  ;;  %2645 = vadd.xlane.f32.xlu1 %v2644_v22 }
 0x480   : > { %v2376_v63 = vpop.xlane.xlu1 %2375 }
 0x481   : > { %v2448_v9 = vsub.f32 %v10944_v20, %v2376_v63  ;;  %v2449_v41 = vsub.f32 %v10946_v38, %v2376_v63 }
 0x482   : > { %v11124_v50 = vpop.eup %8778 }
 0x483   : > { %v11126_v37 = vpop.eup %8780  ;;  %v2556_v29 = vmul.f32 1.442695, %v2448_v9  ;;  %v2558_v1 = vmul.f32 1.442695, %v2449_v41  ;;  %v7457_v15 = vpop.f32.mrf.mxu0 }
 0x484   : > { %v2650_v14 = vadd.f32 %v11126_v37, %v11124_v50 }
 0x485   : > { %8786 = vpow2.f32 %v2556_v29  ;;  %v7458_v18 = vpop.f32.mrf.mxu0 }
 0x486   : > { %8788 = vpow2.f32 %v2558_v1  ;;  %v11130_v53 = vadd.f32 %v7458_v18, %v7457_v15  ;;  %2651 = vadd.xlane.f32.xlu1 %v2650_v14 }
 0x487   : > { %v11132_v7 = vpop.f32.mrf.mxu0 }
 0x488   : > { %v11148_v10 = vpop.xlane.xlu1 %2381 }
 0x489   : > { %v11134_v20 = vpop.f32.mrf.mxu0 }
 0x48a   : > { %v11136_v38 = vpop.eup %8782 }
 0x48b   : > { %v11138_v36 = vpop.eup %8784  ;;  %v7463_v12 = vpop.f32.mrf.mxu0 }
 0x48c   : > { %v2656_v21 = vadd.f32 %v11138_v36, %v11136_v38 }
 0x48d   : > { %v7464_v35 = vpop.f32.mrf.mxu0 }
 0x48e   : > { %v11144_v56 = vadd.f32 %v7464_v35, %v7463_v12  ;;  %2657 = vadd.xlane.f32.xlu1 %v2656_v21 }
 0x48f   : > { %v11146_v5 = vpop.f32.mrf.mxu0 }
 0x490   : > { %v11158_v57 = vpop.xlane.xlu1 %2387 }
 0x491   : > { %v11150_v26 = vpop.f32.mrf.mxu0  ;;  %v2355_v31 = vpop.xlane.xlu0 %2354 }
 0x492   : > { %v11152_v49 = vpop.eup %8786  ;;  %v2434_v16 = vsub.f32 %v10875_v33, %v2355_v31  ;;  %v2435_v17 = vsub.f32 %v10878_v61, %v2355_v31 }
 0x493   : > { %v11156_v30 = vpop.eup %8788  ;;  %v7469_v25 = vpop.f32.mrf.mxu0 }
 0x494   : > { %v2528_v45 = vmul.f32 1.442695, %v2434_v16  ;;  %v2530_v60 = vmul.f32 1.442695, %v2435_v17  ;;  %v2662_v0 = vadd.f32 %v11156_v30, %v11152_v49 }
 0x495   : > { %v7470_v34 = vpop.f32.mrf.mxu0  ;;  %v2361_v48 = vpop.xlane.xlu0 %2360 }
 0x496   : > { %v11162_v28 = vadd.f32 %v7470_v34, %v7469_v25  ;;  %2663 = vadd.xlane.f32.xlu1 %v2662_v0  ;;  %v2438_v6 = vsub.f32 %v10897_v51, %v2361_v48  ;;  %v2439_v33 = vsub.f32 %v10900_v46, %v2361_v48  ;;  %8790 = vpow2.f32 %v2528_v45  ;;  %v14098_v45 = vld [vmem:[#allocation59_spill] sm:$0xff]  ;;  %v14099_v0 = vld [vmem:[#allocation42_spill] sm:$0xff] }
 0x497   : > { %v11166_v61 = vpop.f32.mrf.mxu0  ;;  %8792 = vpow2.f32 %v2530_v60 }
 0x498   : > { %v2536_v54 = vmul.f32 1.442695, %v2438_v6  ;;  %v2538_v62 = vmul.f32 1.442695, %v2439_v33  ;;  %v2394_v22 = vpop.xlane.xlu1 %2393 }
 0x499   : > { %v11168_v63 = vpop.f32.mrf.mxu0  ;;  %v2460_v9 = vsub.f32 %v11002_v44, %v2394_v22  ;;  %v2461_v41 = vsub.f32 %v11004_v42, %v2394_v22  ;;  %v2367_v29 = vpop.xlane.xlu0 %2366 }
 0x49a   : > { %8794 = vpow2.f32 %v2536_v54  ;;  %v2442_v1 = vsub.f32 %v10916_v27, %v2367_v29  ;;  %v2443_v51 = vsub.f32 %v10918_v4, %v2367_v29 }
 0x49b   : > { %8796 = vpow2.f32 %v2538_v62  ;;  %v2580_v46 = vmul.f32 1.442695, %v2460_v9  ;;  %v2582_v15 = vmul.f32 1.442695, %v2461_v41  ;;  %v7475_v14 = vpop.f32.mrf.mxu0 }
 0x49c   : > { %v2544_v18 = vmul.f32 1.442695, %v2442_v1  ;;  %v2546_v12 = vmul.f32 1.442695, %v2443_v51 }
 0x49d   : > { %8798 = vpow2.f32 %v2580_v46  ;;  %v7476_v21 = vpop.f32.mrf.mxu0  ;;  %v2373_v35 = vpop.xlane.xlu0 %2372 }
 0x49e   : > { %8800 = vpow2.f32 %v2582_v15  ;;  %v11174_v31 = vadd.f32 %v7476_v21, %v7475_v14  ;;  %v2446_v44 = vsub.f32 %v10936_v11, %v2373_v35  ;;  %v2447_v42 = vsub.f32 %v10938_v59, %v2373_v35  ;;  %v14100_v11 = vld [vmem:[#allocation86_spill] sm:$0xff]  ;;  %v14101_v14 = vld [vmem:[#allocation45_spill] sm:$0xff] }
 0x49f   : > { %8802 = vpow2.f32 %v2544_v18  ;;  %v11178_v27 = vpop.f32.mrf.mxu0 }
 0x4a0   : > { %8804 = vpow2.f32 %v2546_v12  ;;  %v2552_v4 = vmul.f32 1.442695, %v2446_v44  ;;  %v2554_v16 = vmul.f32 1.442695, %v2447_v42  ;;  %v2400_v17 = vpop.xlane.xlu1 %2399 }
 0x4a1   : > { %v11180_v25 = vpop.f32.mrf.mxu0  ;;  %v2464_v60 = vsub.f32 %v14098_v45, %v2400_v17  ;;  %v2465_v34 = vsub.f32 %v14099_v0, %v2400_v17  ;;  %v2379_v48 = vpop.xlane.xlu0 %2378 }
 0x4a2   : > { %8806 = vpow2.f32 %v2552_v4  ;;  %v2450_v6 = vsub.f32 %v10954_v2, %v2379_v48  ;;  %v2451_v33 = vsub.f32 %v14100_v11, %v2379_v48 }
 0x4a3   : > { %8808 = vpow2.f32 %v2554_v16  ;;  %v2588_v59 = vmul.f32 1.442695, %v2464_v60  ;;  %v2590_v54 = vmul.f32 1.442695, %v2465_v34  ;;  %v11186_v62 = vpop.f32.mrf.mxu0  ;;  %v8791_v22 = vpop.eup %8790 }
 0x4a4   : > { %v2560_v9 = vmul.f32 1.442695, %v2450_v6  ;;  %v2562_v41 = vmul.f32 1.442695, %v2451_v33  ;;  %v8793_v29 = vpop.eup %8792  ;;  %v2706_v46 = vpack.c.bf16 %v8791_v22, %v11108_v39  ;;  %v14102_v6 = vld [vmem:[#allocation88_spill] sm:$0xff] }
 0x4a5   : > { %8810 = vpow2.f32 %v2588_v59  ;;  %v11188_v1 = vpop.f32.mrf.mxu0  ;;  %v11190_v51 = vpop.xlane.xlu0 %2384  ;;  %v2707_v18 = vpack.c.bf16 %v8793_v29, %v11110_v43  ;;  %v2641_v12 = vadd.f32 %v8793_v29, %v8791_v22  ;;  %v2452_v11 = vsub.f32 %v14102_v6, %v11148_v10  ;;  %v14103_v29 = vld [vmem:[#allocation80_spill] sm:$0xff] }
 0x4a6   : > { %8812 = vpow2.f32 %v2590_v54 }
 0x4a7   : > { %v8795_v2 = vpop.eup %8794  ;;  %8814 = vpow2.f32 %v2560_v9  ;;  %v11193_v15 = vpop.f32.mrf.mxu0  ;;  %3758 = vrot.lane.b32.xlu1 %v14101_v14, %s9367_s14  ;;  %2860 = vmatprep.mubr.bf16.mxu0 %v2707_v18 }
 0x4a8   : > { %v8797_v21 = vpop.eup %8796  ;;  %8816 = vpow2.f32 %v2562_v41  ;;  %2642 = vadd.xlane.f32.xlu0 %v2641_v12  ;;  %2861 = vmatmul.mubr.bf16.gmra.mxu0 %v2706_v46  ;;  %v2453_v46 = vsub.f32 %v14103_v29, %v11148_v10  ;;  %v14105_v29 = vld [vmem:[#allocation61_spill] sm:$0xff] }
 0x4a9   : > { %v11198_v35 = vpop.f32.mrf.mxu0  ;;  %v2391_v44 = vpop.xlane.xlu0 %2390  ;;  %v2709_v42 = vpack.c.bf16 %v8797_v21, %v11118_v3  ;;  %v2647_v39 = vadd.f32 %v8797_v21, %v8795_v2  ;;  %v2708_v21 = vpack.c.bf16 %v8795_v2, %v11116_v24 }
 0x4aa   : > { %v11201_v4 = vpop.eup %8798  ;;  %v2458_v16 = vsub.f32 %v10992_v55, %v2391_v44  ;;  %v2459_v17 = vsub.f32 %v10994_v47, %v2391_v44  ;;  %v2564_v44 = vmul.f32 1.442695, %v2452_v11  ;;  %v2566_v6 = vmul.f32 1.442695, %v2453_v46 }
 0x4ab   : > { %v11205_v45 = vpop.eup %8800  ;;  %v11207_v43 = vpop.f32.mrf.mxu0  ;;  %2868 = vmatprep.mubr.bf16.mxu0 %v2709_v42  ;;  %v2454_v46 = vsub.f32 %v14105_v29, %v11190_v51 }
 0x4ac   : > { %v8803_v60 = vpop.eup %8802  ;;  %v2576_v0 = vmul.f32 1.442695, %v2458_v16  ;;  %v2578_v34 = vmul.f32 1.442695, %v2459_v17  ;;  %v11211_v48 = vadd.f32 %v11205_v45, %v11201_v4  ;;  %2648 = vadd.xlane.f32.xlu0 %v2647_v39 }
 0x4ad   : > { %v8805_v3 = vpop.eup %8804  ;;  %v11215_v55 = vpop.f32.mrf.mxu0 }
 0x4ae   : > { %v2397_v47 = vpop.xlane.xlu0 %2396  ;;  %8818 = vpow2.f32 %v2576_v0  ;;  %v2653_v9 = vadd.f32 %v8805_v3, %v8803_v60  ;;  %v2711_v42 = vpack.c.bf16 %v8805_v3, %v11126_v37  ;;  %v14104_v0 = vld [vmem:[#allocation55_spill] sm:$0xff] }
 0x4af   : > { %v2462_v33 = vsub.f32 %v11014_v23, %v2397_v47  ;;  %v2463_v59 = vsub.f32 %v11016_v40, %v2397_v47  ;;  %v11219_v54 = vpop.eup %8806  ;;  %8820 = vpow2.f32 %v2578_v34  ;;  %v11221_v22 = vpop.f32.mrf.mxu0  ;;  %v2455_v23 = vsub.f32 %v10974_v8, %v11190_v51 }
 0x4b0   : > { %v8809_v41 = vpop.eup %8808  ;;  %2654 = vadd.xlane.f32.xlu0 %v2653_v9  ;;  %2869 = vmatmul.mubr.bf16.gmra.mxu0 %v2708_v21 }
 0x4b1   : > { %v2584_v18 = vmul.f32 1.442695, %v2462_v33  ;;  %v2586_v12 = vmul.f32 1.442695, %v2463_v59  ;;  %v11228_v40 = vpop.f32.mrf.mxu0  ;;  %v2659_v16 = vadd.f32 %v8809_v41, %v11219_v54  ;;  %2876 = vmatprep.mubr.bf16.mxu0 %v2711_v42  ;;  %v2570_v33 = vmul.f32 1.442695, %v2455_v23 }
 0x4b2   : > { %v2403_v39 = vpop.xlane.xlu0 %2402  ;;  %v11232_v17 = vpop.eup %8810  ;;  %v2713_v21 = vpack.c.bf16 %v8809_v41, %v11138_v36  ;;  %v14106_v23 = vld [vmem:[#allocation69_spill] sm:$0xff]  ;;  %v2712_v36 = vpack.c.bf16 %v11219_v54, %v11136_v38 }
 0x4b3   : > { %8822 = vpow2.f32 %v2584_v18  ;;  %v2466_v10 = vsub.f32 %v11048_v52, %v2403_v39  ;;  %v2467_v24 = vsub.f32 %v14104_v0, %v2403_v39  ;;  %v11236_v2 = vpop.eup %8812  ;;  %v11238_v8 = vpop.f32.mrf.mxu0  ;;  %v2710_v18 = vpack.c.bf16 %v8803_v60, %v11124_v50 }
 0x4b4   : > { %8824 = vpow2.f32 %v2586_v12  ;;  %v8815_v34 = vpop.eup %8814  ;;  %v11242_v11 = vadd.f32 %v11236_v2, %v11232_v17  ;;  %2660 = vadd.xlane.f32.xlu0 %v2659_v16  ;;  %v2457_v42 = vsub.f32 %v14106_v23, %v11158_v57 }
 0x4b5   : > { %v2592_v37 = vmul.f32 1.442695, %v2466_v10  ;;  %v2594_v3 = vmul.f32 1.442695, %v2467_v24  ;;  %v8817_v47 = vpop.eup %8816  ;;  %8826 = vpow2.f32 %v2564_v44  ;;  %v11244_v52 = vpop.f32.mrf.mxu0  ;;  %v2568_v10 = vmul.f32 1.442695, %v2454_v46 }
 0x4b6   : > { %v2665_v59 = vadd.f32 %v8817_v47, %v8815_v34  ;;  %v2574_v60 = vmul.f32 1.442695, %v2457_v42 }
 0x4b7   : > { %8828 = vpow2.f32 %v2592_v37  ;;  %v11246_v9 = vpop.f32.mrf.mxu0  ;;  %v2715_v37 = vpack.c.bf16 %v8817_v47, %v11156_v30 }
 0x4b8   : > { %8830 = vpow2.f32 %v2594_v3  ;;  %2666 = vadd.xlane.f32.xlu0 %v2665_v59  ;;  %2877 = vmatmul.mubr.bf16.gmra.mxu0 %v2710_v18  ;;  %v14108_v59 = vld [vmem:[#allocation68_spill] sm:$0xff] }
 0x4b9   : > { %8832 = vpow2.f32 %v2566_v6  ;;  %v11251_v12 = vpop.f32.mrf.mxu0  ;;  %2884 = vmatprep.mubr.bf16.mxu0 %v2713_v21  ;;  %v2456_v29 = vsub.f32 %v14108_v59, %v11158_v57 }
 0x4ba   : > { %8834 = vpow2.f32 %v2570_v33 }
 0x4bb   : > { %v8819_v44 = vpop.eup %8818  ;;  %v11256_v39 = vpop.f32.mrf.mxu0  ;;  %8836 = vpow2.f32 %v2568_v10  ;;  %v2572_v30 = vmul.f32 1.442695, %v2456_v29  ;;  %v2714_v10 = vpack.c.bf16 %v8815_v34, %v11152_v49 }
 0x4bc   : > { %v8821_v16 = vpop.eup %8820  ;;  %8838 = vpow2.f32 %v2574_v60 }
 0x4bd   : > { %v11258_v0 = vpop.f32.mrf.mxu0  ;;  %v11260_v51 = vadd.f32 %v8821_v16, %v8819_v44  ;;  %8840 = vpow2.f32 %v2572_v30 }
 0x4bf   : > { %v11262_v24 = vpop.f32.mrf.mxu0 }
 0x4c0   : > { %v8823_v50 = vpop.eup %8822  ;;  %2885 = vmatmul.mubr.bf16.gmra.mxu0 %v2712_v36 }
 0x4c1   : > { %v8825_v6 = vpop.eup %8824  ;;  %v11266_v41 = vpop.f32.mrf.mxu0  ;;  %2892 = vmatprep.mubr.bf16.mxu0 %v2715_v37 }
 0x4c2   : > { %14107 = vst [vmem:[#allocation32_spill] sm:$0xff] %v11266_v41  ;;  %v11269_v3 = vadd.f32 %v8825_v6, %v8823_v50  ;;  %v8827_v33 = vpop.eup %8826 }
 0x4c3   : > { %v11273_v18 = vpop.f32.mrf.mxu0 }
 0x4c4   : > { %v8829_v46 = vpop.eup %8828 }
 0x4c5   : > { %v8831_v21 = vpop.eup %8830  ;;  %v11275_v42 = vpop.f32.mrf.mxu0 }
 0x4c6   : > { %v8833_v23 = vpop.eup %8832  ;;  %14109 = vst [vmem:[#allocation44_spill] sm:$0xff] %v11275_v42  ;;  %v11277_v38 = vadd.f32 %v8831_v21, %v8829_v46  ;;  %v14114_v42 = vld [vmem:[#allocation26_spill] sm:$0xff] }
 0x4c7   : > { %v8835_v54 = vpop.eup %8834  ;;  %v11279_v47 = vpop.f32.mrf.mxu0  ;;  %v2668_v36 = vadd.f32 %v8833_v23, %v8827_v33 }
 0x4c8   : > { %14110 = vst [vmem:[#allocation34_spill] sm:$0xff] %v11279_v47  ;;  %v2717_v57 = vpack.c.bf16 %v8835_v54, %v8833_v23  ;;  %2893 = vmatmul.mubr.bf16.gmra.mxu0 %v2714_v10  ;;  %v8837_v37 = vpop.eup %8836 }
 0x4c9   : > { %v11282_v41 = vpop.f32.mrf.mxu0  ;;  %v8839_v47 = vpop.eup %8838  ;;  %v2716_v49 = vpack.c.bf16 %v8837_v37, %v8827_v33 }
 0x4ca   : > { %14111 = vst [vmem:[#allocation53_spill] sm:$0xff] %v11282_v41  ;;  %2900 = vmatprep.mubr.bf16.mxu0 %v2717_v57  ;;  %v2719_v41 = vpack.c.bf16 %v8821_v16, %v8839_v47  ;;  %v8841_v10 = vpop.eup %8840  ;;  %v14121_v16 = vld [vmem:[#allocation50_spill] sm:$0xff] }
 0x4cb   : > { %v11284_v60 = vpop.f32.mrf.mxu0  ;;  %2669 = vadd.xlane.f32.xlu1 %v2668_v36  ;;  %v2718_v36 = vpack.c.bf16 %v8819_v44, %v8841_v10  ;;  %v2723_v44 = vpack.c.bf16 %v8831_v21, %v11236_v2 }
 0x4cc   : > { %14112 = vst [vmem:[#allocation64_spill] sm:$0xff] %v11284_v60  ;;  %v2721_v60 = vpack.c.bf16 %v8825_v6, %v11205_v45 }
 0x4cd   : > { %v11286_v59 = vpop.f32.mrf.mxu0 }
 0x4ce   : > { %14113 = vst [vmem:[#allocation40_spill] sm:$0xff] %v11286_v59  ;;  %3726 = vrot.lane.b32.xlu0 %v14114_v42, %s9367_s14 }
 0x4cf   : > { %v11290_v29 = vpop.f32.mrf.mxu0 }
 0x4d0   : > { %2901 = vmatmul.mubr.bf16.gmra.mxu0 %v2716_v49 }
 0x4d1   : > { %v11292_v34 = vpop.f32.mrf.mxu0  ;;  %2908 = vmatprep.mubr.bf16.mxu0 %v2719_v41 }
 0x4d2   : > { %14115 = vst [vmem:[#allocation41_spill] sm:$0xff] %v11292_v34 }
 0x4d3   : > { %v11294_v23 = vpop.f32.mrf.mxu0 }
 0x4d4   : > { %14116 = vst [vmem:[#allocation43_spill] sm:$0xff] %v11294_v23 }
 0x4d5   : > { %v11296_v30 = vpop.f32.mrf.mxu0 }
 0x4d6   : > { %14117 = vst [vmem:[#allocation89_spill] sm:$0xff] %v11296_v30  ;;  %v2720_v30 = vpack.c.bf16 %v8823_v50, %v11201_v4 }
 0x4d7   : > { %v11298_v57 = vpop.f32.mrf.mxu0 }
 0x4d8   : > { %14118 = vst [vmem:[#allocation91_spill] sm:$0xff] %v11298_v57  ;;  %2909 = vmatmul.mubr.bf16.gmra.mxu0 %v2718_v36  ;;  %v14144_v57 = vld [vmem:[#allocation66_spill] sm:$0xff] }
 0x4d9   : > { %v11300_v59 = vpop.f32.mrf.mxu0  ;;  %2916 = vmatprep.mubr.bf16.mxu0 %v2721_v60 }
 0x4da   : > { %14119 = vst [vmem:[#allocation94_spill] sm:$0xff] %v11300_v59 }
 0x4db   : > { %v11303_v33 = vpop.f32.mrf.mxu0 }
 0x4dc   : > { %14120 = vst [vmem:[#allocation95_spill] sm:$0xff] %v11303_v33  ;;  %3756 = vrot.lane.b32.xlu1 %v14121_v16, %s9367_s14  ;;  %v2722_v33 = vpack.c.bf16 %v8829_v46, %v11232_v17 }
 0x4dd   : > { %v11307_v41 = vpop.f32.mrf.mxu0 }
 0x4de   : > { %14122 = vst [vmem:[#allocation75_spill] sm:$0xff] %v11307_v41  ;;  %v2671_v41 = vadd.f32 %v8837_v37, %v8835_v54  ;;  %v2601_v54 = vpop.xlane.xlu0 %2600 }
 0x4df   : > { %v11309_v49 = vpop.f32.mrf.mxu0 }
 0x4e0   : > { %14123 = vst [vmem:[#allocation96_spill] sm:$0xff] %v11309_v49  ;;  %2917 = vmatmul.mubr.bf16.gmra.mxu0 %v2720_v30  ;;  %v2598_v30 = vpop.xlane.xlu1 %2597 }
 0x4e1   : > { %v11312_v23 = vpop.f32.mrf.mxu0  ;;  %2924 = vmatprep.mubr.bf16.mxu0 %v2723_v44  ;;  %8842 = vrcp.f32 %v2598_v30  ;;  %v14137_v30 = vld [vmem:[#allocation9_spill] sm:$0xff] }
 0x4e2   : > { %14124 = vst [vmem:[#allocation85_spill] sm:$0xff] %v11312_v23  ;;  %8844 = vrcp.f32 %v2601_v54 }
 0x4e3   : > { %v7529_v45 = vpop.f32.mrf.mxu0 }
 0x4e5   : > { %v7530_v6 = vpop.f32.mrf.mxu0 }
 0x4e6   : > { %v11315_v60 = vadd.f32 %v7530_v6, %v7529_v45 }
 0x4e7   : > { %v11317_v36 = vpop.f32.mrf.mxu0 }
 0x4e8   : > { %14125 = vst [vmem:[#allocation98_spill] sm:$0xff] %v11315_v60  ;;  %14126 = vst [vmem:[#allocation90_spill] sm:$0xff] %v11317_v36  ;;  %2925 = vmatmul.mubr.bf16.gmra.mxu0 %v2722_v33  ;;  %v2604_v36 = vpop.xlane.xlu1 %2603 }
 0x4e9   : > { %v11320_v59 = vpop.f32.mrf.mxu0  ;;  %8846 = vrcp.f32 %v2604_v36 }
 0x4ea   : > { %14127 = vst [vmem:[#allocation59_spill] sm:$0xff] %v11320_v59 }
 0x4eb   : > { %v7535_v49 = vpop.f32.mrf.mxu0 }
 0x4ec   : > { %v2610_v37 = vpop.xlane.xlu1 %2609 }
 0x4ed   : > { %v7536_v4 = vpop.f32.mrf.mxu0  ;;  %2672 = vadd.xlane.f32.xlu0 %v2671_v41 }
 0x4ee   : > { %v11322_v50 = vadd.f32 %v7536_v4, %v7535_v49  ;;  %v2674_v4 = vadd.f32 %v8841_v10, %v8839_v47  ;;  %v8843_v54 = vpop.eup %8842 }
 0x4ef   : > { %v11324_v2 = vpop.f32.mrf.mxu0  ;;  %v8845_v36 = vpop.eup %8844 }
 0x4f0   : > { %14128 = vst [vmem:[#allocation42_spill] sm:$0xff] %v11322_v50  ;;  %14129 = vst [vmem:[#allocation86_spill] sm:$0xff] %v11324_v2 }
 0x4f1   : > { %v11326_v21 = vpop.f32.mrf.mxu0 }
 0x4f2   : > { %14130 = vst [vmem:[#allocation88_spill] sm:$0xff] %v11326_v21  ;;  %v2616_v21 = vpop.xlane.xlu1 %2615 }
 0x4f3   : > { %v7541_v44 = vpop.f32.mrf.mxu0 }
 0x4f5   : > { %v7542_v45 = vpop.f32.mrf.mxu0 }
 0x4f6   : > { %v11328_v6 = vadd.f32 %v7542_v45, %v7541_v44  ;;  %v2607_v45 = vpop.xlane.xlu0 %2606 }
 0x4f7   : > { %v11330_v17 = vpop.f32.mrf.mxu0  ;;  %8848 = vrcp.f32 %v2607_v45 }
 0x4f8   : > { %14131 = vst [vmem:[#allocation80_spill] sm:$0xff] %v11328_v6  ;;  %14132 = vst [vmem:[#allocation55_spill] sm:$0xff] %v11330_v17  ;;  %v2622_v17 = vpop.xlane.xlu1 %2621  ;;  %8850 = vrcp.f32 %v2610_v37 }
 0x4f9   : > { %v11332_v46 = vpop.f32.mrf.mxu0 }
 0x4fa   : > { %14133 = vst [vmem:[#allocation61_spill] sm:$0xff] %v11332_v46 }
 0x4fb   : > { %v7547_v33 = vpop.f32.mrf.mxu0 }
 0x4fd   : > { %v7548_v41 = vpop.f32.mrf.mxu0 }
 0x4fe   : > { %v11334_v49 = vadd.f32 %v7548_v41, %v7547_v33  ;;  %v2628_v33 = vpop.xlane.xlu1 %2627 }
 0x4ff   : > { %v11336_v2 = vpop.f32.mrf.mxu0 }
 0x500   : > { %14134 = vst [vmem:[#allocation69_spill] sm:$0xff] %v11334_v49  ;;  %14135 = vst [vmem:[#allocation68_spill] sm:$0xff] %v11336_v2  ;;  %2675 = vadd.xlane.f32.xlu1 %v2674_v4  ;;  %v2613_v2 = vpop.xlane.xlu0 %2612 }
 0x501   : > { %v11338_v44 = vpop.f32.mrf.mxu0  ;;  %8852 = vrcp.f32 %v2613_v2 }
 0x502   : > { %14136 = vst [vmem:[#allocation111_spill] sm:$0xff] %v11338_v44  ;;  %v11343_v44 = vpop.xlane.xlu1 %2633  ;;  %8854 = vrcp.f32 %v2616_v21 }
 0x503   : > { %v7665_v6 = vpop.f32.mrf.mxu0  ;;  %3724 = vrot.lane.b32.xlu0 %v14137_v30, %s9367_s14 }
 0x504   : > { %v2619_v2 = vpop.xlane.xlu0 %2618 }
 0x505   : > { %v7666_v46 = vpop.f32.mrf.mxu0  ;;  %8856 = vrcp.f32 %v2619_v2 }
 0x506   : > { %v7667_v50 = vadd.f32 %v7666_v46, %v7665_v6  ;;  %v8847_v6 = vpop.eup %8846  ;;  %v11346_v46 = vpop.xlane.xlu1 %2639  ;;  %8858 = vrcp.f32 %v2622_v17 }
 0x507   : > { %v7668_v41 = vpop.f32.mrf.mxu0 }
 0x508   : > { %v2965_v47 = vmul.f32 %v8843_v54, %v7667_v50  ;;  %v14138_v50 = vld [vmem:[#allocation35_spill] sm:$0xff]  ;;  %v14139_v54 = vld [vmem:[#allocation74_spill] sm:$0xff] }
 0x509   : > { %v7669_v10 = vpop.f32.mrf.mxu0 }
 0x50a   : > { %v7670_v4 = vadd.f32 %v7669_v10, %v7668_v41  ;;  %8367 = vmatprep.mubr.msk.f32.mxu1 %vm687_vm1, %v2965_v47  ;;  %v14140_v47 = vld [vmem:[#allocation30_spill] sm:$0xff]  ;;  %v14141_v10 = vld [vmem:[#allocation84_spill] sm:$0xff] }
 0x50b   : > { %v7671_v49 = vpop.f32.mrf.mxu0 }
 0x50c   : > { %v2966_v59 = vmul.f32 %v8845_v36, %v7670_v4  ;;  %v14142_v36 = vld [vmem:[#allocation47_spill] sm:$0xff] }
 0x50d   : > { %v7672_v60 = vpop.f32.mrf.mxu0 }
 0x50e   : > { %v7673_v23 = vadd.f32 %v7672_v60, %v7671_v49  ;;  %8368 = vmatmul.mubr.msk.f32.vlgmr.msra.gmra.mxu1 %vm687_vm1, %v2966_v59  ;;  %v8849_v59 = vpop.eup %8848  ;;  %v11355_v49 = vpop.xlane.xlu1 %2645 }
 0x50f   : > { %7828 = vmatpush3.xpose.msk.msra.mxu1 %vm687_vm1, %v14138_v50  ;;  %v7674_v37 = vpop.f32.mrf.mxu0  ;;  %v8851_v21 = vpop.eup %8850 }
 0x510   : > { %v2967_v45 = vmul.f32 %v8847_v6, %v7673_v23  ;;  %7829 = vmatprep.subr.msk.mxu1 %vm687_vm1, %v14139_v54  ;;  %v8853_v2 = vpop.eup %8852 }
 0x511   : > { %v7675_v41 = vpop.f32.mrf.mxu0  ;;  %3754 = vrot.lane.b32.xlu1 %v14140_v47, %s9367_s14 }
 0x512   : > { %v7676_v60 = vadd.f32 %v7675_v41, %v7674_v37  ;;  %8370 = vmatprep.mubr.msk.f32.mxu1 %vm687_vm1, %v2967_v45  ;;  %v11362_v37 = vpop.xlane.xlu1 %2651  ;;  %v14143_v45 = vld [vmem:[#allocation57_spill] sm:$0xff] }
 0x513   : > { %7830 = vmatpush3.xpose.msk.msra.mxu1 %vm687_vm1, %v14141_v10  ;;  %v7677_v4 = vpop.f32.mrf.mxu0 }
 0x514   : > { %v2968_v23 = vmul.f32 %v8849_v59, %v7676_v60  ;;  %7831 = vmatprep.subr.msk.mxu1 %vm687_vm1, %v14142_v36  ;;  %v2625_v59 = vpop.xlane.xlu0 %2624 }
 0x515   : > { %v7678_v6 = vpop.f32.mrf.mxu0  ;;  %8860 = vrcp.f32 %v2625_v59 }
 0x516   : > { %v7679_v50 = vadd.f32 %v7678_v6, %v7677_v4  ;;  %8371 = vmatmul.mubr.msk.f32.gmra.mxu1 %vm687_vm1, %v2968_v23  ;;  %8862 = vrcp.f32 %v2628_v33 }
 0x517   : > { %7832 = vmatpush3.xpose.msk.msra.mxu1 %vm687_vm1, %v14143_v45  ;;  %v7680_v54 = vpop.f32.mrf.mxu0  ;;  %v11369_v4 = vpop.xlane.xlu1 %2657 }
 0x518   : > { %v2969_v41 = vmul.f32 %v8851_v21, %v7679_v50  ;;  %7833 = vmatprep.subr.msk.mxu1 %vm687_vm1, %v14144_v57  ;;  %v8855_v57 = vpop.eup %8854 }
 0x519   : > { %v7681_v60 = vpop.f32.mrf.mxu0  ;;  %v8857_v34 = vpop.eup %8856 }
 0x51a   : > { %v7682_v10 = vadd.f32 %v7681_v60, %v7680_v54  ;;  %8373 = vmatprep.mubr.msk.f32.mxu1 %vm687_vm1, %v2969_v41  ;;  %v2631_v41 = vpop.xlane.xlu0 %2630 }
 0x51b   : > { %7834 = vmatpush3.xpose.msk.msra.mxu1 %vm687_vm1, %v11142_v19  ;;  %v7683_v23 = vpop.f32.mrf.mxu0  ;;  %8864 = vrcp.f32 %v2631_v41 }
 0x51c   : > { %v2970_v36 = vmul.f32 %v8853_v2, %v7682_v10  ;;  %8866 = vrcp.f32 %v11343_v44 }
 0x51d   : > { %v7684_v6 = vpop.f32.mrf.mxu0 }
 0x51e   : > { %v7685_v50 = vadd.f32 %v7684_v6, %v7683_v23  ;;  %8374 = vmatmul.mubr.msk.f32.gmra.mxu1 %vm687_vm1, %v2970_v36  ;;  %v8859_v36 = vpop.eup %8858 }
 0x51f   : > { %v7686_v21 = vpop.f32.mrf.mxu0  ;;  %v11374_v17 = vpop.xlane.xlu1 %2663 }
 0x520   : > { %v2971_v45 = vmul.f32 %v8855_v57, %v7685_v50 }
 0x521   : > { %v7687_v54 = vpop.f32.mrf.mxu0 }
 0x522   : > { %v7688_v60 = vadd.f32 %v7687_v54, %v7686_v21  ;;  %8376 = vmatprep.mubr.msk.f32.mxu1 %vm687_vm1, %v2971_v45  ;;  %2678 = vadd.xlane.f32.xlu0 %v11260_v51  ;;  %v8861_v51 = vpop.eup %8860  ;;  %v2637_v21 = vpop.xlane.xlu0 %2636 }
 0x523   : > { %v7689_v19 = vpop.f32.mrf.mxu0  ;;  %v3759_v10 = vpop.permute.xlu1 %3758  ;;  %8868 = vrcp.f32 %v2637_v21 }
 0x524   : > { %v2972_v59 = vmul.f32 %v8857_v34, %v7688_v60  ;;  %7835 = vmatprep.subr.msk.mxu1 %vm687_vm1, %v3759_v10  ;;  %v8863_v41 = vpop.eup %8862  ;;  %8870 = vrcp.f32 %v11346_v46 }
 0x525   : > { %v7690_v2 = vpop.f32.mrf.mxu0 }
 0x526   : > { %v7691_v23 = vadd.f32 %v7690_v2, %v7689_v19  ;;  %8377 = vmatmul.mubr.msk.f32.gmra.mxu1 %vm687_vm1, %v2972_v59 }
 0x527   : > { %v7692_v6 = vpop.f32.mrf.mxu0 }
 0x528   : > { %v2973_v33 = vmul.f32 %v8859_v36, %v7691_v23  ;;  %v8865_v44 = vpop.eup %8864 }
 0x529   : > { %v7693_v50 = vpop.f32.mrf.mxu0 }
 0x52a   : > { %v7694_v57 = vadd.f32 %v7693_v50, %v7692_v6  ;;  %8379 = vmatprep.mubr.msk.f32.mxu1 %vm687_vm1, %v2973_v33 }
 0x52b   : > { %v7695_v45 = vpop.f32.mrf.mxu0 }
 0x52c   : > { %v2974_v34 = vmul.f32 %v8861_v51, %v7694_v57  ;;  %v8867_v51 = vpop.eup %8866 }
 0x52d   : > { %v7696_v54 = vpop.f32.mrf.mxu0 }
 0x52e   : > { %v7697_v60 = vadd.f32 %v7696_v54, %v7695_v45  ;;  %8380 = vmatmul.mubr.msk.f32.gmra.mxu1 %vm687_vm1, %v2974_v34  ;;  %v14145_v34 = vld [vmem:[#allocation21_spill] sm:$0xff] }
 0x52f   : > { %v7698_v19 = vpop.f32.mrf.mxu0 }
 0x530   : > { %v2975_v10 = vmul.f32 %v8863_v41, %v7697_v60 }
 0x531   : > { %v7699_v59 = vpop.f32.mrf.mxu0  ;;  %v2643_v2 = vpop.xlane.xlu0 %2642 }
 0x532   : > { %v7700_v23 = vadd.f32 %v7699_v59, %v7698_v19  ;;  %8382 = vmatprep.mubr.msk.f32.mxu1 %vm687_vm1, %v2975_v10  ;;  %v8869_v19 = vpop.eup %8868  ;;  %8872 = vrcp.f32 %v2643_v2 }
 0x533   : > { %v7701_v36 = vpop.f32.mrf.mxu0  ;;  %8874 = vrcp.f32 %v11355_v49 }
 0x534   : > { %v2976_v6 = vmul.f32 %v8865_v44, %v7700_v23  ;;  %v14146_v44 = vld [vmem:[#allocation39_spill] sm:$0xff] }
 0x535   : > { %2681 = vadd.xlane.f32.xlu1 %v11211_v48  ;;  %v7702_v33 = vpop.f32.mrf.mxu0  ;;  %v2649_v50 = vpop.xlane.xlu0 %2648 }
 0x536   : > { %v7703_v57 = vadd.f32 %v7702_v33, %v7701_v36  ;;  %8383 = vmatmul.mubr.msk.f32.gmra.mxu1 %vm687_vm1, %v2976_v6  ;;  %8876 = vrcp.f32 %v2649_v50 }
 0x537   : > { %v7704_v21 = vpop.f32.mrf.mxu0  ;;  %8878 = vrcp.f32 %v11362_v37 }
 0x538   : > { %v2977_v45 = vmul.f32 %v8867_v51, %v7703_v57  ;;  %3722 = vrot.lane.b32.xlu0 %v14145_v34, %s9367_s14 }
 0x539   : > { %v7705_v54 = vpop.f32.mrf.mxu0  ;;  %v2655_v60 = vpop.xlane.xlu0 %2654 }
 0x53a   : > { %v7706_v41 = vadd.f32 %v7705_v54, %v7704_v21  ;;  %8385 = vmatprep.mubr.msk.f32.mxu1 %vm687_vm1, %v2977_v45  ;;  %v8871_v21 = vpop.eup %8870  ;;  %v14147_v54 = vld [vmem:[#allocation7_spill] sm:$0xff]  ;;  %8880 = vrcp.f32 %v2655_v60 }
 0x53b   : > { %8882 = vrcp.f32 %v11369_v4 }
 0x53c   : > { %v2978_v10 = vmul.f32 %v8869_v19, %v7706_v41 }
 0x53d   : > { %v2661_v59 = vpop.xlane.xlu0 %2660 }
 0x53e   : > { %8386 = vmatmul.mubr.msk.f32.gmra.mxu1 %vm687_vm1, %v2978_v10  ;;  %8884 = vrcp.f32 %v2661_v59  ;;  %v14150_v59 = vld [vmem:[#allocation6_spill] sm:$0xff] }
 0x53f   : > { %v8873_v46 = vpop.eup %8872  ;;  %8886 = vrcp.f32 %v11374_v17 }
 0x540   : > { %v8875_v50 = vpop.eup %8874 }
 0x541   : > { %v2667_v48 = vpop.xlane.xlu0 %2666 }
 0x542   : > { %8888 = vrcp.f32 %v2667_v48  ;;  %v14152_v48 = vld [vmem:[#allocation5_spill] sm:$0xff] }
 0x543   : > { %v8877_v37 = vpop.eup %8876 }
 0x545   : > { %v3727_v23 = vpop.permute.xlu0 %3726 }
 0x546   : > { %3752 = vrot.lane.b32.xlu1 %v14146_v44, %s9367_s14  ;;  %7836 = vmatpush3.xpose.msk.msra.mxu1 %vm687_vm1, %v3727_v23 }
 0x554   : > { %v11393_v36 = vpop.xlane.xlu1 %2669 }
 0x555   : > { %8890 = vrcp.f32 %v11393_v36 }
 0x557   : > { %2684 = vadd.xlane.f32.xlu0 %v11269_v3 }
 0x558   : > { %v3757_v6 = vpop.permute.xlu1 %3756 }
 0x559   : > { %7837 = vmatprep.subr.msk.mxu1 %vm687_vm1, %v3757_v6 }
 0x568   : > { %v7707_v33 = vpop.f32.mrf.mxu0 }
 0x56a   : > { %2687 = vadd.xlane.f32.xlu1 %v11242_v11  ;;  %v7708_v57 = vpop.f32.mrf.mxu0 }
 0x56b   : > { %v7709_v51 = vadd.f32 %v7708_v57, %v7707_v33 }
 0x56c   : > { %v7710_v45 = vpop.f32.mrf.mxu0 }
 0x56d   : > { %3720 = vrot.lane.b32.xlu0 %v14147_v54, %s9367_s14  ;;  %v2979_v3 = vmul.f32 %v8871_v21, %v7709_v51 }
 0x56e   : > { %v7711_v41 = vpop.f32.mrf.mxu0 }
 0x56f   : > { %v7712_v19 = vadd.f32 %v7711_v41, %v7710_v45  ;;  %8388 = vmatprep.mubr.msk.f32.mxu1 %vm687_vm1, %v2979_v3  ;;  %v14148_v41 = vld [vmem:[#allocation23_spill] sm:$0xff] }
 0x570   : > { %v7713_v49 = vpop.f32.mrf.mxu0 }
 0x571   : > { %v2980_v2 = vmul.f32 %v8873_v46, %v7712_v19  ;;  %v8879_v46 = vpop.eup %8878 }
 0x572   : > { %v7714_v10 = vpop.f32.mrf.mxu0 }
 0x573   : > { %v7715_v11 = vadd.f32 %v7714_v10, %v7713_v49  ;;  %8389 = vmatmul.mubr.msk.f32.gmra.mxu1 %vm687_vm1, %v2980_v2  ;;  %v14149_v2 = vld [vmem:[#allocation27_spill] sm:$0xff] }
 0x574   : > { %v7716_v23 = vpop.f32.mrf.mxu0 }
 0x575   : > { %v2981_v6 = vmul.f32 %v8875_v50, %v7715_v11  ;;  %v8881_v50 = vpop.eup %8880 }
 0x576   : > { %v2673_v33 = vpop.xlane.xlu0 %2672  ;;  %v7717_v57 = vpop.f32.mrf.mxu0 }
 0x577   : > { %v7718_v51 = vadd.f32 %v7717_v57, %v7716_v23  ;;  %8391 = vmatprep.mubr.msk.f32.mxu1 %vm687_vm1, %v2981_v6  ;;  %8892 = vrcp.f32 %v2673_v33 }
 0x578   : > { %v7719_v21 = vpop.f32.mrf.mxu0 }
 0x579   : > { %v2982_v45 = vmul.f32 %v8877_v37, %v7718_v51  ;;  %v8883_v37 = vpop.eup %8882 }
 0x57a   : > { %v3725_v3 = vpop.permute.xlu0 %3724  ;;  %v7720_v60 = vpop.f32.mrf.mxu0 }
 0x57b   : > { %3750 = vrot.lane.b32.xlu1 %v14148_v41, %s9367_s14  ;;  %7838 = vmatpush3.xpose.msk.msra.mxu1 %vm687_vm1, %v3725_v3  ;;  %v7721_v19 = vadd.f32 %v7720_v60, %v7719_v21  ;;  %v14151_v3 = vld [vmem:[#allocation14_spill] sm:$0xff] }
 0x57c   : > { %8392 = vmatmul.mubr.msk.f32.gmra.mxu1 %vm687_vm1, %v2982_v45  ;;  %v7722_v49 = vpop.f32.mrf.mxu0 }
 0x57d   : > { %v2983_v4 = vmul.f32 %v8879_v46, %v7721_v19  ;;  %v8885_v46 = vpop.eup %8884 }
 0x57e   : > { %v7723_v10 = vpop.f32.mrf.mxu0 }
 0x57f   : > { %3748 = vrot.lane.b32.xlu1 %v14149_v2, %s9367_s14  ;;  %v7724_v11 = vadd.f32 %v7723_v10, %v7722_v49  ;;  %8394 = vmatprep.mubr.msk.f32.mxu1 %vm687_vm1, %v2983_v4 }
 0x580   : > { %v7725_v23 = vpop.f32.mrf.mxu0 }
 0x581   : > { %v2984_v6 = vmul.f32 %v8881_v50, %v7724_v11 }
 0x582   : > { %v7726_v57 = vpop.f32.mrf.mxu0 }
 0x583   : > { %3716 = vrot.lane.b32.xlu1 %v14150_v59, %s9367_s14  ;;  %v7727_v51 = vadd.f32 %v7726_v57, %v7725_v23  ;;  %8395 = vmatmul.mubr.msk.f32.gmra.mxu1 %vm687_vm1, %v2984_v6  ;;  %v8887_v23 = vpop.eup %8886  ;;  %v14153_v57 = vld [vmem:[#allocation8_spill] sm:$0xff] }
 0x584   : > { %v7728_v21 = vpop.f32.mrf.mxu0  ;;  %v8889_v33 = vpop.eup %8888 }
 0x585   : > { %v2985_v45 = vmul.f32 %v8883_v37, %v7727_v51 }
 0x586   : > { %v7729_v17 = vpop.f32.mrf.mxu0 }
 0x587   : > { %3714 = vrot.lane.b32.xlu1 %v14151_v3, %s9367_s14  ;;  %v7730_v60 = vadd.f32 %v7729_v17, %v7728_v21  ;;  %8397 = vmatprep.mubr.msk.f32.mxu1 %vm687_vm1, %v2985_v45 }
 0x588   : > { %v7731_v49 = vpop.f32.mrf.mxu0 }
 0x589   : > { %v2676_v19 = vpop.xlane.xlu1 %2675  ;;  %v2986_v4 = vmul.f32 %v8885_v46, %v7730_v60  ;;  %v8891_v46 = vpop.eup %8890 }
 0x58a   : > { %v7732_v10 = vpop.f32.mrf.mxu0  ;;  %8894 = vrcp.f32 %v2676_v19 }
 0x58b   : > { %3712 = vrot.lane.b32.xlu1 %v14152_v48, %s9367_s14  ;;  %v7733_v11 = vadd.f32 %v7732_v10, %v7731_v49  ;;  %8398 = vmatmul.mubr.msk.f32.gmra.mxu1 %vm687_vm1, %v2986_v4  ;;  %v14155_v10 = vld [vmem:[#allocation2_spill] sm:$0xff] }
 0x58c   : > { %2690 = vadd.xlane.f32.xlu0 %v11277_v38  ;;  %v7734_v36 = vpop.f32.mrf.mxu0  ;;  %v14154_v38 = vld [vmem:[#allocation4_spill] sm:$0xff] }
 0x58d   : > { %v3755_v50 = vpop.permute.xlu1 %3754  ;;  %v2987_v6 = vmul.f32 %v8887_v23, %v7733_v11 }
 0x58e   : > { %7839 = vmatprep.subr.msk.mxu1 %vm687_vm1, %v3755_v50  ;;  %v7735_v51 = vpop.f32.mrf.mxu0  ;;  %v8893_v50 = vpop.eup %8892 }
 0x58f   : > { %3710 = vrot.lane.b32.xlu1 %v14153_v57, %s9367_s14  ;;  %v7736_v37 = vadd.f32 %v7735_v51, %v7734_v36  ;;  %8400 = vmatprep.mubr.msk.f32.mxu1 %vm687_vm1, %v2987_v6  ;;  %v14156_v6 = vld [vmem:[#allocation3_spill] sm:$0xff] }
 0x590   : > { %v7737_v21 = vpop.f32.mrf.mxu0 }
 0x591   : > { %v2988_v45 = vmul.f32 %v8889_v33, %v7736_v37 }
 0x592   : > { %v7738_v17 = vpop.f32.mrf.mxu0 }
 0x593   : > { %3708 = vrot.lane.b32.xlu1 %v14154_v38, %s9367_s14  ;;  %v7739_v60 = vadd.f32 %v7738_v17, %v7737_v21  ;;  %8401 = vmatmul.mubr.msk.f32.gmra.mxu1 %vm687_vm1, %v2988_v45  ;;  %v14157_v45 = vld [vmem:[#allocation17_spill] sm:$0xff]  ;;  %v14158_v17 = vld [vmem:[#allocation20_spill] sm:$0xff] }
 0x594   : > { %v7740_v49 = vpop.f32.mrf.mxu0 }
 0x595   : > { %v2989_v4 = vmul.f32 %v8891_v46, %v7739_v60  ;;  %v14159_v60 = vld [vmem:[#allocation22_spill] sm:$0xff] }
 0x596   : > { %v7741_v19 = vpop.f32.mrf.mxu0 }
 0x597   : > { %3706 = vrot.lane.b32.xlu1 %v14155_v10, %s9367_s14  ;;  %v7742_v11 = vadd.f32 %v7741_v19, %v7740_v49  ;;  %8403 = vmatprep.mubr.msk.f32.mxu1 %vm687_vm1, %v2989_v4  ;;  %v8895_v33 = vpop.eup %8894  ;;  %v14160_v49 = vld [vmem:[#allocation16_spill] sm:$0xff] }
 0x598   : > { %v7743_v23 = vpop.f32.mrf.mxu0 }
 0x599   : > { %v2990_v36 = vmul.f32 %v8893_v50, %v7742_v11  ;;  %v14161_v11 = vld [vmem:[#allocation18_spill] sm:$0xff] }
 0x59a   : > { %v7744_v51 = vpop.f32.mrf.mxu0 }
 0x59b   : > { %3704 = vrot.lane.b32.xlu1 %v14156_v6, %s9367_s14  ;;  %v7745_v37 = vadd.f32 %v7744_v51, %v7743_v23  ;;  %8404 = vmatmul.mubr.msk.f32.gmra.mxu1 %vm687_vm1, %v2990_v36  ;;  %v14162_v23 = vld [vmem:[#allocation13_spill] sm:$0xff] }
 0x59c   : > { %v7746_v19 = vpop.f32.mrf.mxu0  ;;  %v14163_v36 = vld [vmem:[#allocation37_spill] sm:$0xff] }
 0x59d   : > { %v2991_v21 = vmul.f32 %v8895_v33, %v7745_v37  ;;  %v14164_v33 = vld [vmem:[#allocation15_spill] sm:$0xff] }
 0x59e   : > { %v7747_v50 = vpop.f32.mrf.mxu0 }
 0x59f   : > { %3642 = vrot.lane.b32.xlu1 %v14155_v10, %s9368_s17  ;;  %8406 = vmatprep.mubr.msk.f32.mxu1 %vm687_vm1, %v2991_v21  ;;  %v7748_v51 = vadd.f32 %v7747_v50, %v7746_v19  ;;  %v14165_v21 = vld [vmem:[#allocation11_spill] sm:$0xff] }
 0x5a0   : > { %v7749_v19 = vpop.f32.mrf.mxu0 }
 0x5a2   : > { %3718 = vrot.lane.b32.xlu0 %v14157_v45, %s9367_s14  ;;  %v7750_v50 = vpop.f32.mrf.mxu0 }
 0x5a3   : > { %3646 = vrot.lane.b32.xlu1 %v14153_v57, %s9368_s17  ;;  %v14176_v57 = vld [vmem:[#allocation107_spill] sm:$0xff] }
 0x5a6   : > { %3746 = vrot.lane.b32.xlu0 %v14158_v17, %s9367_s14 }
 0x5a7   : > { %3650 = vrot.lane.b32.xlu1 %v14151_v3, %s9368_s17  ;;  %v14177_v3 = vld [vmem:[#allocation109_spill] sm:$0xff] }
 0x5aa   : > { %3744 = vrot.lane.b32.xlu0 %v14159_v60, %s9367_s14 }
 0x5ab   : > { %3654 = vrot.lane.b32.xlu1 %v14157_v45, %s9368_s17  ;;  %v2679_v46 = vpop.xlane.xlu0 %2678  ;;  %v14185_v45 = vld [vmem:[#allocation102_spill] sm:$0xff] }
 0x5ac   : > { %8896 = vrcp.f32 %v2679_v46 }
 0x5ae   : > { %3742 = vrot.lane.b32.xlu0 %v14160_v49, %s9367_s14 }
 0x5af   : > { %3658 = vrot.lane.b32.xlu1 %v14145_v34, %s9368_s17  ;;  %v3723_v4 = vpop.permute.xlu0 %3722 }
 0x5b0   : > { %7840 = vmatpush3.xpose.msk.msra.mxu1 %vm687_vm1, %v3723_v4 }
 0x5b2   : > { %3740 = vrot.lane.b32.xlu0 %v14161_v11, %s9367_s14 }
 0x5b3   : > { %3662 = vrot.lane.b32.xlu1 %v14114_v42, %s9368_s17 }
 0x5b6   : > { %3738 = vrot.lane.b32.xlu0 %v14162_v23, %s9367_s14 }
 0x5b7   : > { %3666 = vrot.lane.b32.xlu1 %v14163_v36, %s9368_s17 }
 0x5b9   : > { %v8897_v37 = vpop.eup %8896 }
 0x5ba   : > { %3736 = vrot.lane.b32.xlu0 %v14164_v33, %s9367_s14  ;;  %v2992_v46 = vmul.f32 %v8897_v37, %v7748_v51  ;;  %v7751_v51 = vadd.f32 %v7750_v50, %v7749_v19  ;;  %v14168_v19 = vld [vmem:[#allocation12_spill] sm:$0xff]  ;;  %v14169_v50 = vld [vmem:[#allocation67_spill] sm:$0xff] }
 0x5bb   : > { %3670 = vrot.lane.b32.xlu1 %v14165_v21, %s9368_s17 }
 0x5bc   : > { %8407 = vmatmul.mubr.msk.f32.gmra.mxu1 %vm687_vm1, %v2992_v46 }
 0x5be   : > { %v2682_v4 = vpop.xlane.xlu1 %2681  ;;  %3640 = vrot.lane.b32.xlu0 %v14156_v6, %s9368_s17  ;;  %v14174_v6 = vld [vmem:[#allocation103_spill] sm:$0xff] }
 0x5bf   : > { %8898 = vrcp.f32 %v2682_v4  ;;  %3674 = vrot.lane.b32.xlu1 %v14162_v23, %s9368_s17  ;;  %v14167_v4 = vld [vmem:[#allocation56_spill] sm:$0xff] }
 0x5c2   : > { %v3753_v10 = vpop.permute.xlu1 %3752  ;;  %3644 = vrot.lane.b32.xlu0 %v14154_v38, %s9368_s17 }
 0x5c3   : > { %3678 = vrot.lane.b32.xlu1 %v14160_v49, %s9368_s17  ;;  %7841 = vmatprep.subr.msk.mxu1 %vm687_vm1, %v3753_v10  ;;  %v14166_v10 = vld [vmem:[#allocation10_spill] sm:$0xff] }
 0x5c6   : > { %3648 = vrot.lane.b32.xlu0 %v14152_v48, %s9368_s17 }
 0x5c7   : > { %3682 = vrot.lane.b32.xlu1 %v14158_v17, %s9368_s17 }
 0x5ca   : > { %3652 = vrot.lane.b32.xlu0 %v14150_v59, %s9368_s17 }
 0x5cb   : > { %3686 = vrot.lane.b32.xlu1 %v14148_v41, %s9368_s17 }
 0x5cc   : > { %v8899_v37 = vpop.eup %8898 }
 0x5cd   : > { %v2993_v46 = vmul.f32 %v8899_v37, %v7751_v51 }
 0x5ce   : > { %3656 = vrot.lane.b32.xlu0 %v14147_v54, %s9368_s17 }
 0x5cf   : > { %3690 = vrot.lane.b32.xlu1 %v14140_v47, %s9368_s17  ;;  %8409 = vmatprep.mubr.msk.f32.mxu1 %vm687_vm1, %v2993_v46  ;;  %v7752_v46 = vpop.f32.mrf.mxu0  ;;  %v14173_v47 = vld [vmem:[#allocation101_spill] sm:$0xff] }
 0x5d1   : > { %v7753_v23 = vpop.f32.mrf.mxu0 }
 0x5d2   : > { %3660 = vrot.lane.b32.xlu0 %v14137_v30, %s9368_s17  ;;  %v7754_v49 = vadd.f32 %v7753_v23, %v7752_v46  ;;  %v14171_v23 = vld [vmem:[#allocation72_spill] sm:$0xff] }
 0x5d3   : > { %3694 = vrot.lane.b32.xlu1 %v14101_v14, %s9368_s17  ;;  %v14279_v14 = vld [vmem:[#allocation82_spill] sm:$0xff] }
 0x5d6   : > { %3664 = vrot.lane.b32.xlu0 %v14166_v10, %s9368_s17 }
 0x5d7   : > { %3698 = vrot.lane.b32.xlu1 %v14167_v4, %s9368_s17 }
 0x5da   : > { %3668 = vrot.lane.b32.xlu0 %v14168_v19, %s9368_s17 }
 0x5db   : > { %3702 = vrot.lane.b32.xlu1 %v14169_v50, %s9368_s17 }
 0x5de   : > { %3672 = vrot.lane.b32.xlu0 %v14164_v33, %s9368_s17  ;;  %v14170_v33 = vld [vmem:[#allocation62_spill] sm:$0xff] }
 0x5e0   : > { %v2685_v51 = vpop.xlane.xlu0 %2684 }
 0x5e1   : > { %8900 = vrcp.f32 %v2685_v51 }
 0x5e2   : > { %3676 = vrot.lane.b32.xlu0 %v14161_v11, %s9368_s17 }
 0x5e4   : > { %v3721_v37 = vpop.permute.xlu0 %3720 }
 0x5e5   : > { %7842 = vmatpush3.xpose.msk.msra.mxu1 %vm687_vm1, %v3721_v37 }
 0x5e6   : > { %3680 = vrot.lane.b32.xlu0 %v14159_v60, %s9368_s17  ;;  %v7755_v60 = vpop.f32.mrf.mxu0 }
 0x5ea   : > { %3684 = vrot.lane.b32.xlu0 %v14149_v2, %s9368_s17  ;;  %v7756_v2 = vpop.f32.mrf.mxu0 }
 0x5ee   : > { %v8901_v17 = vpop.eup %8900  ;;  %3688 = vrot.lane.b32.xlu0 %v14146_v44, %s9368_s17 }
 0x5ef   : > { %v2994_v51 = vmul.f32 %v8901_v17, %v7754_v49  ;;  %v14172_v17 = vld [vmem:[#allocation97_spill] sm:$0xff]  ;;  %v7757_v49 = vadd.f32 %v7756_v2, %v7755_v60  ;;  %v14178_v2 = vld [vmem:[#allocation87_spill] sm:$0xff] }
 0x5f0   : > { %v14179_v60 = vld [vmem:[#allocation93_spill] sm:$0xff] }
 0x5f1   : > { %8410 = vmatmul.mubr.msk.f32.gmra.mxu1 %vm687_vm1, %v2994_v51 }
 0x5f2   : > { %3692 = vrot.lane.b32.xlu0 %v14121_v16, %s9368_s17 }
 0x5f3   : > { %v2688_v37 = vpop.xlane.xlu1 %2687 }
 0x5f4   : > { %8902 = vrcp.f32 %v2688_v37 }
 0x5f6   : > { %3696 = vrot.lane.b32.xlu0 %v14170_v33, %s9368_s17 }
 0x5f7   : > { %v3751_v11 = vpop.permute.xlu1 %3750 }
 0x5f8   : > { %7843 = vmatprep.subr.msk.mxu1 %vm687_vm1, %v3751_v11  ;;  %v14175_v11 = vld [vmem:[#allocation105_spill] sm:$0xff] }
 0x5fa   : > { %3700 = vrot.lane.b32.xlu0 %v14171_v23, %s9368_s17 }
 0x5fb   : > { %v3749_v46 = vpop.permute.xlu1 %3748 }
 0x5ff   : > { %1365 = vadd.xlane.f32.xlu1 %v14172_v17  ;;  %v3717_v51 = vpop.permute.xlu1 %3716 }
 0x601   : > { %v8903_v41 = vpop.eup %8902 }
 0x602   : > { %v2995_v44 = vmul.f32 %v8903_v41, %v7757_v49 }
 0x603   : > { %1374 = vadd.xlane.f32.xlu1 %v14173_v47  ;;  %v3715_v37 = vpop.permute.xlu1 %3714 }
 0x604   : > { %8412 = vmatprep.mubr.msk.f32.mxu1 %vm687_vm1, %v2995_v44  ;;  %v14180_v44 = vld [vmem:[#allocation78_spill] sm:$0xff] }
 0x607   : > { %1380 = vadd.xlane.f32.xlu1 %v14174_v6  ;;  %v3713_v38 = vpop.permute.xlu1 %3712  ;;  %v7758_v6 = vpop.f32.mrf.mxu0 }
 0x60b   : > { %1386 = vadd.xlane.f32.xlu1 %v14175_v11  ;;  %v3711_v48 = vpop.permute.xlu1 %3710 }
 0x60f   : > { %1392 = vadd.xlane.f32.xlu1 %v14176_v57  ;;  %v3709_v41 = vpop.permute.xlu1 %3708  ;;  %v14181_v57 = vld [vmem:[#allocation99_spill] sm:$0xff] }
 0x613   : > { %1398 = vadd.xlane.f32.xlu1 %v14177_v3  ;;  %v3707_v49 = vpop.permute.xlu1 %3706  ;;  %v14182_v3 = vld [vmem:[#allocation110_spill] sm:$0xff] }
 0x615   : > { %v2691_v17 = vpop.xlane.xlu0 %2690 }
 0x616   : > { %8904 = vrcp.f32 %v2691_v17  ;;  %v7759_v17 = vpop.f32.mrf.mxu0 }
 0x617   : > { %1404 = vadd.xlane.f32.xlu1 %v14178_v2  ;;  %v14183_v2 = vld [vmem:[#allocation100_spill] sm:$0xff]  ;;  %v3705_v59 = vpop.permute.xlu1 %3704 }
 0x619   : > { %1362 = vadd.xlane.f32.xlu0 %v14179_v60  ;;  %v3719_v47 = vpop.permute.xlu0 %3718 }
 0x61a   : > { %7844 = vmatpush3.xpose.msk.msra.mxu1 %vm687_vm1, %v3719_v47  ;;  %v7760_v47 = vadd.f32 %v7759_v17, %v7758_v6  ;;  %v14188_v17 = vld [vmem:[#allocation51_spill] sm:$0xff] }
 0x61b   : > { %1410 = vadd.xlane.f32.xlu1 %v14180_v44  ;;  %7845 = vmatprep.subr.msk.mxu1 %vm687_vm1, %v3749_v46  ;;  %v14184_v44 = vld [vmem:[#allocation73_spill] sm:$0xff]  ;;  %v3643_v6 = vpop.permute.xlu1 %3642 }
 0x61d   : > { %1368 = vadd.xlane.f32.xlu0 %v14181_v57  ;;  %v3747_v11 = vpop.permute.xlu0 %3746 }
 0x61e   : > { %7846 = vmatpush3.xpose.msk.msra.mxu1 %vm687_vm1, %v3717_v51 }
 0x61f   : > { %1416 = vadd.xlane.f32.xlu1 %v14182_v3  ;;  %7847 = vmatprep.subr.msk.mxu1 %vm687_vm1, %v3747_v11  ;;  %v14186_v3 = vld [vmem:[#allocation65_spill] sm:$0xff] }
 0x621   : > { %1371 = vadd.xlane.f32.xlu0 %v14183_v2  ;;  %v3745_v60 = vpop.permute.xlu0 %3744 }
 0x622   : > { %7848 = vmatpush3.xpose.msk.msra.mxu1 %vm687_vm1, %v3715_v37  ;;  %v14187_v37 = vld [vmem:[#allocation104_spill] sm:$0xff] }
 0x623   : > { %1422 = vadd.xlane.f32.xlu1 %v14184_v44  ;;  %v8905_v46 = vpop.eup %8904  ;;  %7849 = vmatprep.subr.msk.mxu1 %vm687_vm1, %v3745_v60  ;;  %v14190_v60 = vld [vmem:[#allocation38_spill] sm:$0xff] }
 0x624   : > { %v2996_v57 = vmul.f32 %v8905_v46, %v7760_v47  ;;  %v3647_v47 = vpop.permute.xlu1 %3646  ;;  %v14192_v46 = vld [vmem:[#allocation33_spill] sm:$0xff] }
 0x625   : > { %1377 = vadd.xlane.f32.xlu0 %v14185_v45  ;;  %v3743_v51 = vpop.permute.xlu0 %3742  ;;  %v14189_v45 = vld [vmem:[#allocation106_spill] sm:$0xff] }
 0x626   : > { %8413 = vmatmul.mubr.msk.f32.gmra.mxu1 %vm687_vm1, %v2996_v57 }
 0x627   : > { %1428 = vadd.xlane.f32.xlu1 %v14186_v3  ;;  %7850 = vmatpush3.xpose.msk.msra.mxu1 %vm687_vm1, %v3713_v38  ;;  %v14191_v38 = vld [vmem:[#allocation108_spill] sm:$0xff]  ;;  %v14194_v3 = vld [vmem:[#allocation71_spill] sm:$0xff] }
 0x628   : > { %7851 = vmatprep.subr.msk.mxu1 %vm687_vm1, %v3743_v51  ;;  %v3651_v57 = vpop.permute.xlu1 %3650  ;;  %v14193_v51 = vld [vmem:[#allocation92_spill] sm:$0xff] }
 0x629   : > { %1383 = vadd.xlane.f32.xlu0 %v14187_v37  ;;  %v3741_v11 = vpop.permute.xlu0 %3740 }
 0x62b   : > { %1434 = vadd.xlane.f32.xlu1 %v14188_v17  ;;  %7852 = vmatpush3.xpose.msk.msra.mxu1 %vm687_vm1, %v3711_v48  ;;  %v1794_v48 = vld [vmem:[%s13554_s3] sm:$0xff] }
 0x62c   : > { %7853 = vmatprep.subr.msk.mxu1 %vm687_vm1, %v3741_v11  ;;  %8415 = vmatprep.subr.mxu0 %v1794_v48  ;;  %v3655_v37 = vpop.permute.xlu1 %3654 }
 0x62d   : > { %1389 = vadd.xlane.f32.xlu0 %v14189_v45  ;;  %v3739_v2 = vpop.permute.xlu0 %3738  ;;  %8416 = vmatpush3.msra.mxu0 %v1794_v48  ;;  %v14196_v45 = vld [vmem:[#allocation52_spill] sm:$0xff]  ;;  %v14202_v48 = vld [vmem:[#allocation54_spill] sm:$0xff] }
 0x62f   : > { %1440 = vadd.xlane.f32.xlu1 %v14190_v60  ;;  %7854 = vmatpush3.xpose.msk.msra.mxu1 %vm687_vm1, %v3709_v41  ;;  %v14199_v60 = vld [vmem:[#allocation48_spill] sm:$0xff] }
 0x630   : > { %7855 = vmatprep.subr.msk.mxu1 %vm687_vm1, %v3739_v2  ;;  %v3659_v17 = vpop.permute.xlu1 %3658 }
 0x631   : > { %1395 = vadd.xlane.f32.xlu0 %v14191_v38  ;;  %v3737_v44 = vpop.permute.xlu0 %3736  ;;  %v14200_v38 = vld [vmem:[#allocation70_spill] sm:$0xff] }
 0x633   : > { %1446 = vadd.xlane.f32.xlu1 %v14192_v46  ;;  %7856 = vmatpush3.xpose.msk.msra.mxu1 %vm687_vm1, %v3707_v49  ;;  %v14195_v49 = vld [vmem:[#allocation83_spill] sm:$0xff]  ;;  %v14201_v46 = vld [vmem:[#allocation29_spill] sm:$0xff] }
 0x634   : > { %7857 = vmatprep.subr.msk.mxu1 %vm687_vm1, %v3737_v44  ;;  %v3663_v2 = vpop.permute.xlu1 %3662 }
 0x635   : > { %1401 = vadd.xlane.f32.xlu0 %v14193_v51  ;;  %v3641_v41 = vpop.permute.xlu0 %3640  ;;  %v14203_v51 = vld [vmem:[#allocation28_spill] sm:$0xff] }
 0x636   : > { %7859 = vmatprep.mubr.msk.f32.mxu1 %vm687_vm1, %v3641_v41 }
 0x637   : > { %1452 = vadd.xlane.f32.xlu1 %v11076_v13  ;;  %7858 = vmatpush3.xpose.msk.msra.mxu1 %vm687_vm1, %v3705_v59  ;;  %v14197_v13 = vld [vmem:[#allocation58_spill] sm:$0xff] }
 0x638   : > { %v3667_v44 = vpop.permute.xlu1 %3666 }
 0x639   : > { %1407 = vadd.xlane.f32.xlu0 %v14194_v3  ;;  %v3645_v11 = vpop.permute.xlu0 %3644 }
 0x63a   : > { %7860 = vmatmul.mubr.msk.f32.vlgmr.msra.gmra.mxu1 %vm687_vm1, %v3641_v41 }
 0x63b   : > { %7861 = vmatprep.mubr.msk.f32.mxu1 %vm687_vm1, %v3643_v6 }
 0x63c   : > { %v3671_v41 = vpop.permute.xlu1 %3670 }
 0x63d   : > { %1413 = vadd.xlane.f32.xlu0 %v14195_v49  ;;  %v3649_v59 = vpop.permute.xlu0 %3648 }
 0x63e   : > { %7862 = vmatmul.mubr.msk.f32.gmra.mxu1 %vm687_vm1, %v3643_v6  ;;  %v14198_v6 = vld [vmem:[#allocation76_spill] sm:$0xff] }
 0x63f   : > { %7863 = vmatprep.mubr.msk.f32.mxu1 %vm687_vm1, %v3645_v11 }
 0x641   : > { %1419 = vadd.xlane.f32.xlu0 %v14196_v45 }
 0x642   : > { %7864 = vmatmul.mubr.msk.f32.gmra.mxu1 %vm687_vm1, %v3645_v11 }
 0x643   : > { %7865 = vmatprep.mubr.msk.f32.mxu1 %vm687_vm1, %v3647_v47 }
 0x645   : > { %1425 = vadd.xlane.f32.xlu0 %v14197_v13 }
 0x646   : > { %7866 = vmatmul.mubr.msk.f32.gmra.mxu1 %vm687_vm1, %v3647_v47  ;;  %v3653_v47 = vpop.permute.xlu0 %3652 }
 0x647   : > { %7867 = vmatprep.mubr.msk.f32.mxu1 %vm687_vm1, %v3649_v59 }
 0x648   : > { %4599 = vrot.lane.b32.xlu1 %v14198_v6, %s9369_s22  ;;  %v14278_v6 = vld [vmem:[#allocation79_spill] sm:$0xff] }
 0x649   : > { %1431 = vadd.xlane.f32.xlu0 %v14199_v60 }
 0x64a   : > { %7868 = vmatmul.mubr.msk.f32.gmra.mxu1 %vm687_vm1, %v3649_v59  ;;  %v3657_v3 = vpop.permute.xlu0 %3656 }
 0x64b   : > { %7869 = vmatprep.mubr.msk.f32.mxu1 %vm687_vm1, %v3651_v57 }
 0x64c   : > { %4597 = vrot.lane.b32.xlu1 %v14200_v38, %s9369_s22 }
 0x64d   : > { %1437 = vadd.xlane.f32.xlu0 %v14201_v46 }
 0x64e   : > { %7870 = vmatmul.mubr.msk.f32.gmra.mxu1 %vm687_vm1, %v3651_v57  ;;  %v3675_v57 = vpop.permute.xlu1 %3674  ;;  %v3661_v49 = vpop.permute.xlu0 %3660 }
 0x64f   : > { %7871 = vmatprep.mubr.msk.f32.mxu1 %vm687_vm1, %v3653_v47 }
 0x650   : > { %4581 = vrot.lane.b32.xlu1 %v14202_v48, %s9369_s22 }
 0x651   : > { %1443 = vadd.xlane.f32.xlu0 %v14203_v51 }
 0x652   : > { %7872 = vmatmul.mubr.msk.f32.gmra.mxu1 %vm687_vm1, %v3653_v47  ;;  %v3679_v11 = vpop.permute.xlu1 %3678 }
 0x653   : > { %7873 = vmatprep.mubr.msk.f32.mxu1 %vm687_vm1, %v3655_v37 }
 0x655   : > { %1449 = vadd.xlane.f32.xlu0 %v11072_v58 }
 0x656   : > { %7874 = vmatmul.mubr.msk.f32.gmra.mxu1 %vm687_vm1, %v3655_v37  ;;  %v3683_v58 = vpop.permute.xlu1 %3682  ;;  %v3665_v37 = vpop.permute.xlu0 %3664 }
 0x657   : > { %7875 = vmatprep.mubr.msk.f32.mxu1 %vm687_vm1, %v3657_v3 }
 0x659   : > { %1455 = vadd.xlane.f32.xlu0 %v11080_v32 }
 0x65a   : > { %7876 = vmatmul.mubr.msk.f32.gmra.mxu1 %vm687_vm1, %v3657_v3  ;;  %v3687_v32 = vpop.permute.xlu1 %3686  ;;  %v3669_v45 = vpop.permute.xlu0 %3668 }
 0x65b   : > { %7877 = vmatprep.mubr.msk.f32.mxu1 %vm687_vm1, %v3659_v17 }
 0x65e   : > { %7878 = vmatmul.mubr.msk.f32.gmra.mxu1 %vm687_vm1, %v3659_v17  ;;  %v3691_v17 = vpop.permute.xlu1 %3690  ;;  %v3673_v13 = vpop.permute.xlu0 %3672 }
 0x65f   : > { %7879 = vmatprep.mubr.msk.f32.mxu1 %vm687_vm1, %v3661_v49 }
 0x662   : > { %7880 = vmatmul.mubr.msk.f32.gmra.mxu1 %vm687_vm1, %v3661_v49  ;;  %v3695_v59 = vpop.permute.xlu1 %3694 }
 0x663   : > { %7881 = vmatprep.mubr.msk.f32.mxu1 %vm687_vm1, %v3663_v2 }
 0x666   : > { %7882 = vmatmul.mubr.msk.f32.gmra.mxu1 %vm687_vm1, %v3663_v2  ;;  %v3677_v2 = vpop.permute.xlu0 %3676  ;;  %v3699_v60 = vpop.permute.xlu1 %3698 }
 0x667   : > { %7883 = vmatprep.mubr.msk.f32.mxu1 %vm687_vm1, %v3665_v37 }
 0x66a   : > { %7884 = vmatmul.mubr.msk.f32.gmra.mxu1 %vm687_vm1, %v3665_v37  ;;  %v11621_v46 = vpop.permute.xlu1 %3702 }
 0x66b   : > { %7885 = vmatprep.mubr.msk.f32.mxu1 %vm687_vm1, %v3667_v44 }
 0x66e   : > { %7886 = vmatmul.mubr.msk.f32.gmra.mxu1 %vm687_vm1, %v3667_v44  ;;  %v3681_v44 = vpop.permute.xlu0 %3680 }
 0x66f   : > { %7887 = vmatprep.mubr.msk.f32.mxu1 %vm687_vm1, %v3669_v45 }
 0x672   : > { %7888 = vmatmul.mubr.msk.f32.gmra.mxu1 %vm687_vm1, %v3669_v45  ;;  %v3685_v47 = vpop.permute.xlu0 %3684 }
 0x673   : > { %7889 = vmatprep.mubr.msk.f32.mxu1 %vm687_vm1, %v3671_v41 }
 0x676   : > { %7890 = vmatmul.mubr.msk.f32.gmra.mxu1 %vm687_vm1, %v3671_v41  ;;  %v3689_v3 = vpop.permute.xlu0 %3688 }
 0x677   : > { %7891 = vmatprep.mubr.msk.f32.mxu1 %vm687_vm1, %v3673_v13 }
 0x67a   : > { %7892 = vmatmul.mubr.msk.f32.gmra.mxu1 %vm687_vm1, %v3673_v13  ;;  %v3693_v49 = vpop.permute.xlu0 %3692  ;;  %v11634_v13 = vpop.f32.mrf.mxu1 }
 0x67b   : > { %7893 = vmatprep.mubr.msk.f32.mxu1 %vm687_vm1, %v3675_v57  ;;  %14204 = vst [vmem:[#allocation35_spill] sm:$0xff] %v11634_v13 }
 0x67e   : > { %7894 = vmatmul.mubr.msk.f32.gmra.mxu1 %vm687_vm1, %v3675_v57  ;;  %v3697_v45 = vpop.permute.xlu0 %3696 }
 0x67f   : > { %7895 = vmatprep.mubr.msk.f32.mxu1 %vm687_vm1, %v3677_v2 }
 0x682   : > { %7896 = vmatmul.mubr.msk.f32.gmra.mxu1 %vm687_vm1, %v3677_v2  ;;  %v11640_v2 = vpop.f32.mrf.mxu1 }
 0x683   : > { %7897 = vmatprep.mubr.msk.f32.mxu1 %vm687_vm1, %v3679_v11  ;;  %14205 = vst [vmem:[#allocation74_spill] sm:$0xff] %v11640_v2 }
 0x686   : > { %7898 = vmatmul.mubr.msk.f32.gmra.mxu1 %vm687_vm1, %v3679_v11 }
 0x687   : > { %7899 = vmatprep.mubr.msk.f32.mxu1 %vm687_vm1, %v3681_v44 }
 0x688   : > { %v1366_v51 = vpop.xlane.xlu1 %1365 }
 0x689   : > { %8906 = vrcp.f32 %v1366_v51 }
 0x68a   : > { %7900 = vmatmul.mubr.msk.f32.gmra.mxu1 %vm687_vm1, %v3681_v44  ;;  %v3701_v44 = vpop.permute.xlu0 %3700 }
 0x68b   : > { %7901 = vmatprep.mubr.msk.f32.mxu1 %vm687_vm1, %v3683_v58 }
 0x68c   : > { %v1375_v41 = vpop.xlane.xlu1 %1374 }
 0x68e   : > { %7902 = vmatmul.mubr.msk.f32.gmra.mxu1 %vm687_vm1, %v3683_v58 }
 0x68f   : > { %7903 = vmatprep.mubr.msk.f32.mxu1 %vm687_vm1, %v3685_v47 }
 0x690   : > { %v1381_v57 = vpop.xlane.xlu1 %1380 }
 0x692   : > { %7904 = vmatmul.mubr.msk.f32.gmra.mxu1 %vm687_vm1, %v3685_v47  ;;  %v11646_v47 = vpop.f32.mrf.mxu1 }
 0x693   : > { %7905 = vmatprep.mubr.msk.f32.mxu1 %vm687_vm1, %v3687_v32  ;;  %14206 = vst [vmem:[#allocation84_spill] sm:$0xff] %v11646_v47 }
 0x694   : > { %v1387_v11 = vpop.xlane.xlu1 %1386  ;;  %v11652_v48 = vpop.f32.mrf.mxu1 }
 0x695   : > { %14207 = vst [vmem:[#allocation47_spill] sm:$0xff] %v11652_v48 }
 0x696   : > { %7906 = vmatmul.mubr.msk.f32.gmra.mxu1 %vm687_vm1, %v3687_v32  ;;  %v11654_v2 = vpop.f32.mrf.mxu1 }
 0x697   : > { %7907 = vmatprep.mubr.msk.f32.mxu1 %vm687_vm1, %v3689_v3  ;;  %14208 = vst [vmem:[#allocation57_spill] sm:$0xff] %v11654_v2 }
 0x698   : > { %v1393_v37 = vpop.xlane.xlu1 %1392  ;;  %v11660_v51 = vpop.f32.mrf.mxu1 }
 0x699   : > { %14209 = vst [vmem:[#allocation66_spill] sm:$0xff] %v11660_v51 }
 0x69a   : > { %7908 = vmatmul.mubr.msk.f32.gmra.mxu1 %vm687_vm1, %v3689_v3  ;;  %v11666_v48 = vpop.f32.mrf.mxu1 }
 0x69b   : > { %7909 = vmatprep.mubr.msk.f32.mxu1 %vm687_vm1, %v3691_v17  ;;  %14210 = vst [vmem:[#allocation56_spill] sm:$0xff] %v11666_v48 }
 0x69c   : > { %v11638_v58 = vpop.xlane.xlu1 %1398  ;;  %v11674_v2 = vpop.f32.mrf.mxu1 }
 0x69d   : > { %14211 = vst [vmem:[#allocation62_spill] sm:$0xff] %v11674_v2 }
 0x69e   : > { %7910 = vmatmul.mubr.msk.f32.gmra.mxu1 %vm687_vm1, %v3691_v17  ;;  %v11677_v38 = vpop.f32.mrf.mxu1 }
 0x69f   : > { %7911 = vmatprep.mubr.msk.f32.mxu1 %vm687_vm1, %v3693_v49  ;;  %14212 = vst [vmem:[#allocation97_spill] sm:$0xff] %v11677_v38 }
 0x6a0   : > { %v11644_v32 = vpop.xlane.xlu1 %1404 }
 0x6a2   : > { %7912 = vmatmul.mubr.msk.f32.gmra.mxu1 %vm687_vm1, %v3693_v49  ;;  %v1363_v13 = vpop.xlane.xlu0 %1362 }
 0x6a3   : > { %7913 = vmatprep.mubr.msk.f32.mxu1 %vm687_vm1, %v3695_v59  ;;  %8908 = vrcp.f32 %v1363_v13 }
 0x6a4   : > { %v11650_v3 = vpop.xlane.xlu1 %1410 }
 0x6a6   : > { %7914 = vmatmul.mubr.msk.f32.gmra.mxu1 %vm687_vm1, %v3695_v59  ;;  %v1369_v17 = vpop.xlane.xlu0 %1368 }
 0x6a7   : > { %7915 = vmatprep.mubr.msk.f32.mxu1 %vm687_vm1, %v3697_v45  ;;  %8910 = vrcp.f32 %v1369_v17  ;;  %v8907_v17 = vpop.eup %8906 }
 0x6a8   : > { %v11658_v47 = vpop.xlane.xlu1 %1416  ;;  %8912 = vrcp.f32 %v1375_v41 }
 0x6aa   : > { %7916 = vmatmul.mubr.msk.f32.gmra.mxu1 %vm687_vm1, %v3697_v45  ;;  %v1372_v49 = vpop.xlane.xlu0 %1371  ;;  %v7462_v45 = vadd.f32 %v11134_v20, %v11132_v7  ;;  %v11687_v20 = vpop.f32.mrf.mxu1 }
 0x6ab   : > { %7917 = vmatprep.mubr.msk.f32.mxu1 %vm687_vm1, %v3699_v60  ;;  %8914 = vrcp.f32 %v1372_v49  ;;  %14213 = vst [vmem:[#allocation101_spill] sm:$0xff] %v11687_v20 }
 0x6ac   : > { %v11664_v13 = vpop.xlane.xlu1 %1422  ;;  %8916 = vrcp.f32 %v1381_v57  ;;  %v1763_v57 = vmul.f32 %v8907_v17, %v7462_v45  ;;  %v7468_v17 = vadd.f32 %v11150_v26, %v11146_v5 }
 0x6ae   : > { %7918 = vmatmul.mubr.msk.f32.gmra.mxu1 %vm687_vm1, %v3699_v60  ;;  %v1378_v59 = vpop.xlane.xlu0 %1377 }
 0x6af   : > { %7919 = vmatprep.mubr.msk.f32.mxu1 %vm687_vm1, %v3701_v44  ;;  %8918 = vrcp.f32 %v1378_v59 }
 0x6b0   : > { %v11670_v51 = vpop.xlane.xlu1 %1428  ;;  %v8909_v41 = vpop.eup %8908  ;;  %8920 = vrcp.f32 %v1387_v11 }
 0x6b1   : > { %v1762_v49 = vmul.f32 %v8909_v41, %v11130_v53 }
 0x6b2   : > { %7920 = vmatmul.mubr.msk.f32.gmra.mxu1 %vm687_vm1, %v3701_v44  ;;  %v1384_v60 = vpop.xlane.xlu0 %1383 }
 0x6b3   : > { %7921 = vmatprep.mubr.msk.f32.mxu1 %vm687_vm1, %v11621_v46  ;;  %8922 = vrcp.f32 %v1384_v60  ;;  %8417 = vmatprep.mubr.msk.f32.mxu0 %vm687_vm1, %v1762_v49  ;;  %v11696_v49 = vpop.f32.mrf.mxu1  ;;  %v7474_v60 = vadd.f32 %v11168_v63, %v11166_v61  ;;  %v7480_v61 = vadd.f32 %v11180_v25, %v11178_v27  ;;  %v7486_v27 = vadd.f32 %v11198_v35, %v11193_v15 }
 0x6b4   : > { %v11683_v59 = vpop.xlane.xlu1 %1434  ;;  %v8911_v7 = vpop.eup %8910  ;;  %8418 = vmatmul.mubr.msk.f32.vlgmr.msra.gmra.mxu0 %vm687_vm1, %v1763_v57  ;;  %8924 = vrcp.f32 %v1393_v37  ;;  %14214 = vst [vmem:[#allocation103_spill] sm:$0xff] %v11696_v49  ;;  %v7492_v15 = vadd.f32 %v11228_v40, %v11221_v22  ;;  %v7498_v22 = vadd.f32 %v11251_v12, %v11246_v9 }
 0x6b5   : > { %v1764_v53 = vmul.f32 %v8911_v7, %v11144_v56  ;;  %v8913_v44 = vpop.eup %8912  ;;  %v11705_v7 = vpop.f32.mrf.mxu1 }
 0x6b6   : > { %7922 = vmatmul.mubr.msk.f32.gmra.mxu1 %vm687_vm1, %v11621_v46  ;;  %v1390_v11 = vpop.xlane.xlu0 %1389  ;;  %v1766_v57 = vmul.f32 %v8913_v44, %v11162_v28  ;;  %14215 = vst [vmem:[#allocation105_spill] sm:$0xff] %v11705_v7 }
 0x6b7   : > { %8926 = vrcp.f32 %v1390_v11  ;;  %8420 = vmatprep.mubr.msk.f32.mxu0 %vm687_vm1, %v1764_v53  ;;  %v11708_v11 = vpop.f32.mrf.mxu1 }
 0x6b8   : > { %v11694_v41 = vpop.xlane.xlu1 %1440  ;;  %v8915_v45 = vpop.eup %8914  ;;  %8928 = vrcp.f32 %v11638_v58  ;;  %14216 = vst [vmem:[#allocation107_spill] sm:$0xff] %v11708_v11 }
 0x6b9   : > { %v1765_v56 = vmul.f32 %v8915_v45, %v7468_v17  ;;  %v8917_v46 = vpop.eup %8916  ;;  %v7483_v45 = vadd.f32 %v11188_v1, %v11186_v62  ;;  %v7489_v62 = vadd.f32 %v11215_v55, %v11207_v43  ;;  %v7495_v43 = vadd.f32 %v11244_v52, %v11238_v8 }
 0x6ba   : > { %v1396_v37 = vpop.xlane.xlu0 %1395  ;;  %v1768_v58 = vmul.f32 %v8917_v46, %v11174_v31  ;;  %v7501_v8 = vadd.f32 %v11258_v0, %v11256_v39 }
 0x6bb   : > { %8930 = vrcp.f32 %v1396_v37  ;;  %8421 = vmatmul.mubr.msk.f32.gmra.mxu0 %vm687_vm1, %v1765_v56 }
 0x6bc   : > { %v11703_v5 = vpop.xlane.xlu1 %1446  ;;  %v8919_v26 = vpop.eup %8918  ;;  %8423 = vmatprep.mubr.msk.f32.mxu0 %vm687_vm1, %v1766_v57  ;;  %8932 = vrcp.f32 %v11644_v32 }
 0x6bd   : > { %v1767_v53 = vmul.f32 %v8919_v26, %v7474_v60  ;;  %v8921_v44 = vpop.eup %8920  ;;  %v11720_v32 = vpop.f32.mrf.mxu1 }
 0x6be   : > { %v1402_v28 = vpop.xlane.xlu0 %1401  ;;  %14217 = vst [vmem:[#allocation109_spill] sm:$0xff] %v11720_v32  ;;  %v1770_v37 = vmul.f32 %v8921_v44, %v7483_v45 }
 0x6bf   : > { %8934 = vrcp.f32 %v1402_v28  ;;  %8424 = vmatmul.mubr.msk.f32.gmra.mxu0 %vm687_vm1, %v1767_v53  ;;  %v11728_v1 = vpop.f32.mrf.mxu1 }
 0x6c0   : > { %v11715_v63 = vpop.xlane.xlu1 %1452  ;;  %v8923_v17 = vpop.eup %8922  ;;  %8426 = vmatprep.mubr.msk.f32.mxu0 %vm687_vm1, %v1768_v58  ;;  %8936 = vrcp.f32 %v11650_v3  ;;  %14218 = vst [vmem:[#allocation87_spill] sm:$0xff] %v11728_v1 }
 0x6c1   : > { %v1769_v56 = vmul.f32 %v8923_v17, %v7480_v61  ;;  %v8925_v57 = vpop.eup %8924  ;;  %v11737_v55 = vpop.f32.mrf.mxu1 }
 0x6c2   : > { %v1408_v31 = vpop.xlane.xlu0 %1407  ;;  %v1772_v26 = vmul.f32 %v8925_v57, %v7489_v62  ;;  %14219 = vst [vmem:[#allocation93_spill] sm:$0xff] %v11737_v55  ;;  %v14226_v62 = vld [vmem:[#allocation53_spill] sm:$0xff] }
 0x6c3   : > { %8938 = vrcp.f32 %v1408_v31  ;;  %8427 = vmatmul.mubr.msk.f32.gmra.mxu0 %vm687_vm1, %v1769_v56  ;;  %v11740_v58 = vpop.f32.mrf.mxu1  ;;  %v14222_v31 = vld [vmem:[#allocation32_spill] sm:$0xff] }
 0x6c4   : > { %v4600_v25 = vpop.permute.xlu1 %4599  ;;  %v8927_v46 = vpop.eup %8926  ;;  %8429 = vmatprep.mubr.msk.f32.mxu0 %vm687_vm1, %v1770_v37  ;;  %8940 = vrcp.f32 %v11658_v47  ;;  %14220 = vst [vmem:[#allocation78_spill] sm:$0xff] %v11740_v58  ;;  %v7504_v9 = vadd.f32 %v14222_v31, %v11262_v24  ;;  %v14223_v37 = vld [vmem:[#allocation44_spill] sm:$0xff]  ;;  %v14235_v31 = vld [vmem:[#allocation91_spill] sm:$0xff] }
 0x6c5   : > { %7923 = vmatprep.subr.bf16.mxu0 %v4600_v25  ;;  %v1771_v3 = vmul.f32 %v8927_v46, %v7486_v27  ;;  %v8929_v53 = vpop.eup %8928  ;;  %v11749_v17 = vpop.f32.mrf.mxu1  ;;  %v7507_v39 = vadd.f32 %v14223_v37, %v11273_v18  ;;  %v14225_v46 = vld [vmem:[#allocation34_spill] sm:$0xff]  ;;  %v14237_v37 = vld [vmem:[#allocation95_spill] sm:$0xff] }
 0x6c6   : > { %v1414_v60 = vpop.xlane.xlu0 %1413  ;;  %v1774_v44 = vmul.f32 %v8929_v53, %v7495_v43  ;;  %14221 = vst [vmem:[#allocation99_spill] sm:$0xff] %v11749_v17  ;;  %v7510_v24 = vadd.f32 %v14226_v62, %v14225_v46  ;;  %v14240_v62 = vld [vmem:[#allocation96_spill] sm:$0xff] }
 0x6c7   : > { %8942 = vrcp.f32 %v1414_v60  ;;  %8430 = vmatmul.mubr.msk.f32.gmra.mxu0 %vm687_vm1, %v1771_v3  ;;  %v11757_v0 = vpop.f32.mrf.mxu1  ;;  %v14227_v60 = vld [vmem:[#allocation64_spill] sm:$0xff] }
 0x6c8   : > { %v8931_v35 = vpop.eup %8930  ;;  %8432 = vmatprep.mubr.msk.f32.mxu0 %vm687_vm1, %v1772_v26  ;;  %8944 = vrcp.f32 %v11664_v13  ;;  %14224 = vst [vmem:[#allocation110_spill] sm:$0xff] %v11757_v0  ;;  %v14228_v26 = vld [vmem:[#allocation40_spill] sm:$0xff] }
 0x6c9   : > { %v1773_v28 = vmul.f32 %v8931_v35, %v7492_v15  ;;  %v8933_v61 = vpop.eup %8932  ;;  %v7513_v18 = vadd.f32 %v14228_v26, %v14227_v60  ;;  %v11766_v53 = vpop.f32.mrf.mxu1 }
 0x6ca   : > { %v1420_v47 = vpop.xlane.xlu0 %1419  ;;  %v1776_v45 = vmul.f32 %v8933_v61, %v7501_v8  ;;  %14229 = vst [vmem:[#allocation100_spill] sm:$0xff] %v11766_v53 }
 0x6cb   : > { %8946 = vrcp.f32 %v1420_v47  ;;  %8433 = vmatmul.mubr.msk.f32.gmra.mxu0 %vm687_vm1, %v1773_v28  ;;  %v11769_v35 = vpop.f32.mrf.mxu1  ;;  %v14231_v47 = vld [vmem:[#allocation41_spill] sm:$0xff] }
 0x6cc   : > { %v8935_v40 = vpop.eup %8934  ;;  %8435 = vmatprep.mubr.msk.f32.mxu0 %vm687_vm1, %v1774_v44  ;;  %8948 = vrcp.f32 %v11670_v51  ;;  %14230 = vst [vmem:[#allocation73_spill] sm:$0xff] %v11769_v35  ;;  %v7516_v44 = vadd.f32 %v14231_v47, %v11290_v29  ;;  %v14245_v47 = vld [vmem:[#allocation90_spill] sm:$0xff]  ;;  %v14270_v35 = vld [vmem:[#allocation36_spill] sm:$0xff] }
 0x6cd   : > { %v1775_v52 = vmul.f32 %v8935_v40, %v7498_v22  ;;  %v8937_v56 = vpop.eup %8936  ;;  %v14232_v22 = vld [vmem:[#allocation43_spill] sm:$0xff]  ;;  %v14233_v40 = vld [vmem:[#allocation89_spill] sm:$0xff] }
 0x6ce   : > { %v1426_v13 = vpop.xlane.xlu0 %1425  ;;  %v1778_v27 = vmul.f32 %v8937_v56, %v7507_v39  ;;  %v7519_v8 = vadd.f32 %v14233_v40, %v14232_v22  ;;  %v14238_v39 = vld [vmem:[#allocation75_spill] sm:$0xff] }
 0x6cf   : > { %8950 = vrcp.f32 %v1426_v13  ;;  %8436 = vmatmul.mubr.msk.f32.gmra.mxu0 %vm687_vm1, %v1775_v52  ;;  %v11778_v13 = vpop.f32.mrf.mxu1 }
 0x6d0   : > { %v8939_v12 = vpop.eup %8938  ;;  %8438 = vmatprep.mubr.msk.f32.mxu0 %vm687_vm1, %v1776_v45  ;;  %8952 = vrcp.f32 %v11683_v59  ;;  %14234 = vst [vmem:[#allocation102_spill] sm:$0xff] %v11778_v13 }
 0x6d1   : > { %v1777_v57 = vmul.f32 %v8939_v12, %v7504_v9  ;;  %v8941_v25 = vpop.eup %8940  ;;  %v14236_v9 = vld [vmem:[#allocation94_spill] sm:$0xff] }
 0x6d2   : > { %v1432_v51 = vpop.xlane.xlu0 %1431  ;;  %v1780_v43 = vmul.f32 %v8941_v25, %v7513_v18  ;;  %v7522_v29 = vadd.f32 %v14236_v9, %v14235_v31  ;;  %v14250_v31 = vld [vmem:[#allocation88_spill] sm:$0xff] }
 0x6d3   : > { %8954 = vrcp.f32 %v1432_v51  ;;  %8439 = vmatmul.mubr.msk.f32.gmra.mxu0 %vm687_vm1, %v1777_v57  ;;  %v7525_v57 = vadd.f32 %v14238_v39, %v14237_v37  ;;  %v11786_v51 = vpop.f32.mrf.mxu1  ;;  %v14252_v39 = vld [vmem:[#allocation80_spill] sm:$0xff] }
 0x6d4   : > { %v8943_v3 = vpop.eup %8942  ;;  %8441 = vmatprep.mubr.msk.f32.mxu0 %vm687_vm1, %v1778_v27  ;;  %8956 = vrcp.f32 %v11694_v41  ;;  %14239 = vst [vmem:[#allocation65_spill] sm:$0xff] %v11786_v51  ;;  %v4598_v51 = vpop.permute.xlu1 %4597 }
 0x6d5   : > { %v1779_v15 = vmul.f32 %v8943_v3, %v7510_v24  ;;  %v8945_v28 = vpop.eup %8944  ;;  %v14241_v24 = vld [vmem:[#allocation85_spill] sm:$0xff]  ;;  %v11793_v26 = vpop.f32.mrf.mxu1 }
 0x6d6   : > { %v1438_v59 = vpop.xlane.xlu0 %1437  ;;  %v1782_v45 = vmul.f32 %v8945_v28, %v7519_v8  ;;  %v7528_v3 = vadd.f32 %v14241_v24, %v14240_v62  ;;  %14242 = vst [vmem:[#allocation104_spill] sm:$0xff] %v11793_v26  ;;  %v14269_v26 = vld [vmem:[#allocation19_spill] sm:$0xff] }
 0x6d7   : > { %8958 = vrcp.f32 %v1438_v59  ;;  %8442 = vmatmul.mubr.msk.f32.gmra.mxu0 %vm687_vm1, %v1779_v15  ;;  %v11796_v15 = vpop.f32.mrf.mxu1 }
 0x6d8   : > { %v8947_v61 = vpop.eup %8946  ;;  %8444 = vmatprep.mubr.msk.f32.mxu0 %vm687_vm1, %v1780_v43  ;;  %8960 = vrcp.f32 %v11703_v5  ;;  %14243 = vst [vmem:[#allocation51_spill] sm:$0xff] %v11796_v15  ;;  %v14244_v43 = vld [vmem:[#allocation98_spill] sm:$0xff]  ;;  %v4582_v58 = vpop.permute.xlu1 %4581 }
 0x6d9   : > { %v1781_v52 = vmul.f32 %v8947_v61, %v7516_v44  ;;  %v8949_v56 = vpop.eup %8948  ;;  %v14246_v44 = vld [vmem:[#allocation59_spill] sm:$0xff]  ;;  %v11803_v8 = vpop.f32.mrf.mxu1 }
 0x6da   : > { %v1444_v41 = vpop.xlane.xlu0 %1443  ;;  %v1784_v25 = vmul.f32 %v8949_v56, %v7525_v57  ;;  %v7534_v61 = vadd.f32 %v14246_v44, %v14245_v47  ;;  %14247 = vst [vmem:[#allocation106_spill] sm:$0xff] %v11803_v8  ;;  %v14249_v56 = vld [vmem:[#allocation86_spill] sm:$0xff]  ;;  %v14268_v8 = vld [vmem:[#allocation24_spill] sm:$0xff] }
 0x6db   : > { %8962 = vrcp.f32 %v1444_v41  ;;  %8445 = vmatmul.mubr.msk.f32.gmra.mxu0 %vm687_vm1, %v1781_v52  ;;  %v14248_v52 = vld [vmem:[#allocation42_spill] sm:$0xff]  ;;  %v7540_v9 = vadd.f32 %v14250_v31, %v14249_v56 }
 0x6dc   : > { %v8951_v12 = vpop.eup %8950  ;;  %8447 = vmatprep.mubr.msk.f32.mxu0 %vm687_vm1, %v1782_v45  ;;  %8964 = vrcp.f32 %v11715_v63 }
 0x6dd   : > { %v1783_v27 = vmul.f32 %v8951_v12, %v7522_v29  ;;  %v8953_v46 = vpop.eup %8952  ;;  %v11809_v12 = vpop.f32.mrf.mxu1 }
 0x6de   : > { %v1450_v5 = vpop.xlane.xlu0 %1449  ;;  %v1786_v63 = vmul.f32 %v8953_v46, %v14244_v43  ;;  %14251 = vst [vmem:[#allocation38_spill] sm:$0xff] %v11809_v12  ;;  %v14258_v43 = vld [vmem:[#allocation68_spill] sm:$0xff] }
 0x6df   : > { %8966 = vrcp.f32 %v1450_v5  ;;  %8448 = vmatmul.mubr.msk.f32.gmra.mxu0 %vm687_vm1, %v1783_v27  ;;  %v14253_v5 = vld [vmem:[#allocation55_spill] sm:$0xff]  ;;  %v11816_v24 = vpop.f32.mrf.mxu1 }
 0x6e0   : > { %v8955_v60 = vpop.eup %8954  ;;  %8450 = vmatprep.mubr.msk.f32.mxu0 %vm687_vm1, %v1784_v25  ;;  %v14254_v25 = vld [vmem:[#allocation61_spill] sm:$0xff]  ;;  %14255 = vst [vmem:[#allocation108_spill] sm:$0xff] %v11816_v24 }
 0x6e1   : > { %v1785_v18 = vmul.f32 %v8955_v60, %v7528_v3  ;;  %v8957_v28 = vpop.eup %8956  ;;  %v7546_v46 = vadd.f32 %v14254_v25, %v14253_v5  ;;  %v11819_v60 = vpop.f32.mrf.mxu1  ;;  %v14263_v5 = vld [vmem:[#allocation63_spill] sm:$0xff]  ;;  %v14264_v25 = vld [vmem:[#allocation46_spill] sm:$0xff] }
 0x6e2   : > { %v1456_v59 = vpop.xlane.xlu0 %1455  ;;  %v1788_v41 = vmul.f32 %v8957_v28, %v14248_v52  ;;  %14256 = vst [vmem:[#allocation33_spill] sm:$0xff] %v11819_v60 }
 0x6e3   : > { %8968 = vrcp.f32 %v1456_v59  ;;  %8451 = vmatmul.mubr.msk.f32.gmra.mxu0 %vm687_vm1, %v1785_v18  ;;  %v14257_v18 = vld [vmem:[#allocation69_spill] sm:$0xff] }
 0x6e4   : > { %v8959_v22 = vpop.eup %8958  ;;  %8453 = vmatprep.mubr.msk.f32.mxu0 %vm687_vm1, %v1786_v63  ;;  %v14259_v63 = vld [vmem:[#allocation111_spill] sm:$0xff] }
 0x6e5   : > { %v1787_v40 = vmul.f32 %v8959_v22, %v7534_v61  ;;  %v8961_v45 = vpop.eup %8960  ;;  %v7552_v28 = vadd.f32 %v14259_v63, %v14258_v43  ;;  %v11826_v61 = vpop.f32.mrf.mxu1 }
 0x6e6   : > { %v1790_v57 = vmul.f32 %v8961_v45, %v14252_v39  ;;  %14260 = vst [vmem:[#allocation92_spill] sm:$0xff] %v11826_v61 }
 0x6e7   : > { %8454 = vmatmul.mubr.msk.f32.gmra.mxu0 %vm687_vm1, %v1787_v40  ;;  %v11829_v22 = vpop.f32.mrf.mxu1 }
 0x6e8   : > { %v8963_v29 = vpop.eup %8962  ;;  %8456 = vmatprep.mubr.msk.f32.mxu0 %vm687_vm1, %v1788_v41  ;;  %14261 = vst [vmem:[#allocation71_spill] sm:$0xff] %v11829_v22 }
 0x6e9   : > { %v1789_v37 = vmul.f32 %v8963_v29, %v7540_v9  ;;  %v8965_v27 = vpop.eup %8964  ;;  %v11831_v40 = vpop.f32.mrf.mxu1 }
 0x6ea   : > { %v1792_v59 = vmul.f32 %v8965_v27, %v14257_v18  ;;  %14262 = vst [vmem:[#allocation83_spill] sm:$0xff] %v11831_v40  ;;  %v14267_v40 = vld [vmem:[#allocation49_spill] sm:$0xff] }
 0x6eb   : > { %8457 = vmatmul.mubr.msk.f32.gmra.mxu0 %vm687_vm1, %v1789_v37 }
 0x6ec   : > { %v8967_v62 = vpop.eup %8966  ;;  %8459 = vmatprep.mubr.msk.f32.mxu0 %vm687_vm1, %v1790_v57 }
 0x6ed   : > { %v1791_v3 = vmul.f32 %v8967_v62, %v7546_v46  ;;  %v14265_v46 = vld [vmem:[#allocation31_spill] sm:$0xff] }
 0x6ef   : > { %8460 = vmatmul.mubr.msk.f32.gmra.mxu0 %vm687_vm1, %v1791_v3 }
 0x6f0   : > { %v8969_v47 = vpop.eup %8968  ;;  %8462 = vmatprep.mubr.msk.f32.mxu0 %vm687_vm1, %v1792_v59 }
 0x6f1   : > { %v1793_v44 = vmul.f32 %v8969_v47, %v7552_v28 }
 0x6f3   : > { %8463 = vmatmul.mubr.msk.f32.gmra.mxu0 %vm687_vm1, %v1793_v44 }
 0x6fa   : > { %v3962_v52 = vpop.f32.mrf.mxu1 }
 0x6fc   : > { %v3964_v41 = vpop.f32.mrf.mxu1 }
 0x6fd   : > { %v4153_v45 = vmax.f32 %v3962_v52, %v3964_v41 }
 0x6fe   : > { %v11833_v56 = vpop.f32.mrf.mxu1 }
 0x6ff   : > { %4154 = vmax.xlane.f32.xlu0 %v4153_v45 }
 0x700   : > { %v11835_v31 = vpop.f32.mrf.mxu1 }
 0x701   : > { %v4156_v9 = vmax.f32 %v11833_v56, %v11835_v31 }
 0x702   : > { %v11839_v29 = vpop.f32.mrf.mxu1 }
 0x703   : > { %4157 = vmax.xlane.f32.xlu1 %v4156_v9 }
 0x704   : > { %v11841_v37 = vpop.f32.mrf.mxu1 }
 0x705   : > { %v4159_v59 = vmax.f32 %v11839_v29, %v11841_v37 }
 0x706   : > { %v11843_v39 = vpop.f32.mrf.mxu1 }
 0x708   : > { %v11845_v57 = vpop.f32.mrf.mxu1 }
 0x709   : > { %v4162_v27 = vmax.f32 %v11843_v39, %v11845_v57 }
 0x70a   : > { %v11855_v62 = vpop.f32.mrf.mxu1 }
 0x70b   : > { %4163 = vmax.xlane.f32.xlu1 %v4162_v27  ;;  %v14266_v27 = vld [vmem:[#allocation60_spill] sm:$0xff] }
 0x70c   : > { %v11857_v3 = vpop.f32.mrf.mxu1 }
 0x70d   : > { %v4165_v32 = vmax.f32 %v11855_v62, %v11857_v3 }
 0x70e   : > { %v11859_v18 = vpop.f32.mrf.mxu1 }
 0x710   : > { %v11863_v43 = vpop.f32.mrf.mxu1 }
 0x711   : > { %v4168_v44 = vmax.f32 %v11859_v18, %v11863_v43 }
 0x712   : > { %v11865_v63 = vpop.f32.mrf.mxu1 }
 0x714   : > { %v11867_v28 = vpop.f32.mrf.mxu1 }
 0x715   : > { %4583 = vrot.lane.b32.xlu0 %v14263_v5, %s9369_s22 }
 0x716   : > { %v11869_v47 = vpop.f32.mrf.mxu1 }
 0x718   : > { %v11873_v45 = vpop.f32.mrf.mxu1 }
 0x719   : > { %v4174_v60 = vmax.f32 %v11869_v47, %v11873_v45 }
 0x71a   : > { %v11875_v9 = vpop.f32.mrf.mxu1 }
 0x71c   : > { %4579 = vrot.lane.b32.xlu1 %v14264_v25, %s9369_s22 }
 0x720   : > { %4577 = vrot.lane.b32.xlu1 %v14265_v46, %s9369_s22 }
 0x734   : > { %4160 = vmax.xlane.f32.xlu0 %v4159_v59  ;;  %v11879_v59 = vpop.f32.mrf.mxu1 }
 0x736   : > { %v11883_v61 = vpop.f32.mrf.mxu1 }
 0x738   : > { %v11885_v24 = vpop.f32.mrf.mxu1 }
 0x744   : > { %4169 = vmax.xlane.f32.xlu1 %v4168_v44  ;;  %v11889_v44 = vpop.f32.mrf.mxu1 }
 0x746   : > { %v11893_v13 = vpop.f32.mrf.mxu1 }
 0x748   : > { %v11895_v53 = vpop.f32.mrf.mxu1 }
 0x74a   : > { %4595 = vrot.lane.b32.xlu0 %v14266_v27, %s9369_s22  ;;  %v11897_v17 = vpop.f32.mrf.mxu1 }
 0x74c   : > { %v11899_v55 = vpop.f32.mrf.mxu1 }
 0x74e   : > { %4593 = vrot.lane.b32.xlu0 %v14267_v40, %s9369_s22  ;;  %v11903_v7 = vpop.f32.mrf.mxu1 }
 0x750   : > { %v11905_v20 = vpop.f32.mrf.mxu1 }
 0x752   : > { %v11907_v2 = vpop.f32.mrf.mxu1 }
 0x754   : > { %v11909_v22 = vpop.f32.mrf.mxu1 }
 0x755   : > { %4575 = vrot.lane.b32.xlu1 %v14268_v8, %s9369_s22 }
 0x756   : > { %v11913_v12 = vpop.f32.mrf.mxu1 }
 0x757   : > { %v4195_v5 = vmax.f32 %v11909_v22, %v11913_v12 }
 0x758   : > { %v11915_v15 = vpop.f32.mrf.mxu1 }
 0x759   : > { %4573 = vrot.lane.b32.xlu1 %v14269_v26, %s9369_s22 }
 0x75a   : > { %v11919_v0 = vpop.f32.mrf.mxu1 }
 0x75c   : > { %v11923_v11 = vpop.f32.mrf.mxu1 }
 0x75e   : > { %v11925_v46 = vpop.f32.mrf.mxu1 }
 0x76d   : > { %4166 = vmax.xlane.f32.xlu0 %v4165_v32  ;;  %v14271_v32 = vld [vmem:[#allocation25_spill] sm:$0xff] }
 0x77d   : > { %4175 = vmax.xlane.f32.xlu1 %v4174_v60 }
 0x783   : > { %4591 = vrot.lane.b32.xlu0 %v14270_v35, %s9369_s22 }
 0x787   : > { %4589 = vrot.lane.b32.xlu0 %v14271_v32, %s9369_s22  ;;  %v14272_v32 = vld [vmem:[#allocation77_spill] sm:$0xff] }
 0x788   : > { %v4155_v1 = vpop.xlane.xlu0 %4154 }
 0x789   : > { %v4249_v26 = vsub.f32 %v3962_v52, %v4155_v1  ;;  %v4250_v49 = vsub.f32 %v3964_v41, %v4155_v1  ;;  %v11931_v1 = vpop.f32.mrf.mxu1 }
 0x78b   : > { %v4313_v8 = vmul.f32 1.442695, %v4249_v26  ;;  %v4315_v38 = vmul.f32 1.442695, %v4250_v49  ;;  %v14273_v49 = vld [vmem:[#allocation81_spill] sm:$0xff] }
 0x78c   : > { %v4158_v60 = vpop.xlane.xlu1 %4157  ;;  %v4584_v48 = vpop.permute.xlu0 %4583 }
 0x78d   : > { %8970 = vpow2.f32 %v4313_v8  ;;  %v4251_v35 = vsub.f32 %v11833_v56, %v4158_v60  ;;  %v4252_v40 = vsub.f32 %v11835_v31, %v4158_v60  ;;  %7924 = vmatpush3.bf16.msra.mxu0 %v4584_v48  ;;  %v11935_v8 = vpop.f32.mrf.mxu1 }
 0x78e   : > { %8972 = vpow2.f32 %v4315_v38  ;;  %4571 = vrot.lane.b32.xlu1 %v14272_v32, %s9369_s22  ;;  %7925 = vmatprep.subr.bf16.mxu0 %v4598_v51 }
 0x78f   : > { %v4317_v25 = vmul.f32 1.442695, %v4251_v35  ;;  %v4319_v52 = vmul.f32 1.442695, %v4252_v40  ;;  %v11939_v51 = vpop.f32.mrf.mxu1 }
 0x791   : > { %8974 = vpow2.f32 %v4317_v25  ;;  %7926 = vmatpush3.bf16.msra.mxu0 %v4582_v58  ;;  %v11946_v31 = vpop.f32.mrf.mxu1 }
 0x792   : > { %8976 = vpow2.f32 %v4319_v52  ;;  %4569 = vrot.lane.b32.xlu1 %v14273_v49, %s9369_s22 }
 0x793   : > { %v11953_v52 = vpop.f32.mrf.mxu1 }
 0x794   : > { %v4164_v26 = vpop.xlane.xlu1 %4163 }
 0x795   : > { %v4255_v48 = vsub.f32 %v11843_v39, %v4164_v26  ;;  %v4256_v38 = vsub.f32 %v11845_v57, %v4164_v26  ;;  %v4171_v26 = vmax.f32 %v11865_v63, %v11867_v28 }
 0x797   : > { %v4325_v41 = vmul.f32 1.442695, %v4255_v48  ;;  %v4327_v56 = vmul.f32 1.442695, %v4256_v38  ;;  %v11957_v48 = vpop.f32.mrf.mxu1 }
 0x798   : > { %14276 = vst [vmem:[#allocation48_spill] sm:$0xff] %v11957_v48  ;;  %v4580_v34 = vpop.permute.xlu1 %4579 }
 0x799   : > { %8978 = vpow2.f32 %v4325_v41 }
 0x79a   : > { %v11941_v35 = vpop.eup %8970  ;;  %8980 = vpow2.f32 %v4327_v56 }
 0x79b   : > { %v8973_v58 = vpop.eup %8972 }
 0x79c   : > { %v11944_v40 = vadd.f32 %v8973_v58, %v11941_v35 }
 0x79e   : > { %14274 = vst [vmem:[#allocation52_spill] sm:$0xff] %v11944_v40  ;;  %v11948_v25 = vpop.eup %8974 }
 0x79f   : > { %v8977_v60 = vpop.eup %8976 }
 0x7a0   : > { %v4538_v39 = vpack.c.bf16 %v8977_v60, %v8973_v58  ;;  %v11951_v57 = vadd.f32 %v8977_v60, %v11948_v25  ;;  %v11967_v58 = vpop.f32.mrf.mxu1 }
 0x7a2   : > { %14275 = vst [vmem:[#allocation58_spill] sm:$0xff] %v11951_v57  ;;  %4649 = vmatprep.mubr.bf16.mxu0 %v4538_v39  ;;  %v11969_v60 = vpop.f32.mrf.mxu1  ;;  %v4180_v39 = vmax.f32 %v11883_v61, %v11885_v24 }
 0x7a4   : > { %v11971_v49 = vpop.f32.mrf.mxu1 }
 0x7a6   : > { %v11959_v38 = vpop.eup %8978  ;;  %4172 = vmax.xlane.f32.xlu0 %v4171_v26  ;;  %v11975_v32 = vpop.f32.mrf.mxu1  ;;  %v4189_v26 = vmax.f32 %v11899_v55, %v11903_v7 }
 0x7a7   : > { %v11961_v41 = vpop.eup %8980 }
 0x7a8   : > { %v11965_v56 = vadd.f32 %v11961_v41, %v11959_v38  ;;  %v11979_v27 = vpop.f32.mrf.mxu1 }
 0x7aa   : > { %14277 = vst [vmem:[#allocation29_spill] sm:$0xff] %v11965_v56  ;;  %v11985_v56 = vpop.f32.mrf.mxu1 }
 0x7ac   : > { %v11993_v30 = vpop.f32.mrf.mxu1 }
 0x7b6   : > { %4181 = vmax.xlane.f32.xlu1 %v4180_v39  ;;  %v4201_v39 = vmax.f32 %v11923_v11, %v11925_v46 }
 0x7ba   : > { %4190 = vmax.xlane.f32.xlu1 %v4189_v26 }
 0x7bc   : > { %4587 = vrot.lane.b32.xlu0 %v14278_v6, %s9369_s22 }
 0x7bd   : > { %v4161_v40 = vpop.xlane.xlu0 %4160 }
 0x7be   : > { %v4253_v57 = vsub.f32 %v11839_v29, %v4161_v40  ;;  %v4254_v54 = vsub.f32 %v11841_v37, %v4161_v40  ;;  %4196 = vmax.xlane.f32.xlu1 %v4195_v5  ;;  %v4207_v29 = vmax.f32 %v11939_v51, %v11946_v31  ;;  %v11997_v37 = vpop.f32.mrf.mxu1  ;;  %v4578_v40 = vpop.permute.xlu1 %4577 }
 0x7bf   : > { %14280 = vst [vmem:[#allocation28_spill] sm:$0xff] %v11997_v37 }
 0x7c0   : > { %v4321_v16 = vmul.f32 1.442695, %v4253_v57  ;;  %v4323_v26 = vmul.f32 1.442695, %v4254_v54  ;;  %4585 = vrot.lane.b32.xlu0 %v14279_v14, %s9369_s22  ;;  %v4213_v54 = vmax.f32 %v11967_v58, %v11969_v60  ;;  %v12001_v57 = vpop.f32.mrf.mxu1 }
 0x7c1   : > { %v4596_v6 = vpop.permute.xlu0 %4595 }
 0x7c2   : > { %8982 = vpow2.f32 %v4321_v16  ;;  %4202 = vmax.xlane.f32.xlu1 %v4201_v39  ;;  %7927 = vmatprep.subr.bf16.mxu0 %v4596_v6  ;;  %v4219_v16 = vmax.f32 %v11979_v27, %v11985_v56 }
 0x7c3   : > { %8984 = vpow2.f32 %v4323_v26  ;;  %7928 = vmatpush3.bf16.msra.mxu0 %v4580_v34  ;;  %v12005_v34 = vpop.f32.mrf.mxu1 }
 0x7c5   : > { %v4594_v5 = vpop.permute.xlu0 %4593 }
 0x7c6   : > { %4208 = vmax.xlane.f32.xlu1 %v4207_v29  ;;  %7929 = vmatprep.subr.bf16.mxu0 %v4594_v5 }
 0x7c7   : > { %7930 = vmatpush3.bf16.msra.mxu0 %v4578_v40  ;;  %v4225_v40 = vmax.f32 %v12001_v57, %v12005_v34 }
 0x7ca   : > { %4214 = vmax.xlane.f32.xlu1 %v4213_v54 }
 0x7cd   : > { %v4170_v6 = vpop.xlane.xlu1 %4169 }
 0x7ce   : > { %v4259_v39 = vsub.f32 %v11859_v18, %v4170_v6  ;;  %v4260_v26 = vsub.f32 %v11863_v43, %v4170_v6  ;;  %4220 = vmax.xlane.f32.xlu1 %v4219_v16  ;;  %v4177_v18 = vmax.f32 %v11875_v9, %v11879_v59  ;;  %v4183_v6 = vmax.f32 %v11889_v44, %v11893_v13 }
 0x7cf   : > { %v12009_v29 = vpop.eup %8982 }
 0x7d0   : > { %v12011_v5 = vpop.eup %8984  ;;  %v4333_v14 = vmul.f32 1.442695, %v4259_v39  ;;  %v4335_v54 = vmul.f32 1.442695, %v4260_v26  ;;  %v4192_v26 = vmax.f32 %v11905_v20, %v11907_v2 }
 0x7d1   : > { %v12017_v42 = vadd.f32 %v12011_v5, %v12009_v29 }
 0x7d2   : > { %8986 = vpow2.f32 %v4333_v14  ;;  %4226 = vmax.xlane.f32.xlu1 %v4225_v40  ;;  %v4186_v14 = vmax.f32 %v11895_v53, %v11897_v17  ;;  %v4198_v40 = vmax.f32 %v11915_v15, %v11919_v0 }
 0x7d3   : > { %14281 = vst [vmem:[#allocation32_spill] sm:$0xff] %v12017_v42  ;;  %8988 = vpow2.f32 %v4335_v54  ;;  %v4204_v54 = vmax.f32 %v11931_v1, %v11935_v8  ;;  %v4216_v42 = vmax.f32 %v11971_v49, %v11975_v32 }
 0x7df   : > { %v12021_v43 = vpop.eup %8986  ;;  %4178 = vmax.xlane.f32.xlu0 %v4177_v18  ;;  %v4210_v18 = vmax.f32 %v11953_v52, %v11957_v48 }
 0x7e0   : > { %v12023_v16 = vpop.eup %8988 }
 0x7e1   : > { %v12029_v39 = vadd.f32 %v12023_v16, %v12021_v43 }
 0x7e3   : > { %14282 = vst [vmem:[#allocation44_spill] sm:$0xff] %v12029_v39  ;;  %4184 = vmax.xlane.f32.xlu0 %v4183_v6  ;;  %5322 = vrot.lane.b32.xlu1 %v14169_v50, %s9370_s23  ;;  %v12047_v6 = vpop.f32.mrf.mxu1 }
 0x7e5   : > { %v12053_v50 = vpop.f32.mrf.mxu1 }
 0x7e6   : > { %14283 = vst [vmem:[#allocation34_spill] sm:$0xff] %v12053_v50 }
 0x7e7   : > { %4187 = vmax.xlane.f32.xlu0 %v4186_v14  ;;  %5320 = vrot.lane.b32.xlu1 %v14171_v23, %s9370_s23  ;;  %v4576_v23 = vpop.permute.xlu1 %4575  ;;  %v12057_v48 = vpop.f32.mrf.mxu1 }
 0x7eb   : > { %4193 = vmax.xlane.f32.xlu0 %v4192_v26  ;;  %5288 = vrot.lane.b32.xlu1 %v14168_v19, %s9370_s23 }
 0x7ef   : > { %4199 = vmax.xlane.f32.xlu0 %v4198_v40 }
 0x7f3   : > { %4205 = vmax.xlane.f32.xlu0 %v4204_v54 }
 0x7f6   : > { %v4167_v14 = vpop.xlane.xlu0 %4166 }
 0x7f7   : > { %v4257_v39 = vsub.f32 %v11855_v62, %v4167_v14  ;;  %v4258_v26 = vsub.f32 %v11857_v3, %v4167_v14  ;;  %4211 = vmax.xlane.f32.xlu0 %v4210_v18  ;;  %v4222_v62 = vmax.f32 %v11993_v30, %v11997_v37  ;;  %v4574_v18 = vpop.permute.xlu1 %4573  ;;  %v12061_v14 = vpop.f32.mrf.mxu1 }
 0x7f9   : > { %v4329_v40 = vmul.f32 1.442695, %v4257_v39  ;;  %v4331_v19 = vmul.f32 1.442695, %v4258_v26  ;;  %v4228_v39 = vmax.f32 %v12047_v6, %v12053_v50 }
 0x7fa   : > { %v4592_v54 = vpop.permute.xlu0 %4591 }
 0x7fb   : > { %8990 = vpow2.f32 %v4329_v40  ;;  %4217 = vmax.xlane.f32.xlu0 %v4216_v42  ;;  %7931 = vmatprep.subr.bf16.mxu0 %v4592_v54  ;;  %v12063_v42 = vpop.f32.mrf.mxu1 }
 0x7fc   : > { %8992 = vpow2.f32 %v4331_v19  ;;  %7932 = vmatpush3.bf16.msra.mxu0 %v4576_v23 }
 0x7fe   : > { %v4590_v3 = vpop.permute.xlu0 %4589 }
 0x7ff   : > { %4223 = vmax.xlane.f32.xlu0 %v4222_v62  ;;  %7933 = vmatprep.subr.bf16.mxu0 %v4590_v3  ;;  %v12069_v3 = vpop.f32.mrf.mxu1 }
 0x800   : > { %7934 = vmatpush3.bf16.msra.mxu0 %v4574_v18 }
 0x803   : > { %4229 = vmax.xlane.f32.xlu0 %v4228_v39  ;;  %v4234_v39 = vmax.f32 %v12063_v42, %v12069_v3 }
 0x806   : > { %v4176_v19 = vpop.xlane.xlu1 %4175 }
 0x807   : > { %v4263_v23 = vsub.f32 %v11869_v47, %v4176_v19  ;;  %v4264_v26 = vsub.f32 %v11873_v45, %v4176_v19 }
 0x808   : > { %v12067_v40 = vpop.eup %8990 }
 0x809   : > { %v8993_v54 = vpop.eup %8992  ;;  %v4341_v37 = vmul.f32 1.442695, %v4263_v23  ;;  %v4343_v62 = vmul.f32 1.442695, %v4264_v26 }
 0x80a   : > { %v12072_v18 = vadd.f32 %v8993_v54, %v12067_v40  ;;  %v4572_v26 = vpop.permute.xlu1 %4571 }
 0x80b   : > { %8994 = vpow2.f32 %v4341_v37 }
 0x80c   : > { %14284 = vst [vmem:[#allocation53_spill] sm:$0xff] %v12072_v18  ;;  %8996 = vpow2.f32 %v4343_v62 }
 0x80f   : > { %4235 = vmax.xlane.f32.xlu1 %v4234_v39 }
 0x818   : > { %v12076_v50 = vpop.eup %8994 }
 0x819   : > { %v12078_v47 = vpop.eup %8996  ;;  %5290 = vrot.lane.b32.xlu0 %v14165_v21, %s9370_s23  ;;  %v12094_v21 = vpop.f32.mrf.mxu1 }
 0x81a   : > { %v12084_v45 = vadd.f32 %v12078_v47, %v12076_v50 }
 0x81c   : > { %14285 = vst [vmem:[#allocation64_spill] sm:$0xff] %v12084_v45  ;;  %v4231_v45 = vmax.f32 %v12057_v48, %v12061_v14 }
 0x820   : > { %5286 = vrot.lane.b32.xlu1 %v14163_v36, %s9370_s23 }
 0x824   : > { %5284 = vrot.lane.b32.xlu1 %v14166_v10, %s9370_s23  ;;  %v4570_v10 = vpop.permute.xlu1 %4569 }
 0x82f   : > { %v4173_v37 = vpop.xlane.xlu0 %4172 }
 0x830   : > { %v4261_v19 = vsub.f32 %v11865_v63, %v4173_v37  ;;  %v4262_v23 = vsub.f32 %v11867_v28, %v4173_v37  ;;  %v4537_v63 = vpack.c.bf16 %v11948_v25, %v11941_v35  ;;  %v12098_v28 = vpop.f32.mrf.mxu1  ;;  %v4539_v35 = vpack.c.bf16 %v11959_v38, %v12009_v29 }
 0x832   : > { %v4337_v62 = vmul.f32 1.442695, %v4261_v19  ;;  %v4339_v39 = vmul.f32 1.442695, %v4262_v23  ;;  %v12102_v37 = vpop.f32.mrf.mxu1 }
 0x833   : > { %v4588_v18 = vpop.permute.xlu0 %4587 }
 0x834   : > { %8998 = vpow2.f32 %v4337_v62  ;;  %7935 = vmatprep.subr.bf16.mxu0 %v4588_v18  ;;  %v4540_v18 = vpack.c.bf16 %v11961_v41, %v12011_v5  ;;  %v12108_v25 = vpop.f32.mrf.mxu1  ;;  %v4542_v41 = vpack.c.bf16 %v12023_v16, %v8993_v54 }
 0x835   : > { %9000 = vpow2.f32 %v4339_v39  ;;  %7936 = vmatpush3.bf16.msra.mxu0 %v4572_v26 }
 0x837   : > { %v4586_v36 = vpop.permute.xlu0 %4585 }
 0x838   : > { %4232 = vmax.xlane.f32.xlu0 %v4231_v45  ;;  %7937 = vmatprep.subr.bf16.mxu0 %v4586_v36 }
 0x839   : > { %7938 = vmatpush3.bf16.msra.mxu0 %v4570_v10 }
 0x83c   : > { %4650 = vmatmul.mubr.bf16.vlgmr.msra.gmra.mxu0 %v4537_v63 }
 0x83d   : > { %4657 = vmatprep.mubr.bf16.mxu0 %v4540_v18 }
 0x83f   : > { %v4182_v19 = vpop.xlane.xlu1 %4181 }
 0x840   : > { %v4267_v23 = vsub.f32 %v11883_v61, %v4182_v19  ;;  %v4268_v26 = vsub.f32 %v11885_v24, %v4182_v19  ;;  %v4240_v24 = vmax.f32 %v12102_v37, %v12108_v25 }
 0x841   : > { %v8999_v45 = vpop.eup %8998 }
 0x842   : > { %v9001_v36 = vpop.eup %9000  ;;  %v4349_v10 = vmul.f32 1.442695, %v4267_v23  ;;  %v4351_v62 = vmul.f32 1.442695, %v4268_v26 }
 0x843   : > { %v4191_v39 = vpop.xlane.xlu1 %4190  ;;  %v12111_v5 = vadd.f32 %v9001_v36, %v8999_v45  ;;  %v4544_v26 = vpack.c.bf16 %v12078_v47, %v9001_v36 }
 0x844   : > { %9002 = vpow2.f32 %v4349_v10  ;;  %v4273_v63 = vsub.f32 %v11899_v55, %v4191_v39  ;;  %v4274_v61 = vsub.f32 %v11903_v7, %v4191_v39  ;;  %4658 = vmatmul.mubr.bf16.gmra.mxu0 %v4539_v35  ;;  %v4541_v7 = vpack.c.bf16 %v12021_v43, %v12067_v40 }
 0x845   : > { %9004 = vpow2.f32 %v4351_v62  ;;  %4665 = vmatprep.mubr.bf16.mxu0 %v4542_v41  ;;  %v4543_v39 = vpack.c.bf16 %v12076_v50, %v8999_v45 }
 0x846   : > { %v4361_v18 = vmul.f32 1.442695, %v4273_v63  ;;  %v4363_v38 = vmul.f32 1.442695, %v4274_v61 }
 0x847   : > { %v4197_v29 = vpop.xlane.xlu1 %4196 }
 0x848   : > { %9006 = vpow2.f32 %v4361_v18  ;;  %v4277_v19 = vsub.f32 %v11909_v22, %v4197_v29  ;;  %v4278_v16 = vsub.f32 %v11913_v12, %v4197_v29  ;;  %4241 = vmax.xlane.f32.xlu1 %v4240_v24 }
 0x849   : > { %9008 = vpow2.f32 %v4363_v38 }
 0x84a   : > { %v4369_v54 = vmul.f32 1.442695, %v4277_v19  ;;  %v4371_v55 = vmul.f32 1.442695, %v4278_v16 }
 0x84b   : > { %v4203_v23 = vpop.xlane.xlu1 %4202 }
 0x84c   : > { %9010 = vpow2.f32 %v4369_v54  ;;  %v4281_v10 = vsub.f32 %v11923_v11, %v4203_v23  ;;  %v4282_v62 = vsub.f32 %v11925_v46, %v4203_v23  ;;  %4666 = vmatmul.mubr.bf16.gmra.mxu0 %v4541_v7 }
 0x84d   : > { %9012 = vpow2.f32 %v4371_v55  ;;  %4673 = vmatprep.mubr.bf16.mxu0 %v4544_v26 }
 0x84e   : > { %v4377_v22 = vmul.f32 1.442695, %v4281_v10  ;;  %v4379_v12 = vmul.f32 1.442695, %v4282_v62  ;;  %5318 = vrot.lane.b32.xlu0 %v14167_v4, %s9370_s23  ;;  %v14288_v10 = vld [vmem:[#allocation9_spill] sm:$0xff] }
 0x84f   : > { %v4209_v35 = vpop.xlane.xlu1 %4208 }
 0x850   : > { %9014 = vpow2.f32 %v4377_v22  ;;  %v4285_v43 = vsub.f32 %v11939_v51, %v4209_v35  ;;  %v4286_v40 = vsub.f32 %v11946_v31, %v4209_v35 }
 0x851   : > { %v12128_v47 = vpop.eup %9002  ;;  %9016 = vpow2.f32 %v4379_v12 }
 0x852   : > { %v12130_v11 = vpop.eup %9004  ;;  %v4385_v46 = vmul.f32 1.442695, %v4285_v43  ;;  %v4387_v36 = vmul.f32 1.442695, %v4286_v40  ;;  %5316 = vrot.lane.b32.xlu0 %v14170_v33, %s9370_s23 }
 0x853   : > { %v4215_v41 = vpop.xlane.xlu1 %4214  ;;  %v12137_v63 = vadd.f32 %v12130_v11, %v12128_v47 }
 0x854   : > { %9018 = vpow2.f32 %v4385_v46  ;;  %v4289_v51 = vsub.f32 %v11967_v58, %v4215_v41  ;;  %v4290_v31 = vsub.f32 %v11969_v60, %v4215_v41  ;;  %4674 = vmatmul.mubr.bf16.gmra.mxu0 %v4543_v39  ;;  %v14287_v60 = vld [vmem:[#allocation26_spill] sm:$0xff] }
 0x855   : > { %14286 = vst [vmem:[#allocation40_spill] sm:$0xff] %v12137_v63  ;;  %v12141_v61 = vpop.eup %9006  ;;  %9020 = vpow2.f32 %v4387_v36 }
 0x856   : > { %v12143_v24 = vpop.eup %9008  ;;  %v4393_v18 = vmul.f32 1.442695, %v4289_v51  ;;  %v4395_v38 = vmul.f32 1.442695, %v4290_v31 }
 0x857   : > { %v4221_v29 = vpop.xlane.xlu1 %4220  ;;  %v12147_v50 = vadd.f32 %v12143_v24, %v12141_v61 }
 0x858   : > { %9022 = vpow2.f32 %v4393_v18  ;;  %v4293_v45 = vsub.f32 %v11979_v27, %v4221_v29  ;;  %v4294_v58 = vsub.f32 %v11985_v56, %v4221_v29 }
 0x859   : > { %v12151_v19 = vpop.eup %9010  ;;  %9024 = vpow2.f32 %v4395_v38  ;;  %5282 = vrot.lane.b32.xlu1 %v14287_v60, %s9370_s23 }
 0x85a   : > { %v12155_v16 = vpop.eup %9012  ;;  %v4401_v54 = vmul.f32 1.442695, %v4293_v45  ;;  %v4403_v55 = vmul.f32 1.442695, %v4294_v58 }
 0x85b   : > { %v4227_v7 = vpop.xlane.xlu1 %4226  ;;  %v12159_v23 = vadd.f32 %v12155_v16, %v12151_v19 }
 0x85c   : > { %9026 = vpow2.f32 %v4401_v54  ;;  %v4297_v27 = vsub.f32 %v12001_v57, %v4227_v7  ;;  %v4298_v56 = vsub.f32 %v12005_v34, %v4227_v7 }
 0x85d   : > { %v12163_v26 = vpop.eup %9014  ;;  %9028 = vpow2.f32 %v4403_v55  ;;  %5280 = vrot.lane.b32.xlu1 %v14288_v10, %s9370_s23 }
 0x85e   : > { %v12167_v62 = vpop.eup %9016  ;;  %v4409_v22 = vmul.f32 1.442695, %v4297_v27  ;;  %v4411_v12 = vmul.f32 1.442695, %v4298_v56 }
 0x85f   : > { %v5323_v35 = vpop.permute.xlu1 %5322  ;;  %v12171_v43 = vadd.f32 %v12167_v62, %v12163_v26 }
 0x860   : > { %9030 = vpow2.f32 %v4409_v22  ;;  %8068 = vmatprep.subr.msk.mxu0 %vm687_vm1, %v5323_v35  ;;  %v12212_v35 = vpop.f32.mrf.mxu1 }
 0x861   : > { %v12174_v57 = vpop.eup %9018  ;;  %9032 = vpow2.f32 %v4411_v12 }
 0x862   : > { %v12176_v34 = vpop.eup %9020 }
 0x863   : > { %v12180_v40 = vadd.f32 %v12176_v34, %v12174_v57 }
 0x865   : > { %v12182_v46 = vpop.eup %9022 }
 0x866   : > { %v12184_v36 = vpop.eup %9024 }
 0x867   : > { %v12188_v39 = vadd.f32 %v12184_v36, %v12182_v46 }
 0x868   : > { %v4179_v41 = vpop.xlane.xlu0 %4178 }
 0x869   : > { %v12190_v51 = vpop.eup %9026  ;;  %v4265_v31 = vsub.f32 %v11875_v9, %v4179_v41  ;;  %v4266_v18 = vsub.f32 %v11879_v59, %v4179_v41  ;;  %v4237_v9 = vmax.f32 %v12094_v21, %v12098_v28 }
 0x86a   : > { %v12194_v38 = vpop.eup %9028 }
 0x86b   : > { %v4345_v29 = vmul.f32 1.442695, %v4265_v31  ;;  %v4347_v45 = vmul.f32 1.442695, %v4266_v18  ;;  %v12198_v58 = vadd.f32 %v12194_v38, %v12190_v51 }
 0x86c   : > { %v4185_v54 = vpop.xlane.xlu0 %4184 }
 0x86d   : > { %v12200_v55 = vpop.eup %9030  ;;  %9034 = vpow2.f32 %v4345_v29  ;;  %v4269_v7 = vsub.f32 %v11889_v44, %v4185_v54  ;;  %v4270_v27 = vsub.f32 %v11893_v13, %v4185_v54  ;;  %v12216_v29 = vpop.f32.mrf.mxu1 }
 0x86e   : > { %v12204_v56 = vpop.eup %9032  ;;  %9036 = vpow2.f32 %v4347_v45 }
 0x86f   : > { %v4353_v59 = vmul.f32 1.442695, %v4269_v7  ;;  %v4355_v22 = vmul.f32 1.442695, %v4270_v27  ;;  %v12210_v12 = vadd.f32 %v12204_v56, %v12200_v55 }
 0x870   : > { %v4188_v41 = vpop.xlane.xlu0 %4187 }
 0x871   : > { %9038 = vpow2.f32 %v4353_v59  ;;  %v4271_v44 = vsub.f32 %v11895_v53, %v4188_v41  ;;  %v4272_v13 = vsub.f32 %v11897_v17, %v4188_v41  ;;  %4238 = vmax.xlane.f32.xlu0 %v4237_v9  ;;  %v12220_v59 = vpop.f32.mrf.mxu1 }
 0x872   : > { %9040 = vpow2.f32 %v4355_v22 }
 0x873   : > { %v4357_v31 = vmul.f32 1.442695, %v4271_v44  ;;  %v4359_v18 = vmul.f32 1.442695, %v4272_v13 }
 0x874   : > { %v4194_v45 = vpop.xlane.xlu0 %4193 }
 0x875   : > { %9042 = vpow2.f32 %v4357_v31  ;;  %v4275_v54 = vsub.f32 %v11905_v20, %v4194_v45  ;;  %v4276_v7 = vsub.f32 %v11907_v2, %v4194_v45  ;;  %v12225_v31 = vpop.f32.mrf.mxu1 }
 0x876   : > { %9044 = vpow2.f32 %v4359_v18 }
 0x877   : > { %v4365_v27 = vmul.f32 1.442695, %v4275_v54  ;;  %v4367_v63 = vmul.f32 1.442695, %v4276_v7  ;;  %v4246_v7 = vmax.f32 %v12220_v59, %v12225_v31 }
 0x878   : > { %v4200_v53 = vpop.xlane.xlu0 %4199 }
 0x879   : > { %9046 = vpow2.f32 %v4365_v27  ;;  %v4279_v17 = vsub.f32 %v11915_v15, %v4200_v53  ;;  %v4280_v9 = vsub.f32 %v11919_v0, %v4200_v53 }
 0x87a   : > { %v9035_v22 = vpop.eup %9034  ;;  %9048 = vpow2.f32 %v4367_v63 }
 0x87b   : > { %v9037_v41 = vpop.eup %9036  ;;  %v4373_v44 = vmul.f32 1.442695, %v4279_v17  ;;  %v4375_v13 = vmul.f32 1.442695, %v4280_v9  ;;  %v4545_v20 = vpack.c.bf16 %v12128_v47, %v9035_v22  ;;  %v14289_v9 = vld [vmem:[#allocation48_spill] sm:$0xff] }
 0x87c   : > { %v4206_v2 = vpop.xlane.xlu0 %4205  ;;  %v4546_v18 = vpack.c.bf16 %v12130_v11, %v9037_v41  ;;  %v12228_v45 = vadd.f32 %v9037_v41, %v9035_v22 }
 0x87d   : > { %9050 = vpow2.f32 %v4373_v44  ;;  %v4283_v54 = vsub.f32 %v11931_v1, %v4206_v2  ;;  %v4284_v15 = vsub.f32 %v11935_v8, %v4206_v2 }
 0x87e   : > { %v9039_v0 = vpop.eup %9038  ;;  %9052 = vpow2.f32 %v4375_v13  ;;  %4681 = vmatprep.mubr.bf16.mxu0 %v4546_v18 }
 0x87f   : > { %v9041_v63 = vpop.eup %9040  ;;  %v4381_v47 = vmul.f32 1.442695, %v4283_v54  ;;  %v4383_v27 = vmul.f32 1.442695, %v4284_v15  ;;  %4682 = vmatmul.mubr.bf16.gmra.mxu0 %v4545_v20 }
 0x880   : > { %v4212_v53 = vpop.xlane.xlu0 %4211  ;;  %v12234_v17 = vadd.f32 %v9041_v63, %v9039_v0 }
 0x881   : > { %9054 = vpow2.f32 %v4381_v47  ;;  %v4287_v11 = vsub.f32 %v11953_v52, %v4212_v53  ;;  %v4288_v1 = vsub.f32 %v14289_v9, %v4212_v53  ;;  %4247 = vmax.xlane.f32.xlu1 %v4246_v7  ;;  %v14291_v9 = vld [vmem:[#allocation28_spill] sm:$0xff] }
 0x882   : > { %v9043_v8 = vpop.eup %9042  ;;  %9056 = vpow2.f32 %v4383_v27  ;;  %v14290_v27 = vld [vmem:[#allocation45_spill] sm:$0xff] }
 0x883   : > { %v9045_v22 = vpop.eup %9044  ;;  %v4389_v41 = vmul.f32 1.442695, %v4287_v11  ;;  %v4391_v44 = vmul.f32 1.442695, %v4288_v1  ;;  %v4547_v13 = vpack.c.bf16 %v9043_v8, %v9039_v0 }
 0x884   : > { %v4218_v2 = vpop.xlane.xlu0 %4217  ;;  %v4548_v18 = vpack.c.bf16 %v9045_v22, %v9041_v63  ;;  %v12238_v54 = vadd.f32 %v9045_v22, %v9043_v8 }
 0x885   : > { %9058 = vpow2.f32 %v4389_v41  ;;  %v4291_v20 = vsub.f32 %v11971_v49, %v4218_v2  ;;  %v4292_v15 = vsub.f32 %v11975_v32, %v4218_v2 }
 0x886   : > { %v9047_v47 = vpop.eup %9046  ;;  %9060 = vpow2.f32 %v4391_v44  ;;  %4689 = vmatprep.mubr.bf16.mxu0 %v4548_v18  ;;  %v14292_v44 = vld [vmem:[#allocation50_spill] sm:$0xff] }
 0x887   : > { %v9049_v52 = vpop.eup %9048  ;;  %v4397_v7 = vmul.f32 1.442695, %v4291_v20  ;;  %v4399_v53 = vmul.f32 1.442695, %v4292_v15  ;;  %4690 = vmatmul.mubr.bf16.gmra.mxu0 %v4547_v13  ;;  %5314 = vrot.lane.b32.xlu0 %v14290_v27, %s9370_s23  ;;  %v14293_v18 = vld [vmem:[#allocation34_spill] sm:$0xff] }
 0x888   : > { %v4224_v0 = vpop.xlane.xlu0 %4223  ;;  %v4550_v63 = vpack.c.bf16 %v9049_v52, %v12143_v24  ;;  %v12245_v11 = vadd.f32 %v9049_v52, %v9047_v47  ;;  %v5321_v52 = vpop.permute.xlu1 %5320 }
 0x889   : > { %9062 = vpow2.f32 %v4397_v7  ;;  %v4295_v49 = vsub.f32 %v11993_v30, %v4224_v0  ;;  %v4296_v32 = vsub.f32 %v14291_v9, %v4224_v0  ;;  %v4549_v30 = vpack.c.bf16 %v9047_v47, %v12141_v61  ;;  %v14294_v61 = vld [vmem:[#allocation21_spill] sm:$0xff] }
 0x88a   : > { %v9051_v1 = vpop.eup %9050  ;;  %9064 = vpow2.f32 %v4399_v53  ;;  %4697 = vmatprep.mubr.bf16.mxu0 %v4550_v63 }
 0x88b   : > { %v9053_v8 = vpop.eup %9052  ;;  %v4405_v22 = vmul.f32 1.442695, %v4295_v49  ;;  %v4407_v41 = vmul.f32 1.442695, %v4296_v32  ;;  %5312 = vrot.lane.b32.xlu0 %v14292_v44, %s9370_s23 }
 0x88c   : > { %v4230_v13 = vpop.xlane.xlu0 %4229  ;;  %v12251_v2 = vadd.f32 %v9053_v8, %v9051_v1  ;;  %v4552_v7 = vpack.c.bf16 %v9053_v8, %v12155_v16  ;;  %v5289_v16 = vpop.permute.xlu1 %5288  ;;  %v4551_v8 = vpack.c.bf16 %v9051_v1, %v12151_v19 }
 0x88d   : > { %9066 = vpow2.f32 %v4405_v22  ;;  %v4299_v24 = vsub.f32 %v12047_v6, %v4230_v13  ;;  %v4300_v20 = vsub.f32 %v14293_v18, %v4230_v13 }
 0x88e   : > { %v9055_v15 = vpop.eup %9054  ;;  %9068 = vpow2.f32 %v4407_v41  ;;  %v14295_v41 = vld [vmem:[#allocation7_spill] sm:$0xff] }
 0x88f   : > { %v9057_v53 = vpop.eup %9056  ;;  %v4413_v0 = vmul.f32 1.442695, %v4299_v24  ;;  %v4415_v63 = vmul.f32 1.442695, %v4300_v20  ;;  %4698 = vmatmul.mubr.bf16.gmra.mxu0 %v4549_v30 }
 0x890   : > { %4705 = vmatprep.mubr.bf16.mxu0 %v4552_v7  ;;  %v5291_v49 = vpop.permute.xlu0 %5290  ;;  %v12257_v9 = vadd.f32 %v9057_v53, %v9055_v15  ;;  %v4554_v13 = vpack.c.bf16 %v9057_v53, %v12167_v62  ;;  %v4553_v62 = vpack.c.bf16 %v9055_v15, %v12163_v26  ;;  %v14300_v26 = vld [vmem:[#allocation5_spill] sm:$0xff] }
 0x891   : > { %9070 = vpow2.f32 %v4413_v0  ;;  %8069 = vmatpush3.xpose.msk.msra.mxu0 %vm687_vm1, %v5291_v49  ;;  %v14296_v0 = vld [vmem:[#allocation17_spill] sm:$0xff] }
 0x892   : > { %v9059_v6 = vpop.eup %9058  ;;  %9072 = vpow2.f32 %v4415_v63  ;;  %5278 = vrot.lane.b32.xlu1 %v14294_v61, %s9370_s23  ;;  %8070 = vmatprep.subr.msk.mxu0 %vm687_vm1, %v5321_v52 }
 0x893   : > { %v9061_v47 = vpop.eup %9060 }
 0x894   : > { %v12263_v32 = vadd.f32 %v9061_v47, %v9059_v6 }
 0x895   : > { %8071 = vmatpush3.xpose.msk.msra.mxu0 %vm687_vm1, %v5289_v16  ;;  %v14297_v16 = vld [vmem:[#allocation6_spill] sm:$0xff] }
 0x896   : > { %v9063_v22 = vpop.eup %9062  ;;  %5276 = vrot.lane.b32.xlu1 %v14295_v41, %s9370_s23 }
 0x897   : > { %v9065_v24 = vpop.eup %9064  ;;  %4706 = vmatmul.mubr.bf16.gmra.mxu0 %v4551_v8 }
 0x898   : > { %4713 = vmatprep.mubr.bf16.mxu0 %v4554_v13  ;;  %v4236_v18 = vpop.xlane.xlu1 %4235  ;;  %v12270_v20 = vadd.f32 %v9065_v24, %v9063_v22  ;;  %v14298_v13 = vld [vmem:[#allocation14_spill] sm:$0xff]  ;;  %v4558_v15 = vpack.c.bf16 %v9065_v24, %v12184_v36  ;;  %v4557_v24 = vpack.c.bf16 %v9063_v22, %v12182_v46 }
 0x899   : > { %v4303_v30 = vsub.f32 %v12063_v42, %v4236_v18  ;;  %v4304_v52 = vsub.f32 %v12069_v3, %v4236_v18  ;;  %v4556_v42 = vpack.c.bf16 %v9061_v47, %v12176_v34  ;;  %v4555_v18 = vpack.c.bf16 %v9059_v6, %v12174_v57 }
 0x89a   : > { %v9067_v7 = vpop.eup %9066  ;;  %5274 = vrot.lane.b32.xlu1 %v14296_v0, %s9370_s23  ;;  %v4243_v34 = vmax.f32 %v12212_v35, %v12216_v29 }
 0x89b   : > { %v9069_v19 = vpop.eup %9068  ;;  %v4421_v1 = vmul.f32 1.442695, %v4303_v30  ;;  %v4423_v63 = vmul.f32 1.442695, %v4304_v52  ;;  %v12287_v30 = vpop.f32.mrf.mxu0 }
 0x89c   : > { %v12276_v49 = vadd.f32 %v9069_v19, %v9067_v7  ;;  %14299 = vst [vmem:[#allocation41_spill] sm:$0xff] %v12287_v30 }
 0x89d   : > { %9074 = vpow2.f32 %v4421_v1  ;;  %v12296_v52 = vpop.f32.mrf.mxu0  ;;  %v14302_v1 = vld [vmem:[#allocation8_spill] sm:$0xff] }
 0x89e   : > { %v9071_v53 = vpop.eup %9070  ;;  %9076 = vpow2.f32 %v4423_v63  ;;  %5272 = vrot.lane.b32.xlu1 %v14297_v16, %s9370_s23  ;;  %14301 = vst [vmem:[#allocation43_spill] sm:$0xff] %v12296_v52  ;;  %v14304_v63 = vld [vmem:[#allocation4_spill] sm:$0xff]  ;;  %v14308_v52 = vld [vmem:[#allocation3_spill] sm:$0xff] }
 0x89f   : > { %v9073_v3 = vpop.eup %9072  ;;  %4714 = vmatmul.mubr.bf16.gmra.mxu0 %v4553_v62  ;;  %v12302_v6 = vpop.f32.mrf.mxu0  ;;  %v4560_v62 = vpack.c.bf16 %v9069_v19, %v12194_v38  ;;  %v4561_v19 = vpack.c.bf16 %v9071_v53, %v12200_v55 }
 0x8a0   : > { %4721 = vmatprep.mubr.bf16.mxu0 %v4556_v42  ;;  %v12282_v8 = vadd.f32 %v9073_v3, %v9071_v53  ;;  %14303 = vst [vmem:[#allocation89_spill] sm:$0xff] %v12302_v6  ;;  %v4562_v46 = vpack.c.bf16 %v9073_v3, %v12204_v56  ;;  %v14312_v56 = vld [vmem:[#allocation30_spill] sm:$0xff]  ;;  %v5287_v55 = vpop.permute.xlu1 %5286 }
 0x8a1   : > { %v12312_v42 = vpop.f32.mrf.mxu0 }
 0x8a2   : > { %5270 = vrot.lane.b32.xlu1 %v14298_v13, %s9370_s23  ;;  %14305 = vst [vmem:[#allocation91_spill] sm:$0xff] %v12312_v42 }
 0x8a6   : > { %5268 = vrot.lane.b32.xlu1 %v14300_v26, %s9370_s23 }
 0x8a7   : > { %4722 = vmatmul.mubr.bf16.gmra.mxu0 %v4555_v18  ;;  %v14306_v18 = vld [vmem:[#allocation2_spill] sm:$0xff] }
 0x8a8   : > { %4729 = vmatprep.mubr.bf16.mxu0 %v4558_v15  ;;  %v12316_v15 = vpop.f32.mrf.mxu0 }
 0x8a9   : > { %14307 = vst [vmem:[#allocation94_spill] sm:$0xff] %v12316_v15 }
 0x8aa   : > { %v12294_v47 = vpop.eup %9074  ;;  %4244 = vmax.xlane.f32.xlu0 %v4243_v34  ;;  %5266 = vrot.lane.b32.xlu1 %v14302_v1, %s9370_s23  ;;  %v4559_v34 = vpack.c.bf16 %v9067_v7, %v12190_v51  ;;  %v12322_v22 = vpop.f32.mrf.mxu0 }
 0x8ab   : > { %v12300_v57 = vpop.eup %9076  ;;  %14309 = vst [vmem:[#allocation95_spill] sm:$0xff] %v12322_v22 }
 0x8ac   : > { %v12306_v36 = vadd.f32 %v12300_v57, %v12294_v47  ;;  %v12326_v38 = vpop.f32.mrf.mxu0 }
 0x8ad   : > { %14310 = vst [vmem:[#allocation75_spill] sm:$0xff] %v12326_v38 }
 0x8ae   : > { %5264 = vrot.lane.b32.xlu1 %v14304_v63, %s9370_s23  ;;  %v12331_v51 = vpop.f32.mrf.mxu0 }
 0x8af   : > { %4730 = vmatmul.mubr.bf16.gmra.mxu0 %v4557_v24  ;;  %14311 = vst [vmem:[#allocation96_spill] sm:$0xff] %v12331_v51 }
 0x8b0   : > { %4737 = vmatprep.mubr.bf16.mxu0 %v4560_v62  ;;  %v12339_v62 = vpop.f32.mrf.mxu0 }
 0x8b1   : > { %14313 = vst [vmem:[#allocation85_spill] sm:$0xff] %v12339_v62 }
 0x8b2   : > { %5262 = vrot.lane.b32.xlu1 %v14306_v18, %s9370_s23 }
 0x8b6   : > { %5260 = vrot.lane.b32.xlu1 %v14308_v52, %s9370_s23 }
 0x8b7   : > { %4738 = vmatmul.mubr.bf16.gmra.mxu0 %v4559_v34 }
 0x8b8   : > { %4745 = vmatprep.mubr.bf16.mxu0 %v4562_v46  ;;  %v5285_v46 = vpop.permute.xlu1 %5284 }
 0x8ba   : > { %5198 = vrot.lane.b32.xlu1 %v14306_v18, %s9371_s24 }
 0x8be   : > { %5202 = vrot.lane.b32.xlu1 %v14302_v1, %s9371_s24  ;;  %v14314_v1 = vld [vmem:[#allocation39_spill] sm:$0xff] }
 0x8bf   : > { %4746 = vmatmul.mubr.bf16.gmra.mxu0 %v4561_v19  ;;  %v14318_v19 = vld [vmem:[#allocation27_spill] sm:$0xff] }
 0x8c0   : > { %5310 = vrot.lane.b32.xlu0 %v14312_v56, %s9370_s23 }
 0x8c1   : > { %v4233_v7 = vpop.xlane.xlu0 %4232 }
 0x8c2   : > { %v4301_v3 = vsub.f32 %v12057_v48, %v4233_v7  ;;  %v4302_v24 = vsub.f32 %v12061_v14, %v4233_v7  ;;  %5206 = vrot.lane.b32.xlu1 %v14298_v13, %s9371_s24  ;;  %v12347_v48 = vpop.f32.mrf.mxu0  ;;  %v14316_v14 = vld [vmem:[#allocation23_spill] sm:$0xff] }
 0x8c3   : > { %14315 = vst [vmem:[#allocation98_spill] sm:$0xff] %v12347_v48 }
 0x8c4   : > { %v4417_v53 = vmul.f32 1.442695, %v4301_v3  ;;  %v4419_v18 = vmul.f32 1.442695, %v4302_v24  ;;  %5308 = vrot.lane.b32.xlu0 %v14314_v1, %s9370_s23  ;;  %v14320_v3 = vld [vmem:[#allocation20_spill] sm:$0xff] }
 0x8c5   : > { %v5319_v34 = vpop.permute.xlu0 %5318 }
 0x8c6   : > { %9078 = vpow2.f32 %v4417_v53  ;;  %5210 = vrot.lane.b32.xlu1 %v14296_v0, %s9371_s24  ;;  %8072 = vmatprep.subr.msk.mxu0 %vm687_vm1, %v5319_v34  ;;  %v12355_v0 = vpop.f32.mrf.mxu0  ;;  %v14321_v53 = vld [vmem:[#allocation37_spill] sm:$0xff] }
 0x8c7   : > { %9080 = vpow2.f32 %v4419_v18  ;;  %8073 = vmatpush3.xpose.msk.msra.mxu0 %vm687_vm1, %v5287_v55  ;;  %14317 = vst [vmem:[#allocation90_spill] sm:$0xff] %v12355_v0 }
 0x8c8   : > { %5306 = vrot.lane.b32.xlu0 %v14316_v14, %s9370_s23  ;;  %v12361_v7 = vpop.f32.mrf.mxu0 }
 0x8c9   : > { %v5317_v13 = vpop.permute.xlu0 %5316  ;;  %14319 = vst [vmem:[#allocation59_spill] sm:$0xff] %v12361_v7 }
 0x8ca   : > { %5214 = vrot.lane.b32.xlu1 %v14294_v61, %s9371_s24  ;;  %8074 = vmatprep.subr.msk.mxu0 %vm687_vm1, %v5317_v13  ;;  %v12369_v13 = vpop.f32.mrf.mxu0 }
 0x8cb   : > { %8075 = vmatpush3.xpose.msk.msra.mxu0 %vm687_vm1, %v5285_v46  ;;  %14322 = vst [vmem:[#allocation42_spill] sm:$0xff] %v12369_v13 }
 0x8cc   : > { %5304 = vrot.lane.b32.xlu0 %v14318_v19, %s9370_s23 }
 0x8ce   : > { %5218 = vrot.lane.b32.xlu1 %v14287_v60, %s9371_s24  ;;  %v14323_v60 = vld [vmem:[#allocation22_spill] sm:$0xff] }
 0x8d0   : > { %5302 = vrot.lane.b32.xlu0 %v14320_v3, %s9370_s23 }
 0x8d1   : > { %v4242_v24 = vpop.xlane.xlu1 %4241 }
 0x8d2   : > { %v4307_v61 = vsub.f32 %v12102_v37, %v4242_v24  ;;  %v4308_v55 = vsub.f32 %v12108_v25, %v4242_v24  ;;  %5222 = vrot.lane.b32.xlu1 %v14321_v53, %s9371_s24  ;;  %v14324_v37 = vld [vmem:[#allocation11_spill] sm:$0xff]  ;;  %v12379_v25 = vpop.f32.mrf.mxu0  ;;  %v14326_v24 = vld [vmem:[#allocation16_spill] sm:$0xff] }
 0x8d3   : > { %v9079_v18 = vpop.eup %9078  ;;  %14325 = vst [vmem:[#allocation86_spill] sm:$0xff] %v12379_v25  ;;  %v14332_v53 = vld [vmem:[#allocation15_spill] sm:$0xff] }
 0x8d4   : > { %v9081_v34 = vpop.eup %9080  ;;  %v4429_v46 = vmul.f32 1.442695, %v4307_v61  ;;  %v4431_v48 = vmul.f32 1.442695, %v4308_v55  ;;  %5300 = vrot.lane.b32.xlu0 %v14323_v60, %s9370_s23  ;;  %v4563_v7 = vpack.c.bf16 %v12294_v47, %v9079_v18  ;;  %v14327_v61 = vld [vmem:[#allocation13_spill] sm:$0xff]  ;;  %v12385_v47 = vpop.f32.mrf.mxu0 }
 0x8d5   : > { %v4564_v51 = vpack.c.bf16 %v12300_v57, %v9081_v34  ;;  %v12375_v22 = vadd.f32 %v9081_v34, %v9079_v18  ;;  %14328 = vst [vmem:[#allocation88_spill] sm:$0xff] %v12385_v47  ;;  %v14329_v57 = vld [vmem:[#allocation18_spill] sm:$0xff] }
 0x8d6   : > { %9082 = vpow2.f32 %v4429_v46  ;;  %5226 = vrot.lane.b32.xlu1 %v14324_v37, %s9371_s24  ;;  %v12391_v55 = vpop.f32.mrf.mxu0 }
 0x8d7   : > { %9084 = vpow2.f32 %v4431_v48  ;;  %4753 = vmatprep.mubr.bf16.mxu0 %v4564_v51  ;;  %14330 = vst [vmem:[#allocation80_spill] sm:$0xff] %v12391_v55 }
 0x8d8   : > { %4754 = vmatmul.mubr.bf16.gmra.mxu0 %v4563_v7  ;;  %5298 = vrot.lane.b32.xlu0 %v14326_v24, %s9370_s23  ;;  %v12397_v7 = vpop.f32.mrf.mxu0 }
 0x8d9   : > { %14331 = vst [vmem:[#allocation55_spill] sm:$0xff] %v12397_v7 }
 0x8da   : > { %5230 = vrot.lane.b32.xlu1 %v14327_v61, %s9371_s24  ;;  %v12405_v34 = vpop.f32.mrf.mxu0 }
 0x8db   : > { %14333 = vst [vmem:[#allocation61_spill] sm:$0xff] %v12405_v34 }
 0x8dc   : > { %5296 = vrot.lane.b32.xlu0 %v14329_v57, %s9370_s23 }
 0x8de   : > { %5234 = vrot.lane.b32.xlu1 %v14326_v24, %s9371_s24 }
 0x8e0   : > { %5294 = vrot.lane.b32.xlu0 %v14327_v61, %s9370_s23 }
 0x8e2   : > { %5238 = vrot.lane.b32.xlu1 %v14320_v3, %s9371_s24  ;;  %v12411_v3 = vpop.f32.mrf.mxu0 }
 0x8e3   : > { %v9083_v51 = vpop.eup %9082  ;;  %14334 = vst [vmem:[#allocation69_spill] sm:$0xff] %v12411_v3 }
 0x8e4   : > { %v9085_v48 = vpop.eup %9084  ;;  %5292 = vrot.lane.b32.xlu0 %v14332_v53, %s9370_s23  ;;  %v12417_v46 = vpop.f32.mrf.mxu0 }
 0x8e5   : > { %v12401_v18 = vadd.f32 %v9085_v48, %v9083_v51  ;;  %14335 = vst [vmem:[#allocation68_spill] sm:$0xff] %v12417_v46 }
 0x8e6   : > { %5242 = vrot.lane.b32.xlu1 %v14316_v14, %s9371_s24 }
 0x8e8   : > { %5196 = vrot.lane.b32.xlu0 %v14308_v52, %s9371_s24  ;;  %v12423_v52 = vpop.f32.mrf.mxu0 }
 0x8e9   : > { %14336 = vst [vmem:[#allocation111_spill] sm:$0xff] %v12423_v52 }
 0x8ea   : > { %5246 = vrot.lane.b32.xlu1 %v14312_v56, %s9371_s24  ;;  %v14337_v56 = vld [vmem:[#allocation67_spill] sm:$0xff] }
 0x8ec   : > { %5200 = vrot.lane.b32.xlu0 %v14304_v63, %s9371_s24  ;;  %v12429_v63 = vpop.f32.mrf.mxu0 }
 0x8ed   : > { %14338 = vst [vmem:[#allocation26_spill] sm:$0xff] %v12429_v63 }
 0x8ee   : > { %5250 = vrot.lane.b32.xlu1 %v14290_v27, %s9371_s24  ;;  %v12435_v37 = vpop.f32.mrf.mxu0 }
 0x8ef   : > { %14339 = vst [vmem:[#allocation9_spill] sm:$0xff] %v12435_v37 }
 0x8f0   : > { %5204 = vrot.lane.b32.xlu0 %v14300_v26, %s9371_s24 }
 0x8f2   : > { %5254 = vrot.lane.b32.xlu1 %v14167_v4, %s9371_s24  ;;  %v5283_v4 = vpop.permute.xlu1 %5282 }
 0x8f4   : > { %5208 = vrot.lane.b32.xlu0 %v14297_v16, %s9371_s24 }
 0x8f6   : > { %5258 = vrot.lane.b32.xlu1 %v14337_v56, %s9371_s24  ;;  %v12440_v56 = vpop.f32.mrf.mxu0 }
 0x8f7   : > { %14340 = vst [vmem:[#allocation48_spill] sm:$0xff] %v12440_v56 }
 0x8f8   : > { %5212 = vrot.lane.b32.xlu0 %v14295_v41, %s9371_s24  ;;  %v14341_v41 = vld [vmem:[#allocation10_spill] sm:$0xff] }
 0x8fa   : > { %v4239_v27 = vpop.xlane.xlu0 %4238 }
 0x8fb   : > { %v4305_v14 = vsub.f32 %v12094_v21, %v4239_v27  ;;  %v4306_v26 = vsub.f32 %v12098_v28, %v4239_v27  ;;  %v5281_v28 = vpop.permute.xlu1 %5280  ;;  %v14343_v27 = vld [vmem:[#allocation12_spill] sm:$0xff] }
 0x8fc   : > { %5216 = vrot.lane.b32.xlu0 %v14288_v10, %s9371_s24  ;;  %v12446_v10 = vpop.f32.mrf.mxu0 }
 0x8fd   : > { %v4425_v16 = vmul.f32 1.442695, %v4305_v14  ;;  %v4427_v24 = vmul.f32 1.442695, %v4306_v26  ;;  %14342 = vst [vmem:[#allocation45_spill] sm:$0xff] %v12446_v10 }
 0x8fe   : > { %v5315_v61 = vpop.permute.xlu0 %5314  ;;  %v12451_v14 = vpop.f32.mrf.mxu0 }
 0x8ff   : > { %9086 = vpow2.f32 %v4425_v16  ;;  %8076 = vmatprep.subr.msk.mxu0 %vm687_vm1, %v5315_v61  ;;  %14344 = vst [vmem:[#allocation28_spill] sm:$0xff] %v12451_v14 }
 0x900   : > { %9088 = vpow2.f32 %v4427_v24  ;;  %5220 = vrot.lane.b32.xlu0 %v14341_v41, %s9371_s24  ;;  %8077 = vmatpush3.xpose.msk.msra.mxu0 %vm687_vm1, %v5283_v4  ;;  %v12457_v61 = vpop.f32.mrf.mxu0 }
 0x901   : > { %14345 = vst [vmem:[#allocation50_spill] sm:$0xff] %v12457_v61 }
 0x902   : > { %v5313_v21 = vpop.permute.xlu0 %5312 }
 0x903   : > { %8078 = vmatprep.subr.msk.mxu0 %vm687_vm1, %v5313_v21 }
 0x904   : > { %5224 = vrot.lane.b32.xlu0 %v14343_v27, %s9371_s24  ;;  %8079 = vmatpush3.xpose.msk.msra.mxu0 %vm687_vm1, %v5281_v28 }
 0x908   : > { %5228 = vrot.lane.b32.xlu0 %v14332_v53, %s9371_s24  ;;  %v12463_v53 = vpop.f32.mrf.mxu0 }
 0x909   : > { %14346 = vst [vmem:[#allocation34_spill] sm:$0xff] %v12463_v53 }
 0x90a   : > { %v4248_v26 = vpop.xlane.xlu1 %4247 }
 0x90b   : > { %v4311_v16 = vsub.f32 %v12220_v59, %v4248_v26  ;;  %v4312_v4 = vsub.f32 %v12225_v31, %v4248_v26  ;;  %v12467_v59 = vpop.f32.mrf.mxu0  ;;  %v14351_v26 = vld [vmem:[#allocation53_spill] sm:$0xff] }
 0x90c   : > { %v9087_v24 = vpop.eup %9086  ;;  %5232 = vrot.lane.b32.xlu0 %v14329_v57, %s9371_s24  ;;  %14347 = vst [vmem:[#allocation21_spill] sm:$0xff] %v12467_v59 }
 0x90d   : > { %v9089_v41 = vpop.eup %9088  ;;  %v4437_v21 = vmul.f32 1.442695, %v4311_v16  ;;  %v4439_v27 = vmul.f32 1.442695, %v4312_v4  ;;  %v4565_v28 = vpack.c.bf16 %v9083_v51, %v9087_v24  ;;  %v12471_v31 = vpop.f32.mrf.mxu0  ;;  %v14349_v51 = vld [vmem:[#allocation58_spill] sm:$0xff] }
 0x90e   : > { %v4566_v56 = vpack.c.bf16 %v9085_v48, %v9089_v41  ;;  %v12461_v14 = vadd.f32 %v9089_v41, %v9087_v24  ;;  %14348 = vst [vmem:[#allocation7_spill] sm:$0xff] %v12471_v31  ;;  %v5279_v57 = vpop.permute.xlu1 %5278  ;;  %v14353_v24 = vld [vmem:[#allocation72_spill] sm:$0xff] }
 0x90f   : > { %9090 = vpow2.f32 %v4437_v21 }
 0x910   : > { %9092 = vpow2.f32 %v4439_v27  ;;  %4761 = vmatprep.mubr.bf16.mxu0 %v4566_v56  ;;  %5236 = vrot.lane.b32.xlu0 %v14323_v60, %s9371_s24  ;;  %v12478_v56 = vpop.f32.mrf.mxu0 }
 0x911   : > { %4762 = vmatmul.mubr.bf16.gmra.mxu0 %v4565_v28  ;;  %14350 = vst [vmem:[#allocation17_spill] sm:$0xff] %v12478_v56 }
 0x912   : > { %v5277_v16 = vpop.permute.xlu1 %5276  ;;  %v12486_v4 = vpop.f32.mrf.mxu0 }
 0x913   : > { %14352 = vst [vmem:[#allocation6_spill] sm:$0xff] %v12486_v4 }
 0x914   : > { %5240 = vrot.lane.b32.xlu0 %v14318_v19, %s9371_s24 }
 0x918   : > { %5244 = vrot.lane.b32.xlu0 %v14314_v1, %s9371_s24  ;;  %v12490_v1 = vpop.f32.mrf.mxu0 }
 0x91a   : > { %4445 = vadd.xlane.f32.xlu1 %v14349_v51  ;;  %v12495_v41 = vpop.f32.mrf.mxu0 }
 0x91c   : > { %v12476_v48 = vpop.eup %9090  ;;  %5248 = vrot.lane.b32.xlu0 %v14292_v44, %s9371_s24  ;;  %v5275_v44 = vpop.permute.xlu1 %5274 }
 0x91d   : > { %v9093_v60 = vpop.eup %9092  ;;  %v12498_v21 = vpop.f32.mrf.mxu0 }
 0x91e   : > { %4454 = vadd.xlane.f32.xlu1 %v14351_v26  ;;  %v12484_v19 = vadd.f32 %v9093_v60, %v12476_v48 }
 0x91f   : > { %v12501_v28 = vpop.f32.mrf.mxu0 }
 0x920   : > { %5252 = vrot.lane.b32.xlu0 %v14170_v33, %s9371_s24  ;;  %v5273_v27 = vpop.permute.xlu1 %5272 }
 0x921   : > { %v12504_v51 = vpop.f32.mrf.mxu0 }
 0x922   : > { %4460 = vadd.xlane.f32.xlu1 %v12111_v5 }
 0x924   : > { %5256 = vrot.lane.b32.xlu0 %v14353_v24, %s9371_s24  ;;  %v5271_v33 = vpop.permute.xlu1 %5270 }
 0x926   : > { %4466 = vadd.xlane.f32.xlu1 %v12228_v45  ;;  %v12509_v45 = vpop.f32.mrf.mxu0 }
 0x927   : > { %v7947_v30 = vadd.f32 %v12509_v45, %v12504_v51 }
 0x92a   : > { %4472 = vadd.xlane.f32.xlu1 %v12234_v17  ;;  %v5269_v17 = vpop.permute.xlu1 %5268 }
 0x92e   : > { %4478 = vadd.xlane.f32.xlu1 %v12147_v50  ;;  %v12514_v50 = vpop.f32.mrf.mxu0 }
 0x932   : > { %4484 = vadd.xlane.f32.xlu1 %v12159_v23 }
 0x933   : > { %v4245_v5 = vpop.xlane.xlu0 %4244 }
 0x934   : > { %v4309_v26 = vsub.f32 %v12212_v35, %v4245_v5  ;;  %v4310_v24 = vsub.f32 %v12216_v29, %v4245_v5  ;;  %v5267_v35 = vpop.permute.xlu1 %5266  ;;  %v12519_v29 = vpop.f32.mrf.mxu0  ;;  %v14355_v5 = vld [vmem:[#allocation32_spill] sm:$0xff] }
 0x936   : > { %v4433_v4 = vmul.f32 1.442695, %v4309_v26  ;;  %v4435_v31 = vmul.f32 1.442695, %v4310_v24  ;;  %4490 = vadd.xlane.f32.xlu1 %v12171_v43 }
 0x937   : > { %v5311_v53 = vpop.permute.xlu0 %5310 }
 0x938   : > { %9094 = vpow2.f32 %v4433_v4  ;;  %8080 = vmatprep.subr.msk.mxu0 %vm687_vm1, %v5311_v53  ;;  %v12524_v53 = vpop.f32.mrf.mxu0 }
 0x939   : > { %9096 = vpow2.f32 %v4435_v31  ;;  %8081 = vmatpush3.xpose.msk.msra.mxu0 %vm687_vm1, %v5279_v57  ;;  %v14354_v31 = vld [vmem:[#allocation52_spill] sm:$0xff] }
 0x93a   : > { %4496 = vadd.xlane.f32.xlu1 %v12180_v40  ;;  %v5265_v40 = vpop.permute.xlu1 %5264 }
 0x93b   : > { %v5309_v23 = vpop.permute.xlu0 %5308 }
 0x93c   : > { %8082 = vmatprep.subr.msk.mxu0 %vm687_vm1, %v5309_v23 }
 0x93d   : > { %8083 = vmatpush3.xpose.msk.msra.mxu0 %vm687_vm1, %v5277_v16 }
 0x93e   : > { %4502 = vadd.xlane.f32.xlu1 %v12188_v39  ;;  %v12530_v39 = vpop.f32.mrf.mxu0  ;;  %v5263_v24 = vpop.permute.xlu1 %5262 }
 0x93f   : > { %v5307_v43 = vpop.permute.xlu0 %5306  ;;  %v7953_v45 = vadd.f32 %v12530_v39, %v12524_v53 }
 0x940   : > { %8084 = vmatprep.subr.msk.mxu0 %vm687_vm1, %v5307_v43  ;;  %v12537_v23 = vpop.f32.mrf.mxu0  ;;  %v14357_v43 = vld [vmem:[#allocation44_spill] sm:$0xff] }
 0x941   : > { %8085 = vmatpush3.xpose.msk.msra.mxu0 %vm687_vm1, %v5275_v44 }
 0x942   : > { %4508 = vadd.xlane.f32.xlu1 %v12198_v58 }
 0x943   : > { %4442 = vadd.xlane.f32.xlu0 %v14354_v31  ;;  %v5305_v57 = vpop.permute.xlu0 %5304 }
 0x944   : > { %8086 = vmatprep.subr.msk.mxu0 %vm687_vm1, %v5305_v57  ;;  %v14358_v57 = vld [vmem:[#allocation64_spill] sm:$0xff] }
 0x945   : > { %v9095_v16 = vpop.eup %9094  ;;  %8087 = vmatpush3.xpose.msk.msra.mxu0 %vm687_vm1, %v5273_v27  ;;  %v14356_v27 = vld [vmem:[#allocation29_spill] sm:$0xff] }
 0x946   : > { %v9097_v4 = vpop.eup %9096  ;;  %4514 = vadd.xlane.f32.xlu1 %v12210_v12  ;;  %v4567_v44 = vpack.c.bf16 %v12476_v48, %v9095_v16  ;;  %v12543_v48 = vpop.f32.mrf.mxu0 }
 0x947   : > { %4448 = vadd.xlane.f32.xlu0 %v14355_v5  ;;  %v5303_v26 = vpop.permute.xlu0 %5302  ;;  %v4568_v58 = vpack.c.bf16 %v9093_v60, %v9097_v4  ;;  %v5261_v60 = vpop.permute.xlu1 %5260  ;;  %v4531_v31 = vadd.f32 %v9097_v4, %v9095_v16  ;;  %v14359_v5 = vld [vmem:[#allocation40_spill] sm:$0xff] }
 0x948   : > { %8088 = vmatprep.subr.msk.mxu0 %vm687_vm1, %v5303_v26 }
 0x949   : > { %4769 = vmatprep.mubr.bf16.mxu0 %v4568_v58  ;;  %8089 = vmatpush3.xpose.msk.msra.mxu0 %vm687_vm1, %v5271_v33 }
 0x94a   : > { %4770 = vmatmul.mubr.bf16.gmra.mxu0 %v4567_v44  ;;  %4520 = vadd.xlane.f32.xlu1 %v12375_v22  ;;  %v12549_v22 = vpop.f32.mrf.mxu0 }
 0x94b   : > { %4451 = vadd.xlane.f32.xlu0 %v14356_v27  ;;  %v5301_v12 = vpop.permute.xlu0 %5300 }
 0x94c   : > { %8090 = vmatprep.subr.msk.mxu0 %vm687_vm1, %v5301_v12 }
 0x94d   : > { %8091 = vmatpush3.xpose.msk.msra.mxu0 %vm687_vm1, %v5269_v17  ;;  %v5199_v17 = vpop.permute.xlu1 %5198 }
 0x94e   : > { %4526 = vadd.xlane.f32.xlu1 %v12461_v14  ;;  %v12554_v14 = vpop.f32.mrf.mxu0 }
 0x94f   : > { %4457 = vadd.xlane.f32.xlu0 %v14357_v43  ;;  %v5299_v33 = vpop.permute.xlu0 %5298 }
 0x950   : > { %8092 = vmatprep.subr.msk.mxu0 %vm687_vm1, %v5299_v33 }
 0x951   : > { %8093 = vmatpush3.xpose.msk.msra.mxu0 %vm687_vm1, %v5267_v35  ;;  %v12559_v35 = vpop.f32.mrf.mxu0  ;;  %v5203_v16 = vpop.permute.xlu1 %5202 }
 0x952   : > { %4532 = vadd.xlane.f32.xlu1 %v4531_v31 }
 0x953   : > { %4463 = vadd.xlane.f32.xlu0 %v14358_v57  ;;  %v5297_v44 = vpop.permute.xlu0 %5296  ;;  %v12567_v58 = vpop.f32.mrf.mxu0 }
 0x954   : > { %8094 = vmatprep.subr.msk.mxu0 %vm687_vm1, %v5297_v44 }
 0x955   : > { %8095 = vmatpush3.xpose.msk.msra.mxu0 %vm687_vm1, %v5265_v40  ;;  %v4842_v40 = vld [vmem:[%s13554_s3 + $0x10] sm:$0xff]  ;;  %v12570_v27 = vpop.f32.mrf.mxu0 }
 0x956   : > { %8465 = vmatprep.subr.mxu1 %v4842_v40 }
 0x957   : > { %4469 = vadd.xlane.f32.xlu0 %v14359_v5  ;;  %v5295_v26 = vpop.permute.xlu0 %5294  ;;  %8466 = vmatpush3.msra.mxu1 %v4842_v40  ;;  %v12576_v12 = vpop.f32.mrf.mxu0 }
 0x958   : > { %8096 = vmatprep.subr.msk.mxu0 %vm687_vm1, %v5295_v26 }
 0x959   : > { %8097 = vmatpush3.xpose.msk.msra.mxu0 %vm687_vm1, %v5263_v24  ;;  %v12581_v43 = vpop.f32.mrf.mxu0 }
 0x95b   : > { %4475 = vadd.xlane.f32.xlu0 %v12238_v54  ;;  %v5293_v4 = vpop.permute.xlu0 %5292  ;;  %v5207_v54 = vpop.permute.xlu1 %5206 }
 0x95c   : > { %8098 = vmatprep.subr.msk.mxu0 %vm687_vm1, %v5293_v4  ;;  %v12586_v33 = vpop.f32.mrf.mxu0 }
 0x95d   : > { %8099 = vmatpush3.xpose.msk.msra.mxu0 %vm687_vm1, %v5261_v60 }
 0x95e   : > { %v12591_v57 = vpop.f32.mrf.mxu0 }
 0x95f   : > { %4481 = vadd.xlane.f32.xlu0 %v12245_v11  ;;  %v5197_v24 = vpop.permute.xlu0 %5196  ;;  %v5211_v11 = vpop.permute.xlu1 %5210 }
 0x960   : > { %8100 = vmatprep.mubr.msk.f32.mxu0 %vm687_vm1, %v5197_v24 }
 0x961   : > { %8101 = vmatmul.mubr.msk.f32.vlgmr.msra.gmra.mxu0 %vm687_vm1, %v5197_v24 }
 0x962   : > { %8102 = vmatprep.mubr.msk.f32.mxu0 %vm687_vm1, %v5199_v17 }
 0x963   : > { %4487 = vadd.xlane.f32.xlu0 %v12251_v2  ;;  %v5201_v60 = vpop.permute.xlu0 %5200  ;;  %v5215_v2 = vpop.permute.xlu1 %5214 }
 0x965   : > { %8103 = vmatmul.mubr.msk.f32.gmra.mxu0 %vm687_vm1, %v5199_v17 }
 0x966   : > { %8104 = vmatprep.mubr.msk.f32.mxu0 %vm687_vm1, %v5201_v60 }
 0x967   : > { %4493 = vadd.xlane.f32.xlu0 %v12257_v9  ;;  %v5205_v31 = vpop.permute.xlu0 %5204  ;;  %v5219_v9 = vpop.permute.xlu1 %5218 }
 0x969   : > { %8105 = vmatmul.mubr.msk.f32.gmra.mxu0 %vm687_vm1, %v5201_v60 }
 0x96a   : > { %8106 = vmatprep.mubr.msk.f32.mxu0 %vm687_vm1, %v5203_v16 }
 0x96b   : > { %4499 = vadd.xlane.f32.xlu0 %v12263_v32  ;;  %v12596_v32 = vpop.f32.mrf.mxu0  ;;  %v5209_v44 = vpop.permute.xlu0 %5208 }
 0x96d   : > { %8107 = vmatmul.mubr.msk.f32.gmra.mxu0 %vm687_vm1, %v5203_v16  ;;  %v12601_v17 = vpop.f32.mrf.mxu0 }
 0x96e   : > { %8108 = vmatprep.mubr.msk.f32.mxu0 %vm687_vm1, %v5205_v31 }
 0x96f   : > { %4505 = vadd.xlane.f32.xlu0 %v12270_v20  ;;  %v5223_v20 = vpop.permute.xlu1 %5222  ;;  %v12606_v5 = vpop.f32.mrf.mxu0 }
 0x971   : > { %8109 = vmatmul.mubr.msk.f32.gmra.mxu0 %vm687_vm1, %v5205_v31 }
 0x972   : > { %8110 = vmatprep.mubr.msk.f32.mxu0 %vm687_vm1, %v5207_v54 }
 0x973   : > { %4511 = vadd.xlane.f32.xlu0 %v12276_v49  ;;  %v5213_v49 = vpop.permute.xlu0 %5212  ;;  %v5227_v26 = vpop.permute.xlu1 %5226 }
 0x975   : > { %8111 = vmatmul.mubr.msk.f32.gmra.mxu0 %vm687_vm1, %v5207_v54 }
 0x976   : > { %8112 = vmatprep.mubr.msk.f32.mxu0 %vm687_vm1, %v5209_v44 }
 0x977   : > { %4517 = vadd.xlane.f32.xlu0 %v12282_v8  ;;  %v12611_v8 = vpop.f32.mrf.mxu0  ;;  %v5231_v4 = vpop.permute.xlu1 %5230 }
 0x979   : > { %8113 = vmatmul.mubr.msk.f32.gmra.mxu0 %vm687_vm1, %v5209_v44  ;;  %v12615_v16 = vpop.f32.mrf.mxu0 }
 0x97a   : > { %8114 = vmatprep.mubr.msk.f32.mxu0 %vm687_vm1, %v5211_v11 }
 0x97b   : > { %4523 = vadd.xlane.f32.xlu0 %v12306_v36  ;;  %v5217_v36 = vpop.permute.xlu0 %5216  ;;  %v12619_v40 = vpop.f32.mrf.mxu0 }
 0x97d   : > { %8115 = vmatmul.mubr.msk.f32.gmra.mxu0 %vm687_vm1, %v5211_v11  ;;  %v12623_v24 = vpop.f32.mrf.mxu0 }
 0x97e   : > { %8116 = vmatprep.mubr.msk.f32.mxu0 %vm687_vm1, %v5213_v49 }
 0x97f   : > { %4529 = vadd.xlane.f32.xlu0 %v12401_v18  ;;  %v5235_v18 = vpop.permute.xlu1 %5234  ;;  %v5221_v54 = vpop.permute.xlu0 %5220 }
 0x980   : > { %v12627_v60 = vpop.f32.mrf.mxu0 }
 0x981   : > { %8117 = vmatmul.mubr.msk.f32.gmra.mxu0 %vm687_vm1, %v5213_v49 }
 0x982   : > { %8118 = vmatprep.mubr.msk.f32.mxu0 %vm687_vm1, %v5215_v2 }
 0x983   : > { %v5239_v11 = vpop.permute.xlu1 %5238  ;;  %v5225_v31 = vpop.permute.xlu0 %5224 }
 0x985   : > { %8119 = vmatmul.mubr.msk.f32.gmra.mxu0 %vm687_vm1, %v5215_v2  ;;  %v12631_v2 = vpop.f32.mrf.mxu0 }
 0x986   : > { %8120 = vmatprep.mubr.msk.f32.mxu0 %vm687_vm1, %v5217_v36 }
 0x987   : > { %v5243_v44 = vpop.permute.xlu1 %5242  ;;  %v12635_v49 = vpop.f32.mrf.mxu0 }
 0x989   : > { %8121 = vmatmul.mubr.msk.f32.gmra.mxu0 %vm687_vm1, %v5217_v36 }
 0x98a   : > { %8122 = vmatprep.mubr.msk.f32.mxu0 %vm687_vm1, %v5219_v9 }
 0x98b   : > { %v5247_v36 = vpop.permute.xlu1 %5246 }
 0x98d   : > { %8123 = vmatmul.mubr.msk.f32.gmra.mxu0 %vm687_vm1, %v5219_v9  ;;  %v12639_v9 = vpop.f32.mrf.mxu0 }
 0x98e   : > { %8124 = vmatprep.mubr.msk.f32.mxu0 %vm687_vm1, %v5221_v54 }
 0x98f   : > { %v12643_v63 = vpop.f32.mrf.mxu0 }
 0x991   : > { %8125 = vmatmul.mubr.msk.f32.gmra.mxu0 %vm687_vm1, %v5221_v54  ;;  %v5229_v54 = vpop.permute.xlu0 %5228  ;;  %v12647_v46 = vpop.f32.mrf.mxu0 }
 0x992   : > { %8126 = vmatprep.mubr.msk.f32.mxu0 %vm687_vm1, %v5223_v20 }
 0x993   : > { %v12651_v34 = vpop.f32.mrf.mxu0 }
 0x995   : > { %8127 = vmatmul.mubr.msk.f32.gmra.mxu0 %vm687_vm1, %v5223_v20  ;;  %v5251_v20 = vpop.permute.xlu1 %5250  ;;  %v12655_v25 = vpop.f32.mrf.mxu0 }
 0x996   : > { %8128 = vmatprep.mubr.msk.f32.mxu0 %vm687_vm1, %v5225_v31 }
 0x997   : > { %v12661_v42 = vpop.f32.mrf.mxu0 }
 0x999   : > { %8129 = vmatmul.mubr.msk.f32.gmra.mxu0 %vm687_vm1, %v5225_v31  ;;  %v5233_v31 = vpop.permute.xlu0 %5232  ;;  %v5255_v55 = vpop.permute.xlu1 %5254 }
 0x99a   : > { %8130 = vmatprep.mubr.msk.f32.mxu0 %vm687_vm1, %v5227_v26 }
 0x99d   : > { %8131 = vmatmul.mubr.msk.f32.gmra.mxu0 %vm687_vm1, %v5227_v26  ;;  %v5237_v26 = vpop.permute.xlu0 %5236 }
 0x99e   : > { %8132 = vmatprep.mubr.msk.f32.mxu0 %vm687_vm1, %v5229_v54 }
 0x9a1   : > { %8133 = vmatmul.mubr.msk.f32.gmra.mxu0 %vm687_vm1, %v5229_v54  ;;  %v12659_v54 = vpop.permute.xlu1 %5258 }
 0x9a2   : > { %8134 = vmatprep.mubr.msk.f32.mxu0 %vm687_vm1, %v5231_v4 }
 0x9a5   : > { %8135 = vmatmul.mubr.msk.f32.gmra.mxu0 %vm687_vm1, %v5231_v4  ;;  %v5241_v4 = vpop.permute.xlu0 %5240  ;;  %v4446_v56 = vpop.xlane.xlu1 %4445 }
 0x9a6   : > { %8136 = vmatprep.mubr.msk.f32.mxu0 %vm687_vm1, %v5233_v31  ;;  %9098 = vrcp.f32 %v4446_v56 }
 0x9a9   : > { %8137 = vmatmul.mubr.msk.f32.gmra.mxu0 %vm687_vm1, %v5233_v31  ;;  %v12665_v31 = vpop.f32.mrf.mxu0  ;;  %v5245_v59 = vpop.permute.xlu0 %5244 }
 0x9aa   : > { %8138 = vmatprep.mubr.msk.f32.mxu0 %vm687_vm1, %v5235_v18  ;;  %v4455_v61 = vpop.xlane.xlu1 %4454 }
 0x9ad   : > { %8139 = vmatmul.mubr.msk.f32.gmra.mxu0 %vm687_vm1, %v5235_v18  ;;  %v12669_v18 = vpop.f32.mrf.mxu0 }
 0x9ae   : > { %8140 = vmatprep.mubr.msk.f32.mxu0 %vm687_vm1, %v5237_v26  ;;  %v4461_v37 = vpop.xlane.xlu1 %4460 }
 0x9af   : > { %v12673_v10 = vpop.f32.mrf.mxu0 }
 0x9b1   : > { %8141 = vmatmul.mubr.msk.f32.gmra.mxu0 %vm687_vm1, %v5237_v26  ;;  %v5249_v26 = vpop.permute.xlu0 %5248  ;;  %v12677_v52 = vpop.f32.mrf.mxu0 }
 0x9b2   : > { %8142 = vmatprep.mubr.msk.f32.mxu0 %vm687_vm1, %v5239_v11 }
 0x9b3   : > { %v12681_v3 = vpop.f32.mrf.mxu0  ;;  %v9099_v15 = vpop.eup %9098 }
 0x9b5   : > { %8143 = vmatmul.mubr.msk.f32.gmra.mxu0 %vm687_vm1, %v5239_v11  ;;  %v5253_v11 = vpop.permute.xlu0 %5252  ;;  %v12685_v7 = vpop.f32.mrf.mxu0 }
 0x9b6   : > { %8144 = vmatprep.mubr.msk.f32.mxu0 %vm687_vm1, %v5241_v4 }
 0x9b7   : > { %v12689_v13 = vpop.f32.mrf.mxu0 }
 0x9b9   : > { %8145 = vmatmul.mubr.msk.f32.gmra.mxu0 %vm687_vm1, %v5241_v4  ;;  %v4467_v4 = vpop.xlane.xlu1 %4466 }
 0x9ba   : > { %8146 = vmatprep.mubr.msk.f32.mxu0 %vm687_vm1, %v5243_v44 }
 0x9bd   : > { %8147 = vmatmul.mubr.msk.f32.gmra.mxu0 %vm687_vm1, %v5243_v44  ;;  %v5257_v44 = vpop.permute.xlu0 %5256  ;;  %v4473_v47 = vpop.xlane.xlu1 %4472 }
 0x9be   : > { %8148 = vmatprep.mubr.msk.f32.mxu0 %vm687_vm1, %v5245_v59 }
 0x9c1   : > { %8149 = vmatmul.mubr.msk.f32.gmra.mxu0 %vm687_vm1, %v5245_v59  ;;  %v4479_v62 = vpop.xlane.xlu1 %4478 }
 0x9c2   : > { %8150 = vmatprep.mubr.msk.f32.mxu0 %vm687_vm1, %v5247_v36 }
 0x9c5   : > { %8151 = vmatmul.mubr.msk.f32.gmra.mxu0 %vm687_vm1, %v5247_v36  ;;  %v12693_v36 = vpop.f32.mrf.mxu0  ;;  %v4485_v56 = vpop.xlane.xlu1 %4484 }
 0x9c6   : > { %8152 = vmatprep.mubr.msk.f32.mxu0 %vm687_vm1, %v5249_v26 }
 0x9c9   : > { %8153 = vmatmul.mubr.msk.f32.gmra.mxu0 %vm687_vm1, %v5249_v26  ;;  %v12697_v26 = vpop.f32.mrf.mxu0 }
 0x9ca   : > { %8154 = vmatprep.mubr.msk.f32.mxu0 %vm687_vm1, %v5251_v20 }
 0x9cc   : > { %v4443_v59 = vpop.xlane.xlu0 %4442 }
 0x9cd   : > { %9100 = vrcp.f32 %v4443_v59  ;;  %8155 = vmatmul.mubr.msk.f32.gmra.mxu0 %vm687_vm1, %v5251_v20  ;;  %v12701_v20 = vpop.f32.mrf.mxu0 }
 0x9ce   : > { %8156 = vmatprep.mubr.msk.f32.mxu0 %vm687_vm1, %v5253_v11 }
 0x9d0   : > { %v4449_v0 = vpop.xlane.xlu0 %4448 }
 0x9d1   : > { %9102 = vrcp.f32 %v4449_v0  ;;  %8157 = vmatmul.mubr.msk.f32.gmra.mxu0 %vm687_vm1, %v5253_v11  ;;  %v7941_v0 = vadd.f32 %v12495_v41, %v12490_v1  ;;  %v4491_v1 = vpop.xlane.xlu1 %4490 }
 0x9d2   : > { %8158 = vmatprep.mubr.msk.f32.mxu0 %vm687_vm1, %v5255_v55  ;;  %9104 = vrcp.f32 %v4455_v61  ;;  %v12710_v61 = vpop.f32.mrf.mxu0 }
 0x9d4   : > { %v4452_v38 = vpop.xlane.xlu0 %4451 }
 0x9d5   : > { %9106 = vrcp.f32 %v4452_v38  ;;  %8159 = vmatmul.mubr.msk.f32.gmra.mxu0 %vm687_vm1, %v5255_v55  ;;  %v7944_v38 = vadd.f32 %v12501_v28, %v12498_v21  ;;  %v12718_v28 = vpop.f32.mrf.mxu0 }
 0x9d6   : > { %8160 = vmatprep.mubr.msk.f32.mxu0 %vm687_vm1, %v5257_v44  ;;  %9108 = vrcp.f32 %v4461_v37 }
 0x9d7   : > { %v4811_v6 = vmul.f32 %v9099_v15, %v7944_v38 }
 0x9d8   : > { %v4458_v59 = vpop.xlane.xlu0 %4457 }
 0x9d9   : > { %9110 = vrcp.f32 %v4458_v59  ;;  %8161 = vmatmul.mubr.msk.f32.gmra.mxu0 %vm687_vm1, %v5257_v44  ;;  %v7950_v44 = vadd.f32 %v12519_v29, %v12514_v50  ;;  %v7959_v29 = vadd.f32 %v12554_v14, %v12549_v22  ;;  %v7965_v22 = vadd.f32 %v12576_v12, %v12570_v27 }
 0x9da   : > { %v9101_v11 = vpop.eup %9100  ;;  %8162 = vmatprep.mubr.msk.f32.mxu0 %vm687_vm1, %v12659_v54  ;;  %9112 = vrcp.f32 %v4467_v4 }
 0x9db   : > { %v4810_v55 = vmul.f32 %v9101_v11, %v7941_v0  ;;  %v12725_v0 = vpop.f32.mrf.mxu0  ;;  %v7956_v11 = vadd.f32 %v12543_v48, %v12537_v23 }
 0x9dc   : > { %v4464_v37 = vpop.xlane.xlu0 %4463 }
 0x9dd   : > { %9114 = vrcp.f32 %v4464_v37  ;;  %8467 = vmatprep.mubr.msk.f32.mxu1 %vm687_vm1, %v4810_v55  ;;  %8163 = vmatmul.mubr.msk.f32.gmra.mxu0 %vm687_vm1, %v12659_v54  ;;  %v4497_v54 = vpop.xlane.xlu1 %4496  ;;  %v12733_v39 = vpop.f32.mrf.mxu0  ;;  %v7962_v37 = vadd.f32 %v12567_v58, %v12559_v35  ;;  %v7968_v35 = vadd.f32 %v12586_v33, %v12581_v43  ;;  %v7974_v43 = vadd.f32 %v12606_v5, %v12601_v17 }
 0x9de   : > { %v9103_v41 = vpop.eup %9102  ;;  %8468 = vmatmul.mubr.msk.f32.vlgmr.msra.gmra.mxu1 %vm687_vm1, %v4811_v6  ;;  %9116 = vrcp.f32 %v4473_v47 }
 0x9df   : > { %v4812_v21 = vmul.f32 %v9103_v41, %v7947_v30  ;;  %v9105_v4 = vpop.eup %9104  ;;  %v12741_v41 = vpop.f32.mrf.mxu0 }
 0x9e0   : > { %v4470_v15 = vpop.xlane.xlu0 %4469  ;;  %v4814_v6 = vmul.f32 %v9105_v4, %v7953_v45  ;;  %v7971_v4 = vadd.f32 %v12596_v32, %v12591_v57  ;;  %v7977_v57 = vadd.f32 %v12615_v16, %v12611_v8  ;;  %v7983_v8 = vadd.f32 %v12631_v2, %v12627_v60 }
 0x9e1   : > { %9118 = vrcp.f32 %v4470_v15  ;;  %8470 = vmatprep.mubr.msk.f32.mxu1 %vm687_vm1, %v4812_v21  ;;  %v4503_v23 = vpop.xlane.xlu1 %4502  ;;  %v12748_v27 = vpop.f32.mrf.mxu0 }
 0x9e2   : > { %v9107_v51 = vpop.eup %9106  ;;  %9120 = vrcp.f32 %v4479_v62 }
 0x9e3   : > { %v4813_v59 = vmul.f32 %v9107_v51, %v7950_v44  ;;  %v9109_v47 = vpop.eup %9108  ;;  %v12756_v32 = vpop.f32.mrf.mxu0 }
 0x9e4   : > { %v4476_v30 = vpop.xlane.xlu0 %4475  ;;  %v4816_v38 = vmul.f32 %v9109_v47, %v7959_v29  ;;  %v7980_v47 = vadd.f32 %v12623_v24, %v12619_v40  ;;  %v7986_v40 = vadd.f32 %v12639_v9, %v12635_v49  ;;  %v7992_v49 = vadd.f32 %v12655_v25, %v12651_v34 }
 0x9e5   : > { %9122 = vrcp.f32 %v4476_v30  ;;  %8471 = vmatmul.mubr.msk.f32.gmra.mxu1 %vm687_vm1, %v4813_v59  ;;  %v4509_v12 = vpop.xlane.xlu1 %4508  ;;  %v12764_v16 = vpop.f32.mrf.mxu0  ;;  %v8001_v34 = vadd.f32 %v12681_v3, %v12677_v52 }
 0x9e6   : > { %v9111_v50 = vpop.eup %9110  ;;  %8473 = vmatprep.mubr.msk.f32.mxu1 %vm687_vm1, %v4814_v6  ;;  %9124 = vrcp.f32 %v4485_v56 }
 0x9e7   : > { %v4815_v53 = vmul.f32 %v9111_v50, %v7956_v11  ;;  %v9113_v55 = vpop.eup %9112  ;;  %v12772_v60 = vpop.f32.mrf.mxu0 }
 0x9e8   : > { %v4482_v62 = vpop.xlane.xlu0 %4481  ;;  %v4818_v21 = vmul.f32 %v9113_v55, %v7965_v22 }
 0x9e9   : > { %9126 = vrcp.f32 %v4482_v62  ;;  %8474 = vmatmul.mubr.msk.f32.gmra.mxu1 %vm687_vm1, %v4815_v53  ;;  %v4515_v17 = vpop.xlane.xlu1 %4514  ;;  %v7989_v62 = vadd.f32 %v12647_v46, %v12643_v63  ;;  %v12775_v55 = vpop.f32.mrf.mxu0  ;;  %v7995_v46 = vadd.f32 %v12665_v31, %v12661_v42 }
 0x9ea   : > { %v9115_v48 = vpop.eup %9114  ;;  %8476 = vmatprep.mubr.msk.f32.mxu1 %vm687_vm1, %v4816_v38  ;;  %9128 = vrcp.f32 %v4491_v1 }
 0x9eb   : > { %v4817_v14 = vmul.f32 %v9115_v48, %v7962_v37  ;;  %v9117_v15 = vpop.eup %9116  ;;  %v8024_v22 = vpop.f32.mrf.mxu0 }
 0x9ec   : > { %v4488_v56 = vpop.xlane.xlu0 %4487  ;;  %v4820_v51 = vmul.f32 %v9117_v15, %v7971_v4  ;;  %v7998_v15 = vadd.f32 %v12673_v10, %v12669_v18  ;;  %v8007_v18 = vadd.f32 %v12697_v26, %v12693_v36 }
 0x9ed   : > { %9130 = vrcp.f32 %v4488_v56  ;;  %8477 = vmatmul.mubr.msk.f32.gmra.mxu1 %vm687_vm1, %v4817_v14  ;;  %v4521_v2 = vpop.xlane.xlu1 %4520  ;;  %v8026_v31 = vpop.f32.mrf.mxu0 }
 0x9ee   : > { %v9119_v58 = vpop.eup %9118  ;;  %8479 = vmatprep.mubr.msk.f32.mxu1 %vm687_vm1, %v4818_v21  ;;  %9132 = vrcp.f32 %v4497_v54 }
 0x9ef   : > { %v4819_v44 = vmul.f32 %v9119_v58, %v7968_v35  ;;  %v9121_v45 = vpop.eup %9120 }
 0x9f0   : > { %v4494_v1 = vpop.xlane.xlu0 %4493  ;;  %v4822_v30 = vmul.f32 %v9121_v45, %v7977_v57 }
 0x9f1   : > { %9134 = vrcp.f32 %v4494_v1  ;;  %8480 = vmatmul.mubr.msk.f32.gmra.mxu1 %vm687_vm1, %v4819_v44  ;;  %v4527_v35 = vpop.xlane.xlu1 %4526  ;;  %v8004_v44 = vadd.f32 %v12689_v13, %v12685_v7  ;;  %v8027_v1 = vpop.f32.mrf.mxu0  ;;  %v8013_v7 = vadd.f32 %v12725_v0, %v12718_v28 }
 0x9f2   : > { %v9123_v33 = vpop.eup %9122  ;;  %8482 = vmatprep.mubr.msk.f32.mxu1 %vm687_vm1, %v4820_v51  ;;  %9136 = vrcp.f32 %v4503_v23 }
 0x9f3   : > { %v4821_v59 = vmul.f32 %v9123_v33, %v7974_v43  ;;  %v9125_v6 = vpop.eup %9124  ;;  %v8010_v33 = vadd.f32 %v12710_v61, %v12701_v20  ;;  %v8019_v61 = vadd.f32 %v12756_v32, %v12748_v27 }
 0x9f4   : > { %v4500_v54 = vpop.xlane.xlu0 %4499  ;;  %v4824_v29 = vmul.f32 %v9125_v6, %v7983_v8 }
 0x9f5   : > { %9138 = vrcp.f32 %v4500_v54  ;;  %8483 = vmatmul.mubr.msk.f32.gmra.mxu1 %vm687_vm1, %v4821_v59  ;;  %v4533_v3 = vpop.xlane.xlu1 %4532 }
 0x9f6   : > { %v9127_v5 = vpop.eup %9126  ;;  %8485 = vmatprep.mubr.msk.f32.mxu1 %vm687_vm1, %v4822_v30  ;;  %9140 = vrcp.f32 %v4509_v12  ;;  %v8016_v30 = vadd.f32 %v12741_v41, %v12733_v39  ;;  %v8025_v41 = vadd.f32 %v8024_v22, %v12775_v55 }
 0x9f7   : > { %v4823_v11 = vmul.f32 %v9127_v5, %v7980_v47  ;;  %v9129_v53 = vpop.eup %9128  ;;  %v8022_v5 = vadd.f32 %v12772_v60, %v12764_v16 }
 0x9f8   : > { %v4506_v50 = vpop.xlane.xlu0 %4505  ;;  %v4826_v23 = vmul.f32 %v9129_v53, %v7989_v62 }
 0x9f9   : > { %9142 = vrcp.f32 %v4506_v50  ;;  %8486 = vmatmul.mubr.msk.f32.gmra.mxu1 %vm687_vm1, %v4823_v11  ;;  %v8028_v50 = vadd.f32 %v8027_v1, %v8026_v31 }
 0x9fa   : > { %v9131_v24 = vpop.eup %9130  ;;  %8488 = vmatprep.mubr.msk.f32.mxu1 %vm687_vm1, %v4824_v29  ;;  %9144 = vrcp.f32 %v4515_v17 }
 0x9fb   : > { %v4825_v38 = vmul.f32 %v9131_v24, %v7986_v40  ;;  %v9133_v48 = vpop.eup %9132 }
 0x9fc   : > { %v4512_v37 = vpop.xlane.xlu0 %4511  ;;  %v4828_v56 = vmul.f32 %v9133_v48, %v7995_v46  ;;  %v14362_v48 = vld [vmem:[#allocation63_spill] sm:$0xff] }
 0x9fd   : > { %9146 = vrcp.f32 %v4512_v37  ;;  %8489 = vmatmul.mubr.msk.f32.gmra.mxu1 %vm687_vm1, %v4825_v38  ;;  %v14360_v37 = vld [vmem:[#allocation76_spill] sm:$0xff] }
 0x9fe   : > { %v9135_v9 = vpop.eup %9134  ;;  %8491 = vmatprep.mubr.msk.f32.mxu1 %vm687_vm1, %v4826_v23  ;;  %9148 = vrcp.f32 %v4521_v2  ;;  %v14361_v23 = vld [vmem:[#allocation70_spill] sm:$0xff] }
 0x9ff   : > { %v4827_v63 = vmul.f32 %v9135_v9, %v7992_v49  ;;  %v9137_v21 = vpop.eup %9136  ;;  %v14363_v49 = vld [vmem:[#allocation54_spill] sm:$0xff] }
 0xa00   : > { %v4518_v14 = vpop.xlane.xlu0 %4517  ;;  %v4830_v4 = vmul.f32 %v9137_v21, %v8001_v34 }
 0xa01   : > { %9150 = vrcp.f32 %v4518_v14  ;;  %8492 = vmatmul.mubr.msk.f32.gmra.mxu1 %vm687_vm1, %v4827_v63 }
 0xa02   : > { %v9139_v25 = vpop.eup %9138  ;;  %8494 = vmatprep.mubr.msk.f32.mxu1 %vm687_vm1, %v4828_v56  ;;  %9152 = vrcp.f32 %v4527_v35 }
 0xa03   : > { %v4829_v42 = vmul.f32 %v9139_v25, %v7998_v15  ;;  %v9141_v12 = vpop.eup %9140 }
 0xa04   : > { %v4524_v58 = vpop.xlane.xlu0 %4523  ;;  %v4832_v45 = vmul.f32 %v9141_v12, %v8007_v18 }
 0xa05   : > { %9154 = vrcp.f32 %v4524_v58  ;;  %8495 = vmatmul.mubr.msk.f32.gmra.mxu1 %vm687_vm1, %v4829_v42  ;;  %v14364_v58 = vld [vmem:[#allocation60_spill] sm:$0xff] }
 0xa06   : > { %v9143_v10 = vpop.eup %9142  ;;  %8497 = vmatprep.mubr.msk.f32.mxu1 %vm687_vm1, %v4830_v4  ;;  %v14365_v4 = vld [vmem:[#allocation46_spill] sm:$0xff] }
 0xa07   : > { %v4831_v52 = vmul.f32 %v9143_v10, %v8004_v44  ;;  %v9145_v43 = vpop.eup %9144  ;;  %v14366_v44 = vld [vmem:[#allocation49_spill] sm:$0xff]  ;;  %v14367_v10 = vld [vmem:[#allocation31_spill] sm:$0xff] }
 0xa08   : > { %v4530_v51 = vpop.xlane.xlu0 %4529  ;;  %v4834_v59 = vmul.f32 %v9145_v43, %v8013_v7  ;;  %v14369_v7 = vld [vmem:[#allocation35_spill] sm:$0xff] }
 0xa09   : > { %9156 = vrcp.f32 %v4530_v51  ;;  %8498 = vmatmul.mubr.msk.f32.gmra.mxu1 %vm687_vm1, %v4831_v52 }
 0xa0a   : > { %v9147_v13 = vpop.eup %9146  ;;  %9158 = vrcp.f32 %v4533_v3  ;;  %v8029_v36 = vpop.f32.mrf.mxu0  ;;  %8500 = vmatprep.mubr.msk.f32.mxu1 %vm687_vm1, %v4832_v45 }
 0xa0b   : > { %v4833_v26 = vmul.f32 %v9147_v13, %v8010_v33  ;;  %v9149_v54 = vpop.eup %9148 }
 0xa0c   : > { %v8030_v57 = vpop.f32.mrf.mxu0  ;;  %v4836_v47 = vmul.f32 %v9149_v54, %v8019_v61 }
 0xa0d   : > { %8501 = vmatmul.mubr.msk.f32.gmra.mxu1 %vm687_vm1, %v4833_v26  ;;  %v8031_v32 = vadd.f32 %v8030_v57, %v8029_v36  ;;  %v14370_v36 = vld [vmem:[#allocation41_spill] sm:$0xff] }
 0xa0e   : > { %v9151_v20 = vpop.eup %9150  ;;  %v8032_v6 = vpop.f32.mrf.mxu0  ;;  %8503 = vmatprep.mubr.msk.f32.mxu1 %vm687_vm1, %v4834_v59  ;;  %v3487_v26 = vadd.f32 %v14370_v36, %v14369_v7  ;;  %v14389_v7 = vld [vmem:[#allocation24_spill] sm:$0xff] }
 0xa0f   : > { %v4835_v28 = vmul.f32 %v9151_v20, %v8016_v30  ;;  %v9153_v17 = vpop.eup %9152 }
 0xa10   : > { %v8033_v0 = vpop.f32.mrf.mxu0  ;;  %v4838_v11 = vmul.f32 %v9153_v17, %v8025_v41  ;;  %v14378_v41 = vld [vmem:[#allocation57_spill] sm:$0xff] }
 0xa11   : > { %v12809_v8 = vadd.f32 %v8033_v0, %v8032_v6  ;;  %8504 = vmatmul.mubr.msk.f32.gmra.mxu1 %vm687_vm1, %v4835_v28  ;;  %v14373_v6 = vld [vmem:[#allocation84_spill] sm:$0xff]  ;;  %v14374_v28 = vld [vmem:[#allocation89_spill] sm:$0xff] }
 0xa12   : > { %v9155_v39 = vpop.eup %9154  ;;  %8506 = vmatprep.mubr.msk.f32.mxu1 %vm687_vm1, %v4836_v47  ;;  %v3497_v0 = vadd.f32 %v14374_v28, %v14373_v6  ;;  %v14391_v6 = vld [vmem:[#allocation25_spill] sm:$0xff] }
 0xa13   : > { %v4837_v27 = vmul.f32 %v9155_v39, %v8022_v5 }
 0xa15   : > { %8507 = vmatmul.mubr.msk.f32.gmra.mxu1 %vm687_vm1, %v4837_v27  ;;  %v14379_v27 = vld [vmem:[#allocation94_spill] sm:$0xff] }
 0xa16   : > { %v9157_v29 = vpop.eup %9156  ;;  %8509 = vmatprep.mubr.msk.f32.mxu1 %vm687_vm1, %v4838_v11 }
 0xa17   : > { %v9159_v53 = vpop.eup %9158  ;;  %v4839_v16 = vmul.f32 %v9157_v29, %v8028_v50 }
 0xa18   : > { %v4840_v40 = vmul.f32 %v9159_v53, %v8031_v32  ;;  %v3507_v32 = vadd.f32 %v14379_v27, %v14378_v41 }
 0xa19   : > { %8510 = vmatmul.mubr.msk.f32.gmra.mxu1 %vm687_vm1, %v4839_v16  ;;  %v14382_v16 = vld [vmem:[#allocation56_spill] sm:$0xff] }
 0xa1a   : > { %8512 = vmatprep.mubr.msk.f32.mxu1 %vm687_vm1, %v4840_v40  ;;  %v14383_v40 = vld [vmem:[#allocation75_spill] sm:$0xff] }
 0xa21   : > { %v12818_v24 = vpop.f32.mrf.mxu0 }
 0xa23   : > { %v12820_v62 = vpop.f32.mrf.mxu0 }
 0xa24   : > { %v5709_v60 = vmax.f32 %v12818_v24, %v12820_v62 }
 0xa25   : > { %v12824_v2 = vpop.f32.mrf.mxu0 }
 0xa26   : > { %5710 = vmax.xlane.f32.xlu0 %v5709_v60  ;;  %v3517_v60 = vadd.f32 %v14383_v40, %v14382_v16  ;;  %v14396_v16 = vld [vmem:[#allocation19_spill] sm:$0xff] }
 0xa27   : > { %v12826_v38 = vpop.f32.mrf.mxu0 }
 0xa28   : > { %v5712_v55 = vmax.f32 %v12824_v2, %v12826_v38 }
 0xa29   : > { %v12839_v9 = vpop.f32.mrf.mxu0 }
 0xa2a   : > { %4535 = vadd.xlane.f32.xlu0 %v12484_v19  ;;  %5713 = vmax.xlane.f32.xlu1 %v5712_v55 }
 0xa2b   : > { %v12841_v46 = vpop.f32.mrf.mxu0 }
 0xa2c   : > { %v5715_v14 = vmax.f32 %v12839_v9, %v12841_v46 }
 0xa2d   : > { %v12843_v63 = vpop.f32.mrf.mxu0 }
 0xa2f   : > { %v12845_v19 = vpop.f32.mrf.mxu0 }
 0xa30   : > { %v5718_v15 = vmax.f32 %v12843_v63, %v12845_v19 }
 0xa31   : > { %v12847_v22 = vpop.f32.mrf.mxu0 }
 0xa33   : > { %v12851_v56 = vpop.f32.mrf.mxu0 }
 0xa34   : > { %v5721_v33 = vmax.f32 %v12847_v22, %v12851_v56 }
 0xa35   : > { %v12853_v21 = vpop.f32.mrf.mxu0 }
 0xa37   : > { %v12857_v35 = vpop.f32.mrf.mxu0 }
 0xa38   : > { %v5724_v59 = vmax.f32 %v12853_v21, %v12857_v35 }
 0xa39   : > { %v12859_v25 = vpop.f32.mrf.mxu0 }
 0xa3b   : > { %6155 = vrot.lane.b32.xlu1 %v14360_v37, %s9372_s27  ;;  %v12861_v34 = vpop.f32.mrf.mxu0 }
 0xa3d   : > { %v12863_v42 = vpop.f32.mrf.mxu0 }
 0xa3f   : > { %6153 = vrot.lane.b32.xlu1 %v14361_v23, %s9372_s27  ;;  %v12865_v31 = vpop.f32.mrf.mxu0 }
 0xa40   : > { %6139 = vrot.lane.b32.xlu0 %v14362_v48, %s9372_s27  ;;  %v14385_v48 = vld [vmem:[#allocation36_spill] sm:$0xff] }
 0xa41   : > { %v12871_v12 = vpop.f32.mrf.mxu0 }
 0xa43   : > { %6137 = vrot.lane.b32.xlu1 %v14363_v49, %s9372_s27  ;;  %v12877_v18 = vpop.f32.mrf.mxu0 }
 0xa45   : > { %v12879_v3 = vpop.f32.mrf.mxu0 }
 0xa47   : > { %v12881_v52 = vpop.f32.mrf.mxu0 }
 0xa49   : > { %v12883_v1 = vpop.f32.mrf.mxu0 }
 0xa4b   : > { %v12885_v51 = vpop.f32.mrf.mxu0 }
 0xa4d   : > { %v12887_v45 = vpop.f32.mrf.mxu0 }
 0xa4f   : > { %v12889_v43 = vpop.f32.mrf.mxu0 }
 0xa50   : > { %14368 = vst [vmem:[#allocation14_spill] sm:$0xff] %v12889_v43 }
 0xa51   : > { %v12893_v13 = vpop.f32.mrf.mxu0 }
 0xa53   : > { %v12897_v57 = vpop.f32.mrf.mxu0 }
 0xa55   : > { %v12903_v20 = vpop.f32.mrf.mxu0 }
 0xa57   : > { %v12909_v47 = vpop.f32.mrf.mxu0 }
 0xa58   : > { %14375 = vst [vmem:[#allocation4_spill] sm:$0xff] %v12909_v47 }
 0xa59   : > { %v12917_v11 = vpop.f32.mrf.mxu0 }
 0xa5b   : > { %v12925_v55 = vpop.f32.mrf.mxu0 }
 0xa5f   : > { %5716 = vmax.xlane.f32.xlu0 %v5715_v14 }
 0xa67   : > { %5719 = vmax.xlane.f32.xlu1 %v5718_v15  ;;  %v14387_v15 = vld [vmem:[#allocation97_spill] sm:$0xff] }
 0xa75   : > { %6151 = vrot.lane.b32.xlu0 %v14364_v58, %s9372_s27  ;;  %v14388_v58 = vld [vmem:[#allocation85_spill] sm:$0xff] }
 0xa78   : > { %6135 = vrot.lane.b32.xlu1 %v14365_v4, %s9372_s27  ;;  %v3527_v4 = vadd.f32 %v14388_v58, %v14387_v15  ;;  %v14399_v58 = vld [vmem:[#allocation107_spill] sm:$0xff] }
 0xa79   : > { %6149 = vrot.lane.b32.xlu0 %v14366_v44, %s9372_s27 }
 0xa7c   : > { %6133 = vrot.lane.b32.xlu1 %v14367_v10, %s9372_s27 }
 0xa98   : > { %5722 = vmax.xlane.f32.xlu0 %v5721_v33  ;;  %v12937_v33 = vpop.f32.mrf.mxu0 }
 0xa9e   : > { %v8469_v54 = vpop.f32.mrf.mxu1 }
 0xa9f   : > { %v12901_v30 = vadd.f32 %v8469_v54, %v3487_v26 }
 0xaa0   : > { %5725 = vmax.xlane.f32.xlu1 %v5724_v59  ;;  %v12905_v61 = vpop.f32.mrf.mxu1 }
 0xaa1   : > { %14371 = vst [vmem:[#allocation5_spill] sm:$0xff] %v12901_v30  ;;  %14372 = vst [vmem:[#allocation8_spill] sm:$0xff] %v12905_v61 }
 0xaa5   : > { %v8472_v17 = vpop.f32.mrf.mxu1 }
 0xaa6   : > { %v12911_v5 = vadd.f32 %v8472_v17, %v3497_v0  ;;  %v14393_v17 = vld [vmem:[#allocation103_spill] sm:$0xff] }
 0xaa7   : > { %v12913_v39 = vpop.f32.mrf.mxu1 }
 0xaa8   : > { %14376 = vst [vmem:[#allocation2_spill] sm:$0xff] %v12911_v5  ;;  %14377 = vst [vmem:[#allocation3_spill] sm:$0xff] %v12913_v39  ;;  %v5745_v39 = vmax.f32 %v12893_v13, %v12897_v57 }
 0xaa9   : > { %v8475_v50 = vpop.f32.mrf.mxu1 }
 0xaaa   : > { %v12919_v29 = vadd.f32 %v8475_v50, %v3507_v32  ;;  %v12951_v50 = vpop.f32.mrf.mxu0 }
 0xaab   : > { %v12921_v53 = vpop.f32.mrf.mxu1  ;;  %14395 = vst [vmem:[#allocation22_spill] sm:$0xff] %v12951_v50  ;;  %v5754_v61 = vmax.f32 %v12937_v33, %v12951_v50 }
 0xaac   : > { %14380 = vst [vmem:[#allocation30_spill] sm:$0xff] %v12919_v29  ;;  %14381 = vst [vmem:[#allocation39_spill] sm:$0xff] %v12921_v53  ;;  %v5736_v53 = vmax.f32 %v12879_v3, %v12881_v52 }
 0xaad   : > { %v8478_v37 = vpop.f32.mrf.mxu1 }
 0xaae   : > { %v12927_v23 = vadd.f32 %v8478_v37, %v3517_v60  ;;  %6147 = vrot.lane.b32.xlu0 %v14385_v48, %s9372_s27 }
 0xaaf   : > { %v12931_v49 = vpop.f32.mrf.mxu1  ;;  %v5711_v14 = vpop.xlane.xlu0 %5710 }
 0xab0   : > { %14384 = vst [vmem:[#allocation23_spill] sm:$0xff] %v12927_v23  ;;  %14386 = vst [vmem:[#allocation27_spill] sm:$0xff] %v12931_v49  ;;  %v5805_v44 = vsub.f32 %v12818_v24, %v5711_v14  ;;  %v5806_v10 = vsub.f32 %v12820_v62, %v5711_v14  ;;  %v14394_v24 = vld [vmem:[#allocation90_spill] sm:$0xff] }
 0xab1   : > { %6131 = vrot.lane.b32.xlu1 %v14389_v7, %s9372_s27  ;;  %v8481_v36 = vpop.f32.mrf.mxu1  ;;  %v3537_v41 = vadd.f32 %v14394_v24, %v14393_v17 }
 0xab2   : > { %v5869_v26 = vmul.f32 1.442695, %v5805_v44  ;;  %v5871_v59 = vmul.f32 1.442695, %v5806_v10  ;;  %v12941_v54 = vadd.f32 %v8481_v36, %v3527_v4  ;;  %6145 = vrot.lane.b32.xlu0 %v14391_v6, %s9372_s27  ;;  %v12961_v44 = vpop.f32.mrf.mxu0  ;;  %v14404_v6 = vld [vmem:[#allocation88_spill] sm:$0xff] }
 0xab3   : > { %v5714_v28 = vpop.xlane.xlu1 %5713  ;;  %v12945_v0 = vpop.f32.mrf.mxu1 }
 0xab4   : > { %14390 = vst [vmem:[#allocation20_spill] sm:$0xff] %v12941_v54  ;;  %14392 = vst [vmem:[#allocation37_spill] sm:$0xff] %v12945_v0  ;;  %9160 = vpow2.f32 %v5869_v26  ;;  %v5807_v62 = vsub.f32 %v12824_v2, %v5714_v28  ;;  %v5808_v27 = vsub.f32 %v12826_v38, %v5714_v28  ;;  %v4536_v32 = vpop.xlane.xlu0 %4535  ;;  %v14400_v2 = vld [vmem:[#allocation42_spill] sm:$0xff]  ;;  %v12969_v17 = vpop.f32.mrf.mxu0 }
 0xab5   : > { %9162 = vpow2.f32 %v5871_v59  ;;  %6129 = vrot.lane.b32.xlu1 %v14396_v16, %s9372_s27  ;;  %v8484_v40 = vpop.f32.mrf.mxu1  ;;  %v3547_v4 = vadd.f32 %v14400_v2, %v14399_v58  ;;  %v14403_v59 = vld [vmem:[#allocation87_spill] sm:$0xff] }
 0xab6   : > { %v5873_v60 = vmul.f32 1.442695, %v5807_v62  ;;  %v5875_v37 = vmul.f32 1.442695, %v5808_v27  ;;  %9164 = vrcp.f32 %v4536_v32  ;;  %v12955_v48 = vadd.f32 %v8484_v40, %v3537_v41  ;;  %v14407_v32 = vld [vmem:[#allocation78_spill] sm:$0xff]  ;;  %v14408_v16 = vld [vmem:[#allocation55_spill] sm:$0xff] }
 0xab7   : > { %v6156_v14 = vpop.permute.xlu1 %6155  ;;  %v12957_v15 = vpop.f32.mrf.mxu1  ;;  %v3557_v28 = vadd.f32 %v14404_v6, %v14403_v59  ;;  %v3567_v40 = vadd.f32 %v14408_v16, %v14407_v32  ;;  %v14413_v59 = vld [vmem:[#allocation69_spill] sm:$0xff] }
 0xab8   : > { %14397 = vst [vmem:[#allocation11_spill] sm:$0xff] %v12955_v48  ;;  %14398 = vst [vmem:[#allocation16_spill] sm:$0xff] %v12957_v15  ;;  %9166 = vpow2.f32 %v5873_v60  ;;  %v6140_v38 = vpop.permute.xlu0 %6139  ;;  %8164 = vmatprep.subr.bf16.mxu1 %v6156_v14 }
 0xab9   : > { %9168 = vpow2.f32 %v5875_v37  ;;  %v8487_v10 = vpop.f32.mrf.mxu1  ;;  %8165 = vmatpush3.bf16.msra.mxu1 %v6140_v38  ;;  %v12979_v37 = vpop.f32.mrf.mxu0 }
 0xaba   : > { %v12963_v7 = vadd.f32 %v8487_v10, %v3547_v4  ;;  %14409 = vst [vmem:[#allocation10_spill] sm:$0xff] %v12979_v37 }
 0xabb   : > { %v6154_v36 = vpop.permute.xlu1 %6153  ;;  %v12965_v26 = vpop.f32.mrf.mxu1 }
 0xabc   : > { %14401 = vst [vmem:[#allocation13_spill] sm:$0xff] %v12963_v7  ;;  %14402 = vst [vmem:[#allocation18_spill] sm:$0xff] %v12965_v26  ;;  %8166 = vmatprep.subr.bf16.mxu1 %v6154_v36  ;;  %v14412_v36 = vld [vmem:[#allocation110_spill] sm:$0xff] }
 0xabd   : > { %v8490_v24 = vpop.f32.mrf.mxu1  ;;  %v3577_v6 = vadd.f32 %v14413_v59, %v14412_v36 }
 0xabe   : > { %v12971_v41 = vadd.f32 %v8490_v24, %v3557_v28 }
 0xabf   : > { %v6138_v62 = vpop.permute.xlu1 %6137  ;;  %v12973_v27 = vpop.f32.mrf.mxu1 }
 0xac0   : > { %14405 = vst [vmem:[#allocation15_spill] sm:$0xff] %v12971_v41  ;;  %14406 = vst [vmem:[#allocation67_spill] sm:$0xff] %v12973_v27  ;;  %8167 = vmatpush3.bf16.msra.mxu1 %v6138_v62  ;;  %v12993_v62 = vpop.f32.mrf.mxu0 }
 0xac1   : > { %v12977_v60 = vpop.eup %9160  ;;  %v8493_v14 = vpop.f32.mrf.mxu1  ;;  %14414 = vst [vmem:[#allocation53_spill] sm:$0xff] %v12993_v62 }
 0xac2   : > { %v9163_v58 = vpop.eup %9162  ;;  %v12981_v2 = vadd.f32 %v8493_v14, %v3567_v40  ;;  %v13007_v41 = vpop.f32.mrf.mxu0 }
 0xac3   : > { %v9165_v4 = vpop.eup %9164  ;;  %v12983_v38 = vpop.f32.mrf.mxu1  ;;  %v12986_v10 = vadd.f32 %v9163_v58, %v12977_v60 }
 0xac4   : > { %14410 = vst [vmem:[#allocation12_spill] sm:$0xff] %v12981_v2  ;;  %14411 = vst [vmem:[#allocation58_spill] sm:$0xff] %v12983_v38  ;;  %v4841_v28 = vmul.f32 %v9165_v4, %v12809_v8  ;;  %v14417_v8 = vld [vmem:[#allocation73_spill] sm:$0xff]  ;;  %v14418_v4 = vld [vmem:[#allocation111_spill] sm:$0xff] }
 0xac5   : > { %v12991_v24 = vpop.eup %9166  ;;  %v8496_v32 = vpop.f32.mrf.mxu1  ;;  %v3587_v59 = vadd.f32 %v14418_v4, %v14417_v8  ;;  %v14425_v4 = vld [vmem:[#allocation51_spill] sm:$0xff] }
 0xac6   : > { %v9169_v16 = vpop.eup %9168  ;;  %8513 = vmatmul.mubr.msk.f32.gmra.mxu1 %vm687_vm1, %v4841_v28  ;;  %v12998_v14 = vadd.f32 %v8496_v32, %v3577_v6  ;;  %v14421_v28 = vld [vmem:[#allocation65_spill] sm:$0xff] }
 0xac7   : > { %v13000_v2 = vpop.f32.mrf.mxu1  ;;  %v6094_v38 = vpack.c.bf16 %v9169_v16, %v9163_v58  ;;  %v13003_v36 = vadd.f32 %v9169_v16, %v12991_v24  ;;  %v14422_v6 = vld [vmem:[#allocation9_spill] sm:$0xff]  ;;  %v5727_v16 = vmax.f32 %v12859_v25, %v12861_v34 }
 0xac8   : > { %14415 = vst [vmem:[#allocation72_spill] sm:$0xff] %v12998_v14  ;;  %14416 = vst [vmem:[#allocation52_spill] sm:$0xff] %v13000_v2  ;;  %v3597_v32 = vadd.f32 %v14422_v6, %v14421_v28  ;;  %v13015_v14 = vpop.f32.mrf.mxu0  ;;  %v14429_v6 = vld [vmem:[#allocation38_spill] sm:$0xff] }
 0xac9   : > { %6205 = vmatprep.mubr.bf16.mxu1 %v6094_v38  ;;  %v8499_v27 = vpop.f32.mrf.mxu1  ;;  %v14426_v38 = vld [vmem:[#allocation45_spill] sm:$0xff] }
 0xaca   : > { %v13009_v7 = vadd.f32 %v8499_v27, %v3587_v59  ;;  %v3607_v26 = vadd.f32 %v14426_v38, %v14425_v4  ;;  %v13025_v27 = vpop.f32.mrf.mxu0  ;;  %v14434_v38 = vld [vmem:[#allocation33_spill] sm:$0xff] }
 0xacb   : > { %v13011_v40 = vpop.f32.mrf.mxu1 }
 0xacc   : > { %14419 = vst [vmem:[#allocation32_spill] sm:$0xff] %v13009_v7  ;;  %14420 = vst [vmem:[#allocation29_spill] sm:$0xff] %v13011_v40  ;;  %v14430_v40 = vld [vmem:[#allocation50_spill] sm:$0xff] }
 0xacd   : > { %v8502_v58 = vpop.f32.mrf.mxu1 }
 0xace   : > { %v13017_v2 = vadd.f32 %v8502_v58, %v3597_v32  ;;  %v3617_v32 = vadd.f32 %v14430_v40, %v14429_v6  ;;  %v13033_v58 = vpop.f32.mrf.mxu0 }
 0xacf   : > { %v13021_v8 = vpop.f32.mrf.mxu1  ;;  %14431 = vst [vmem:[#allocation70_spill] sm:$0xff] %v13033_v58 }
 0xad0   : > { %14423 = vst [vmem:[#allocation44_spill] sm:$0xff] %v13017_v2  ;;  %14424 = vst [vmem:[#allocation64_spill] sm:$0xff] %v13021_v8  ;;  %v5730_v8 = vmax.f32 %v12863_v42, %v12865_v31 }
 0xad1   : > { %5728 = vmax.xlane.f32.xlu0 %v5727_v16  ;;  %v8505_v59 = vpop.f32.mrf.mxu1  ;;  %v14435_v16 = vld [vmem:[#allocation21_spill] sm:$0xff] }
 0xad2   : > { %v13027_v7 = vadd.f32 %v8505_v59, %v3607_v26  ;;  %v3627_v15 = vadd.f32 %v14435_v16, %v14434_v38  ;;  %v13043_v26 = vpop.f32.mrf.mxu0  ;;  %v14441_v38 = vld [vmem:[#allocation77_spill] sm:$0xff] }
 0xad3   : > { %v13029_v28 = vpop.f32.mrf.mxu1 }
 0xad4   : > { %14427 = vst [vmem:[#allocation40_spill] sm:$0xff] %v13027_v7  ;;  %14428 = vst [vmem:[#allocation76_spill] sm:$0xff] %v13029_v28  ;;  %v13047_v40 = vpop.f32.mrf.mxu0 }
 0xad5   : > { %v8508_v2 = vpop.f32.mrf.mxu1  ;;  %14437 = vst [vmem:[#allocation46_spill] sm:$0xff] %v13047_v40 }
 0xad6   : > { %v13035_v48 = vadd.f32 %v8508_v2, %v3617_v32  ;;  %v13049_v6 = vpop.f32.mrf.mxu0  ;;  %v14440_v32 = vld [vmem:[#allocation79_spill] sm:$0xff] }
 0xad7   : > { %v13039_v4 = vpop.f32.mrf.mxu1  ;;  %14438 = vst [vmem:[#allocation49_spill] sm:$0xff] %v13049_v6 }
 0xad8   : > { %14432 = vst [vmem:[#allocation63_spill] sm:$0xff] %v13035_v48  ;;  %14433 = vst [vmem:[#allocation54_spill] sm:$0xff] %v13039_v4  ;;  %v13051_v2 = vpop.f32.mrf.mxu0 }
 0xad9   : > { %5731 = vmax.xlane.f32.xlu1 %v5730_v8  ;;  %v8511_v59 = vpop.f32.mrf.mxu1  ;;  %14439 = vst [vmem:[#allocation31_spill] sm:$0xff] %v13051_v2  ;;  %v14442_v8 = vld [vmem:[#allocation82_spill] sm:$0xff] }
 0xada   : > { %v13045_v7 = vadd.f32 %v8511_v59, %v3627_v15  ;;  %v13057_v4 = vpop.f32.mrf.mxu0 }
 0xadc   : > { %14436 = vst [vmem:[#allocation60_spill] sm:$0xff] %v13045_v7  ;;  %v13065_v59 = vpop.f32.mrf.mxu0  ;;  %v14443_v7 = vld [vmem:[#allocation81_spill] sm:$0xff] }
 0xade   : > { %v13071_v54 = vpop.f32.mrf.mxu0 }
 0xadf   : > { %14444 = vst [vmem:[#allocation35_spill] sm:$0xff] %v13071_v54 }
 0xae0   : > { %v13075_v23 = vpop.f32.mrf.mxu0 }
 0xae1   : > { %14445 = vst [vmem:[#allocation41_spill] sm:$0xff] %v13075_v23 }
 0xae2   : > { %v13077_v49 = vpop.f32.mrf.mxu0 }
 0xae7   : > { %6143 = vrot.lane.b32.xlu0 %v14440_v32, %s9372_s27 }
 0xae8   : > { %v13055_v48 = vpop.xlane.xlu0 %5716 }
 0xae9   : > { %v5809_v15 = vsub.f32 %v12839_v9, %v13055_v48 }
 0xaea   : > { %6127 = vrot.lane.b32.xlu1 %v14441_v38, %s9372_s27 }
 0xaeb   : > { %6141 = vrot.lane.b32.xlu0 %v14442_v8, %s9372_s27  ;;  %v5877_v32 = vmul.f32 1.442695, %v5809_v15 }
 0xaec   : > { %v6152_v16 = vpop.permute.xlu0 %6151 }
 0xaed   : > { %8168 = vmatprep.subr.bf16.mxu1 %v6152_v16  ;;  %9170 = vpow2.f32 %v5877_v32  ;;  %v5742_v32 = vmax.f32 %v12887_v45, %v12889_v43 }
 0xaee   : > { %6125 = vrot.lane.b32.xlu1 %v14443_v7, %s9372_s27  ;;  %v13079_v7 = vpop.f32.mrf.mxu0 }
 0xaf0   : > { %v13069_v28 = vpop.xlane.xlu1 %5719  ;;  %v6150_v9 = vpop.permute.xlu0 %6149 }
 0xaf1   : > { %v5811_v38 = vsub.f32 %v12843_v63, %v13069_v28  ;;  %v13083_v29 = vpop.f32.mrf.mxu0 }
 0xaf3   : > { %v5881_v0 = vmul.f32 1.442695, %v5811_v38  ;;  %v13089_v38 = vpop.f32.mrf.mxu0 }
 0xaf4   : > { %v6136_v8 = vpop.permute.xlu1 %6135 }
 0xaf5   : > { %9172 = vpow2.f32 %v5881_v0  ;;  %8169 = vmatpush3.bf16.msra.mxu1 %v6136_v8  ;;  %v5733_v0 = vmax.f32 %v12871_v12, %v12877_v18  ;;  %v13093_v8 = vpop.f32.mrf.mxu0 }
 0xaf6   : > { %8170 = vmatprep.subr.bf16.mxu1 %v6150_v9  ;;  %v5739_v9 = vmax.f32 %v12883_v1, %v12885_v51 }
 0xaf8   : > { %v6134_v16 = vpop.permute.xlu1 %6133 }
 0xaf9   : > { %8171 = vmatpush3.bf16.msra.mxu1 %v6134_v16  ;;  %v13097_v16 = vpop.f32.mrf.mxu0 }
 0xafa   : > { %v13081_v15 = vpop.eup %9170 }
 0xafb   : > { %v13103_v5 = vpop.f32.mrf.mxu0 }
 0xafd   : > { %v13109_v30 = vpop.f32.mrf.mxu0 }
 0xaff   : > { %v13115_v43 = vpop.f32.mrf.mxu0 }
 0xb02   : > { %v13085_v63 = vpop.eup %9172 }
 0xb0a   : > { %5734 = vmax.xlane.f32.xlu0 %v5733_v0  ;;  %v5748_v0 = vmax.f32 %v12903_v20, %v12909_v47  ;;  %v13121_v47 = vpop.f32.mrf.mxu0 }
 0xb0c   : > { %v13127_v50 = vpop.f32.mrf.mxu0 }
 0xb0e   : > { %5740 = vmax.xlane.f32.xlu0 %v5739_v9  ;;  %v5751_v9 = vmax.f32 %v12917_v11, %v12925_v55 }
 0xb12   : > { %5737 = vmax.xlane.f32.xlu1 %v5736_v53  ;;  %5743 = vmax.xlane.f32.xlu0 %v5742_v32  ;;  %v5757_v53 = vmax.f32 %v12961_v44, %v12969_v17  ;;  %v5760_v32 = vmax.f32 %v12979_v37, %v12993_v62  ;;  %v5772_v62 = vmax.f32 %v13049_v6, %v13051_v2  ;;  %v13133_v37 = vpop.f32.mrf.mxu0 }
 0xb13   : > { %v5812_v2 = vsub.f32 %v12845_v19, %v13069_v28 }
 0xb14   : > { %v13144_v6 = vpop.f32.mrf.mxu0 }
 0xb16   : > { %5746 = vmax.xlane.f32.xlu1 %v5745_v39  ;;  %5749 = vmax.xlane.f32.xlu0 %v5748_v0  ;;  %v5763_v39 = vmax.f32 %v13007_v41, %v13015_v14  ;;  %v5766_v0 = vmax.f32 %v13025_v27, %v13033_v58  ;;  %v5810_v58 = vsub.f32 %v12841_v46, %v13055_v48 }
 0xb17   : > { %v5781_v46 = vmax.f32 %v13077_v49, %v13079_v7 }
 0xb18   : > { %v5879_v48 = vmul.f32 1.442695, %v5810_v58  ;;  %v5790_v58 = vmax.f32 %v13103_v5, %v13109_v30 }
 0xb1a   : > { %5752 = vmax.xlane.f32.xlu1 %v5751_v9  ;;  %5755 = vmax.xlane.f32.xlu0 %v5754_v61  ;;  %v5769_v61 = vmax.f32 %v13043_v26, %v13047_v40 }
 0xb1e   : > { %5758 = vmax.xlane.f32.xlu1 %v5757_v53  ;;  %5761 = vmax.xlane.f32.xlu0 %v5760_v32 }
 0xb21   : > { %v5723_v9 = vpop.xlane.xlu0 %5722 }
 0xb22   : > { %5764 = vmax.xlane.f32.xlu1 %v5763_v39  ;;  %5767 = vmax.xlane.f32.xlu0 %v5766_v0  ;;  %v5813_v53 = vsub.f32 %v12847_v22, %v5723_v9  ;;  %v5775_v39 = vmax.f32 %v13057_v4, %v13065_v59  ;;  %v5778_v0 = vmax.f32 %v13071_v54, %v13075_v23  ;;  %v5883_v23 = vmul.f32 1.442695, %v5812_v2  ;;  %v13153_v54 = vpop.f32.mrf.mxu0 }
 0xb24   : > { %v5885_v40 = vmul.f32 1.442695, %v5813_v53  ;;  %v13159_v2 = vpop.f32.mrf.mxu0 }
 0xb25   : > { %v6148_v32 = vpop.permute.xlu0 %6147 }
 0xb26   : > { %5770 = vmax.xlane.f32.xlu1 %v5769_v61  ;;  %5773 = vmax.xlane.f32.xlu0 %v5772_v62  ;;  %v5814_v62 = vsub.f32 %v12851_v56, %v5723_v9  ;;  %9174 = vpow2.f32 %v5885_v40  ;;  %v5787_v56 = vmax.f32 %v13093_v8, %v13097_v16  ;;  %v5793_v9 = vmax.f32 %v13115_v43, %v13121_v47 }
 0xb27   : > { %8172 = vmatprep.subr.bf16.mxu1 %v6148_v32  ;;  %v5784_v32 = vmax.f32 %v13083_v29, %v13089_v38 }
 0xb29   : > { %v5726_v22 = vpop.xlane.xlu1 %5725 }
 0xb2a   : > { %v5815_v61 = vsub.f32 %v12853_v21, %v5726_v22  ;;  %5776 = vmax.xlane.f32.xlu1 %v5775_v39  ;;  %5779 = vmax.xlane.f32.xlu0 %v5778_v0  ;;  %v5816_v19 = vsub.f32 %v12857_v35, %v5726_v22  ;;  %v5887_v21 = vmul.f32 1.442695, %v5814_v62  ;;  %v6146_v39 = vpop.permute.xlu0 %6145  ;;  %v5796_v0 = vmax.f32 %v13127_v50, %v13133_v37  ;;  %v13165_v22 = vpop.f32.mrf.mxu0 }
 0xb2c   : > { %v5889_v28 = vmul.f32 1.442695, %v5815_v61  ;;  %v5891_v35 = vmul.f32 1.442695, %v5816_v19  ;;  %v5802_v61 = vmax.f32 %v13159_v2, %v13165_v22 }
 0xb2d   : > { %v6132_v53 = vpop.permute.xlu1 %6131 }
 0xb2e   : > { %9176 = vpow2.f32 %v5889_v28  ;;  %5782 = vmax.xlane.f32.xlu1 %v5781_v46  ;;  %5785 = vmax.xlane.f32.xlu0 %v5784_v32 }
 0xb2f   : > { %9178 = vpow2.f32 %v5879_v48  ;;  %8173 = vmatpush3.bf16.msra.mxu1 %v6132_v53 }
 0xb30   : > { %9180 = vpow2.f32 %v5883_v23  ;;  %8174 = vmatprep.subr.bf16.mxu1 %v6146_v39  ;;  %v5799_v23 = vmax.f32 %v13144_v6, %v13153_v54 }
 0xb31   : > { %v6130_v40 = vpop.permute.xlu1 %6129  ;;  %9182 = vpow2.f32 %v5887_v21 }
 0xb32   : > { %5788 = vmax.xlane.f32.xlu1 %v5787_v56  ;;  %5791 = vmax.xlane.f32.xlu0 %v5790_v58  ;;  %9184 = vpow2.f32 %v5891_v35 }
 0xb33   : > { %8175 = vmatpush3.bf16.msra.mxu1 %v6130_v40  ;;  %v9175_v46 = vpop.eup %9174 }
 0xb36   : > { %5794 = vmax.xlane.f32.xlu1 %v5793_v9  ;;  %5797 = vmax.xlane.f32.xlu0 %v5796_v0 }
 0xb3a   : > { %5800 = vmax.xlane.f32.xlu1 %v5799_v23  ;;  %5803 = vmax.xlane.f32.xlu0 %v5802_v61 }
 0xb3b   : > { %v9177_v48 = vpop.eup %9176 }
 0xb3c   : > { %v9179_v62 = vpop.eup %9178  ;;  %v6097_v32 = vpack.c.bf16 %v9177_v48, %v9175_v46 }
 0xb3d   : > { %v9181_v19 = vpop.eup %9180  ;;  %v6003_v21 = vadd.f32 %v9179_v62, %v13081_v15 }
 0xb3e   : > { %6001 = vadd.xlane.f32.xlu0 %v13003_v36  ;;  %5998 = vadd.xlane.f32.xlu1 %v12986_v10  ;;  %v9183_v28 = vpop.eup %9182  ;;  %v6006_v53 = vadd.f32 %v9181_v19, %v13085_v63 }
 0xb3f   : > { %v9185_v39 = vpop.eup %9184  ;;  %v6009_v58 = vadd.f32 %v9183_v28, %v9175_v46 }
 0xb40   : > { %v6012_v56 = vadd.f32 %v9185_v39, %v9177_v48 }
 0xb42   : > { %6007 = vadd.xlane.f32.xlu0 %v6006_v53  ;;  %6004 = vadd.xlane.f32.xlu1 %v6003_v21 }
 0xb46   : > { %6013 = vadd.xlane.f32.xlu0 %v6012_v56  ;;  %6010 = vadd.xlane.f32.xlu1 %v6009_v58 }
 0xb5a   : > { %v5729_v35 = vpop.xlane.xlu0 %5728 }
 0xb5b   : > { %v5817_v40 = vsub.f32 %v12859_v25, %v5729_v35  ;;  %v5818_v9 = vsub.f32 %v12861_v34, %v5729_v35  ;;  %v6096_v35 = vpack.c.bf16 %v9181_v19, %v9179_v62  ;;  %v13185_v62 = vpop.f32.mrf.mxu1  ;;  %v14449_v19 = vld [vmem:[#allocation17_spill] sm:$0xff] }
 0xb5d   : > { %v5893_v36 = vmul.f32 1.442695, %v5817_v40  ;;  %v5895_v0 = vmul.f32 1.442695, %v5818_v9  ;;  %v14446_v40 = vpack.c.bf16 %v12991_v24, %v12977_v60  ;;  %v14448_v24 = vld [vmem:[#allocation71_spill] sm:$0xff] }
 0xb5e   : > { %v6144_v10 = vpop.permute.xlu0 %6143 }
 0xb5f   : > { %9186 = vpow2.f32 %v5893_v36  ;;  %8176 = vmatprep.subr.bf16.mxu1 %v6144_v10  ;;  %v6098_v36 = vpack.c.bf16 %v9185_v39, %v9183_v28 }
 0xb60   : > { %9188 = vpow2.f32 %v5895_v0  ;;  %v14447_v0 = vpack.c.bf16 %v13085_v63, %v13081_v15 }
 0xb62   : > { %v5732_v23 = vpop.xlane.xlu1 %5731  ;;  %v6142_v56 = vpop.permute.xlu0 %6141 }
 0xb63   : > { %v5819_v61 = vsub.f32 %v12863_v42, %v5732_v23  ;;  %v5820_v53 = vsub.f32 %v12865_v31, %v5732_v23 }
 0xb65   : > { %v5897_v48 = vmul.f32 1.442695, %v5819_v61  ;;  %v5899_v46 = vmul.f32 1.442695, %v5820_v53  ;;  %v3637_v61 = vadd.f32 %v14449_v19, %v14448_v24 }
 0xb66   : > { %v6128_v21 = vpop.permute.xlu1 %6127 }
 0xb67   : > { %9190 = vpow2.f32 %v5897_v48  ;;  %8177 = vmatpush3.bf16.msra.mxu1 %v6128_v21 }
 0xb68   : > { %9192 = vpow2.f32 %v5899_v46  ;;  %8178 = vmatprep.subr.bf16.mxu1 %v6142_v56 }
 0xb6a   : > { %v6126_v25 = vpop.permute.xlu1 %6125 }
 0xb6b   : > { %8179 = vmatpush3.bf16.msra.mxu1 %v6126_v25 }
 0xb6c   : > { %v9187_v34 = vpop.eup %9186 }
 0xb6d   : > { %v9189_v58 = vpop.eup %9188 }
 0xb6e   : > { %6206 = vmatmul.mubr.bf16.vlgmr.msra.gmra.mxu1 %v14446_v40  ;;  %v6015_v42 = vadd.f32 %v9189_v58, %v9187_v34 }
 0xb6f   : > { %6213 = vmatprep.mubr.bf16.mxu1 %v6096_v35 }
 0xb70   : > { %6016 = vadd.xlane.f32.xlu1 %v6015_v42  ;;  %v14450_v42 = vld [vmem:[#allocation14_spill] sm:$0xff] }
 0xb74   : > { %v9191_v31 = vpop.eup %9190 }
 0xb75   : > { %v9193_v9 = vpop.eup %9192  ;;  %v6099_v60 = vpack.c.bf16 %v9191_v31, %v9187_v34 }
 0xb76   : > { %6214 = vmatmul.mubr.bf16.gmra.mxu1 %v14447_v0  ;;  %v6018_v10 = vadd.f32 %v9193_v9, %v9191_v31  ;;  %v6100_v23 = vpack.c.bf16 %v9193_v9, %v9189_v58 }
 0xb77   : > { %6221 = vmatprep.mubr.bf16.mxu1 %v6098_v36 }
 0xb78   : > { %6019 = vadd.xlane.f32.xlu0 %v6018_v10 }
 0xb7e   : > { %6222 = vmatmul.mubr.bf16.gmra.mxu1 %v6097_v32 }
 0xb7f   : > { %6229 = vmatprep.mubr.bf16.mxu1 %v6100_v23 }
 0xb86   : > { %v8514_v53 = vpop.f32.mrf.mxu1  ;;  %6230 = vmatmul.mubr.bf16.gmra.mxu1 %v6099_v60 }
 0xb87   : > { %v13189_v48 = vadd.f32 %v8514_v53, %v3637_v61 }
 0xb93   : > { %v5735_v28 = vpop.xlane.xlu0 %5734 }
 0xb94   : > { %v5821_v15 = vsub.f32 %v12871_v12, %v5735_v28  ;;  %v5822_v63 = vsub.f32 %v12877_v18, %v5735_v28 }
 0xb96   : > { %v5901_v39 = vmul.f32 1.442695, %v5821_v15  ;;  %v5903_v46 = vmul.f32 1.442695, %v5822_v63 }
 0xb97   : > { %v5741_v21 = vpop.xlane.xlu0 %5740 }
 0xb98   : > { %9194 = vpow2.f32 %v5901_v39  ;;  %v5825_v32 = vsub.f32 %v12883_v1, %v5741_v21  ;;  %v5826_v56 = vsub.f32 %v12885_v51, %v5741_v21 }
 0xb99   : > { %9196 = vpow2.f32 %v5903_v46 }
 0xb9a   : > { %v5909_v25 = vmul.f32 1.442695, %v5825_v32  ;;  %v5911_v34 = vmul.f32 1.442695, %v5826_v56 }
 0xb9b   : > { %v5738_v58 = vpop.xlane.xlu1 %5737  ;;  %v5744_v35 = vpop.xlane.xlu0 %5743 }
 0xb9c   : > { %9198 = vpow2.f32 %v5909_v25  ;;  %v5823_v40 = vsub.f32 %v12879_v3, %v5738_v58  ;;  %v5824_v12 = vsub.f32 %v12881_v52, %v5738_v58  ;;  %v5827_v18 = vsub.f32 %v12887_v45, %v5744_v35  ;;  %v14451_v52 = vld [vmem:[#allocation4_spill] sm:$0xff] }
 0xb9d   : > { %9200 = vpow2.f32 %v5911_v34  ;;  %v5828_v31 = vsub.f32 %v14450_v42, %v5744_v35  ;;  %v14454_v42 = vld [vmem:[#allocation53_spill] sm:$0xff] }
 0xb9e   : > { %v5905_v9 = vmul.f32 1.442695, %v5823_v40  ;;  %v5907_v36 = vmul.f32 1.442695, %v5824_v12  ;;  %v5913_v1 = vmul.f32 1.442695, %v5827_v18 }
 0xb9f   : > { %v5915_v0 = vmul.f32 1.442695, %v5828_v31  ;;  %v5747_v51 = vpop.xlane.xlu1 %5746  ;;  %v5750_v10 = vpop.xlane.xlu0 %5749  ;;  %v14453_v40 = vld [vmem:[#allocation10_spill] sm:$0xff] }
 0xba0   : > { %9202 = vpow2.f32 %v5905_v9  ;;  %v5829_v23 = vsub.f32 %v12893_v13, %v5747_v51  ;;  %v5830_v60 = vsub.f32 %v12897_v57, %v5747_v51  ;;  %v5831_v3 = vsub.f32 %v12903_v20, %v5750_v10  ;;  %v14452_v20 = vld [vmem:[#allocation22_spill] sm:$0xff] }
 0xba1   : > { %9204 = vpow2.f32 %v5907_v36  ;;  %v5832_v24 = vsub.f32 %v14451_v52, %v5750_v10 }
 0xba2   : > { %9206 = vpow2.f32 %v5913_v1  ;;  %v5917_v45 = vmul.f32 1.442695, %v5829_v23  ;;  %v5919_v19 = vmul.f32 1.442695, %v5830_v60  ;;  %v5921_v61 = vmul.f32 1.442695, %v5831_v3 }
 0xba3   : > { %9208 = vpow2.f32 %v5915_v0  ;;  %v5923_v53 = vmul.f32 1.442695, %v5832_v24  ;;  %v5753_v28 = vpop.xlane.xlu1 %5752  ;;  %v5756_v15 = vpop.xlane.xlu0 %5755  ;;  %v14455_v24 = vld [vmem:[#allocation70_spill] sm:$0xff] }
 0xba4   : > { %9210 = vpow2.f32 %v5917_v45  ;;  %v5833_v63 = vsub.f32 %v12917_v11, %v5753_v28  ;;  %v5834_v13 = vsub.f32 %v12925_v55, %v5753_v28  ;;  %v5835_v57 = vsub.f32 %v12937_v33, %v5756_v15 }
 0xba5   : > { %v13206_v39 = vpop.eup %9194  ;;  %9212 = vpow2.f32 %v5919_v19  ;;  %v5836_v46 = vsub.f32 %v14452_v20, %v5756_v15 }
 0xba6   : > { %v9197_v21 = vpop.eup %9196  ;;  %9214 = vpow2.f32 %v5921_v61  ;;  %v5925_v32 = vmul.f32 1.442695, %v5833_v63  ;;  %v5927_v56 = vmul.f32 1.442695, %v5834_v13  ;;  %v5929_v25 = vmul.f32 1.442695, %v5835_v57 }
 0xba7   : > { %9216 = vpow2.f32 %v5923_v53  ;;  %v5931_v34 = vmul.f32 1.442695, %v5836_v46  ;;  %v5759_v58 = vpop.xlane.xlu1 %5758  ;;  %v5762_v35 = vpop.xlane.xlu0 %5761  ;;  %v6021_v11 = vadd.f32 %v9197_v21, %v13206_v39  ;;  %v14456_v46 = vld [vmem:[#allocation46_spill] sm:$0xff] }
 0xba8   : > { %9218 = vpow2.f32 %v5925_v32  ;;  %v5837_v55 = vsub.f32 %v12961_v44, %v5759_v58  ;;  %v5838_v33 = vsub.f32 %v12969_v17, %v5759_v58  ;;  %v5839_v12 = vsub.f32 %v14453_v40, %v5762_v35  ;;  %v14458_v58 = vld [vmem:[#allocation31_spill] sm:$0xff] }
 0xba9   : > { %v13213_v18 = vpop.eup %9198  ;;  %9220 = vpow2.f32 %v5927_v56  ;;  %v5840_v31 = vsub.f32 %v14454_v42, %v5762_v35  ;;  %6022 = vadd.xlane.f32.xlu1 %v6021_v11  ;;  %v14457_v56 = vld [vmem:[#allocation49_spill] sm:$0xff] }
 0xbaa   : > { %v9201_v9 = vpop.eup %9200  ;;  %9222 = vpow2.f32 %v5929_v25  ;;  %v5933_v36 = vmul.f32 1.442695, %v5837_v55  ;;  %v5935_v1 = vmul.f32 1.442695, %v5838_v33  ;;  %v5937_v0 = vmul.f32 1.442695, %v5839_v12 }
 0xbab   : > { %9224 = vpow2.f32 %v5931_v34  ;;  %v5939_v51 = vmul.f32 1.442695, %v5840_v31  ;;  %v5765_v10 = vpop.xlane.xlu1 %5764  ;;  %v5768_v23 = vpop.xlane.xlu0 %5767  ;;  %v6027_v44 = vadd.f32 %v9201_v9, %v13213_v18 }
 0xbac   : > { %9226 = vpow2.f32 %v5933_v36  ;;  %v5841_v17 = vsub.f32 %v13007_v41, %v5765_v10  ;;  %v5842_v60 = vsub.f32 %v13015_v14, %v5765_v10  ;;  %v5843_v3 = vsub.f32 %v13025_v27, %v5768_v23  ;;  %v14459_v10 = vld [vmem:[#allocation35_spill] sm:$0xff] }
 0xbad   : > { %v9203_v52 = vpop.eup %9202  ;;  %9228 = vpow2.f32 %v5935_v1  ;;  %v5844_v45 = vsub.f32 %v14455_v24, %v5768_v23  ;;  %6028 = vadd.xlane.f32.xlu1 %v6027_v44 }
 0xbae   : > { %v9205_v19 = vpop.eup %9204  ;;  %9230 = vpow2.f32 %v5937_v0  ;;  %v5941_v61 = vmul.f32 1.442695, %v5841_v17  ;;  %v5943_v53 = vmul.f32 1.442695, %v5842_v60  ;;  %v5945_v28 = vmul.f32 1.442695, %v5843_v3 }
 0xbaf   : > { %v13221_v15 = vpop.eup %9206  ;;  %9232 = vpow2.f32 %v5939_v51  ;;  %v5947_v63 = vmul.f32 1.442695, %v5844_v45  ;;  %v5771_v13 = vpop.xlane.xlu1 %5770  ;;  %v6024_v57 = vadd.f32 %v9205_v19, %v9203_v52  ;;  %v6102_v14 = vpack.c.bf16 %v9205_v19, %v9197_v21  ;;  %v14460_v17 = vld [vmem:[#allocation41_spill] sm:$0xff] }
 0xbb0   : > { %v5774_v41 = vpop.xlane.xlu0 %5773  ;;  %v9209_v20 = vpop.eup %9208  ;;  %9234 = vpow2.f32 %v5941_v61  ;;  %v5845_v27 = vsub.f32 %v13043_v26, %v5771_v13  ;;  %v5846_v32 = vsub.f32 %v14456_v46, %v5771_v13  ;;  %v6101_v11 = vpack.c.bf16 %v9203_v52, %v13206_v39 }
 0xbb1   : > { %v5847_v25 = vsub.f32 %v14457_v56, %v5774_v41  ;;  %v13226_v34 = vpop.eup %9210  ;;  %9236 = vpow2.f32 %v5943_v53  ;;  %v5848_v35 = vsub.f32 %v14458_v58, %v5774_v41  ;;  %6025 = vadd.xlane.f32.xlu0 %v6024_v57  ;;  %6237 = vmatprep.mubr.bf16.mxu1 %v6102_v14  ;;  %v6104_v55 = vpack.c.bf16 %v9209_v20, %v9201_v9 }
 0xbb2   : > { %v13230_v33 = vpop.eup %9212  ;;  %9238 = vpow2.f32 %v5945_v28  ;;  %v5949_v21 = vmul.f32 1.442695, %v5845_v27  ;;  %v5951_v40 = vmul.f32 1.442695, %v5846_v32  ;;  %6238 = vmatmul.mubr.bf16.gmra.mxu1 %v6101_v11  ;;  %v6030_v0 = vadd.f32 %v9209_v20, %v13221_v15 }
 0xbb3   : > { %v5953_v26 = vmul.f32 1.442695, %v5847_v25  ;;  %v13232_v12 = vpop.eup %9214  ;;  %9240 = vpow2.f32 %v5947_v63  ;;  %v5955_v42 = vmul.f32 1.442695, %v5848_v35  ;;  %v5777_v31 = vpop.xlane.xlu1 %5776  ;;  %v6033_v1 = vadd.f32 %v13230_v33, %v13226_v34  ;;  %6245 = vmatprep.mubr.bf16.mxu1 %v6104_v55  ;;  %v6398_v63 = vld [vmem:[%s13554_s3 + $0x18] sm:$0xff] }
 0xbb4   : > { %v5780_v36 = vpop.xlane.xlu0 %5779  ;;  %v9217_v39 = vpop.eup %9216  ;;  %9242 = vpow2.f32 %v5949_v21  ;;  %v5849_v9 = vsub.f32 %v13057_v4, %v5777_v31  ;;  %v5850_v51 = vsub.f32 %v13065_v59, %v5777_v31  ;;  %8515 = vmatprep.subr.mxu0 %v6398_v63  ;;  %8565 = vmatprep.subr.mxu1 %v6398_v63  ;;  %v6103_v46 = vpack.c.bf16 %v13221_v15, %v13213_v18 }
 0xbb5   : > { %v5851_v23 = vsub.f32 %v14459_v10, %v5780_v36  ;;  %v13240_v44 = vpop.eup %9218  ;;  %9244 = vpow2.f32 %v5951_v40  ;;  %v5852_v60 = vsub.f32 %v14460_v17, %v5780_v36  ;;  %6034 = vadd.xlane.f32.xlu1 %v6033_v1  ;;  %6031 = vadd.xlane.f32.xlu0 %v6030_v0  ;;  %v6036_v28 = vadd.f32 %v9217_v39, %v13232_v12 }
 0xbb6   : > { %v13243_v3 = vpop.eup %9220  ;;  %9246 = vpow2.f32 %v5953_v26  ;;  %v5957_v52 = vmul.f32 1.442695, %v5849_v9  ;;  %v5959_v24 = vmul.f32 1.442695, %v5850_v51  ;;  %v6106_v32 = vpack.c.bf16 %v9217_v39, %v13230_v33  ;;  %8516 = vmatpush3.msra.mxu0 %v6398_v63  ;;  %8566 = vmatpush3.msra.mxu1 %v6398_v63 }
 0xbb7   : > { %v5961_v45 = vmul.f32 1.442695, %v5851_v23  ;;  %v13245_v19 = vpop.eup %9222  ;;  %9248 = vpow2.f32 %v5955_v42  ;;  %v5963_v4 = vmul.f32 1.442695, %v5852_v60  ;;  %v5783_v59 = vpop.xlane.xlu1 %5782  ;;  %v6039_v53 = vadd.f32 %v13243_v3, %v13240_v44 }
 0xbb8   : > { %v5786_v61 = vpop.xlane.xlu0 %5785  ;;  %v13253_v13 = vpop.eup %9224  ;;  %9250 = vpow2.f32 %v5957_v52  ;;  %v5853_v41 = vsub.f32 %v13077_v49, %v5783_v59  ;;  %v5854_v57 = vsub.f32 %v13079_v7, %v5783_v59  ;;  %v6105_v52 = vpack.c.bf16 %v13232_v12, %v13226_v34 }
 0xbb9   : > { %v5855_v14 = vsub.f32 %v13083_v29, %v5786_v61  ;;  %v13258_v20 = vpop.eup %9226  ;;  %9252 = vpow2.f32 %v5959_v24  ;;  %v5856_v27 = vsub.f32 %v13089_v38, %v5786_v61  ;;  %6040 = vadd.xlane.f32.xlu1 %v6039_v53  ;;  %6037 = vadd.xlane.f32.xlu0 %v6036_v28  ;;  %v6042_v15 = vadd.f32 %v13253_v13, %v13245_v19 }
 0xbba   : > { %v13264_v56 = vpop.eup %9228  ;;  %9254 = vpow2.f32 %v5961_v45  ;;  %v5965_v49 = vmul.f32 1.442695, %v5853_v41  ;;  %v5967_v7 = vmul.f32 1.442695, %v5854_v57  ;;  %6246 = vmatmul.mubr.bf16.gmra.mxu1 %v6103_v46  ;;  %v6108_v24 = vpack.c.bf16 %v13253_v13, %v13243_v3 }
 0xbbb   : > { %v5969_v29 = vmul.f32 1.442695, %v5855_v14  ;;  %v13266_v25 = vpop.eup %9230  ;;  %9256 = vpow2.f32 %v5963_v4  ;;  %v5971_v58 = vmul.f32 1.442695, %v5856_v27  ;;  %v5789_v38 = vpop.xlane.xlu1 %5788  ;;  %v6045_v18 = vadd.f32 %v13264_v56, %v13258_v20  ;;  %6253 = vmatprep.mubr.bf16.mxu1 %v6106_v32 }
 0xbbc   : > { %v5792_v35 = vpop.xlane.xlu0 %5791  ;;  %v13272_v11 = vpop.eup %9232  ;;  %9258 = vpow2.f32 %v5965_v49  ;;  %v5857_v55 = vsub.f32 %v13093_v8, %v5789_v38  ;;  %v5858_v33 = vsub.f32 %v13097_v16, %v5789_v38 }
 0xbbd   : > { %v5859_v21 = vsub.f32 %v13103_v5, %v5792_v35  ;;  %v13277_v40 = vpop.eup %9234  ;;  %9260 = vpow2.f32 %v5967_v7  ;;  %v5860_v26 = vsub.f32 %v13109_v30, %v5792_v35  ;;  %6046 = vadd.xlane.f32.xlu1 %v6045_v18  ;;  %6043 = vadd.xlane.f32.xlu0 %v6042_v15  ;;  %v6048_v30 = vadd.f32 %v13272_v11, %v13266_v25 }
 0xbbe   : > { %v13280_v42 = vpop.eup %9236  ;;  %9262 = vpow2.f32 %v5969_v29  ;;  %v5973_v31 = vmul.f32 1.442695, %v5857_v55  ;;  %v5975_v36 = vmul.f32 1.442695, %v5858_v33  ;;  %v6107_v7 = vpack.c.bf16 %v13245_v19, %v13240_v44 }
 0xbbf   : > { %v5977_v1 = vmul.f32 1.442695, %v5859_v21  ;;  %v13282_v0 = vpop.eup %9238  ;;  %9264 = vpow2.f32 %v5971_v58  ;;  %v5979_v8 = vmul.f32 1.442695, %v5860_v26  ;;  %v5795_v16 = vpop.xlane.xlu1 %5794  ;;  %v6051_v5 = vadd.f32 %v13280_v42, %v13277_v40 }
 0xbc0   : > { %v5798_v39 = vpop.xlane.xlu0 %5797  ;;  %v13288_v9 = vpop.eup %9240  ;;  %9266 = vpow2.f32 %v5973_v31  ;;  %v5861_v51 = vsub.f32 %v13115_v43, %v5795_v16  ;;  %v5862_v10 = vsub.f32 %v13121_v47, %v5795_v16  ;;  %v6110_v58 = vpack.c.bf16 %v13272_v11, %v13264_v56 }
 0xbc1   : > { %v5863_v23 = vsub.f32 %v13127_v50, %v5798_v39  ;;  %v13293_v17 = vpop.eup %9242  ;;  %9268 = vpow2.f32 %v5975_v36  ;;  %v5864_v60 = vsub.f32 %v13133_v37, %v5798_v39  ;;  %6052 = vadd.xlane.f32.xlu1 %v6051_v5  ;;  %6049 = vadd.xlane.f32.xlu0 %v6048_v30  ;;  %v6054_v34 = vadd.f32 %v13288_v9, %v13282_v0 }
 0xbc2   : > { %v13300_v45 = vpop.eup %9244  ;;  %9270 = vpow2.f32 %v5977_v1  ;;  %v5981_v43 = vmul.f32 1.442695, %v5861_v51  ;;  %v5983_v47 = vmul.f32 1.442695, %v5862_v10  ;;  %6254 = vmatmul.mubr.bf16.gmra.mxu1 %v6105_v52  ;;  %v6109_v56 = vpack.c.bf16 %v13266_v25, %v13258_v20 }
 0xbc3   : > { %v5985_v4 = vmul.f32 1.442695, %v5863_v23  ;;  %v13302_v50 = vpop.eup %9246  ;;  %9272 = vpow2.f32 %v5979_v8  ;;  %v5987_v59 = vmul.f32 1.442695, %v5864_v60  ;;  %v5801_v37 = vpop.xlane.xlu1 %5800  ;;  %v6057_v53 = vadd.f32 %v13300_v45, %v13293_v17  ;;  %6261 = vmatprep.mubr.bf16.mxu1 %v6108_v24 }
 0xbc4   : > { %v5804_v61 = vpop.xlane.xlu0 %5803  ;;  %v13308_v12 = vpop.eup %9248  ;;  %9274 = vpow2.f32 %v5981_v43  ;;  %v5865_v3 = vsub.f32 %v13144_v6, %v5801_v37  ;;  %v5866_v28 = vsub.f32 %v13153_v54, %v5801_v37  ;;  %v6112_v36 = vpack.c.bf16 %v13288_v9, %v13280_v42 }
 0xbc5   : > { %v5867_v63 = vsub.f32 %v13159_v2, %v5804_v61  ;;  %v13313_v13 = vpop.eup %9250  ;;  %9276 = vpow2.f32 %v5983_v47  ;;  %v5868_v41 = vsub.f32 %v13165_v22, %v5804_v61  ;;  %6058 = vadd.xlane.f32.xlu1 %v6057_v53  ;;  %6055 = vadd.xlane.f32.xlu0 %v6054_v34  ;;  %v6060_v2 = vadd.f32 %v13308_v12, %v13302_v50  ;;  %v13342_v53 = vpop.f32.mrf.mxu1 }
 0xbc6   : > { %v13316_v57 = vpop.eup %9252  ;;  %9278 = vpow2.f32 %v5985_v4  ;;  %v5989_v14 = vmul.f32 1.442695, %v5865_v3  ;;  %v5991_v27 = vmul.f32 1.442695, %v5866_v28  ;;  %v6111_v20 = vpack.c.bf16 %v13282_v0, %v13277_v40 }
 0xbc7   : > { %v5993_v46 = vmul.f32 1.442695, %v5867_v63  ;;  %v13318_v32 = vpop.eup %9254  ;;  %9280 = vpow2.f32 %v5987_v59  ;;  %v5995_v6 = vmul.f32 1.442695, %v5868_v41  ;;  %v6063_v54 = vadd.f32 %v13316_v57, %v13313_v13  ;;  %v5999_v59 = vpop.xlane.xlu1 %5998 }
 0xbc8   : > { %v9257_v49 = vpop.eup %9256  ;;  %9282 = vpow2.f32 %v5989_v14  ;;  %v6114_v25 = vpack.c.bf16 %v13308_v12, %v13300_v45  ;;  %v6113_v9 = vpack.c.bf16 %v13302_v50, %v13293_v17  ;;  %v6115_v24 = vpack.c.bf16 %v13318_v32, %v13313_v13  ;;  %v6002_v37 = vpop.xlane.xlu0 %6001 }
 0xbc9   : > { %v9259_v22 = vpop.eup %9258  ;;  %9284 = vpow2.f32 %v5991_v27  ;;  %6064 = vadd.xlane.f32.xlu1 %v6063_v54  ;;  %6061 = vadd.xlane.f32.xlu0 %v6060_v2  ;;  %v6066_v18 = vadd.f32 %v9257_v49, %v13318_v32  ;;  %v6116_v52 = vpack.c.bf16 %v9257_v49, %v13316_v57 }
 0xbca   : > { %v9261_v29 = vpop.eup %9260  ;;  %9286 = vpow2.f32 %v5993_v46  ;;  %6262 = vmatmul.mubr.bf16.gmra.mxu1 %v6107_v7 }
 0xbcb   : > { %v9263_v38 = vpop.eup %9262  ;;  %9288 = vpow2.f32 %v5995_v6  ;;  %v6069_v35 = vadd.f32 %v9261_v29, %v9259_v22  ;;  %6269 = vmatprep.mubr.bf16.mxu1 %v6110_v58  ;;  %v6005_v61 = vpop.xlane.xlu1 %6004 }
 0xbcc   : > { %v9265_v15 = vpop.eup %9264  ;;  %v6117_v40 = vpack.c.bf16 %v9263_v38, %v9259_v22  ;;  %9290 = vrcp.f32 %v5999_v59  ;;  %v6008_v34 = vpop.xlane.xlu0 %6007 }
 0xbcd   : > { %v9267_v55 = vpop.eup %9266  ;;  %6070 = vadd.xlane.f32.xlu1 %v6069_v35  ;;  %6067 = vadd.xlane.f32.xlu0 %v6066_v18  ;;  %v6072_v44 = vadd.f32 %v9265_v15, %v9263_v38  ;;  %v6118_v43 = vpack.c.bf16 %v9265_v15, %v9261_v29  ;;  %9292 = vrcp.f32 %v6002_v37 }
 0xbce   : > { %v9269_v33 = vpop.eup %9268  ;;  %9294 = vrcp.f32 %v6005_v61 }
 0xbcf   : > { %v9271_v21 = vpop.eup %9270  ;;  %v6075_v26 = vadd.f32 %v9269_v33, %v9267_v55  ;;  %9296 = vrcp.f32 %v6008_v34  ;;  %v6011_v41 = vpop.xlane.xlu1 %6010 }
 0xbd0   : > { %v9273_v19 = vpop.eup %9272  ;;  %v6119_v45 = vpack.c.bf16 %v9271_v21, %v9267_v55  ;;  %9298 = vrcp.f32 %v6011_v41  ;;  %v6014_v6 = vpop.xlane.xlu0 %6013 }
 0xbd1   : > { %v9275_v31 = vpop.eup %9274  ;;  %6076 = vadd.xlane.f32.xlu1 %v6075_v26  ;;  %6073 = vadd.xlane.f32.xlu0 %v6072_v44  ;;  %v6078_v16 = vadd.f32 %v9273_v19, %v9271_v21  ;;  %v6120_v0 = vpack.c.bf16 %v9273_v19, %v9269_v33  ;;  %9300 = vrcp.f32 %v6014_v6 }
 0xbd2   : > { %v9277_v11 = vpop.eup %9276  ;;  %6270 = vmatmul.mubr.bf16.gmra.mxu1 %v6109_v56 }
 0xbd3   : > { %v9279_v1 = vpop.eup %9278  ;;  %v6081_v8 = vadd.f32 %v9277_v11, %v9275_v31  ;;  %6277 = vmatprep.mubr.bf16.mxu1 %v6112_v36 }
 0xbd4   : > { %v9281_v39 = vpop.eup %9280  ;;  %v6121_v4 = vpack.c.bf16 %v9279_v1, %v9275_v31 }
 0xbd5   : > { %v9283_v5 = vpop.eup %9282  ;;  %6082 = vadd.xlane.f32.xlu1 %v6081_v8  ;;  %6079 = vadd.xlane.f32.xlu0 %v6078_v16  ;;  %v6084_v23 = vadd.f32 %v9281_v39, %v9279_v1  ;;  %v6122_v47 = vpack.c.bf16 %v9281_v39, %v9277_v11 }
 0xbd6   : > { %v9285_v30 = vpop.eup %9284 }
 0xbd7   : > { %v9287_v51 = vpop.eup %9286  ;;  %v6087_v10 = vadd.f32 %v9285_v30, %v9283_v5 }
 0xbd8   : > { %v9289_v60 = vpop.eup %9288  ;;  %v6123_v50 = vpack.c.bf16 %v9287_v51, %v9283_v5 }
 0xbd9   : > { %6088 = vadd.xlane.f32.xlu0 %v6087_v10  ;;  %6085 = vadd.xlane.f32.xlu1 %v6084_v23  ;;  %v6090_v42 = vadd.f32 %v9289_v60, %v9287_v51  ;;  %v6124_v17 = vpack.c.bf16 %v9289_v60, %v9285_v30  ;;  %v9291_v63 = vpop.eup %9290 }
 0xbda   : > { %6278 = vmatmul.mubr.bf16.gmra.mxu1 %v6111_v20  ;;  %v9293_v46 = vpop.eup %9292 }
 0xbdb   : > { %6285 = vmatprep.mubr.bf16.mxu1 %v6114_v25  ;;  %v9295_v22 = vpop.eup %9294 }
 0xbdc   : > { %v9297_v18 = vpop.eup %9296 }
 0xbdd   : > { %6091 = vadd.xlane.f32.xlu0 %v6090_v42  ;;  %v9299_v44 = vpop.eup %9298 }
 0xbde   : > { %v9301_v36 = vpop.eup %9300 }
 0xbe2   : > { %6286 = vmatmul.mubr.bf16.gmra.mxu1 %v6113_v9 }
 0xbe3   : > { %6293 = vmatprep.mubr.bf16.mxu1 %v6116_v52 }
 0xbea   : > { %6294 = vmatmul.mubr.bf16.gmra.mxu1 %v6115_v24 }
 0xbeb   : > { %6301 = vmatprep.mubr.bf16.mxu1 %v6118_v43 }
 0xbf2   : > { %6302 = vmatmul.mubr.bf16.gmra.mxu1 %v6117_v40 }
 0xbf3   : > { %6309 = vmatprep.mubr.bf16.mxu1 %v6120_v0 }
 0xbf9   : > { %v6017_v29 = vpop.xlane.xlu1 %6016 }
 0xbfa   : > { %6310 = vmatmul.mubr.bf16.gmra.mxu1 %v6119_v45  ;;  %9302 = vrcp.f32 %v6017_v29 }
 0xbfb   : > { %6317 = vmatprep.mubr.bf16.mxu1 %v6122_v47 }
 0xc01   : > { %v6020_v15 = vpop.xlane.xlu0 %6019 }
 0xc02   : > { %6318 = vmatmul.mubr.bf16.gmra.mxu1 %v6121_v4  ;;  %9304 = vrcp.f32 %v6020_v15 }
 0xc03   : > { %6325 = vmatprep.mubr.bf16.mxu1 %v6124_v17 }
 0xc07   : > { %v9303_v5 = vpop.eup %9302 }
 0xc0a   : > { %6326 = vmatmul.mubr.bf16.gmra.mxu1 %v6123_v50 }
 0xc0f   : > { %v9305_v60 = vpop.eup %9304 }
 0xc2e   : > { %v8180_v12 = vpop.f32.mrf.mxu1 }
 0xc30   : > { %v8181_v3 = vpop.f32.mrf.mxu1 }
 0xc31   : > { %v8182_v28 = vadd.f32 %v8181_v3, %v8180_v12 }
 0xc32   : > { %v8183_v13 = vpop.f32.mrf.mxu1  ;;  %v6023_v25 = vpop.xlane.xlu1 %6022 }
 0xc33   : > { %v6366_v57 = vmul.f32 %v9291_v63, %v8182_v28  ;;  %9306 = vrcp.f32 %v6023_v25 }
 0xc34   : > { %v8184_v14 = vpop.f32.mrf.mxu1 }
 0xc35   : > { %v8185_v27 = vadd.f32 %v8184_v14, %v8183_v13  ;;  %8517 = vmatprep.mubr.msk.f32.mxu0 %vm687_vm1, %v6366_v57 }
 0xc36   : > { %v8186_v32 = vpop.f32.mrf.mxu1  ;;  %v6029_v9 = vpop.xlane.xlu1 %6028 }
 0xc37   : > { %v6367_v54 = vmul.f32 %v9293_v46, %v8185_v27 }
 0xc38   : > { %v8187_v2 = vpop.f32.mrf.mxu1 }
 0xc39   : > { %v8188_v49 = vadd.f32 %v8187_v2, %v8186_v32  ;;  %8518 = vmatmul.mubr.msk.f32.vlgmr.msra.gmra.mxu0 %vm687_vm1, %v6367_v54 }
 0xc3a   : > { %v8189_v7 = vpop.f32.mrf.mxu1  ;;  %v6026_v42 = vpop.xlane.xlu0 %6025 }
 0xc3b   : > { %v6368_v58 = vmul.f32 %v9295_v22, %v8188_v49  ;;  %9308 = vrcp.f32 %v6026_v42 }
 0xc3c   : > { %v8190_v38 = vpop.f32.mrf.mxu1  ;;  %9310 = vrcp.f32 %v6029_v9 }
 0xc3d   : > { %v8191_v35 = vadd.f32 %v8190_v38, %v8189_v7  ;;  %8520 = vmatprep.mubr.msk.f32.mxu0 %vm687_vm1, %v6368_v58 }
 0xc3e   : > { %v8192_v33 = vpop.f32.mrf.mxu1  ;;  %v6032_v52 = vpop.xlane.xlu0 %6031 }
 0xc3f   : > { %v6369_v55 = vmul.f32 %v9297_v18, %v8191_v35  ;;  %9312 = vrcp.f32 %v6032_v52  ;;  %v6035_v45 = vpop.xlane.xlu1 %6034 }
 0xc40   : > { %v8193_v21 = vpop.f32.mrf.mxu1  ;;  %v9307_v0 = vpop.eup %9306  ;;  %9314 = vrcp.f32 %v6035_v45 }
 0xc41   : > { %8521 = vmatmul.mubr.msk.f32.gmra.mxu0 %vm687_vm1, %v6369_v55  ;;  %v8194_v26 = vadd.f32 %v8193_v21, %v8192_v33 }
 0xc42   : > { %v8195_v19 = vpop.f32.mrf.mxu1  ;;  %v6038_v37 = vpop.xlane.xlu0 %6037 }
 0xc43   : > { %v6370_v31 = vmul.f32 %v9299_v44, %v8194_v26  ;;  %9316 = vrcp.f32 %v6038_v37  ;;  %v6041_v63 = vpop.xlane.xlu1 %6040 }
 0xc44   : > { %v8196_v56 = vpop.f32.mrf.mxu1  ;;  %9318 = vrcp.f32 %v6041_v63 }
 0xc45   : > { %v8197_v11 = vadd.f32 %v8196_v56, %v8195_v19  ;;  %8523 = vmatprep.mubr.msk.f32.mxu0 %vm687_vm1, %v6370_v31 }
 0xc46   : > { %v8198_v1 = vpop.f32.mrf.mxu1  ;;  %v6044_v46 = vpop.xlane.xlu0 %6043 }
 0xc47   : > { %v6371_v8 = vmul.f32 %v9301_v36, %v8197_v11  ;;  %9320 = vrcp.f32 %v6044_v46  ;;  %v6047_v22 = vpop.xlane.xlu1 %6046 }
 0xc48   : > { %v8199_v16 = vpop.f32.mrf.mxu1  ;;  %v9309_v59 = vpop.eup %9308  ;;  %9322 = vrcp.f32 %v6047_v22 }
 0xc49   : > { %v8200_v39 = vadd.f32 %v8199_v16, %v8198_v1  ;;  %8524 = vmatmul.mubr.msk.f32.gmra.mxu0 %vm687_vm1, %v6371_v8  ;;  %v9311_v28 = vpop.eup %9310 }
 0xc4a   : > { %v8201_v30 = vpop.f32.mrf.mxu1  ;;  %v6050_v18 = vpop.xlane.xlu0 %6049 }
 0xc4b   : > { %v6372_v51 = vmul.f32 %v9303_v5, %v8200_v39  ;;  %9324 = vrcp.f32 %v6050_v18  ;;  %v6053_v44 = vpop.xlane.xlu1 %6052 }
 0xc4c   : > { %v8202_v10 = vpop.f32.mrf.mxu1  ;;  %v9313_v27 = vpop.eup %9312  ;;  %9326 = vrcp.f32 %v6053_v44 }
 0xc4d   : > { %v8203_v23 = vadd.f32 %v8202_v10, %v8201_v30  ;;  %8526 = vmatprep.mubr.msk.f32.mxu0 %vm687_vm1, %v6372_v51  ;;  %v9315_v49 = vpop.eup %9314 }
 0xc4e   : > { %v6056_v1 = vpop.xlane.xlu0 %6055 }
 0xc4f   : > { %v6373_v20 = vmul.f32 %v9305_v60, %v8203_v23  ;;  %9328 = vrcp.f32 %v6056_v1  ;;  %v6059_v51 = vpop.xlane.xlu1 %6058 }
 0xc50   : > { %v9317_v35 = vpop.eup %9316  ;;  %9330 = vrcp.f32 %v6059_v51 }
 0xc51   : > { %8527 = vmatmul.mubr.msk.f32.gmra.mxu0 %vm687_vm1, %v6373_v20  ;;  %v9319_v26 = vpop.eup %9318 }
 0xc52   : > { %v6062_v42 = vpop.xlane.xlu0 %6061 }
 0xc53   : > { %9332 = vrcp.f32 %v6062_v42 }
 0xc54   : > { %v9321_v36 = vpop.eup %9320 }
 0xc55   : > { %v9323_v30 = vpop.eup %9322 }
 0xc58   : > { %v9325_v25 = vpop.eup %9324 }
 0xc72   : > { %v8204_v24 = vpop.f32.mrf.mxu1 }
 0xc74   : > { %v8205_v43 = vpop.f32.mrf.mxu1 }
 0xc75   : > { %v8206_v40 = vadd.f32 %v8205_v43, %v8204_v24 }
 0xc76   : > { %v8207_v47 = vpop.f32.mrf.mxu1 }
 0xc77   : > { %v6374_v4 = vmul.f32 %v9307_v0, %v8206_v40  ;;  %v9327_v40 = vpop.eup %9326  ;;  %v6065_v0 = vpop.xlane.xlu1 %6064 }
 0xc78   : > { %v8208_v17 = vpop.f32.mrf.mxu1  ;;  %9334 = vrcp.f32 %v6065_v0 }
 0xc79   : > { %v8209_v50 = vadd.f32 %v8208_v17, %v8207_v47  ;;  %8529 = vmatprep.mubr.msk.f32.mxu0 %vm687_vm1, %v6374_v4 }
 0xc7a   : > { %v8210_v61 = vpop.f32.mrf.mxu1 }
 0xc7b   : > { %v6375_v34 = vmul.f32 %v9309_v59, %v8209_v50  ;;  %v9329_v50 = vpop.eup %9328  ;;  %v6068_v59 = vpop.xlane.xlu0 %6067 }
 0xc7c   : > { %v8211_v12 = vpop.f32.mrf.mxu1  ;;  %9336 = vrcp.f32 %v6068_v59 }
 0xc7d   : > { %v8212_v3 = vadd.f32 %v8211_v12, %v8210_v61  ;;  %8530 = vmatmul.mubr.msk.f32.gmra.mxu0 %vm687_vm1, %v6375_v34 }
 0xc7e   : > { %v8213_v13 = vpop.f32.mrf.mxu1 }
 0xc7f   : > { %v6376_v41 = vmul.f32 %v9311_v28, %v8212_v3  ;;  %v9331_v3 = vpop.eup %9330  ;;  %v6071_v28 = vpop.xlane.xlu1 %6070 }
 0xc80   : > { %v8214_v57 = vpop.f32.mrf.mxu1  ;;  %9338 = vrcp.f32 %v6071_v28 }
 0xc81   : > { %v8215_v14 = vadd.f32 %v8214_v57, %v8213_v13  ;;  %8532 = vmatprep.mubr.msk.f32.mxu0 %vm687_vm1, %v6376_v41 }
 0xc82   : > { %v8216_v32 = vpop.f32.mrf.mxu1 }
 0xc83   : > { %v6377_v6 = vmul.f32 %v9313_v27, %v8215_v14  ;;  %v9333_v14 = vpop.eup %9332  ;;  %v6074_v27 = vpop.xlane.xlu0 %6073 }
 0xc84   : > { %v8217_v54 = vpop.f32.mrf.mxu1  ;;  %9340 = vrcp.f32 %v6074_v27 }
 0xc85   : > { %v8218_v2 = vadd.f32 %v8217_v54, %v8216_v32  ;;  %8533 = vmatmul.mubr.msk.f32.gmra.mxu0 %vm687_vm1, %v6377_v6 }
 0xc86   : > { %v8219_v7 = vpop.f32.mrf.mxu1 }
 0xc87   : > { %v6378_v29 = vmul.f32 %v9315_v49, %v8218_v2  ;;  %v9335_v2 = vpop.eup %9334  ;;  %v6077_v49 = vpop.xlane.xlu1 %6076 }
 0xc88   : > { %v8220_v58 = vpop.f32.mrf.mxu1  ;;  %9342 = vrcp.f32 %v6077_v49 }
 0xc89   : > { %v8221_v38 = vadd.f32 %v8220_v58, %v8219_v7  ;;  %8535 = vmatprep.mubr.msk.f32.mxu0 %vm687_vm1, %v6378_v29 }
 0xc8a   : > { %v8222_v15 = vpop.f32.mrf.mxu1 }
 0xc8b   : > { %v6379_v55 = vmul.f32 %v9317_v35, %v8221_v38  ;;  %v9337_v38 = vpop.eup %9336  ;;  %v6080_v35 = vpop.xlane.xlu0 %6079 }
 0xc8c   : > { %v8223_v33 = vpop.f32.mrf.mxu1  ;;  %9344 = vrcp.f32 %v6080_v35 }
 0xc8d   : > { %v8224_v21 = vadd.f32 %v8223_v33, %v8222_v15  ;;  %8536 = vmatmul.mubr.msk.f32.gmra.mxu0 %vm687_vm1, %v6379_v55  ;;  %v6083_v55 = vpop.xlane.xlu1 %6082 }
 0xc8e   : > { %v8225_v19 = vpop.f32.mrf.mxu1  ;;  %9346 = vrcp.f32 %v6083_v55 }
 0xc8f   : > { %v6380_v31 = vmul.f32 %v9319_v26, %v8224_v21  ;;  %v9339_v26 = vpop.eup %9338 }
 0xc90   : > { %v8226_v56 = vpop.f32.mrf.mxu1 }
 0xc91   : > { %v8227_v11 = vadd.f32 %v8226_v56, %v8225_v19  ;;  %8538 = vmatprep.mubr.msk.f32.mxu0 %vm687_vm1, %v6380_v31 }
 0xc92   : > { %v8228_v8 = vpop.f32.mrf.mxu1 }
 0xc93   : > { %v6381_v16 = vmul.f32 %v9321_v36, %v8227_v11  ;;  %v9341_v11 = vpop.eup %9340  ;;  %v6086_v36 = vpop.xlane.xlu1 %6085 }
 0xc94   : > { %v8229_v39 = vpop.f32.mrf.mxu1  ;;  %9348 = vrcp.f32 %v6086_v36 }
 0xc95   : > { %v8230_v5 = vadd.f32 %v8229_v39, %v8228_v8  ;;  %8539 = vmatmul.mubr.msk.f32.gmra.mxu0 %vm687_vm1, %v6381_v16  ;;  %v6089_v16 = vpop.xlane.xlu0 %6088 }
 0xc96   : > { %v8231_v10 = vpop.f32.mrf.mxu1  ;;  %9350 = vrcp.f32 %v6089_v16 }
 0xc97   : > { %v6382_v23 = vmul.f32 %v9323_v30, %v8230_v5  ;;  %v9343_v30 = vpop.eup %9342 }
 0xc98   : > { %v8232_v60 = vpop.f32.mrf.mxu1 }
 0xc99   : > { %v8233_v20 = vadd.f32 %v8232_v60, %v8231_v10  ;;  %8541 = vmatprep.mubr.msk.f32.mxu0 %vm687_vm1, %v6382_v23 }
 0xc9a   : > { %v8234_v9 = vpop.f32.mrf.mxu1 }
 0xc9b   : > { %v6383_v52 = vmul.f32 %v9325_v25, %v8233_v20  ;;  %v9345_v20 = vpop.eup %9344  ;;  %v6092_v25 = vpop.xlane.xlu0 %6091 }
 0xc9c   : > { %v8235_v24 = vpop.f32.mrf.mxu1  ;;  %9352 = vrcp.f32 %v6092_v25 }
 0xc9d   : > { %v8236_v43 = vadd.f32 %v8235_v24, %v8234_v9  ;;  %8542 = vmatmul.mubr.msk.f32.gmra.mxu0 %vm687_vm1, %v6383_v52 }
 0xc9e   : > { %v8237_v45 = vpop.f32.mrf.mxu1 }
 0xc9f   : > { %v6384_v47 = vmul.f32 %v9327_v40, %v8236_v43  ;;  %v9347_v43 = vpop.eup %9346 }
 0xca0   : > { %v8238_v4 = vpop.f32.mrf.mxu1 }
 0xca1   : > { %v8239_v17 = vadd.f32 %v8238_v4, %v8237_v45  ;;  %8544 = vmatprep.mubr.msk.f32.mxu0 %vm687_vm1, %v6384_v47  ;;  %v9349_v4 = vpop.eup %9348 }
 0xca2   : > { %v8240_v37 = vpop.f32.mrf.mxu1 }
 0xca3   : > { %v6385_v61 = vmul.f32 %v9329_v50, %v8239_v17 }
 0xca4   : > { %v8241_v34 = vpop.f32.mrf.mxu1 }
 0xca5   : > { %v8242_v12 = vadd.f32 %v8241_v34, %v8240_v37  ;;  %8545 = vmatmul.mubr.msk.f32.gmra.mxu0 %vm687_vm1, %v6385_v61  ;;  %v9351_v61 = vpop.eup %9350 }
 0xca6   : > { %v8243_v63 = vpop.f32.mrf.mxu1 }
 0xca7   : > { %v6386_v13 = vmul.f32 %v9331_v3, %v8242_v12 }
 0xca8   : > { %v8244_v41 = vpop.f32.mrf.mxu1 }
 0xca9   : > { %v8245_v57 = vadd.f32 %v8244_v41, %v8243_v63  ;;  %8547 = vmatprep.mubr.msk.f32.mxu0 %vm687_vm1, %v6386_v13  ;;  %v9353_v63 = vpop.eup %9352  ;;  %v14461_v41 = vld [vmem:[#allocation74_spill] sm:$0xff] }
 0xcaa   : > { %v8246_v46 = vpop.f32.mrf.mxu1 }
 0xcab   : > { %v6387_v32 = vmul.f32 %v9333_v14, %v8245_v57  ;;  %v14462_v57 = vld [vmem:[#allocation43_spill] sm:$0xff] }
 0xcac   : > { %v8247_v6 = vpop.f32.mrf.mxu1  ;;  %v3482_v14 = vadd.f32 %v14462_v57, %v14461_v41  ;;  %v14481_v41 = vld [vmem:[#allocation105_spill] sm:$0xff]  ;;  %v14482_v57 = vld [vmem:[#allocation59_spill] sm:$0xff] }
 0xcad   : > { %v8248_v54 = vadd.f32 %v8247_v6, %v8246_v46  ;;  %8548 = vmatmul.mubr.msk.f32.gmra.mxu0 %vm687_vm1, %v6387_v32  ;;  %v13381_v46 = vld [vmem:[%s13555_s4] ss:$0 sm:$0xff]  ;;  %v14463_v32 = vld [vmem:[#allocation8_spill] sm:$0xff] }
 0xcae   : > { %v8249_v22 = vpop.f32.mrf.mxu1  ;;  %v5164_v6 = vadd.f32 %v14463_v32, %v3482_v14  ;;  %v3532_v14 = vadd.f32 %v14482_v57, %v14481_v41  ;;  %v14483_v32 = vld [vmem:[#allocation16_spill] sm:$0xff]  ;;  %v14501_v41 = vld [vmem:[#allocation102_spill] sm:$0xff] }
 0xcaf   : > { %v6388_v7 = vmul.f32 %v9335_v2, %v8248_v54  ;;  %v14464_v54 = vld [vmem:[#allocation5_spill] sm:$0xff]  ;;  %v14502_v57 = vld [vmem:[#allocation26_spill] sm:$0xff] }
 0xcb0   : > { %v8250_v29 = vpop.f32.mrf.mxu1 }
 0xcb1   : > { %v8251_v58 = vadd.f32 %v8250_v29, %v8249_v22  ;;  %8550 = vmatprep.mubr.msk.f32.mxu0 %vm687_vm1, %v6388_v7 }
 0xcb2   : > { %v8252_v18 = vpop.f32.mrf.mxu1 }
 0xcb3   : > { %v6389_v15 = vmul.f32 %v9337_v38, %v8251_v58  ;;  %v14465_v58 = vld [vmem:[#allocation47_spill] sm:$0xff] }
 0xcb4   : > { %v8253_v33 = vpop.f32.mrf.mxu1  ;;  %v14466_v38 = vld [vmem:[#allocation91_spill] sm:$0xff] }
 0xcb5   : > { %v8254_v21 = vadd.f32 %v8253_v33, %v8252_v18  ;;  %8551 = vmatmul.mubr.msk.f32.gmra.mxu0 %vm687_vm1, %v6389_v15  ;;  %v3492_v35 = vadd.f32 %v14466_v38, %v14465_v58  ;;  %v14467_v15 = vld [vmem:[#allocation3_spill] sm:$0xff]  ;;  %v14468_v33 = vld [vmem:[#allocation2_spill] sm:$0xff]  ;;  %v14485_v58 = vld [vmem:[#allocation109_spill] sm:$0xff] }
 0xcb6   : > { %v8255_v44 = vpop.f32.mrf.mxu1  ;;  %v14486_v38 = vld [vmem:[#allocation86_spill] sm:$0xff] }
 0xcb7   : > { %v6390_v19 = vmul.f32 %v9339_v26, %v8254_v21  ;;  %v5166_v55 = vadd.f32 %v14467_v15, %v3492_v35  ;;  %v3542_v35 = vadd.f32 %v14486_v38, %v14485_v58  ;;  %v14487_v15 = vld [vmem:[#allocation18_spill] sm:$0xff]  ;;  %v14505_v58 = vld [vmem:[#allocation104_spill] sm:$0xff] }
 0xcb8   : > { %v8256_v31 = vpop.f32.mrf.mxu1  ;;  %v14506_v38 = vld [vmem:[#allocation48_spill] sm:$0xff] }
 0xcb9   : > { %v8257_v56 = vadd.f32 %v8256_v31, %v8255_v44  ;;  %8553 = vmatprep.mubr.msk.f32.mxu0 %vm687_vm1, %v6390_v19 }
 0xcba   : > { %v8258_v1 = vpop.f32.mrf.mxu1 }
 0xcbb   : > { %v6391_v8 = vmul.f32 %v9341_v11, %v8257_v56  ;;  %v14469_v56 = vld [vmem:[#allocation66_spill] sm:$0xff]  ;;  %v14470_v11 = vld [vmem:[#allocation95_spill] sm:$0xff] }
 0xcbc   : > { %v8259_v39 = vpop.f32.mrf.mxu1  ;;  %v3502_v36 = vadd.f32 %v14470_v11, %v14469_v56  ;;  %v14489_v56 = vld [vmem:[#allocation93_spill] sm:$0xff]  ;;  %v14490_v11 = vld [vmem:[#allocation80_spill] sm:$0xff] }
 0xcbd   : > { %v8260_v5 = vadd.f32 %v8259_v39, %v8258_v1  ;;  %8554 = vmatmul.mubr.msk.f32.gmra.mxu0 %vm687_vm1, %v6391_v8  ;;  %v14471_v8 = vld [vmem:[#allocation39_spill] sm:$0xff]  ;;  %v14472_v39 = vld [vmem:[#allocation30_spill] sm:$0xff] }
 0xcbe   : > { %v8261_v51 = vpop.f32.mrf.mxu1  ;;  %v5168_v16 = vadd.f32 %v14471_v8, %v3502_v36  ;;  %v3552_v36 = vadd.f32 %v14490_v11, %v14489_v56  ;;  %v14491_v8 = vld [vmem:[#allocation67_spill] sm:$0xff]  ;;  %v14509_v56 = vld [vmem:[#allocation106_spill] sm:$0xff]  ;;  %v14510_v11 = vld [vmem:[#allocation28_spill] sm:$0xff] }
 0xcbf   : > { %v6392_v10 = vmul.f32 %v9343_v30, %v8260_v5 }
 0xcc0   : > { %v8262_v23 = vpop.f32.mrf.mxu1 }
 0xcc1   : > { %v8263_v60 = vadd.f32 %v8262_v23, %v8261_v51  ;;  %8556 = vmatprep.mubr.msk.f32.mxu0 %vm687_vm1, %v6392_v10 }
 0xcc2   : > { %v8264_v42 = vpop.f32.mrf.mxu1 }
 0xcc3   : > { %v6393_v9 = vmul.f32 %v9345_v20, %v8263_v60  ;;  %v14473_v60 = vld [vmem:[#allocation62_spill] sm:$0xff]  ;;  %v14474_v20 = vld [vmem:[#allocation96_spill] sm:$0xff] }
 0xcc4   : > { %v8265_v52 = vpop.f32.mrf.mxu1  ;;  %v3512_v25 = vadd.f32 %v14474_v20, %v14473_v60  ;;  %v14493_v60 = vld [vmem:[#allocation99_spill] sm:$0xff]  ;;  %v14494_v20 = vld [vmem:[#allocation61_spill] sm:$0xff] }
 0xcc5   : > { %v8266_v24 = vadd.f32 %v8265_v52, %v8264_v42  ;;  %8557 = vmatmul.mubr.msk.f32.gmra.mxu0 %vm687_vm1, %v6393_v9  ;;  %v14475_v9 = vld [vmem:[#allocation27_spill] sm:$0xff] }
 0xcc6   : > { %v8267_v40 = vpop.f32.mrf.mxu1  ;;  %v5170_v52 = vadd.f32 %v14475_v9, %v3512_v25  ;;  %v3562_v25 = vadd.f32 %v14494_v20, %v14493_v60  ;;  %v14495_v9 = vld [vmem:[#allocation58_spill] sm:$0xff]  ;;  %v14513_v60 = vld [vmem:[#allocation108_spill] sm:$0xff] }
 0xcc7   : > { %v6394_v0 = vmul.f32 %v9347_v43, %v8266_v24  ;;  %v14476_v24 = vld [vmem:[#allocation23_spill] sm:$0xff]  ;;  %v14514_v20 = vld [vmem:[#allocation34_spill] sm:$0xff] }
 0xcc8   : > { %v8268_v45 = vpop.f32.mrf.mxu1 }
 0xcc9   : > { %v8269_v47 = vadd.f32 %v8268_v45, %v8267_v40  ;;  %8559 = vmatprep.mubr.msk.f32.mxu0 %vm687_vm1, %v6394_v0 }
 0xcca   : > { %v8270_v17 = vpop.f32.mrf.mxu1 }
 0xccb   : > { %v6395_v50 = vmul.f32 %v9349_v4, %v8269_v47  ;;  %v14477_v4 = vld [vmem:[#allocation101_spill] sm:$0xff] }
 0xccc   : > { %v8271_v59 = vpop.f32.mrf.mxu1 }
 0xccd   : > { %v8272_v37 = vadd.f32 %v8271_v59, %v8270_v17  ;;  %8560 = vmatmul.mubr.msk.f32.gmra.mxu0 %vm687_vm1, %v6395_v50  ;;  %v14478_v17 = vld [vmem:[#allocation98_spill] sm:$0xff] }
 0xcce   : > { %v8273_v34 = vpop.f32.mrf.mxu1  ;;  %v3522_v50 = vadd.f32 %v14478_v17, %v14477_v4  ;;  %v14497_v4 = vld [vmem:[#allocation100_spill] sm:$0xff] }
 0xccf   : > { %v6396_v12 = vmul.f32 %v9351_v61, %v8272_v37  ;;  %v14479_v37 = vld [vmem:[#allocation37_spill] sm:$0xff]  ;;  %v14498_v17 = vld [vmem:[#allocation68_spill] sm:$0xff] }
 0xcd0   : > { %v8274_v3 = vpop.f32.mrf.mxu1  ;;  %v5172_v61 = vadd.f32 %v14479_v37, %v3522_v50  ;;  %v3572_v50 = vadd.f32 %v14498_v17, %v14497_v4  ;;  %v14499_v37 = vld [vmem:[#allocation52_spill] sm:$0xff]  ;;  %v14518_v17 = vld [vmem:[#allocation7_spill] sm:$0xff] }
 0xcd1   : > { %v8275_v28 = vadd.f32 %v8274_v3, %v8273_v34  ;;  %8562 = vmatprep.mubr.msk.f32.mxu1 %vm687_vm1, %v6396_v12  ;;  %v14480_v34 = vld [vmem:[#allocation20_spill] sm:$0xff] }
 0xcd2   : > { %v14517_v4 = vld [vmem:[#allocation92_spill] sm:$0xff] }
 0xcd3   : > { %v6397_v13 = vmul.f32 %v9353_v63, %v8275_v28 }
 0xcd5   : > { %8563 = vmatmul.mubr.msk.f32.vlgmr.msra.gmra.mxu1 %vm687_vm1, %v6397_v13 }
 0xcf9   : > { %v8519_v27 = vpop.f32.mrf.mxu0 }
 0xcfa   : > { %v6721_v2 = vadd.f32 %v8519_v27, %v14464_v54  ;;  %v14484_v54 = vld [vmem:[#allocation11_spill] sm:$0xff] }
 0xcfb   : > { %v6561_v49 = vpop.f32.mrf.mxu0 }
 0xcfc   : > { %v6760_v22 = vadd.f32 %v13381_v46, %v6721_v2  ;;  %v6720_v7 = vadd.f32 %v6561_v49, %v5164_v6  ;;  %v5174_v6 = vadd.f32 %v14483_v32, %v3532_v14  ;;  %v3582_v14 = vadd.f32 %v14502_v57, %v14501_v41  ;;  %v14503_v32 = vld [vmem:[#allocation29_spill] sm:$0xff]  ;;  %v14521_v41 = vld [vmem:[#allocation6_spill] sm:$0xff] }
 0xcfe   : > { %6792 = vst.msk [vmem:[%s13390_s10 + $0x8] sm:$0xff] %vm269_vm0, %v6760_v22  ;;  %v6759_v29 = vadd.f32 %v13381_v46, %v6720_v7 }
 0xd00   : > { %6791 = vst.msk [vmem:[%s13390_s10] sm:$0xff] %vm269_vm0, %v6759_v29 }
 0xd01   : > { %v8522_v18 = vpop.f32.mrf.mxu0 }
 0xd02   : > { %v6723_v21 = vadd.f32 %v8522_v18, %v14468_v33  ;;  %v14488_v33 = vld [vmem:[#allocation13_spill] sm:$0xff] }
 0xd03   : > { %v6571_v26 = vpop.f32.mrf.mxu0 }
 0xd04   : > { %v6762_v44 = vadd.f32 %v13381_v46, %v6723_v21  ;;  %v6722_v19 = vadd.f32 %v6571_v26, %v5166_v55  ;;  %v5176_v55 = vadd.f32 %v14487_v15, %v3542_v35  ;;  %v3592_v35 = vadd.f32 %v14506_v38, %v14505_v58  ;;  %v14507_v15 = vld [vmem:[#allocation64_spill] sm:$0xff] }
 0xd06   : > { %6794 = vst.msk [vmem:[%s13390_s10 + $0x18] sm:$0xff] %vm269_vm0, %v6762_v44  ;;  %v6761_v31 = vadd.f32 %v13381_v46, %v6722_v19 }
 0xd08   : > { %6793 = vst.msk [vmem:[%s13390_s10 + $0x10] sm:$0xff] %vm269_vm0, %v6761_v31 }
 0xd09   : > { %v8525_v1 = vpop.f32.mrf.mxu0 }
 0xd0a   : > { %v6725_v5 = vadd.f32 %v8525_v1, %v14472_v39  ;;  %v14492_v39 = vld [vmem:[#allocation15_spill] sm:$0xff] }
 0xd0b   : > { %v6581_v30 = vpop.f32.mrf.mxu0 }
 0xd0c   : > { %v6764_v51 = vadd.f32 %v13381_v46, %v6725_v5  ;;  %v6724_v10 = vadd.f32 %v6581_v30, %v5168_v16  ;;  %v5178_v16 = vadd.f32 %v14491_v8, %v3552_v36  ;;  %v3602_v36 = vadd.f32 %v14510_v11, %v14509_v56  ;;  %v14511_v8 = vld [vmem:[#allocation76_spill] sm:$0xff] }
 0xd0e   : > { %6796 = vst.msk [vmem:[%s13390_s10 + $0x28] sm:$0xff] %vm269_vm0, %v6764_v51  ;;  %v6763_v23 = vadd.f32 %v13381_v46, %v6724_v10 }
 0xd10   : > { %6795 = vst.msk [vmem:[%s13390_s10 + $0x20] sm:$0xff] %vm269_vm0, %v6763_v23 }
 0xd11   : > { %v8528_v42 = vpop.f32.mrf.mxu0 }
 0xd12   : > { %v6727_v43 = vadd.f32 %v8528_v42, %v14476_v24  ;;  %v14496_v24 = vld [vmem:[#allocation12_spill] sm:$0xff] }
 0xd13   : > { %v6591_v40 = vpop.f32.mrf.mxu0 }
 0xd14   : > { %v6766_v0 = vadd.f32 %v13381_v46, %v6727_v43  ;;  %v6726_v45 = vadd.f32 %v6591_v40, %v5170_v52  ;;  %v5180_v52 = vadd.f32 %v14495_v9, %v3562_v25  ;;  %v3612_v25 = vadd.f32 %v14514_v20, %v14513_v60  ;;  %v14515_v9 = vld [vmem:[#allocation54_spill] sm:$0xff] }
 0xd16   : > { %6798 = vst.msk [vmem:[%s13390_s10 + $0x38] sm:$0xff] %vm269_vm0, %v6766_v0  ;;  %v6765_v47 = vadd.f32 %v13381_v46, %v6726_v45 }
 0xd18   : > { %6797 = vst.msk [vmem:[%s13390_s10 + $0x30] sm:$0xff] %vm269_vm0, %v6765_v47 }
 0xd3d   : > { %v8531_v59 = vpop.f32.mrf.mxu0 }
 0xd3e   : > { %v6729_v12 = vadd.f32 %v8531_v59, %v14480_v34  ;;  %v14500_v34 = vld [vmem:[#allocation72_spill] sm:$0xff] }
 0xd3f   : > { %v6601_v3 = vpop.f32.mrf.mxu0 }
 0xd40   : > { %v6768_v28 = vadd.f32 %v13381_v46, %v6729_v12  ;;  %v6728_v63 = vadd.f32 %v6601_v3, %v5172_v61  ;;  %v5182_v61 = vadd.f32 %v14499_v37, %v3572_v50  ;;  %v3622_v50 = vadd.f32 %v14518_v17, %v14517_v4 }
 0xd42   : > { %6800 = vst.msk [vmem:[%s13390_s10 + $0x48] sm:$0xff] %vm269_vm0, %v6768_v28  ;;  %v6767_v13 = vadd.f32 %v13381_v46, %v6728_v63  ;;  %v5192_v37 = vadd.f32 %v13185_v62, %v3622_v50 }
 0xd44   : > { %6799 = vst.msk [vmem:[%s13390_s10 + $0x40] sm:$0xff] %vm269_vm0, %v6767_v13 }
 0xd45   : > { %v8534_v27 = vpop.f32.mrf.mxu0 }
 0xd46   : > { %v6731_v2 = vadd.f32 %v8534_v27, %v14484_v54  ;;  %v14504_v54 = vld [vmem:[#allocation32_spill] sm:$0xff] }
 0xd47   : > { %v6611_v49 = vpop.f32.mrf.mxu0 }
 0xd48   : > { %v6770_v22 = vadd.f32 %v13381_v46, %v6731_v2  ;;  %v6730_v7 = vadd.f32 %v6611_v49, %v5174_v6  ;;  %v5184_v6 = vadd.f32 %v14503_v32, %v3582_v14 }
 0xd4a   : > { %6802 = vst.msk [vmem:[%s13390_s10 + $0x58] sm:$0xff] %vm269_vm0, %v6770_v22  ;;  %v6769_v29 = vadd.f32 %v13381_v46, %v6730_v7 }
 0xd4c   : > { %6801 = vst.msk [vmem:[%s13390_s10 + $0x50] sm:$0xff] %vm269_vm0, %v6769_v29 }
 0xd4d   : > { %v8537_v18 = vpop.f32.mrf.mxu0 }
 0xd4e   : > { %v6733_v21 = vadd.f32 %v8537_v18, %v14488_v33  ;;  %v14508_v33 = vld [vmem:[#allocation44_spill] sm:$0xff] }
 0xd4f   : > { %v6621_v26 = vpop.f32.mrf.mxu0 }
 0xd50   : > { %v6772_v44 = vadd.f32 %v13381_v46, %v6733_v21  ;;  %v6732_v19 = vadd.f32 %v6621_v26, %v5176_v55  ;;  %v5186_v55 = vadd.f32 %v14507_v15, %v3592_v35 }
 0xd52   : > { %6804 = vst.msk [vmem:[%s13390_s10 + $0x68] sm:$0xff] %vm269_vm0, %v6772_v44  ;;  %v6771_v31 = vadd.f32 %v13381_v46, %v6732_v19 }
 0xd54   : > { %6803 = vst.msk [vmem:[%s13390_s10 + $0x60] sm:$0xff] %vm269_vm0, %v6771_v31 }
 0xd55   : > { %v8540_v1 = vpop.f32.mrf.mxu0 }
 0xd56   : > { %v6735_v5 = vadd.f32 %v8540_v1, %v14492_v39  ;;  %v14512_v39 = vld [vmem:[#allocation40_spill] sm:$0xff] }
 0xd57   : > { %v6631_v30 = vpop.f32.mrf.mxu0 }
 0xd58   : > { %v6774_v51 = vadd.f32 %v13381_v46, %v6735_v5  ;;  %v6734_v10 = vadd.f32 %v6631_v30, %v5178_v16  ;;  %v5188_v16 = vadd.f32 %v14511_v8, %v3602_v36 }
 0xd5a   : > { %6806 = vst.msk [vmem:[%s13390_s10 + $0x78] sm:$0xff] %vm269_vm0, %v6774_v51  ;;  %v6773_v23 = vadd.f32 %v13381_v46, %v6734_v10 }
 0xd5c   : > { %6805 = vst.msk [vmem:[%s13390_s10 + $0x70] sm:$0xff] %vm269_vm0, %v6773_v23 }
 0xd5d   : > { %v8543_v42 = vpop.f32.mrf.mxu0 }
 0xd5e   : > { %v6737_v43 = vadd.f32 %v8543_v42, %v14496_v24  ;;  %v14516_v24 = vld [vmem:[#allocation63_spill] sm:$0xff] }
 0xd5f   : > { %v6641_v40 = vpop.f32.mrf.mxu0 }
 0xd60   : > { %v6776_v0 = vadd.f32 %v13381_v46, %v6737_v43  ;;  %v6736_v45 = vadd.f32 %v6641_v40, %v5180_v52  ;;  %v5190_v52 = vadd.f32 %v14515_v9, %v3612_v25 }
 0xd62   : > { %6808 = vst.msk [vmem:[%s13390_s10 + $0x88] sm:$0xff] %vm269_vm0, %v6776_v0  ;;  %v6775_v47 = vadd.f32 %v13381_v46, %v6736_v45 }
 0xd64   : > { %6807 = vst.msk [vmem:[%s13390_s10 + $0x80] sm:$0xff] %vm269_vm0, %v6775_v47 }
 0xd65   : > { %v8546_v59 = vpop.f32.mrf.mxu0 }
 0xd66   : > { %v6739_v12 = vadd.f32 %v8546_v59, %v14500_v34 }
 0xd67   : > { %v6651_v3 = vpop.f32.mrf.mxu0 }
 0xd68   : > { %v6778_v28 = vadd.f32 %v13381_v46, %v6739_v12  ;;  %v6738_v63 = vadd.f32 %v6651_v3, %v5182_v61  ;;  %v14519_v61 = vld [vmem:[#allocation60_spill] sm:$0xff] }
 0xd6a   : > { %6810 = vst.msk [vmem:[%s13390_s10 + $0x98] sm:$0xff] %vm269_vm0, %v6778_v28  ;;  %v6777_v13 = vadd.f32 %v13381_v46, %v6738_v63 }
 0xd6c   : > { %6809 = vst.msk [vmem:[%s13390_s10 + $0x90] sm:$0xff] %vm269_vm0, %v6777_v13  ;;  %v14520_v13 = vld [vmem:[#allocation83_spill] sm:$0xff] }
 0xd6d   : > { %v8549_v27 = vpop.f32.mrf.mxu0  ;;  %v3632_v57 = vadd.f32 %v14521_v41, %v14520_v13 }
 0xd6e   : > { %v6741_v2 = vadd.f32 %v8549_v27, %v14504_v54 }
 0xd6f   : > { %v6661_v49 = vpop.f32.mrf.mxu0  ;;  %v5194_v27 = vadd.f32 %v13342_v53, %v3632_v57 }
 0xd70   : > { %v6780_v22 = vadd.f32 %v13381_v46, %v6741_v2  ;;  %v6740_v7 = vadd.f32 %v6661_v49, %v5184_v6 }
 0xd72   : > { %6812 = vst.msk [vmem:[%s13390_s10 + $0xa8] sm:$0xff] %vm269_vm0, %v6780_v22  ;;  %v6779_v29 = vadd.f32 %v13381_v46, %v6740_v7 }
 0xd74   : > { %6811 = vst.msk [vmem:[%s13390_s10 + $0xa0] sm:$0xff] %vm269_vm0, %v6779_v29 }
 0xd75   : > { %v8552_v18 = vpop.f32.mrf.mxu0 }
 0xd76   : > { %v6743_v21 = vadd.f32 %v8552_v18, %v14508_v33 }
 0xd77   : > { %v6671_v26 = vpop.f32.mrf.mxu0 }
 0xd78   : > { %v6782_v44 = vadd.f32 %v13381_v46, %v6743_v21  ;;  %v6742_v19 = vadd.f32 %v6671_v26, %v5186_v55 }
 0xd7a   : > { %6814 = vst.msk [vmem:[%s13390_s10 + $0xb8] sm:$0xff] %vm269_vm0, %v6782_v44  ;;  %v6781_v31 = vadd.f32 %v13381_v46, %v6742_v19 }
 0xd7c   : > { %6813 = vst.msk [vmem:[%s13390_s10 + $0xb0] sm:$0xff] %vm269_vm0, %v6781_v31 }
 0xd7d   : > { %v8555_v1 = vpop.f32.mrf.mxu0 }
 0xd7e   : > { %v6745_v5 = vadd.f32 %v8555_v1, %v14512_v39 }
 0xd7f   : > { %v6681_v30 = vpop.f32.mrf.mxu0 }
 0xd80   : > { %v6784_v51 = vadd.f32 %v13381_v46, %v6745_v5  ;;  %v6744_v10 = vadd.f32 %v6681_v30, %v5188_v16 }
 0xd82   : > { %6816 = vst.msk [vmem:[%s13390_s10 + $0xc8] sm:$0xff] %vm269_vm0, %v6784_v51  ;;  %v6783_v23 = vadd.f32 %v13381_v46, %v6744_v10 }
 0xd84   : > { %6815 = vst.msk [vmem:[%s13390_s10 + $0xc0] sm:$0xff] %vm269_vm0, %v6783_v23 }
 0xd85   : > { %v8558_v42 = vpop.f32.mrf.mxu0 }
 0xd86   : > { %v6747_v43 = vadd.f32 %v8558_v42, %v14516_v24 }
 0xd87   : > { %v6691_v40 = vpop.f32.mrf.mxu0 }
 0xd88   : > { %v6786_v0 = vadd.f32 %v13381_v46, %v6747_v43  ;;  %v6746_v45 = vadd.f32 %v6691_v40, %v5190_v52 }
 0xd8a   : > { %6818 = vst.msk [vmem:[%s13390_s10 + $0xd8] sm:$0xff] %vm269_vm0, %v6786_v0  ;;  %v6785_v47 = vadd.f32 %v13381_v46, %v6746_v45 }
 0xd8c   : > { %6817 = vst.msk [vmem:[%s13390_s10 + $0xd0] sm:$0xff] %vm269_vm0, %v6785_v47 }
 0xd8d   : > { %v8561_v59 = vpop.f32.mrf.mxu0 }
 0xd8e   : > { %v6749_v34 = vadd.f32 %v8561_v59, %v14519_v61 }
 0xd8f   : > { %v6701_v12 = vpop.f32.mrf.mxu0 }
 0xd90   : > { %v6788_v3 = vadd.f32 %v13381_v46, %v6749_v34  ;;  %v6748_v28 = vadd.f32 %v6701_v12, %v5192_v37 }
 0xd92   : > { %6820 = vst.msk [vmem:[%s13390_s10 + $0xe8] sm:$0xff] %vm269_vm0, %v6788_v3  ;;  %v6787_v63 = vadd.f32 %v13381_v46, %v6748_v28 }
 0xd94   : > { %6819 = vst.msk [vmem:[%s13390_s10 + $0xe0] sm:$0xff] %vm269_vm0, %v6787_v63 }
 0xd95   : > { %v8564_v14 = vpop.f32.mrf.mxu1 }
 0xd96   : > { %v6751_v62 = vadd.f32 %v8564_v14, %v13189_v48 }
 0xd97   : > { %v6711_v32 = vpop.f32.mrf.mxu1 }
 0xd98   : > { %v6790_v6 = vadd.f32 %v13381_v46, %v6751_v62  ;;  %v6750_v54 = vadd.f32 %v6711_v32, %v5194_v27 }
 0xd9a   : > { %6822 = vst.msk [vmem:[%s13390_s10 + $0xf8] sm:$0xff] %vm269_vm0, %v6790_v6  ;;  %v6789_v2 = vadd.f32 %v13381_v46, %v6750_v54 }
 0xd9c   : > { %6821 = vst.msk [vmem:[%s13390_s10 + $0xf0] sm:$0xff] %vm269_vm0, %v6789_v2 }
 0xd9d PF: > { %s15_s18 = sadd.s32 1, %s9360_s18  }
 0xd9e   : > { %p12_p4 = scmp.ge.s32.totalorder %s15_s18, 4  }
 0xda0   :  { %14 = sbr.rel (!%p12_p4) target bundleno = 1 (0x1), region = 70 }

</bundles_post_ra>
